<compile_context>
chip_gen: v5e
topology: v5e:2x2
jax: 0.10.0
libtpu: 0.0.40
codegen_flags: <defaults>
</compile_context>

<pallas_src>
import functools

import jax
import jax.numpy as jnp
import numpy as np
from jax.experimental import pallas as pl
from jax.experimental.pallas import tpu as pltpu


def _round_up(v, m):
    return (v + m - 1) // m * m


def _fused_denoiser_kernel(
    x_ref,                     # (1, HW, 1)   input image, flattened row-major
    w1_ref, b1_ref,            # (9, 1, C1), (1, C1)            (VPU layer)
    w2_ref, b2_ref,            # (3, 3*C1, C2) mxu-dtype, (1, C2)  (dx-grouped, K-packed)
    w3_ref, b3_ref,            # (3, 3*C2, C3) mxu-dtype, (1, C3)
    w4_ref, b4_ref,            # (9, 1, C3), (1, 1)             (VPU layer, pre-transposed)
    o_ref,                     # (1, HW, 1)
    buf0, buf1, buf2, buf3,    # VMEM scratch (rows, {1, C1, C2, C3}) f32, zero halos
    *, height, width, margin,
):
    HW = height * width
    rows = HW + 2 * margin
    f32 = jnp.float32
    mxu_dtype = w2_ref.dtype   # bf16 fast path / f32 reference mode

    # ---- in-kernel 'same' padding: re-zero halo margins EVERY invocation ----
    # (do NOT guard with program_id: breaks under a 2-TC batch split on v7x)
    for buf in (buf0, buf1, buf2, buf3):
        c = buf.shape[1]
        buf[0:margin, :] = jnp.zeros((margin, c), f32)
        buf[margin + HW:rows, :] = jnp.zeros((rows - margin - HW, c), f32)

    # Input image into the padded column buffer (aligned copy).
    buf0[margin:margin + HW, :] = x_ref[0].astype(f32)

    # Column-boundary masks, shape (HW, 1), broadcast over channel lanes:
    # dx=-1 taps must not contribute in image column 0, dx=+1 not in column W-1.
    col = jax.lax.broadcasted_iota(jnp.int32, (HW, 1), 0) % width
    mask_l = (col != 0).astype(f32)
    mask_r = (col != width - 1).astype(f32)

    def dx_mask(dx, part):
        if dx == -1:
            return part * mask_l
        if dx == 1:
            return part * mask_r
        return part

    def conv3x3_vpu(src, w_ref_l):
        """9-tap VPU conv accumulation (degenerate Cin=1 / Cout=1 layers), all f32."""
        acc = None
        for dx in (-1, 0, 1):
            part = None
            for dy in (-1, 0, 1):
                tap = (dy + 1) * 3 + (dx + 1)
                start = margin + dy * width + dx
                sl = src[start:start + HW, :]              # sublane-shifted load
                contrib = sl * w_ref_l[tap].astype(f32)    # VPU broadcast FMA
                part = contrib if part is None else part + contrib
            part = dx_mask(dx, part)
            acc = part if acc is None else acc + part
        return acc

    def conv3x3_mxu(src, w_ref_l):
        """dx-grouped, K-packed MXU conv: 3 matmuls of (HW, 3*Cin) @ (3*Cin, Cout).

        Per dx, one slab load covers all three dy offsets (the +-1 column shift is
        realigned once per dx, not per tap); the three dy views are aligned slices
        of that slab (W and margin are the offsets), concatenated on lanes into the
        packed LHS, cast to bf16 for the MXU, accumulated in f32.
        """
        acc = None
        for dx in (-1, 0, 1):
            base = margin - width + dx
            big = src[base:base + HW + 2 * width, :]       # one (HW+2W, Cin) slab load
            sl = jnp.concatenate(
                [big[0:HW], big[width:width + HW], big[2 * width:2 * width + HW]],
                axis=1).astype(mxu_dtype)                  # (HW, 3*Cin)
            part = jax.lax.dot_general(
                sl, w_ref_l[dx + 1],
                dimension_numbers=(((1,), (0,)), ((), ())),
                preferred_element_type=f32)
            part = dx_mask(dx, part)
            acc = part if acc is None else acc + part
        return acc

    # layer 1: 1 -> C1, ReLU.  Cin == 1 -> VPU broadcast FMAs.
    a1 = jnp.maximum(conv3x3_vpu(buf0, w1_ref) + b1_ref[0].astype(f32), 0.0)
    buf1[margin:margin + HW, :] = a1

    # layer 2: C1 -> C2, ReLU.  MXU, K = 3*C1, bf16 operands.
    a2 = jnp.maximum(conv3x3_mxu(buf1, w2_ref) + b2_ref[0].astype(f32), 0.0)
    buf2[margin:margin + HW, :] = a2

    # layer 3: C2 -> C3, ReLU.  MXU, K = 3*C2, bf16 operands.
    a3 = jnp.maximum(conv3x3_mxu(buf2, w3_ref) + b3_ref[0].astype(f32), 0.0)
    buf3[margin:margin + HW, :] = a3

    # layer 4: C3 -> 1, no ReLU.  Cout == 1 -> VPU multiplies + one lane reduction.
    acc4 = conv3x3_vpu(buf3, w4_ref)                                    # (HW, C3)
    out4 = jnp.sum(acc4, axis=1, keepdims=True) + b4_ref[0].astype(f32) # (HW, 1)
    o_ref[0] = out4.astype(o_ref.dtype)


def _const_spec(a):
    zeros = (0,) * a.ndim
    return pl.BlockSpec(a.shape, lambda n, _z=zeros: _z)


def cnn_denoiser_forward(x_nchw, params, *, use_bf16_mxu=True):
    """Forward pass matching the PyTorch CNN_Denoiser (input/output NCHW)."""
    N, C, H, W = x_nchw.shape
    assert C == 1, "CNN_Denoiser expects a single input channel"
    HW = H * W
    margin = _round_up(W + 1, 8)          # halo rows; multiple of 8 keeps stores aligned
    rows = HW + 2 * margin

    (w1, b1), (w2, b2), (w3, b3), (w4, b4) = params
    c1, c2, c3, c4 = w1.shape[-1], w2.shape[-1], w3.shape[-1], w4.shape[-1]
    assert w1.shape[2] == 1 and c4 == 1

    mxu_dtype = jnp.bfloat16 if use_bf16_mxu else jnp.float32

    # VPU layers: tap-major weights (tap = ky*3 + kx); layer 4 transposed to (tap, 1, Cin).
    w1t = w1.reshape(9, 1, c1)
    w4t = jnp.transpose(w4.reshape(9, c3, 1), (0, 2, 1))
    # MXU layers: dx-grouped, K-packed weights  Wp[kx, ky*Cin + cin, cout] = w[ky,kx,cin,cout]
    w2p = jnp.transpose(w2, (1, 0, 2, 3)).reshape(3, 3 * c1, c2).astype(mxu_dtype)
    w3p = jnp.transpose(w3, (1, 0, 2, 3)).reshape(3, 3 * c2, c3).astype(mxu_dtype)
    b1r, b2r, b3r, b4r = (b1.reshape(1, -1), b2.reshape(1, -1),
                          b3.reshape(1, -1), b4.reshape(1, -1))

    # Flattened pixel column (pixels on sublanes) -- matches the in-kernel layout.
    # TODO(synk): for large H*W, present I/O lane-dense as (N, H, W) (W on lanes) and
    # add a row-strip grid axis instead of whole-image VMEM residency (v7x: 64 MiB).
    x_col = x_nchw.reshape(N, HW, 1)

    flops = 2 * N * HW * 9 * (1 * c1 + c1 * c2 + c2 * c3 + c3 * 1)
    bytes_accessed = int(
        x_col.size * x_col.dtype.itemsize + N * HW * x_nchw.dtype.itemsize
        + sum(int(np.prod(a.shape)) * a.dtype.itemsize
              for a in (w1t, b1r, w2p, b2r, w3p, b3r, w4t, b4r)))

    kernel = functools.partial(_fused_denoiser_kernel,
                               height=H, width=W, margin=margin)
    out = pl.pallas_call(
        kernel,
        out_shape=jax.ShapeDtypeStruct((N, HW, 1), x_nchw.dtype),
        grid=(N,),
        in_specs=[
            pl.BlockSpec((1, HW, 1), lambda n: (n, 0, 0)),
            _const_spec(w1t), _const_spec(b1r),
            _const_spec(w2p), _const_spec(b2r),
            _const_spec(w3p), _const_spec(b3r),
            _const_spec(w4t), _const_spec(b4r),
        ],
        out_specs=pl.BlockSpec((1, HW, 1), lambda n: (n, 0, 0)),
        scratch_shapes=[
            pltpu.VMEM((rows, 1), jnp.float32),    # padded input column
            pltpu.VMEM((rows, c1), jnp.float32),   # encoder act 1
            pltpu.VMEM((rows, c2), jnp.float32),   # encoder act 2
            pltpu.VMEM((rows, c3), jnp.float32),   # decoder act 1
        ],
        compiler_params=pltpu.CompilerParams(
            dimension_semantics=("parallel",),
            vmem_limit_bytes=32 * 1024 * 1024,     # raise v5e's 16 MiB scoped default
        ),
        cost_estimate=pl.CostEstimate(
            flops=int(flops), transcendentals=0, bytes_accessed=bytes_accessed),
    )(x_col, w1t, b1r, w2p, b2r, w3p, b3r, w4t, b4r)
    return out.reshape(N, 1, H, W)


def init_params(key):
    """Deterministic init mirroring nn.Conv2d default (uniform +/- 1/sqrt(fan_in)), HWIO."""
    layer_dims = [(1, 32), (32, 64), (64, 32), (32, 1)]
    params = []
    for (cin, cout) in layer_dims:
        key, kw, kb = jax.random.split(key, 3)
        fan_in = cin * 3 * 3
        bound = 1.0 / np.sqrt(fan_in)
        w = jax.random.uniform(kw, (3, 3, cin, cout), jnp.float32, -bound, bound)
        b = jax.random.uniform(kb, (cout,), jnp.float32, -bound, bound)
        params.append((w, b))
    return params


def _reference_forward(x_nchw, params):
    """Pure-JAX f32 reference (lax.conv) for correctness checking."""
    x = jnp.transpose(x_nchw, (0, 2, 3, 1))
    relus = [True, True, True, False]
    for (w, b), relu in zip(params, relus):
        dn = jax.lax.conv_dimension_numbers(x.shape, w.shape, ("NHWC", "HWIO", "NHWC"))
        x = jax.lax.conv_general_dilated(x, w, (1, 1), "SAME", dimension_numbers=dn) + b
        if relu:
            x = jnp.maximum(x, 0.0)
    return jnp.transpose(x, (0, 3, 1, 2))


if __name__ == "__main__":
    key = jax.random.PRNGKey(0)
    key, kx = jax.random.split(key)

    # Input consistent with the module: single-channel images, NCHW.
    N, C, H, W = 2, 1, 16, 16
    x = jax.random.normal(kx, (N, C, H, W), jnp.float32)
    params = init_params(key)

    ref = jax.block_until_ready(_reference_forward(x, params))

    # f32-MXU reference mode: tight structural check of the packed-K conv logic.
    fwd_f32 = jax.jit(functools.partial(cnn_denoiser_forward, use_bf16_mxu=False))
    out_f32 = jax.block_until_ready(fwd_f32(x, params))
    assert out_f32.shape == (N, 1, H, W), out_f32.shape
    np.testing.assert_allclose(np.asarray(out_f32), np.asarray(ref), rtol=1e-5, atol=2e-5)

    # bf16-MXU fast path (default): looser tolerance vs the f32 reference.
    fwd = jax.jit(cnn_denoiser_forward)
    out = jax.block_until_ready(fwd(x, params))
    assert out.shape == (N, 1, H, W), out.shape
    np.testing.assert_allclose(np.asarray(out), np.asarray(ref), rtol=5e-2, atol=5e-2)

    print("KERNEL_OK")
</pallas_src>

<mosaic_0001>
module attributes {stable_mosaic.version = 11 : i64} {
  func.func @_fused_denoiser_kernel(%arg0: i32, %arg1: memref<1x256x1xf32, #tpu.memory_space<vmem>>, %arg2: memref<9x1x32xf32, #tpu.memory_space<vmem>>, %arg3: memref<1x32xf32, #tpu.memory_space<vmem>>, %arg4: memref<3x96x64xf32, #tpu.memory_space<vmem>>, %arg5: memref<1x64xf32, #tpu.memory_space<vmem>>, %arg6: memref<3x192x32xf32, #tpu.memory_space<vmem>>, %arg7: memref<1x32xf32, #tpu.memory_space<vmem>>, %arg8: memref<9x1x32xf32, #tpu.memory_space<vmem>>, %arg9: memref<1x1xf32, #tpu.memory_space<vmem>>, %arg10: memref<1x256x1xf32, #tpu.memory_space<vmem>>, %arg11: memref<304x1xf32, #tpu.memory_space<vmem>>, %arg12: memref<304x32xf32, #tpu.memory_space<vmem>>, %arg13: memref<304x64xf32, #tpu.memory_space<vmem>>, %arg14: memref<304x32xf32, #tpu.memory_space<vmem>>) attributes {dimension_semantics = [#tpu.dimension_semantics<parallel>], iteration_bounds = array<i64: 2>, scalar_prefetch = 0 : i64, scratch_operands = 4 : i64, tpu.core_type = #tpu.core_type<tc>, window_params = [{transform_indices = @transform_0, window_bounds = array<i64: 1, 256, 1>}, {pipeline_mode = #tpu.pipeline_mode<synchronous>, transform_indices = @transform_1, window_bounds = array<i64: 9, 1, 32>}, {pipeline_mode = #tpu.pipeline_mode<synchronous>, transform_indices = @transform_2, window_bounds = array<i64: 1, 32>}, {pipeline_mode = #tpu.pipeline_mode<synchronous>, transform_indices = @transform_3, window_bounds = array<i64: 3, 96, 64>}, {pipeline_mode = #tpu.pipeline_mode<synchronous>, transform_indices = @transform_4, window_bounds = array<i64: 1, 64>}, {pipeline_mode = #tpu.pipeline_mode<synchronous>, transform_indices = @transform_5, window_bounds = array<i64: 3, 192, 32>}, {pipeline_mode = #tpu.pipeline_mode<synchronous>, transform_indices = @transform_6, window_bounds = array<i64: 1, 32>}, {pipeline_mode = #tpu.pipeline_mode<synchronous>, transform_indices = @transform_7, window_bounds = array<i64: 9, 1, 32>}, {pipeline_mode = #tpu.pipeline_mode<synchronous>, transform_indices = @transform_8, window_bounds = array<i64: 1, 1>}, {transform_indices = @transform_9, window_bounds = array<i64: 1, 256, 1>}]} {
    %cst = arith.constant 0.000000e+00 : f32
    %0 = vector.broadcast %cst : f32 to vector<24x1xf32>
    %c0 = arith.constant 0 : index
    %c0_0 = arith.constant 0 : index
    %1 = vector.load %arg11[%c0, %c0_0] : memref<304x1xf32, #tpu.memory_space<vmem>>, vector<24x1xf32>
    tpu.vector_store %arg11[%c0, %c0_0], %0 {strides = array<i32>} : memref<304x1xf32, #tpu.memory_space<vmem>>, vector<24x1xf32>,
    %cst_1 = arith.constant 0.000000e+00 : f32
    %2 = vector.broadcast %cst_1 : f32 to vector<24x1xf32>
    %c280 = arith.constant 280 : index
    %c0_2 = arith.constant 0 : index
    %3 = vector.load %arg11[%c280, %c0_2] : memref<304x1xf32, #tpu.memory_space<vmem>>, vector<24x1xf32>
    tpu.vector_store %arg11[%c280, %c0_2], %2 {strides = array<i32>} : memref<304x1xf32, #tpu.memory_space<vmem>>, vector<24x1xf32>,
    %cst_3 = arith.constant 0.000000e+00 : f32
    %4 = vector.broadcast %cst_3 : f32 to vector<24x32xf32>
    %c0_4 = arith.constant 0 : index
    %c0_5 = arith.constant 0 : index
    %5 = vector.load %arg12[%c0_4, %c0_5] : memref<304x32xf32, #tpu.memory_space<vmem>>, vector<24x32xf32>
    tpu.vector_store %arg12[%c0_4, %c0_5], %4 {strides = array<i32>} : memref<304x32xf32, #tpu.memory_space<vmem>>, vector<24x32xf32>,
    %cst_6 = arith.constant 0.000000e+00 : f32
    %6 = vector.broadcast %cst_6 : f32 to vector<24x32xf32>
    %c280_7 = arith.constant 280 : index
    %c0_8 = arith.constant 0 : index
    %7 = vector.load %arg12[%c280_7, %c0_8] : memref<304x32xf32, #tpu.memory_space<vmem>>, vector<24x32xf32>
    tpu.vector_store %arg12[%c280_7, %c0_8], %6 {strides = array<i32>} : memref<304x32xf32, #tpu.memory_space<vmem>>, vector<24x32xf32>,
    %cst_9 = arith.constant 0.000000e+00 : f32
    %8 = vector.broadcast %cst_9 : f32 to vector<24x64xf32>
    %c0_10 = arith.constant 0 : index
    %c0_11 = arith.constant 0 : index
    %9 = vector.load %arg13[%c0_10, %c0_11] : memref<304x64xf32, #tpu.memory_space<vmem>>, vector<24x64xf32>
    tpu.vector_store %arg13[%c0_10, %c0_11], %8 {strides = array<i32>} : memref<304x64xf32, #tpu.memory_space<vmem>>, vector<24x64xf32>,
    %cst_12 = arith.constant 0.000000e+00 : f32
    %10 = vector.broadcast %cst_12 : f32 to vector<24x64xf32>
    %c280_13 = arith.constant 280 : index
    %c0_14 = arith.constant 0 : index
    %11 = vector.load %arg13[%c280_13, %c0_14] : memref<304x64xf32, #tpu.memory_space<vmem>>, vector<24x64xf32>
    tpu.vector_store %arg13[%c280_13, %c0_14], %10 {strides = array<i32>} : memref<304x64xf32, #tpu.memory_space<vmem>>, vector<24x64xf32>,
    %cst_15 = arith.constant 0.000000e+00 : f32
    %12 = vector.broadcast %cst_15 : f32 to vector<24x32xf32>
    %c0_16 = arith.constant 0 : index
    %c0_17 = arith.constant 0 : index
    %13 = vector.load %arg14[%c0_16, %c0_17] : memref<304x32xf32, #tpu.memory_space<vmem>>, vector<24x32xf32>
    tpu.vector_store %arg14[%c0_16, %c0_17], %12 {strides = array<i32>} : memref<304x32xf32, #tpu.memory_space<vmem>>, vector<24x32xf32>,
    %cst_18 = arith.constant 0.000000e+00 : f32
    %14 = vector.broadcast %cst_18 : f32 to vector<24x32xf32>
    %c280_19 = arith.constant 280 : index
    %c0_20 = arith.constant 0 : index
    %15 = vector.load %arg14[%c280_19, %c0_20] : memref<304x32xf32, #tpu.memory_space<vmem>>, vector<24x32xf32>
    tpu.vector_store %arg14[%c280_19, %c0_20], %14 {strides = array<i32>} : memref<304x32xf32, #tpu.memory_space<vmem>>, vector<24x32xf32>,
    %c0_21 = arith.constant 0 : index
    %c0_22 = arith.constant 0 : index
    %c0_23 = arith.constant 0 : index
    %16 = vector.load %arg1[%c0_21, %c0_22, %c0_23] : memref<1x256x1xf32, #tpu.memory_space<vmem>>, vector<1x256x1xf32>
    %17 = vector.shape_cast %16 : vector<1x256x1xf32> to vector<256x1xf32>
    %c24 = arith.constant 24 : index
    %c0_24 = arith.constant 0 : index
    %18 = vector.load %arg11[%c24, %c0_24] : memref<304x1xf32, #tpu.memory_space<vmem>>, vector<256x1xf32>
    tpu.vector_store %arg11[%c24, %c0_24], %17 {strides = array<i32>} : memref<304x1xf32, #tpu.memory_space<vmem>>, vector<256x1xf32>,
    %19 = tpu.iota {dimensions = array<i32: 0>} : vector<256x1xi32>
    %c16_i32 = arith.constant 16 : i32
    %c0_i32 = arith.constant 0 : i32
    %20 = arith.cmpi eq, %c16_i32, %c0_i32 : i32
    %c1_i32 = arith.constant 1 : i32
    %21 = arith.select %20, %c1_i32, %c16_i32 : i32
    %22 = vector.broadcast %21 : i32 to vector<256x1xi32>
    %23 = arith.remsi %19, %22 : vector<256x1xi32>
    %c0_i32_25 = arith.constant 0 : i32
    %24 = vector.broadcast %c0_i32_25 : i32 to vector<256x1xi32>
    %25 = arith.cmpi ne, %23, %24 : vector<256x1xi32>
    %c0_i32_26 = arith.constant 0 : i32
    %26 = vector.broadcast %c0_i32_26 : i32 to vector<256x1xi32>
    %27 = arith.cmpi slt, %23, %26 : vector<256x1xi32>
    %c0_i32_27 = arith.constant 0 : i32
    %28 = arith.cmpi slt, %21, %c0_i32_27 : i32
    %29 = vector.broadcast %28 : i1 to vector<256x1xi1>
    %30 = vector.broadcast %29 : vector<256x1xi1> to vector<256x1xi1>
    %31 = arith.xori %27, %30 : vector<256x1xi1>
    %32 = arith.andi %31, %25 : vector<256x1xi1>
    %33 = vector.broadcast %21 : i32 to vector<256x1xi32>
    %34 = arith.addi %23, %33 : vector<256x1xi32>
    %35 = arith.select %32, %34, %23 : vector<256x1xi1>, vector<256x1xi32>
    %c0_i32_28 = arith.constant 0 : i32
    %36 = vector.broadcast %c0_i32_28 : i32 to vector<256x1xi32>
    %37 = arith.cmpi ne, %35, %36 : vector<256x1xi32>
    %38 = arith.extui %37 : vector<256x1xi1> to vector<256x1xi32>
    %39 = arith.sitofp %38 : vector<256x1xi32> to vector<256x1xf32>
    %c15_i32 = arith.constant 15 : i32
    %40 = vector.broadcast %c15_i32 : i32 to vector<256x1xi32>
    %41 = arith.cmpi ne, %35, %40 : vector<256x1xi32>
    %42 = arith.extui %41 : vector<256x1xi1> to vector<256x1xi32>
    %43 = arith.sitofp %42 : vector<256x1xi32> to vector<256x1xf32>
    %c7 = arith.constant 7 : index
    %c0_29 = arith.constant 0 : index
    %44 = vector.load %arg11[%c7, %c0_29] : memref<304x1xf32, #tpu.memory_space<vmem>>, vector<256x1xf32>
    %c0_30 = arith.constant 0 : index
    %c0_31 = arith.constant 0 : index
    %c0_32 = arith.constant 0 : index
    %45 = vector.load %arg2[%c0_30, %c0_31, %c0_32] : memref<9x1x32xf32, #tpu.memory_space<vmem>>, vector<1x1x32xf32>
    %46 = vector.shape_cast %45 : vector<1x1x32xf32> to vector<1x32xf32>
    %47 = vector.broadcast %44 : vector<256x1xf32> to vector<256x32xf32>
    %48 = vector.broadcast %46 : vector<1x32xf32> to vector<256x32xf32>
    %49 = arith.mulf %47, %48 : vector<256x32xf32>
    %c23 = arith.constant 23 : index
    %c0_33 = arith.constant 0 : index
    %50 = vector.load %arg11[%c23, %c0_33] : memref<304x1xf32, #tpu.memory_space<vmem>>, vector<256x1xf32>
    %c3 = arith.constant 3 : index
    %c0_34 = arith.constant 0 : index
    %c0_35 = arith.constant 0 : index
    %51 = vector.load %arg2[%c3, %c0_34, %c0_35] : memref<9x1x32xf32, #tpu.memory_space<vmem>>, vector<1x1x32xf32>
    %52 = vector.shape_cast %51 : vector<1x1x32xf32> to vector<1x32xf32>
    %53 = vector.broadcast %50 : vector<256x1xf32> to vector<256x32xf32>
    %54 = vector.broadcast %52 : vector<1x32xf32> to vector<256x32xf32>
    %55 = arith.mulf %53, %54 : vector<256x32xf32>
    %56 = arith.addf %49, %55 : vector<256x32xf32>
    %c39 = arith.constant 39 : index
    %c0_36 = arith.constant 0 : index
    %57 = vector.load %arg11[%c39, %c0_36] : memref<304x1xf32, #tpu.memory_space<vmem>>, vector<256x1xf32>
    %c6 = arith.constant 6 : index
    %c0_37 = arith.constant 0 : index
    %c0_38 = arith.constant 0 : index
    %58 = vector.load %arg2[%c6, %c0_37, %c0_38] : memref<9x1x32xf32, #tpu.memory_space<vmem>>, vector<1x1x32xf32>
    %59 = vector.shape_cast %58 : vector<1x1x32xf32> to vector<1x32xf32>
    %60 = vector.broadcast %57 : vector<256x1xf32> to vector<256x32xf32>
    %61 = vector.broadcast %59 : vector<1x32xf32> to vector<256x32xf32>
    %62 = arith.mulf %60, %61 : vector<256x32xf32>
    %63 = arith.addf %56, %62 : vector<256x32xf32>
    %64 = vector.broadcast %39 : vector<256x1xf32> to vector<256x32xf32>
    %65 = arith.mulf %63, %64 : vector<256x32xf32>
    %c8 = arith.constant 8 : index
    %c0_39 = arith.constant 0 : index
    %66 = vector.load %arg11[%c8, %c0_39] : memref<304x1xf32, #tpu.memory_space<vmem>>, vector<256x1xf32>
    %c1 = arith.constant 1 : index
    %c0_40 = arith.constant 0 : index
    %c0_41 = arith.constant 0 : index
    %67 = vector.load %arg2[%c1, %c0_40, %c0_41] : memref<9x1x32xf32, #tpu.memory_space<vmem>>, vector<1x1x32xf32>
    %68 = vector.shape_cast %67 : vector<1x1x32xf32> to vector<1x32xf32>
    %69 = vector.broadcast %66 : vector<256x1xf32> to vector<256x32xf32>
    %70 = vector.broadcast %68 : vector<1x32xf32> to vector<256x32xf32>
    %71 = arith.mulf %69, %70 : vector<256x32xf32>
    %c24_42 = arith.constant 24 : index
    %c0_43 = arith.constant 0 : index
    %72 = vector.load %arg11[%c24_42, %c0_43] : memref<304x1xf32, #tpu.memory_space<vmem>>, vector<256x1xf32>
    %c4 = arith.constant 4 : index
    %c0_44 = arith.constant 0 : index
    %c0_45 = arith.constant 0 : index
    %73 = vector.load %arg2[%c4, %c0_44, %c0_45] : memref<9x1x32xf32, #tpu.memory_space<vmem>>, vector<1x1x32xf32>
    %74 = vector.shape_cast %73 : vector<1x1x32xf32> to vector<1x32xf32>
    %75 = vector.broadcast %72 : vector<256x1xf32> to vector<256x32xf32>
    %76 = vector.broadcast %74 : vector<1x32xf32> to vector<256x32xf32>
    %77 = arith.mulf %75, %76 : vector<256x32xf32>
    %78 = arith.addf %71, %77 : vector<256x32xf32>
    %c40 = arith.constant 40 : index
    %c0_46 = arith.constant 0 : index
    %79 = vector.load %arg11[%c40, %c0_46] : memref<304x1xf32, #tpu.memory_space<vmem>>, vector<256x1xf32>
    %c7_47 = arith.constant 7 : index
    %c0_48 = arith.constant 0 : index
    %c0_49 = arith.constant 0 : index
    %80 = vector.load %arg2[%c7_47, %c0_48, %c0_49] : memref<9x1x32xf32, #tpu.memory_space<vmem>>, vector<1x1x32xf32>
    %81 = vector.shape_cast %80 : vector<1x1x32xf32> to vector<1x32xf32>
    %82 = vector.broadcast %79 : vector<256x1xf32> to vector<256x32xf32>
    %83 = vector.broadcast %81 : vector<1x32xf32> to vector<256x32xf32>
    %84 = arith.mulf %82, %83 : vector<256x32xf32>
    %85 = arith.addf %78, %84 : vector<256x32xf32>
    %86 = arith.addf %65, %85 : vector<256x32xf32>
    %c9 = arith.constant 9 : index
    %c0_50 = arith.constant 0 : index
    %87 = vector.load %arg11[%c9, %c0_50] : memref<304x1xf32, #tpu.memory_space<vmem>>, vector<256x1xf32>
    %c2 = arith.constant 2 : index
    %c0_51 = arith.constant 0 : index
    %c0_52 = arith.constant 0 : index
    %88 = vector.load %arg2[%c2, %c0_51, %c0_52] : memref<9x1x32xf32, #tpu.memory_space<vmem>>, vector<1x1x32xf32>
    %89 = vector.shape_cast %88 : vector<1x1x32xf32> to vector<1x32xf32>
    %90 = vector.broadcast %87 : vector<256x1xf32> to vector<256x32xf32>
    %91 = vector.broadcast %89 : vector<1x32xf32> to vector<256x32xf32>
    %92 = arith.mulf %90, %91 : vector<256x32xf32>
    %c25 = arith.constant 25 : index
    %c0_53 = arith.constant 0 : index
    %93 = vector.load %arg11[%c25, %c0_53] : memref<304x1xf32, #tpu.memory_space<vmem>>, vector<256x1xf32>
    %c5 = arith.constant 5 : index
    %c0_54 = arith.constant 0 : index
    %c0_55 = arith.constant 0 : index
    %94 = vector.load %arg2[%c5, %c0_54, %c0_55] : memref<9x1x32xf32, #tpu.memory_space<vmem>>, vector<1x1x32xf32>
    %95 = vector.shape_cast %94 : vector<1x1x32xf32> to vector<1x32xf32>
    %96 = vector.broadcast %93 : vector<256x1xf32> to vector<256x32xf32>
    %97 = vector.broadcast %95 : vector<1x32xf32> to vector<256x32xf32>
    %98 = arith.mulf %96, %97 : vector<256x32xf32>
    %99 = arith.addf %92, %98 : vector<256x32xf32>
    %c41 = arith.constant 41 : index
    %c0_56 = arith.constant 0 : index
    %100 = vector.load %arg11[%c41, %c0_56] : memref<304x1xf32, #tpu.memory_space<vmem>>, vector<256x1xf32>
    %c8_57 = arith.constant 8 : index
    %c0_58 = arith.constant 0 : index
    %c0_59 = arith.constant 0 : index
    %101 = vector.load %arg2[%c8_57, %c0_58, %c0_59] : memref<9x1x32xf32, #tpu.memory_space<vmem>>, vector<1x1x32xf32>
    %102 = vector.shape_cast %101 : vector<1x1x32xf32> to vector<1x32xf32>
    %103 = vector.broadcast %100 : vector<256x1xf32> to vector<256x32xf32>
    %104 = vector.broadcast %102 : vector<1x32xf32> to vector<256x32xf32>
    %105 = arith.mulf %103, %104 : vector<256x32xf32>
    %106 = arith.addf %99, %105 : vector<256x32xf32>
    %107 = vector.broadcast %43 : vector<256x1xf32> to vector<256x32xf32>
    %108 = arith.mulf %106, %107 : vector<256x32xf32>
    %109 = arith.addf %86, %108 : vector<256x32xf32>
    %c0_60 = arith.constant 0 : index
    %c0_61 = arith.constant 0 : index
    %110 = vector.load %arg3[%c0_60, %c0_61] : memref<1x32xf32, #tpu.memory_space<vmem>>, vector<1x32xf32>
    %111 = vector.shape_cast %110 : vector<1x32xf32> to vector<32xf32>
    %112 = vector.shape_cast %111 : vector<32xf32> to vector<1x32xf32>
    %113 = vector.broadcast %112 : vector<1x32xf32> to vector<256x32xf32>
    %114 = arith.addf %109, %113 : vector<256x32xf32>
    %cst_62 = arith.constant 0.000000e+00 : f32
    %115 = vector.broadcast %cst_62 : f32 to vector<256x32xf32>
    %116 = arith.maximumf %114, %115 : vector<256x32xf32>
    %c24_63 = arith.constant 24 : index
    %c0_64 = arith.constant 0 : index
    %117 = vector.load %arg12[%c24_63, %c0_64] : memref<304x32xf32, #tpu.memory_space<vmem>>, vector<256x32xf32>
    tpu.vector_store %arg12[%c24_63, %c0_64], %116 {strides = array<i32>} : memref<304x32xf32, #tpu.memory_space<vmem>>, vector<256x32xf32>,
    %c7_65 = arith.constant 7 : index
    %c0_66 = arith.constant 0 : index
    %118 = vector.load %arg12[%c7_65, %c0_66] : memref<304x32xf32, #tpu.memory_space<vmem>>, vector<288x32xf32>
    %119 = vector.extract_strided_slice %118 {offsets = [0, 0], sizes = [256, 32], strides = [1, 1]} : vector<288x32xf32> to vector<256x32xf32>
    %120 = vector.extract_strided_slice %118 {offsets = [16, 0], sizes = [256, 32], strides = [1, 1]} : vector<288x32xf32> to vector<256x32xf32>
    %121 = vector.extract_strided_slice %118 {offsets = [32, 0], sizes = [256, 32], strides = [1, 1]} : vector<288x32xf32> to vector<256x32xf32>
    %122 = tpu.concatenate %119, %120, %121 in 1 : vector<256x32xf32>, vector<256x32xf32>, vector<256x32xf32> -> vector<256x96xf32>
    %c0_67 = arith.constant 0 : index
    %c0_68 = arith.constant 0 : index
    %c0_69 = arith.constant 0 : index
    %123 = vector.load %arg4[%c0_67, %c0_68, %c0_69] : memref<3x96x64xf32, #tpu.memory_space<vmem>>, vector<1x96x64xf32>
    %124 = vector.shape_cast %123 : vector<1x96x64xf32> to vector<96x64xf32>
    %cst_70 = arith.constant dense<0.000000e+00> : vector<256x64xf32>
    %125 = tpu.matmul %122, %124, %cst_70 {dimension_numbers = #tpu.dot_dimension_numbers<[1], [0], [0], [1], [0, 0, 1, 1], [], []>} : vector<256x96xf32>, vector<96x64xf32>, vector<256x64xf32> -> vector<256x64xf32>
    %126 = vector.broadcast %39 : vector<256x1xf32> to vector<256x64xf32>
    %127 = arith.mulf %125, %126 : vector<256x64xf32>
    %c8_71 = arith.constant 8 : index
    %c0_72 = arith.constant 0 : index
    %128 = vector.load %arg12[%c8_71, %c0_72] : memref<304x32xf32, #tpu.memory_space<vmem>>, vector<288x32xf32>
    %129 = vector.extract_strided_slice %128 {offsets = [0, 0], sizes = [256, 32], strides = [1, 1]} : vector<288x32xf32> to vector<256x32xf32>
    %130 = vector.extract_strided_slice %128 {offsets = [16, 0], sizes = [256, 32], strides = [1, 1]} : vector<288x32xf32> to vector<256x32xf32>
    %131 = vector.extract_strided_slice %128 {offsets = [32, 0], sizes = [256, 32], strides = [1, 1]} : vector<288x32xf32> to vector<256x32xf32>
    %132 = tpu.concatenate %129, %130, %131 in 1 : vector<256x32xf32>, vector<256x32xf32>, vector<256x32xf32> -> vector<256x96xf32>
    %c1_73 = arith.constant 1 : index
    %c0_74 = arith.constant 0 : index
    %c0_75 = arith.constant 0 : index
    %133 = vector.load %arg4[%c1_73, %c0_74, %c0_75] : memref<3x96x64xf32, #tpu.memory_space<vmem>>, vector<1x96x64xf32>
    %134 = vector.shape_cast %133 : vector<1x96x64xf32> to vector<96x64xf32>
    %cst_76 = arith.constant dense<0.000000e+00> : vector<256x64xf32>
    %135 = tpu.matmul %132, %134, %cst_76 {dimension_numbers = #tpu.dot_dimension_numbers<[1], [0], [0], [1], [0, 0, 1, 1], [], []>} : vector<256x96xf32>, vector<96x64xf32>, vector<256x64xf32> -> vector<256x64xf32>
    %136 = arith.addf %127, %135 : vector<256x64xf32>
    %c9_77 = arith.constant 9 : index
    %c0_78 = arith.constant 0 : index
    %137 = vector.load %arg12[%c9_77, %c0_78] : memref<304x32xf32, #tpu.memory_space<vmem>>, vector<288x32xf32>
    %138 = vector.extract_strided_slice %137 {offsets = [0, 0], sizes = [256, 32], strides = [1, 1]} : vector<288x32xf32> to vector<256x32xf32>
    %139 = vector.extract_strided_slice %137 {offsets = [16, 0], sizes = [256, 32], strides = [1, 1]} : vector<288x32xf32> to vector<256x32xf32>
    %140 = vector.extract_strided_slice %137 {offsets = [32, 0], sizes = [256, 32], strides = [1, 1]} : vector<288x32xf32> to vector<256x32xf32>
    %141 = tpu.concatenate %138, %139, %140 in 1 : vector<256x32xf32>, vector<256x32xf32>, vector<256x32xf32> -> vector<256x96xf32>
    %c2_79 = arith.constant 2 : index
    %c0_80 = arith.constant 0 : index
    %c0_81 = arith.constant 0 : index
    %142 = vector.load %arg4[%c2_79, %c0_80, %c0_81] : memref<3x96x64xf32, #tpu.memory_space<vmem>>, vector<1x96x64xf32>
    %143 = vector.shape_cast %142 : vector<1x96x64xf32> to vector<96x64xf32>
    %cst_82 = arith.constant dense<0.000000e+00> : vector<256x64xf32>
    %144 = tpu.matmul %141, %143, %cst_82 {dimension_numbers = #tpu.dot_dimension_numbers<[1], [0], [0], [1], [0, 0, 1, 1], [], []>} : vector<256x96xf32>, vector<96x64xf32>, vector<256x64xf32> -> vector<256x64xf32>
    %145 = vector.broadcast %43 : vector<256x1xf32> to vector<256x64xf32>
    %146 = arith.mulf %144, %145 : vector<256x64xf32>
    %147 = arith.addf %136, %146 : vector<256x64xf32>
    %c0_83 = arith.constant 0 : index
    %c0_84 = arith.constant 0 : index
    %148 = vector.load %arg5[%c0_83, %c0_84] : memref<1x64xf32, #tpu.memory_space<vmem>>, vector<1x64xf32>
    %149 = vector.shape_cast %148 : vector<1x64xf32> to vector<64xf32>
    %150 = vector.shape_cast %149 : vector<64xf32> to vector<1x64xf32>
    %151 = vector.broadcast %150 : vector<1x64xf32> to vector<256x64xf32>
    %152 = arith.addf %147, %151 : vector<256x64xf32>
    %cst_85 = arith.constant 0.000000e+00 : f32
    %153 = vector.broadcast %cst_85 : f32 to vector<256x64xf32>
    %154 = arith.maximumf %152, %153 : vector<256x64xf32>
    %c24_86 = arith.constant 24 : index
    %c0_87 = arith.constant 0 : index
    %155 = vector.load %arg13[%c24_86, %c0_87] : memref<304x64xf32, #tpu.memory_space<vmem>>, vector<256x64xf32>
    tpu.vector_store %arg13[%c24_86, %c0_87], %154 {strides = array<i32>} : memref<304x64xf32, #tpu.memory_space<vmem>>, vector<256x64xf32>,
    %c7_88 = arith.constant 7 : index
    %c0_89 = arith.constant 0 : index
    %156 = vector.load %arg13[%c7_88, %c0_89] : memref<304x64xf32, #tpu.memory_space<vmem>>, vector<288x64xf32>
    %157 = vector.extract_strided_slice %156 {offsets = [0, 0], sizes = [256, 64], strides = [1, 1]} : vector<288x64xf32> to vector<256x64xf32>
    %158 = vector.extract_strided_slice %156 {offsets = [16, 0], sizes = [256, 64], strides = [1, 1]} : vector<288x64xf32> to vector<256x64xf32>
    %159 = vector.extract_strided_slice %156 {offsets = [32, 0], sizes = [256, 64], strides = [1, 1]} : vector<288x64xf32> to vector<256x64xf32>
    %160 = tpu.concatenate %157, %158, %159 in 1 : vector<256x64xf32>, vector<256x64xf32>, vector<256x64xf32> -> vector<256x192xf32>
    %c0_90 = arith.constant 0 : index
    %c0_91 = arith.constant 0 : index
    %c0_92 = arith.constant 0 : index
    %161 = vector.load %arg6[%c0_90, %c0_91, %c0_92] : memref<3x192x32xf32, #tpu.memory_space<vmem>>, vector<1x192x32xf32>
    %162 = vector.shape_cast %161 : vector<1x192x32xf32> to vector<192x32xf32>
    %cst_93 = arith.constant dense<0.000000e+00> : vector<256x32xf32>
    %163 = tpu.matmul %160, %162, %cst_93 {dimension_numbers = #tpu.dot_dimension_numbers<[1], [0], [0], [1], [0, 0, 1, 1], [], []>} : vector<256x192xf32>, vector<192x32xf32>, vector<256x32xf32> -> vector<256x32xf32>
    %164 = vector.broadcast %39 : vector<256x1xf32> to vector<256x32xf32>
    %165 = arith.mulf %163, %164 : vector<256x32xf32>
    %c8_94 = arith.constant 8 : index
    %c0_95 = arith.constant 0 : index
    %166 = vector.load %arg13[%c8_94, %c0_95] : memref<304x64xf32, #tpu.memory_space<vmem>>, vector<288x64xf32>
    %167 = vector.extract_strided_slice %166 {offsets = [0, 0], sizes = [256, 64], strides = [1, 1]} : vector<288x64xf32> to vector<256x64xf32>
    %168 = vector.extract_strided_slice %166 {offsets = [16, 0], sizes = [256, 64], strides = [1, 1]} : vector<288x64xf32> to vector<256x64xf32>
    %169 = vector.extract_strided_slice %166 {offsets = [32, 0], sizes = [256, 64], strides = [1, 1]} : vector<288x64xf32> to vector<256x64xf32>
    %170 = tpu.concatenate %167, %168, %169 in 1 : vector<256x64xf32>, vector<256x64xf32>, vector<256x64xf32> -> vector<256x192xf32>
    %c1_96 = arith.constant 1 : index
    %c0_97 = arith.constant 0 : index
    %c0_98 = arith.constant 0 : index
    %171 = vector.load %arg6[%c1_96, %c0_97, %c0_98] : memref<3x192x32xf32, #tpu.memory_space<vmem>>, vector<1x192x32xf32>
    %172 = vector.shape_cast %171 : vector<1x192x32xf32> to vector<192x32xf32>
    %cst_99 = arith.constant dense<0.000000e+00> : vector<256x32xf32>
    %173 = tpu.matmul %170, %172, %cst_99 {dimension_numbers = #tpu.dot_dimension_numbers<[1], [0], [0], [1], [0, 0, 1, 1], [], []>} : vector<256x192xf32>, vector<192x32xf32>, vector<256x32xf32> -> vector<256x32xf32>
    %174 = arith.addf %165, %173 : vector<256x32xf32>
    %c9_100 = arith.constant 9 : index
    %c0_101 = arith.constant 0 : index
    %175 = vector.load %arg13[%c9_100, %c0_101] : memref<304x64xf32, #tpu.memory_space<vmem>>, vector<288x64xf32>
    %176 = vector.extract_strided_slice %175 {offsets = [0, 0], sizes = [256, 64], strides = [1, 1]} : vector<288x64xf32> to vector<256x64xf32>
    %177 = vector.extract_strided_slice %175 {offsets = [16, 0], sizes = [256, 64], strides = [1, 1]} : vector<288x64xf32> to vector<256x64xf32>
    %178 = vector.extract_strided_slice %175 {offsets = [32, 0], sizes = [256, 64], strides = [1, 1]} : vector<288x64xf32> to vector<256x64xf32>
    %179 = tpu.concatenate %176, %177, %178 in 1 : vector<256x64xf32>, vector<256x64xf32>, vector<256x64xf32> -> vector<256x192xf32>
    %c2_102 = arith.constant 2 : index
    %c0_103 = arith.constant 0 : index
    %c0_104 = arith.constant 0 : index
    %180 = vector.load %arg6[%c2_102, %c0_103, %c0_104] : memref<3x192x32xf32, #tpu.memory_space<vmem>>, vector<1x192x32xf32>
    %181 = vector.shape_cast %180 : vector<1x192x32xf32> to vector<192x32xf32>
    %cst_105 = arith.constant dense<0.000000e+00> : vector<256x32xf32>
    %182 = tpu.matmul %179, %181, %cst_105 {dimension_numbers = #tpu.dot_dimension_numbers<[1], [0], [0], [1], [0, 0, 1, 1], [], []>} : vector<256x192xf32>, vector<192x32xf32>, vector<256x32xf32> -> vector<256x32xf32>
    %183 = vector.broadcast %43 : vector<256x1xf32> to vector<256x32xf32>
    %184 = arith.mulf %182, %183 : vector<256x32xf32>
    %185 = arith.addf %174, %184 : vector<256x32xf32>
    %c0_106 = arith.constant 0 : index
    %c0_107 = arith.constant 0 : index
    %186 = vector.load %arg7[%c0_106, %c0_107] : memref<1x32xf32, #tpu.memory_space<vmem>>, vector<1x32xf32>
    %187 = vector.shape_cast %186 : vector<1x32xf32> to vector<32xf32>
    %188 = vector.shape_cast %187 : vector<32xf32> to vector<1x32xf32>
    %189 = vector.broadcast %188 : vector<1x32xf32> to vector<256x32xf32>
    %190 = arith.addf %185, %189 : vector<256x32xf32>
    %cst_108 = arith.constant 0.000000e+00 : f32
    %191 = vector.broadcast %cst_108 : f32 to vector<256x32xf32>
    %192 = arith.maximumf %190, %191 : vector<256x32xf32>
    %c24_109 = arith.constant 24 : index
    %c0_110 = arith.constant 0 : index
    %193 = vector.load %arg14[%c24_109, %c0_110] : memref<304x32xf32, #tpu.memory_space<vmem>>, vector<256x32xf32>
    tpu.vector_store %arg14[%c24_109, %c0_110], %192 {strides = array<i32>} : memref<304x32xf32, #tpu.memory_space<vmem>>, vector<256x32xf32>,
    %c7_111 = arith.constant 7 : index
    %c0_112 = arith.constant 0 : index
    %194 = vector.load %arg14[%c7_111, %c0_112] : memref<304x32xf32, #tpu.memory_space<vmem>>, vector<256x32xf32>
    %c0_113 = arith.constant 0 : index
    %c0_114 = arith.constant 0 : index
    %c0_115 = arith.constant 0 : index
    %195 = vector.load %arg8[%c0_113, %c0_114, %c0_115] : memref<9x1x32xf32, #tpu.memory_space<vmem>>, vector<1x1x32xf32>
    %196 = vector.shape_cast %195 : vector<1x1x32xf32> to vector<1x32xf32>
    %197 = vector.broadcast %196 : vector<1x32xf32> to vector<256x32xf32>
    %198 = arith.mulf %194, %197 : vector<256x32xf32>
    %c23_116 = arith.constant 23 : index
    %c0_117 = arith.constant 0 : index
    %199 = vector.load %arg14[%c23_116, %c0_117] : memref<304x32xf32, #tpu.memory_space<vmem>>, vector<256x32xf32>
    %c3_118 = arith.constant 3 : index
    %c0_119 = arith.constant 0 : index
    %c0_120 = arith.constant 0 : index
    %200 = vector.load %arg8[%c3_118, %c0_119, %c0_120] : memref<9x1x32xf32, #tpu.memory_space<vmem>>, vector<1x1x32xf32>
    %201 = vector.shape_cast %200 : vector<1x1x32xf32> to vector<1x32xf32>
    %202 = vector.broadcast %201 : vector<1x32xf32> to vector<256x32xf32>
    %203 = arith.mulf %199, %202 : vector<256x32xf32>
    %204 = arith.addf %198, %203 : vector<256x32xf32>
    %c39_121 = arith.constant 39 : index
    %c0_122 = arith.constant 0 : index
    %205 = vector.load %arg14[%c39_121, %c0_122] : memref<304x32xf32, #tpu.memory_space<vmem>>, vector<256x32xf32>
    %c6_123 = arith.constant 6 : index
    %c0_124 = arith.constant 0 : index
    %c0_125 = arith.constant 0 : index
    %206 = vector.load %arg8[%c6_123, %c0_124, %c0_125] : memref<9x1x32xf32, #tpu.memory_space<vmem>>, vector<1x1x32xf32>
    %207 = vector.shape_cast %206 : vector<1x1x32xf32> to vector<1x32xf32>
    %208 = vector.broadcast %207 : vector<1x32xf32> to vector<256x32xf32>
    %209 = arith.mulf %205, %208 : vector<256x32xf32>
    %210 = arith.addf %204, %209 : vector<256x32xf32>
    %211 = vector.broadcast %39 : vector<256x1xf32> to vector<256x32xf32>
    %212 = arith.mulf %210, %211 : vector<256x32xf32>
    %c8_126 = arith.constant 8 : index
    %c0_127 = arith.constant 0 : index
    %213 = vector.load %arg14[%c8_126, %c0_127] : memref<304x32xf32, #tpu.memory_space<vmem>>, vector<256x32xf32>
    %c1_128 = arith.constant 1 : index
    %c0_129 = arith.constant 0 : index
    %c0_130 = arith.constant 0 : index
    %214 = vector.load %arg8[%c1_128, %c0_129, %c0_130] : memref<9x1x32xf32, #tpu.memory_space<vmem>>, vector<1x1x32xf32>
    %215 = vector.shape_cast %214 : vector<1x1x32xf32> to vector<1x32xf32>
    %216 = vector.broadcast %215 : vector<1x32xf32> to vector<256x32xf32>
    %217 = arith.mulf %213, %216 : vector<256x32xf32>
    %c24_131 = arith.constant 24 : index
    %c0_132 = arith.constant 0 : index
    %218 = vector.load %arg14[%c24_131, %c0_132] : memref<304x32xf32, #tpu.memory_space<vmem>>, vector<256x32xf32>
    %c4_133 = arith.constant 4 : index
    %c0_134 = arith.constant 0 : index
    %c0_135 = arith.constant 0 : index
    %219 = vector.load %arg8[%c4_133, %c0_134, %c0_135] : memref<9x1x32xf32, #tpu.memory_space<vmem>>, vector<1x1x32xf32>
    %220 = vector.shape_cast %219 : vector<1x1x32xf32> to vector<1x32xf32>
    %221 = vector.broadcast %220 : vector<1x32xf32> to vector<256x32xf32>
    %222 = arith.mulf %218, %221 : vector<256x32xf32>
    %223 = arith.addf %217, %222 : vector<256x32xf32>
    %c40_136 = arith.constant 40 : index
    %c0_137 = arith.constant 0 : index
    %224 = vector.load %arg14[%c40_136, %c0_137] : memref<304x32xf32, #tpu.memory_space<vmem>>, vector<256x32xf32>
    %c7_138 = arith.constant 7 : index
    %c0_139 = arith.constant 0 : index
    %c0_140 = arith.constant 0 : index
    %225 = vector.load %arg8[%c7_138, %c0_139, %c0_140] : memref<9x1x32xf32, #tpu.memory_space<vmem>>, vector<1x1x32xf32>
    %226 = vector.shape_cast %225 : vector<1x1x32xf32> to vector<1x32xf32>
    %227 = vector.broadcast %226 : vector<1x32xf32> to vector<256x32xf32>
    %228 = arith.mulf %224, %227 : vector<256x32xf32>
    %229 = arith.addf %223, %228 : vector<256x32xf32>
    %230 = arith.addf %212, %229 : vector<256x32xf32>
    %c9_141 = arith.constant 9 : index
    %c0_142 = arith.constant 0 : index
    %231 = vector.load %arg14[%c9_141, %c0_142] : memref<304x32xf32, #tpu.memory_space<vmem>>, vector<256x32xf32>
    %c2_143 = arith.constant 2 : index
    %c0_144 = arith.constant 0 : index
    %c0_145 = arith.constant 0 : index
    %232 = vector.load %arg8[%c2_143, %c0_144, %c0_145] : memref<9x1x32xf32, #tpu.memory_space<vmem>>, vector<1x1x32xf32>
    %233 = vector.shape_cast %232 : vector<1x1x32xf32> to vector<1x32xf32>
    %234 = vector.broadcast %233 : vector<1x32xf32> to vector<256x32xf32>
    %235 = arith.mulf %231, %234 : vector<256x32xf32>
    %c25_146 = arith.constant 25 : index
    %c0_147 = arith.constant 0 : index
    %236 = vector.load %arg14[%c25_146, %c0_147] : memref<304x32xf32, #tpu.memory_space<vmem>>, vector<256x32xf32>
    %c5_148 = arith.constant 5 : index
    %c0_149 = arith.constant 0 : index
    %c0_150 = arith.constant 0 : index
    %237 = vector.load %arg8[%c5_148, %c0_149, %c0_150] : memref<9x1x32xf32, #tpu.memory_space<vmem>>, vector<1x1x32xf32>
    %238 = vector.shape_cast %237 : vector<1x1x32xf32> to vector<1x32xf32>
    %239 = vector.broadcast %238 : vector<1x32xf32> to vector<256x32xf32>
    %240 = arith.mulf %236, %239 : vector<256x32xf32>
    %241 = arith.addf %235, %240 : vector<256x32xf32>
    %c41_151 = arith.constant 41 : index
    %c0_152 = arith.constant 0 : index
    %242 = vector.load %arg14[%c41_151, %c0_152] : memref<304x32xf32, #tpu.memory_space<vmem>>, vector<256x32xf32>
    %c8_153 = arith.constant 8 : index
    %c0_154 = arith.constant 0 : index
    %c0_155 = arith.constant 0 : index
    %243 = vector.load %arg8[%c8_153, %c0_154, %c0_155] : memref<9x1x32xf32, #tpu.memory_space<vmem>>, vector<1x1x32xf32>
    %244 = vector.shape_cast %243 : vector<1x1x32xf32> to vector<1x32xf32>
    %245 = vector.broadcast %244 : vector<1x32xf32> to vector<256x32xf32>
    %246 = arith.mulf %242, %245 : vector<256x32xf32>
    %247 = arith.addf %241, %246 : vector<256x32xf32>
    %248 = vector.broadcast %43 : vector<256x1xf32> to vector<256x32xf32>
    %249 = arith.mulf %247, %248 : vector<256x32xf32>
    %250 = arith.addf %230, %249 : vector<256x32xf32>
    %cst_156 = arith.constant dense<0.000000e+00> : vector<256xf32>
    %251 = vector.multi_reduction <add>, %250, %cst_156 [1] : vector<256x32xf32> to vector<256xf32>
    %252 = vector.shape_cast %251 : vector<256xf32> to vector<256x1xf32>
    %c0_157 = arith.constant 0 : index
    %c0_158 = arith.constant 0 : index
    %253 = vector.load %arg9[%c0_157, %c0_158] : memref<1x1xf32, #tpu.memory_space<vmem>>, vector<1x1xf32>
    %254 = vector.shape_cast %253 : vector<1x1xf32> to vector<1xf32>
    %255 = vector.shape_cast %254 : vector<1xf32> to vector<1x1xf32>
    %256 = vector.broadcast %255 : vector<1x1xf32> to vector<256x1xf32>
    %257 = arith.addf %252, %256 : vector<256x1xf32>
    %c0_159 = arith.constant 0 : index
    %c0_160 = arith.constant 0 : index
    %c0_161 = arith.constant 0 : index
    %258 = vector.load %arg10[%c0_159, %c0_160, %c0_161] : memref<1x256x1xf32, #tpu.memory_space<vmem>>, vector<1x256x1xf32>
    %259 = vector.shape_cast %258 : vector<1x256x1xf32> to vector<256x1xf32>
    %260 = vector.shape_cast %257 : vector<256x1xf32> to vector<1x256x1xf32>
    tpu.vector_store %arg10[%c0_159, %c0_160, %c0_161], %260 {strides = array<i32>} : memref<1x256x1xf32, #tpu.memory_space<vmem>>, vector<1x256x1xf32>,
    return
  }
  func.func @transform_0(%arg0: i32) -> (i32, i32, i32) {
    %c0_i32 = arith.constant 0 : i32
    %c0_i32_0 = arith.constant 0 : i32
    %c0_i32_1 = arith.constant 0 : i32
    return %arg0, %c0_i32, %c0_i32_0 : i32, i32, i32
  }
  func.func @transform_1(%arg0: i32) -> (i32, i32, i32) {
    %c0_i32 = arith.constant 0 : i32
    %c0_i32_0 = arith.constant 0 : i32
    %c0_i32_1 = arith.constant 0 : i32
    %c0_i32_2 = arith.constant 0 : i32
    return %c0_i32, %c0_i32_0, %c0_i32_1 : i32, i32, i32
  }
  func.func @transform_2(%arg0: i32) -> (i32, i32) {
    %c0_i32 = arith.constant 0 : i32
    %c0_i32_0 = arith.constant 0 : i32
    %c0_i32_1 = arith.constant 0 : i32
    return %c0_i32, %c0_i32_0 : i32, i32
  }
  func.func @transform_3(%arg0: i32) -> (i32, i32, i32) {
    %c0_i32 = arith.constant 0 : i32
    %c0_i32_0 = arith.constant 0 : i32
    %c0_i32_1 = arith.constant 0 : i32
    %c0_i32_2 = arith.constant 0 : i32
    return %c0_i32, %c0_i32_0, %c0_i32_1 : i32, i32, i32
  }
  func.func @transform_4(%arg0: i32) -> (i32, i32) {
    %c0_i32 = arith.constant 0 : i32
    %c0_i32_0 = arith.constant 0 : i32
    %c0_i32_1 = arith.constant 0 : i32
    return %c0_i32, %c0_i32_0 : i32, i32
  }
  func.func @transform_5(%arg0: i32) -> (i32, i32, i32) {
    %c0_i32 = arith.constant 0 : i32
    %c0_i32_0 = arith.constant 0 : i32
    %c0_i32_1 = arith.constant 0 : i32
    %c0_i32_2 = arith.constant 0 : i32
    return %c0_i32, %c0_i32_0, %c0_i32_1 : i32, i32, i32
  }
  func.func @transform_6(%arg0: i32) -> (i32, i32) {
    %c0_i32 = arith.constant 0 : i32
    %c0_i32_0 = arith.constant 0 : i32
    %c0_i32_1 = arith.constant 0 : i32
    return %c0_i32, %c0_i32_0 : i32, i32
  }
  func.func @transform_7(%arg0: i32) -> (i32, i32, i32) {
    %c0_i32 = arith.constant 0 : i32
    %c0_i32_0 = arith.constant 0 : i32
    %c0_i32_1 = arith.constant 0 : i32
    %c0_i32_2 = arith.constant 0 : i32
    return %c0_i32, %c0_i32_0, %c0_i32_1 : i32, i32, i32
  }
  func.func @transform_8(%arg0: i32) -> (i32, i32) {
    %c0_i32 = arith.constant 0 : i32
    %c0_i32_0 = arith.constant 0 : i32
    %c0_i32_1 = arith.constant 0 : i32
    return %c0_i32, %c0_i32_0 : i32, i32
  }
  func.func @transform_9(%arg0: i32) -> (i32, i32, i32) {
    %c0_i32 = arith.constant 0 : i32
    %c0_i32_0 = arith.constant 0 : i32
    %c0_i32_1 = arith.constant 0 : i32
    return %arg0, %c0_i32, %c0_i32_0 : i32, i32, i32
  }
}

</mosaic_0001>

<bundles_post_ra>
// kernel: cnn_denoiser_forward.1
= control target key start
LH: loop header
LB: loop body
LE: loop exit
PB: predicated region body
PF: predicated region fallthrough
CT: control target
= control target key end

     0   :  { %s8848_s11 = smov 0   ;;  %s14974_s0 = inlined_call_operand.vmem [shape: f32[2,256,1], index: 0, kind: input, shape index: {}]   ;;  %s14975_s1 = inlined_call_operand.vmem [shape: f32[9,1,32], index: 1, kind: input, shape index: {}]   ;;  %s14976_s2 = inlined_call_operand.vmem [shape: f32[1,32], index: 2, kind: input, shape index: {}]   ;;  %s14977_s3 = inlined_call_operand.vmem [shape: f32[3,96,64], index: 3, kind: input, shape index: {}]   ;;  %s14978_s4 = inlined_call_operand.vmem [shape: f32[1,64], index: 4, kind: input, shape index: {}]   ;;  %s14979_s5 = inlined_call_operand.vmem [shape: f32[3,192,32], index: 5, kind: input, shape index: {}]   ;;  %s14980_s6 = inlined_call_operand.vmem [shape: f32[1,32], index: 6, kind: input, shape index: {}]   ;;  %s14981_s7 = inlined_call_operand.vmem [shape: f32[9,1,32], index: 7, kind: input, shape index: {}]   ;;  %s14982_s8 = inlined_call_operand.<no memory space> [shape: f32[1,1], index: 8, kind: input, shape index: {}]   ;;  %s14983_s9 = inlined_call_operand.vmem [shape: f32[2,256,1], index: 9, kind: output, shape index: {}]  }
   0x1   :  { %v14_v0 = vstv %s14982_s8 }
   0x2   :  { %15 = vst [vmem:[#allocation6] sm:$0x1] %v14_v0 }
   0x3 LB: > { %s8132_s12 = sadd.s32 4294967295, %s8789_s11   ;;  %p8136_p0 = scmp.ge.s32.totalorder %s8789_s11, 1  ;;  %s8789_s11 = sphi %s8848_s11, %s21_s11  }
   0x4   : > { %p289_p1 = scmp.lt.s32.totalorder %s8789_s11, 3 }
   0x6   : > { %p290_p2 = pnand %p8136_p0, %p289_p1 }
   0x8   : > { %293 = sbr.rel (%p290_p2) target bundleno = 2395 (0x95b), region = 56 }
   0xd   : > { %vm335_vm0 = vcmask 7168   ;;  %p325_p3 = scmp.lt.s32.totalorder %s8132_s12, 1  ;;  %v8791_v1 = vmov 0   ;;  %v14984_v2 = vmov 0.0   ;;  %vm342_vm10 = vcmask 261120   ;;  %s8793_s17 = smov 32  }
   0xe   : > { %8513 = vset.pattern.permute.xlu0 %v8791_v1  ;;  %336 = vst.msk [vmem:[#allocation2] sm:$0xff] %vm335_vm0, %v14984_v2  ;;  %8515 = vset.pattern.permute.xlu2 %v8791_v1  ;;  %s8794_s18 = smov 64  }
   0xf   : > { %337 = vst.msk [vmem:[#allocation2 + $0x8] sm:$0xff] %vm335_vm0, %v14984_v2  ;;  %8514 = vset.pattern.permute.xlu1 %v8791_v1  ;;  %s15877_s12 = smov (!%p325_p3, %s8132_s12), 1 }
  0x10   : > { %338 = vst.msk [vmem:[#allocation2 + $0x10] sm:$0xff] %vm335_vm0, %v14984_v2  ;;  %s8455_s8 = sshll.u32 %s15877_s12, 8 }
  0x11   : > { %339 = vst.msk [vmem:[#allocation2 + $0x118] sm:$0xff] %vm335_vm0, %v14984_v2  ;;  %s8874_s15 = scalar_lea.vmem %s14974_s0, %s8455_s8  ;;  %s14381_s30 = scalar_lea.vmem %s14983_s9, %s8455_s8 }
  0x12   : > { %340 = vst.msk [vmem:[#allocation2 + $0x120] sm:$0xff] %vm335_vm0, %v14984_v2  ;;  %v363_v3 = vld [vmem:[%s8874_s15 + $0x8] sm:$0xff]  ;;  %v364_v4 = vld [vmem:[%s8874_s15 + $0x10] sm:$0xff]  ;;  %v362_v5 = vld [vmem:[%s8874_s15] sm:$0xff] }
  0x13   : > { %341 = vst.msk [vmem:[#allocation2 + $0x128] sm:$0xff] %vm335_vm0, %v14984_v2  ;;  %v365_v6 = vld [vmem:[%s8874_s15 + $0x18] sm:$0xff]  ;;  %v366_v7 = vld [vmem:[%s8874_s15 + $0x20] sm:$0xff]  ;;  %v367_v9 = vld [vmem:[%s8874_s15 + $0x28] sm:$0xff] }
  0x14   : > { %395 = vst.msk [vmem:[#allocation2 + $0x20] sm:$0xff] %vm335_vm0, %v363_v3  ;;  %v368_v10 = vld [vmem:[%s8874_s15 + $0x30] sm:$0xff]  ;;  %v369_v11 = vld [vmem:[%s8874_s15 + $0x38] sm:$0xff]  ;;  %v370_v12 = vld [vmem:[%s8874_s15 + $0x40] sm:$0xff] }
  0x15   : > { %396 = vst.msk [vmem:[#allocation2 + $0x28] sm:$0xff] %vm335_vm0, %v364_v4  ;;  %v371_v13 = vld [vmem:[%s8874_s15 + $0x48] sm:$0xff]  ;;  %v372_v14 = vld [vmem:[%s8874_s15 + $0x50] sm:$0xff]  ;;  %v373_v16 = vld [vmem:[%s8874_s15 + $0x58] sm:$0xff] }
  0x16   : > { %v1035_v8 = vld [vmem:[#allocation2 + $0x7] sm:$0xff]  ;;  %394 = vst.msk [vmem:[#allocation2 + $0x18] sm:$0xff] %vm335_vm0, %v362_v5  ;;  %v376_v21 = vld [vmem:[%s8874_s15 + $0x70] sm:$0xff]  ;;  %v377_v22 = vld [vmem:[%s8874_s15 + $0x78] sm:$0xff] }
  0x17   : > { %1070 = vperm.xlu0 %8513, %v1035_v8   ;;  %397 = vst.msk [vmem:[#allocation2 + $0x30] sm:$0xff] %vm335_vm0, %v365_v6  ;;  %v1036_v15 = vld [vmem:[#allocation2 + $0xf] sm:$0xff]  ;;  %v374_v19 = vld [vmem:[%s8874_s15 + $0x60] sm:$0xff]  ;;  %v381_v29 = vld [vmem:[%s8874_s15 + $0x98] sm:$0xff] }
  0x18   : > { %398 = vst.msk [vmem:[#allocation2 + $0x38] sm:$0xff] %vm335_vm0, %v366_v7  ;;  %v375_v20 = vld [vmem:[%s8874_s15 + $0x68] sm:$0xff]  ;;  %v378_v23 = vld [vmem:[%s8874_s15 + $0x80] sm:$0xff]  ;;  %v380_v28 = vld [vmem:[%s8874_s15 + $0x90] sm:$0xff] }
  0x19   : > { %399 = vst.msk [vmem:[#allocation2 + $0x40] sm:$0xff] %vm335_vm0, %v367_v9  ;;  %v379_v27 = vld [vmem:[%s8874_s15 + $0x88] sm:$0xff]  ;;  %v382_v33 = vld [vmem:[%s8874_s15 + $0xa0] sm:$0xff]  ;;  %v384_v35 = vld [vmem:[%s8874_s15 + $0xb0] sm:$0xff] }
  0x1a   : > { %400 = vst.msk [vmem:[#allocation2 + $0x48] sm:$0xff] %vm335_vm0, %v368_v10  ;;  %v383_v34 = vld [vmem:[%s8874_s15 + $0xa8] sm:$0xff]  ;;  %v385_v39 = vld [vmem:[%s8874_s15 + $0xb8] sm:$0xff]  ;;  %v386_v40 = vld [vmem:[%s8874_s15 + $0xc0] sm:$0xff] }
  0x1b   : > { %401 = vst.msk [vmem:[#allocation2 + $0x50] sm:$0xff] %vm335_vm0, %v369_v11  ;;  %v387_v41 = vld [vmem:[%s8874_s15 + $0xc8] sm:$0xff]  ;;  %v388_v45 = vld [vmem:[%s8874_s15 + $0xd0] sm:$0xff]  ;;  %v389_v46 = vld [vmem:[%s8874_s15 + $0xd8] sm:$0xff] }
  0x1c   : > { %v8898_v17 = vld [vmem:[#allocation2 + $0x27] sm:$0xff]  ;;  %402 = vst.msk [vmem:[#allocation2 + $0x58] sm:$0xff] %vm335_vm0, %v370_v12  ;;  %v392_v9 = vld [vmem:[%s8874_s15 + $0xf0] sm:$0xff]  ;;  %v393_v11 = vld [vmem:[%s8874_s15 + $0xf8] sm:$0xff] }
  0x1d   : > { %1090 = vperm.xlu2 %8515, %v8898_v17   ;;  %v8902_v18 = vld [vmem:[#allocation2 + $0x17] sm:$0xff]  ;;  %403 = vst.msk [vmem:[#allocation2 + $0x60] sm:$0xff] %vm335_vm0, %v371_v13  ;;  %v8918_v25 = vld [vmem:[#allocation2 + $0x1f] sm:$0xff]  ;;  %v391_v51 = vld [vmem:[%s8874_s15 + $0xe8] sm:$0xff] }
  0x1e   : > { %1080 = vperm.xlu1 %8514, %v8902_v18   ;;  %404 = vst.msk [vmem:[#allocation2 + $0x68] sm:$0xff] %vm335_vm0, %v372_v14  ;;  %v8915_v24 = vld [vmem:[#allocation2 + $0x2f] sm:$0xff]  ;;  %v390_v47 = vld [vmem:[%s8874_s15 + $0xe0] sm:$0xff] }
  0x1f   : > { %1075 = vperm.xlu0 %8513, %v1036_v15   ;;  %405 = vst.msk [vmem:[#allocation2 + $0x70] sm:$0xff] %vm335_vm0, %v373_v16  ;;  %v8921_v26 = vld [vmem:[#allocation2 + $0x37] sm:$0xff]  ;;  %v9208_v2 = vld [vmem:[#allocation2 + $0x20] sm:$0xff] }
  0x20   : > { %406 = vst.msk [vmem:[#allocation2 + $0x78] sm:$0xff] %vm335_vm0, %v374_v19  ;;  %v8935_v31 = vld [vmem:[#allocation2 + $0x3f] sm:$0xff] }
  0x21   : > { %407 = vst.msk [vmem:[#allocation2 + $0x80] sm:$0xff] %vm335_vm0, %v375_v20  ;;  %v8933_v30 = vld [vmem:[#allocation2 + $0x47] sm:$0xff] }
  0x22   : > { %408 = vst.msk [vmem:[#allocation2 + $0x88] sm:$0xff] %vm335_vm0, %v376_v21  ;;  %v8937_v32 = vld [vmem:[#allocation2 + $0x4f] sm:$0xff] }
  0x23   : > { %409 = vst.msk [vmem:[#allocation2 + $0x90] sm:$0xff] %vm335_vm0, %v377_v22  ;;  %v8950_v37 = vld [vmem:[#allocation2 + $0x57] sm:$0xff] }
  0x24   : > { %410 = vst.msk [vmem:[#allocation2 + $0x98] sm:$0xff] %vm335_vm0, %v378_v23  ;;  %v8948_v36 = vld [vmem:[#allocation2 + $0x5f] sm:$0xff] }
  0x25   : > { %1095 = vperm.xlu2 %8515, %v8915_v24   ;;  %411 = vst.msk [vmem:[#allocation2 + $0xa0] sm:$0xff] %vm335_vm0, %v379_v27  ;;  %v8952_v38 = vld [vmem:[#allocation2 + $0x67] sm:$0xff] }
  0x26   : > { %1085 = vperm.xlu1 %8514, %v8918_v25   ;;  %412 = vst.msk [vmem:[#allocation2 + $0xa8] sm:$0xff] %vm335_vm0, %v380_v28  ;;  %v8965_v43 = vld [vmem:[#allocation2 + $0x6f] sm:$0xff] }
  0x27   : > { %1100 = vperm.xlu0 %8513, %v8921_v26   ;;  %413 = vst.msk [vmem:[#allocation2 + $0xb0] sm:$0xff] %vm335_vm0, %v381_v29  ;;  %v8963_v42 = vld [vmem:[#allocation2 + $0x77] sm:$0xff] }
  0x28   : > { %414 = vst.msk [vmem:[#allocation2 + $0xb8] sm:$0xff] %vm335_vm0, %v382_v33  ;;  %v8967_v44 = vld [vmem:[#allocation2 + $0x7f] sm:$0xff] }
  0x29   : > { %415 = vst.msk [vmem:[#allocation2 + $0xc0] sm:$0xff] %vm335_vm0, %v383_v34  ;;  %v8980_v49 = vld [vmem:[#allocation2 + $0x87] sm:$0xff] }
  0x2a   : > { %416 = vst.msk [vmem:[#allocation2 + $0xc8] sm:$0xff] %vm335_vm0, %v384_v35  ;;  %v8978_v48 = vld [vmem:[#allocation2 + $0x8f] sm:$0xff] }
  0x2b   : > { %417 = vst.msk [vmem:[#allocation2 + $0xd0] sm:$0xff] %vm335_vm0, %v385_v39  ;;  %v8982_v50 = vld [vmem:[#allocation2 + $0x97] sm:$0xff] }
  0x2c   : > { %418 = vst.msk [vmem:[#allocation2 + $0xd8] sm:$0xff] %vm335_vm0, %v386_v40  ;;  %v8991_v53 = vld [vmem:[#allocation2 + $0x9f] sm:$0xff] }
  0x2d   : > { %1110 = vperm.xlu2 %8515, %v8933_v30   ;;  %419 = vst.msk [vmem:[#allocation2 + $0xe0] sm:$0xff] %vm335_vm0, %v387_v41  ;;  %v8989_v52 = vld [vmem:[#allocation2 + $0xa7] sm:$0xff] }
  0x2e   : > { %1105 = vperm.xlu1 %8514, %v8935_v31   ;;  %420 = vst.msk [vmem:[#allocation2 + $0xe8] sm:$0xff] %vm335_vm0, %v388_v45  ;;  %v8993_v54 = vld [vmem:[#allocation2 + $0xaf] sm:$0xff] }
  0x2f   : > { %1115 = vperm.xlu0 %8513, %v8937_v32   ;;  %421 = vst.msk [vmem:[#allocation2 + $0xf0] sm:$0xff] %vm335_vm0, %v389_v46  ;;  %v9000_v56 = vld [vmem:[#allocation2 + $0xb7] sm:$0xff] }
  0x30   : > { %422 = vst.msk [vmem:[#allocation2 + $0xf8] sm:$0xff] %vm335_vm0, %v390_v47  ;;  %v8998_v55 = vld [vmem:[#allocation2 + $0xbf] sm:$0xff] }
  0x31   : > { %423 = vst.msk [vmem:[#allocation2 + $0x100] sm:$0xff] %vm335_vm0, %v391_v51  ;;  %v9002_v57 = vld [vmem:[#allocation2 + $0xc7] sm:$0xff] }
  0x32   : > { %v9009_v59 = vld [vmem:[#allocation2 + $0xcf] sm:$0xff]  ;;  %424 = vst.msk [vmem:[#allocation2 + $0x108] sm:$0xff] %vm335_vm0, %v392_v9 }
  0x33   : > { %v9007_v58 = vld [vmem:[#allocation2 + $0xd7] sm:$0xff]  ;;  %425 = vst.msk [vmem:[#allocation2 + $0x110] sm:$0xff] %vm335_vm0, %v393_v11  ;;  %v1817_v9 = vld [vmem:[#allocation2 + $0x8] sm:$0xff] }
  0x34   : > { %v9011_v60 = vld [vmem:[#allocation2 + $0xdf] sm:$0xff] }
  0x35   : > { %1125 = vperm.xlu2 %8515, %v8948_v36   ;;  %v9018_v62 = vld [vmem:[#allocation2 + $0xe7] sm:$0xff] }
  0x36   : > { %1120 = vperm.xlu1 %8514, %v8950_v37   ;;  %v9016_v61 = vld [vmem:[#allocation2 + $0xef] sm:$0xff] }
  0x37   : > { %1130 = vperm.xlu0 %8513, %v8952_v38   ;;  %v9020_v63 = vld [vmem:[#allocation2 + $0xf7] sm:$0xff] }
  0x38   : > { %v9025_v0 = vld [vmem:[#allocation2 + $0xff] sm:$0xff] }
  0x39   : > { %v1293_v29 = vld [vmem:[#allocation2 + $0x107] sm:$0xff] }
  0x3a   : > { %v1294_v33 = vld [vmem:[#allocation2 + $0x10f] sm:$0xff] }
  0x3d   : > { %1140 = vperm.xlu2 %8515, %v8963_v42  }
  0x3e   : > { %1135 = vperm.xlu1 %8514, %v8965_v43  }
  0x3f   : > { %1145 = vperm.xlu0 %8513, %v8967_v44  }
  0x45   : > { %1155 = vperm.xlu2 %8515, %v8978_v48  }
  0x46   : > { %1150 = vperm.xlu1 %8514, %v8980_v49  }
  0x47   : > { %1160 = vperm.xlu0 %8513, %v8982_v50  }
  0x4d   : > { %1170 = vperm.xlu2 %8515, %v8989_v52  }
  0x4e   : > { %1165 = vperm.xlu1 %8514, %v8991_v53  }
  0x4f   : > { %1175 = vperm.xlu0 %8513, %v8993_v54  }
  0x55   : > { %1185 = vperm.xlu2 %8515, %v8998_v55  }
  0x56   : > { %1180 = vperm.xlu1 %8514, %v9000_v56  }
  0x57   : > { %1190 = vperm.xlu0 %8513, %v9002_v57  }
  0x5d   : > { %1200 = vperm.xlu2 %8515, %v9007_v58  }
  0x5e   : > { %1195 = vperm.xlu1 %8514, %v9009_v59  }
  0x5f   : > { %1205 = vperm.xlu0 %8513, %v9011_v60  }
  0x65   : > { %1215 = vperm.xlu2 %8515, %v9016_v61  }
  0x66   : > { %1210 = vperm.xlu1 %8514, %v9018_v62  }
  0x67   : > { %1220 = vperm.xlu0 %8513, %v9020_v63  }
  0x6d   : > { %1299 = vperm.xlu2 %8515, %v8902_v18  }
  0x6e   : > { %1225 = vperm.xlu1 %8514, %v9025_v0  }
  0x6f   : > { %1304 = vperm.xlu0 %8513, %v8918_v25  }
  0x75   : > { %1314 = vperm.xlu2 %8515, %v8915_v24  }
  0x76   : > { %1309 = vperm.xlu1 %8514, %v8898_v17  }
  0x77   : > { %v9032_v1 = vpop.permute.xlu2 %1090  ;;  %1319 = vperm.xlu0 %8513, %v8921_v26  }
  0x7d   : > { %1329 = vperm.xlu2 %8515, %v8933_v30  }
  0x7e   : > { %1324 = vperm.xlu1 %8514, %v8935_v31  }
  0x7f   : > { %v9037_v3 = vpop.permute.xlu2 %1095  ;;  %1334 = vperm.xlu0 %8513, %v8937_v32  }
  0x85   : > { %1344 = vperm.xlu2 %8515, %v8948_v36  }
  0x86   : > { %1339 = vperm.xlu1 %8514, %v8950_v37  }
  0x87   : > { %v9042_v4 = vpop.permute.xlu2 %1110  ;;  %1349 = vperm.xlu0 %8513, %v8952_v38  }
  0x89   : > { %v9045_v5 = vpop.permute.xlu0 %1070 }
  0x8d   : > { %1359 = vperm.xlu2 %8515, %v8963_v42  }
  0x8e   : > { %1354 = vperm.xlu1 %8514, %v8965_v43  }
  0x8f   : > { %v9049_v6 = vpop.permute.xlu2 %1125  ;;  %1364 = vperm.xlu0 %8513, %v8967_v44  }
  0x90   : > { %v9052_v7 = vpop.permute.xlu1 %1080 }
  0x91   : > { %v9054_v8 = vpop.permute.xlu0 %1075 }
  0x95   : > { %1374 = vperm.xlu2 %8515, %v8978_v48  }
  0x96   : > { %1369 = vperm.xlu1 %8514, %v8980_v49  }
  0x97   : > { %v9060_v10 = vpop.permute.xlu2 %1140  ;;  %1379 = vperm.xlu0 %8513, %v8982_v50  }
  0x98   : > { %v9064_v12 = vpop.permute.xlu1 %1085 }
  0x99   : > { %v9067_v13 = vpop.permute.xlu0 %1100 }
  0x9d   : > { %1389 = vperm.xlu2 %8515, %v8989_v52  }
  0x9e   : > { %1384 = vperm.xlu1 %8514, %v8991_v53  }
  0x9f   : > { %v9071_v14 = vpop.permute.xlu2 %1155  ;;  %1394 = vperm.xlu0 %8513, %v8993_v54  }
  0xa0   : > { %v9074_v15 = vpop.permute.xlu1 %1105 }
  0xa1   : > { %v9076_v16 = vpop.permute.xlu0 %1115 }
  0xa5   : > { %1404 = vperm.xlu2 %8515, %v8998_v55  }
  0xa6   : > { %1399 = vperm.xlu1 %8514, %v9000_v56  }
  0xa7   : > { %v9080_v18 = vpop.permute.xlu2 %1170  ;;  %1409 = vperm.xlu0 %8513, %v9002_v57  }
  0xa8   : > { %v9083_v19 = vpop.permute.xlu1 %1120 }
  0xa9   : > { %v9085_v20 = vpop.permute.xlu0 %1130 }
  0xad   : > { %1419 = vperm.xlu2 %8515, %v9007_v58  }
  0xae   : > { %1414 = vperm.xlu1 %8514, %v9009_v59  }
  0xaf   : > { %v9089_v21 = vpop.permute.xlu2 %1185  ;;  %1424 = vperm.xlu0 %8513, %v9011_v60  }
  0xb0   : > { %v9092_v22 = vpop.permute.xlu1 %1135 }
  0xb1   : > { %v9094_v23 = vpop.permute.xlu0 %1145 }
  0xb5   : > { %1434 = vperm.xlu2 %8515, %v9016_v61  }
  0xb6   : > { %1429 = vperm.xlu1 %8514, %v9018_v62  }
  0xb7   : > { %v9098_v25 = vpop.permute.xlu2 %1200  ;;  %1439 = vperm.xlu0 %8513, %v9020_v63  }
  0xb8   : > { %v9101_v27 = vpop.permute.xlu1 %1150 }
  0xb9   : > { %v9103_v28 = vpop.permute.xlu0 %1160 }
  0xbd   : > { %1449 = vperm.xlu2 %8515, %v1293_v29  }
  0xbe   : > { %1444 = vperm.xlu1 %8514, %v9025_v0  }
  0xbf   : > { %v9106_v34 = vpop.permute.xlu2 %1215  ;;  %1454 = vperm.xlu0 %8513, %v1294_v33  }
  0xc0   : > { %15068 = vst [vmem:[#allocation7_spill] sm:$0xff] %v9106_v34  ;;  %v9108_v35 = vpop.permute.xlu1 %1165 }
  0xc1   : > { %v9110_v39 = vpop.permute.xlu0 %1175 }
  0xc5   : > { %1565 = vperm.xlu2 %8515, %v8915_v24  }
  0xc6   : > { %1560 = vperm.xlu1 %8514, %v8898_v17  }
  0xc7   : > { %1570 = vperm.xlu0 %8513, %v8921_v26   ;;  %v9115_v40 = vpop.permute.xlu2 %1299 }
  0xc8   : > { %v9117_v41 = vpop.permute.xlu1 %1180 }
  0xc9   : > { %v9119_v45 = vpop.permute.xlu0 %1190 }
  0xca   : > { %15069 = vst [vmem:[#allocation8_spill] sm:$0xff] %v9119_v45 }
  0xcd   : > { %1580 = vperm.xlu2 %8515, %v8933_v30  }
  0xce   : > { %1575 = vperm.xlu1 %8514, %v8935_v31  }
  0xcf   : > { %1585 = vperm.xlu0 %8513, %v8937_v32   ;;  %v9124_v46 = vpop.permute.xlu2 %1314 }
  0xd0   : > { %v9126_v47 = vpop.permute.xlu1 %1195 }
  0xd1   : > { %15070 = vst [vmem:[#allocation9_spill] sm:$0xff] %v9126_v47  ;;  %v9128_v24 = vpop.permute.xlu0 %1205 }
  0xd2   : > { %15071 = vst [vmem:[#allocation10_spill] sm:$0xff] %v9128_v24  ;;  %v9233_v24 = vld [vmem:[#allocation2 + $0x48] sm:$0xff] }
  0xd5   : > { %1595 = vperm.xlu2 %8515, %v8948_v36  }
  0xd6   : > { %1590 = vperm.xlu1 %8514, %v8950_v37  }
  0xd7   : > { %1600 = vperm.xlu0 %8513, %v8952_v38   ;;  %v9133_v17 = vpop.permute.xlu2 %1329 }
  0xd8   : > { %v9135_v26 = vpop.permute.xlu1 %1210 }
  0xd9   : > { %15072 = vst [vmem:[#allocation11_spill] sm:$0xff] %v9135_v26  ;;  %v9137_v30 = vpop.permute.xlu0 %1220 }
  0xda   : > { %15073 = vst [vmem:[#allocation12_spill] sm:$0xff] %v9137_v30  ;;  %v9220_v30 = vld [vmem:[#allocation2 + $0x28] sm:$0xff] }
  0xdd   : > { %1610 = vperm.xlu2 %8515, %v8963_v42  }
  0xde   : > { %1605 = vperm.xlu1 %8514, %v8965_v43  }
  0xdf   : > { %1615 = vperm.xlu0 %8513, %v8967_v44   ;;  %v9142_v31 = vpop.permute.xlu2 %1344 }
  0xe0   : > { %15074 = vst [vmem:[#allocation13_spill] sm:$0xff] %v9142_v31  ;;  %v9144_v32 = vpop.permute.xlu1 %1225 }
  0xe1   : > { %15075 = vst [vmem:[#allocation14_spill] sm:$0xff] %v9144_v32  ;;  %v9146_v36 = vpop.permute.xlu0 %1304 }
  0xe2   : > { %15076 = vst [vmem:[#allocation15_spill] sm:$0xff] %v9146_v36 }
  0xe5   : > { %1625 = vperm.xlu2 %8515, %v8978_v48  }
  0xe6   : > { %1620 = vperm.xlu1 %8514, %v8980_v49  }
  0xe7   : > { %1630 = vperm.xlu0 %8513, %v8982_v50   ;;  %v9151_v37 = vpop.permute.xlu2 %1359 }
  0xe8   : > { %15077 = vst [vmem:[#allocation16_spill] sm:$0xff] %v9151_v37  ;;  %v9153_v38 = vpop.permute.xlu1 %1309  ;;  %v9342_v37 = vld [vmem:[#allocation2 + $0xf8] sm:$0xff] }
  0xe9   : > { %15078 = vst [vmem:[#allocation17_spill] sm:$0xff] %v9153_v38  ;;  %v9155_v42 = vpop.permute.xlu0 %1319 }
  0xea   : > { %15079 = vst [vmem:[#allocation18_spill] sm:$0xff] %v9155_v42 }
  0xed   : > { %1640 = vperm.xlu2 %8515, %v8989_v52  }
  0xee   : > { %1635 = vperm.xlu1 %8514, %v8991_v53  }
  0xef   : > { %1645 = vperm.xlu0 %8513, %v8993_v54   ;;  %v9160_v43 = vpop.permute.xlu2 %1374 }
  0xf0   : > { %15080 = vst [vmem:[#allocation19_spill] sm:$0xff] %v9160_v43  ;;  %v9162_v44 = vpop.permute.xlu1 %1324  ;;  %v9327_v43 = vld [vmem:[#allocation2 + $0xe0] sm:$0xff] }
  0xf1   : > { %15081 = vst [vmem:[#allocation20_spill] sm:$0xff] %v9162_v44  ;;  %v9164_v48 = vpop.permute.xlu0 %1334 }
  0xf2   : > { %15082 = vst [vmem:[#allocation21_spill] sm:$0xff] %v9164_v48 }
  0xf5   : > { %1655 = vperm.xlu2 %8515, %v8998_v55  }
  0xf6   : > { %1650 = vperm.xlu1 %8514, %v9000_v56  }
  0xf7   : > { %1660 = vperm.xlu0 %8513, %v9002_v57   ;;  %v9169_v49 = vpop.permute.xlu2 %1389 }
  0xf8   : > { %15083 = vst [vmem:[#allocation22_spill] sm:$0xff] %v9169_v49  ;;  %v9171_v50 = vpop.permute.xlu1 %1339  ;;  %v9312_v49 = vld [vmem:[#allocation2 + $0xc8] sm:$0xff] }
  0xf9   : > { %15084 = vst [vmem:[#allocation23_spill] sm:$0xff] %v9171_v50  ;;  %v9173_v51 = vpop.permute.xlu0 %1349 }
  0xfa   : > { %15085 = vst [vmem:[#allocation24_spill] sm:$0xff] %v9173_v51 }
  0xfd   : > { %1670 = vperm.xlu2 %8515, %v9007_v58  }
  0xfe   : > { %1665 = vperm.xlu1 %8514, %v9009_v59  }
  0xff   : > { %1675 = vperm.xlu0 %8513, %v9011_v60   ;;  %v9178_v52 = vpop.permute.xlu2 %1404 }
 0x100   : > { %15086 = vst [vmem:[#allocation25_spill] sm:$0xff] %v9178_v52  ;;  %v9180_v53 = vpop.permute.xlu1 %1354  ;;  %v9297_v52 = vld [vmem:[#allocation2 + $0xb0] sm:$0xff] }
 0x101   : > { %15087 = vst [vmem:[#allocation26_spill] sm:$0xff] %v9180_v53  ;;  %v9182_v54 = vpop.permute.xlu0 %1364 }
 0x102   : > { %15088 = vst [vmem:[#allocation27_spill] sm:$0xff] %v9182_v54 }
 0x105   : > { %1685 = vperm.xlu2 %8515, %v9016_v61   ;;  %v1555_v61 = vld [vmem:[#allocation2 + $0x11f] sm:$0xff] }
 0x106   : > { %1680 = vperm.xlu1 %8514, %v9018_v62   ;;  %v1554_v62 = vld [vmem:[#allocation2 + $0x117] sm:$0xff] }
 0x107   : > { %1690 = vperm.xlu0 %8513, %v9020_v63   ;;  %v9187_v55 = vpop.permute.xlu2 %1419 }
 0x108   : > { %15089 = vst [vmem:[#allocation28_spill] sm:$0xff] %v9187_v55  ;;  %v9189_v56 = vpop.permute.xlu1 %1369  ;;  %v9282_v55 = vld [vmem:[#allocation2 + $0x98] sm:$0xff] }
 0x109   : > { %15090 = vst [vmem:[#allocation29_spill] sm:$0xff] %v9189_v56  ;;  %v9191_v57 = vpop.permute.xlu0 %1379 }
 0x10a   : > { %15091 = vst [vmem:[#allocation30_spill] sm:$0xff] %v9191_v57 }
 0x10d   : > { %1700 = vperm.xlu2 %8515, %v1293_v29  }
 0x10e   : > { %1695 = vperm.xlu1 %8514, %v9025_v0   ;;  %v9206_v0 = vld [vmem:[#allocation2 + $0x18] sm:$0xff] }
 0x10f   : > { %1705 = vperm.xlu0 %8513, %v1294_v33   ;;  %v9194_v58 = vpop.permute.xlu2 %1434  ;;  %v1818_v33 = vld [vmem:[#allocation2 + $0x10] sm:$0xff] }
 0x110   : > { %15092 = vst [vmem:[#allocation31_spill] sm:$0xff] %v9194_v58  ;;  %v9196_v59 = vpop.permute.xlu1 %1384  ;;  %v9235_v58 = vld [vmem:[#allocation2 + $0x40] sm:$0xff] }
 0x111   : > { %15093 = vst [vmem:[#allocation32_spill] sm:$0xff] %v9196_v59  ;;  %v9198_v60 = vpop.permute.xlu0 %1394  ;;  %v9267_v59 = vld [vmem:[#allocation2 + $0x80] sm:$0xff] }
 0x112   : > { %15094 = vst [vmem:[#allocation33_spill] sm:$0xff] %v9198_v60 }
 0x115   : > { %1715 = vperm.xlu2 %8515, %v1555_v61  }
 0x116   : > { %1710 = vperm.xlu1 %8514, %v1554_v62  }
 0x117   : > { %1853 = vperm.xlu0 %8513, %v1817_v9   ;;  %v9200_v63 = vpop.permute.xlu2 %1449  ;;  %v9218_v9 = vld [vmem:[#allocation2 + $0x30] sm:$0xff] }
 0x118   : > { %15095 = vst [vmem:[#allocation34_spill] sm:$0xff] %v9200_v63  ;;  %v9202_v11 = vpop.permute.xlu1 %1399  ;;  %v9222_v63 = vld [vmem:[#allocation2 + $0x38] sm:$0xff] }
 0x119   : > { %15096 = vst [vmem:[#allocation35_spill] sm:$0xff] %v9202_v11  ;;  %v9204_v29 = vpop.permute.xlu0 %1409 }
 0x11a   : > { %15097 = vst [vmem:[#allocation36_spill] sm:$0xff] %v9204_v29  ;;  %v9252_v29 = vld [vmem:[#allocation2 + $0x68] sm:$0xff] }
 0x11d   : > { %1863 = vperm.xlu2 %8515, %v9206_v0  }
 0x11e   : > { %1858 = vperm.xlu1 %8514, %v1818_v33  }
 0x11f   : > { %1868 = vperm.xlu0 %8513, %v9208_v2   ;;  %v9212_v32 = vpop.permute.xlu2 %1565 }
 0x120   : > { %15098 = vst [vmem:[#allocation37_spill] sm:$0xff] %v9212_v32  ;;  %v9214_v61 = vpop.permute.xlu1 %1414 }
 0x121   : > { %15099 = vst [vmem:[#allocation38_spill] sm:$0xff] %v9214_v61  ;;  %v9216_v62 = vpop.permute.xlu0 %1424 }
 0x122   : > { %15100 = vst [vmem:[#allocation39_spill] sm:$0xff] %v9216_v62  ;;  %v9237_v62 = vld [vmem:[#allocation2 + $0x50] sm:$0xff] }
 0x125   : > { %1878 = vperm.xlu2 %8515, %v9218_v9  }
 0x126   : > { %1873 = vperm.xlu1 %8514, %v9220_v30  }
 0x127   : > { %1883 = vperm.xlu0 %8513, %v9222_v63   ;;  %v9227_v33 = vpop.permute.xlu2 %1580 }
 0x128   : > { %15101 = vst [vmem:[#allocation40_spill] sm:$0xff] %v9227_v33  ;;  %v9229_v26 = vpop.permute.xlu1 %1429 }
 0x129   : > { %15102 = vst [vmem:[#allocation41_spill] sm:$0xff] %v9229_v26  ;;  %v9231_v34 = vpop.permute.xlu0 %1439  ;;  %v9248_v26 = vld [vmem:[#allocation2 + $0x60] sm:$0xff] }
 0x12a   : > { %15103 = vst [vmem:[#allocation42_spill] sm:$0xff] %v9231_v34  ;;  %v9250_v34 = vld [vmem:[#allocation2 + $0x58] sm:$0xff] }
 0x12d   : > { %1893 = vperm.xlu2 %8515, %v9233_v24  }
 0x12e   : > { %1888 = vperm.xlu1 %8514, %v9235_v58  }
 0x12f   : > { %1898 = vperm.xlu0 %8513, %v9237_v62   ;;  %v9242_v61 = vpop.permute.xlu2 %1595 }
 0x130   : > { %15104 = vst [vmem:[#allocation43_spill] sm:$0xff] %v9242_v61  ;;  %v9244_v32 = vpop.permute.xlu1 %1444 }
 0x131   : > { %15105 = vst [vmem:[#allocation44_spill] sm:$0xff] %v9244_v32  ;;  %v9246_v33 = vpop.permute.xlu0 %1454  ;;  %v9263_v32 = vld [vmem:[#allocation2 + $0x78] sm:$0xff] }
 0x132   : > { %15106 = vst [vmem:[#allocation45_spill] sm:$0xff] %v9246_v33  ;;  %v9265_v33 = vld [vmem:[#allocation2 + $0x70] sm:$0xff] }
 0x135   : > { %1908 = vperm.xlu2 %8515, %v9248_v26  }
 0x136   : > { %1903 = vperm.xlu1 %8514, %v9250_v34  }
 0x137   : > { %1913 = vperm.xlu0 %8513, %v9252_v29   ;;  %v9257_v11 = vpop.permute.xlu2 %1610 }
 0x138   : > { %15107 = vst [vmem:[#allocation46_spill] sm:$0xff] %v9257_v11  ;;  %v9259_v60 = vpop.permute.xlu1 %1560 }
 0x139   : > { %15108 = vst [vmem:[#allocation47_spill] sm:$0xff] %v9259_v60  ;;  %v9261_v61 = vpop.permute.xlu0 %1570  ;;  %v9278_v60 = vld [vmem:[#allocation2 + $0x90] sm:$0xff] }
 0x13a   : > { %15109 = vst [vmem:[#allocation48_spill] sm:$0xff] %v9261_v61  ;;  %v9280_v61 = vld [vmem:[#allocation2 + $0x88] sm:$0xff] }
 0x13d   : > { %1923 = vperm.xlu2 %8515, %v9263_v32  }
 0x13e   : > { %1918 = vperm.xlu1 %8514, %v9265_v33  }
 0x13f   : > { %1928 = vperm.xlu0 %8513, %v9267_v59   ;;  %v9272_v57 = vpop.permute.xlu2 %1625 }
 0x140   : > { %15110 = vst [vmem:[#allocation49_spill] sm:$0xff] %v9272_v57  ;;  %v9274_v56 = vpop.permute.xlu1 %1575 }
 0x141   : > { %15111 = vst [vmem:[#allocation50_spill] sm:$0xff] %v9274_v56  ;;  %v9276_v11 = vpop.permute.xlu0 %1585  ;;  %v9293_v56 = vld [vmem:[#allocation2 + $0xa8] sm:$0xff] }
 0x142   : > { %15112 = vst [vmem:[#allocation51_spill] sm:$0xff] %v9276_v11  ;;  %v9295_v11 = vld [vmem:[#allocation2 + $0xa0] sm:$0xff] }
 0x145   : > { %1938 = vperm.xlu2 %8515, %v9278_v60  }
 0x146   : > { %1933 = vperm.xlu1 %8514, %v9280_v61  }
 0x147   : > { %1943 = vperm.xlu0 %8513, %v9282_v55   ;;  %v9287_v54 = vpop.permute.xlu2 %1640 }
 0x148   : > { %15113 = vst [vmem:[#allocation52_spill] sm:$0xff] %v9287_v54  ;;  %v9289_v53 = vpop.permute.xlu1 %1590 }
 0x149   : > { %15114 = vst [vmem:[#allocation53_spill] sm:$0xff] %v9289_v53  ;;  %v9291_v57 = vpop.permute.xlu0 %1600  ;;  %v9308_v53 = vld [vmem:[#allocation2 + $0xc0] sm:$0xff] }
 0x14a   : > { %15115 = vst [vmem:[#allocation54_spill] sm:$0xff] %v9291_v57  ;;  %v9310_v57 = vld [vmem:[#allocation2 + $0xb8] sm:$0xff] }
 0x14d   : > { %1953 = vperm.xlu2 %8515, %v9293_v56  }
 0x14e   : > { %1948 = vperm.xlu1 %8514, %v9295_v11  }
 0x14f   : > { %1958 = vperm.xlu0 %8513, %v9297_v52   ;;  %v9302_v51 = vpop.permute.xlu2 %1655 }
 0x150   : > { %15116 = vst [vmem:[#allocation55_spill] sm:$0xff] %v9302_v51  ;;  %v9304_v50 = vpop.permute.xlu1 %1605 }
 0x151   : > { %15117 = vst [vmem:[#allocation56_spill] sm:$0xff] %v9304_v50  ;;  %v9306_v54 = vpop.permute.xlu0 %1615  ;;  %v9323_v50 = vld [vmem:[#allocation2 + $0xd8] sm:$0xff] }
 0x152   : > { %15118 = vst [vmem:[#allocation57_spill] sm:$0xff] %v9306_v54  ;;  %v9325_v54 = vld [vmem:[#allocation2 + $0xd0] sm:$0xff] }
 0x155   : > { %1968 = vperm.xlu2 %8515, %v9308_v53  }
 0x156   : > { %1963 = vperm.xlu1 %8514, %v9310_v57  }
 0x157   : > { %1973 = vperm.xlu0 %8513, %v9312_v49   ;;  %v9317_v48 = vpop.permute.xlu2 %1670 }
 0x158   : > { %15119 = vst [vmem:[#allocation58_spill] sm:$0xff] %v9317_v48  ;;  %v9319_v44 = vpop.permute.xlu1 %1620 }
 0x159   : > { %15120 = vst [vmem:[#allocation59_spill] sm:$0xff] %v9319_v44  ;;  %v9321_v51 = vpop.permute.xlu0 %1630  ;;  %v9338_v44 = vld [vmem:[#allocation2 + $0xf0] sm:$0xff] }
 0x15a   : > { %15121 = vst [vmem:[#allocation60_spill] sm:$0xff] %v9321_v51  ;;  %v9340_v51 = vld [vmem:[#allocation2 + $0xe8] sm:$0xff] }
 0x15d   : > { %1983 = vperm.xlu2 %8515, %v9323_v50  }
 0x15e   : > { %1978 = vperm.xlu1 %8514, %v9325_v54  }
 0x15f   : > { %1988 = vperm.xlu0 %8513, %v9327_v43   ;;  %v9332_v42 = vpop.permute.xlu2 %1685 }
 0x160   : > { %15122 = vst [vmem:[#allocation61_spill] sm:$0xff] %v9332_v42  ;;  %v9334_v38 = vpop.permute.xlu1 %1635 }
 0x161   : > { %15123 = vst [vmem:[#allocation62_spill] sm:$0xff] %v9334_v38  ;;  %v9336_v48 = vpop.permute.xlu0 %1645  ;;  %v9353_v38 = vld [vmem:[#allocation2 + $0x100] sm:$0xff] }
 0x162   : > { %15124 = vst [vmem:[#allocation63_spill] sm:$0xff] %v9336_v48 }
 0x165   : > { %1998 = vperm.xlu2 %8515, %v9338_v44  }
 0x166   : > { %1993 = vperm.xlu1 %8514, %v9340_v51  }
 0x167   : > { %2003 = vperm.xlu0 %8513, %v9342_v37   ;;  %v9347_v47 = vpop.permute.xlu2 %1700 }
 0x168   : > { %15125 = vst [vmem:[#allocation64_spill] sm:$0xff] %v9347_v47  ;;  %v9349_v45 = vpop.permute.xlu1 %1650 }
 0x169   : > { %15126 = vst [vmem:[#allocation65_spill] sm:$0xff] %v9349_v45  ;;  %v9351_v42 = vpop.permute.xlu0 %1660  ;;  %v2077_v45 = vld [vmem:[#allocation2 + $0x110] sm:$0xff] }
 0x16a   : > { %15127 = vst [vmem:[#allocation66_spill] sm:$0xff] %v9351_v42 }
 0x16d   : > { %2082 = vperm.xlu2 %8515, %v9206_v0  }
 0x16e   : > { %2008 = vperm.xlu1 %8514, %v9353_v38  }
 0x16f   : > { %2087 = vperm.xlu0 %8513, %v9208_v2   ;;  %v9358_v48 = vpop.permute.xlu2 %1715 }
 0x170   : > { %15128 = vst [vmem:[#allocation67_spill] sm:$0xff] %v9358_v48  ;;  %v9360_v36 = vpop.permute.xlu1 %1665 }
 0x171   : > { %15129 = vst [vmem:[#allocation68_spill] sm:$0xff] %v9360_v36  ;;  %v9362_v31 = vpop.permute.xlu0 %1675  ;;  %v2076_v36 = vld [vmem:[#allocation2 + $0x108] sm:$0xff] }
 0x172   : > { %15130 = vst [vmem:[#allocation69_spill] sm:$0xff] %v9362_v31 }
 0x175   : > { %2097 = vperm.xlu2 %8515, %v9218_v9  }
 0x176   : > { %2092 = vperm.xlu1 %8514, %v9220_v30  }
 0x177   : > { %2102 = vperm.xlu0 %8513, %v9222_v63   ;;  %v9367_v47 = vpop.permute.xlu2 %1863 }
 0x178   : > { %15131 = vst [vmem:[#allocation70_spill] sm:$0xff] %v9367_v47  ;;  %v9369_v42 = vpop.permute.xlu1 %1680 }
 0x179   : > { %15132 = vst [vmem:[#allocation71_spill] sm:$0xff] %v9369_v42  ;;  %v9371_v0 = vpop.permute.xlu0 %1690 }
 0x17a   : > { %15133 = vst [vmem:[#allocation72_spill] sm:$0xff] %v9371_v0 }
 0x17d   : > { %2112 = vperm.xlu2 %8515, %v9233_v24  }
 0x17e   : > { %2107 = vperm.xlu1 %8514, %v9235_v58  }
 0x17f   : > { %2117 = vperm.xlu0 %8513, %v9237_v62   ;;  %v9376_v2 = vpop.permute.xlu2 %1878 }
 0x180   : > { %15134 = vst [vmem:[#allocation73_spill] sm:$0xff] %v9376_v2  ;;  %v9378_v48 = vpop.permute.xlu1 %1695 }
 0x181   : > { %15135 = vst [vmem:[#allocation74_spill] sm:$0xff] %v9378_v48  ;;  %v9380_v31 = vpop.permute.xlu0 %1705 }
 0x182   : > { %15136 = vst [vmem:[#allocation75_spill] sm:$0xff] %v9380_v31 }
 0x185   : > { %2127 = vperm.xlu2 %8515, %v9248_v26  }
 0x186   : > { %2122 = vperm.xlu1 %8514, %v9250_v34  }
 0x187   : > { %2132 = vperm.xlu0 %8513, %v9252_v29   ;;  %v9385_v47 = vpop.permute.xlu2 %1893 }
 0x188   : > { %15137 = vst [vmem:[#allocation76_spill] sm:$0xff] %v9385_v47  ;;  %v9387_v0 = vpop.permute.xlu1 %1710 }
 0x189   : > { %15138 = vst [vmem:[#allocation77_spill] sm:$0xff] %v9387_v0  ;;  %v9389_v42 = vpop.permute.xlu0 %1853 }
 0x18a   : > { %15139 = vst [vmem:[#allocation78_spill] sm:$0xff] %v9389_v42 }
 0x18d   : > { %2142 = vperm.xlu2 %8515, %v9263_v32  }
 0x18e   : > { %2137 = vperm.xlu1 %8514, %v9265_v33  }
 0x18f   : > { %2147 = vperm.xlu0 %8513, %v9267_v59   ;;  %v9394_v48 = vpop.permute.xlu2 %1908 }
 0x190   : > { %15140 = vst [vmem:[#allocation79_spill] sm:$0xff] %v9394_v48  ;;  %v9396_v31 = vpop.permute.xlu1 %1858 }
 0x191   : > { %15141 = vst [vmem:[#allocation80_spill] sm:$0xff] %v9396_v31  ;;  %v9398_v2 = vpop.permute.xlu0 %1868 }
 0x192   : > { %15142 = vst [vmem:[#allocation81_spill] sm:$0xff] %v9398_v2 }
 0x195   : > { %2157 = vperm.xlu2 %8515, %v9278_v60  }
 0x196   : > { %2152 = vperm.xlu1 %8514, %v9280_v61  }
 0x197   : > { %2162 = vperm.xlu0 %8513, %v9282_v55   ;;  %v9403_v0 = vpop.permute.xlu2 %1923 }
 0x198   : > { %15143 = vst [vmem:[#allocation82_spill] sm:$0xff] %v9403_v0  ;;  %v9405_v42 = vpop.permute.xlu1 %1873 }
 0x199   : > { %15144 = vst [vmem:[#allocation83_spill] sm:$0xff] %v9405_v42  ;;  %v9407_v47 = vpop.permute.xlu0 %1883 }
 0x19a   : > { %15145 = vst [vmem:[#allocation84_spill] sm:$0xff] %v9407_v47 }
 0x19d   : > { %2172 = vperm.xlu2 %8515, %v9293_v56  }
 0x19e   : > { %2167 = vperm.xlu1 %8514, %v9295_v11  }
 0x19f   : > { %2177 = vperm.xlu0 %8513, %v9297_v52   ;;  %v9412_v31 = vpop.permute.xlu2 %1938 }
 0x1a0   : > { %15146 = vst [vmem:[#allocation85_spill] sm:$0xff] %v9412_v31  ;;  %v9414_v2 = vpop.permute.xlu1 %1888 }
 0x1a1   : > { %15147 = vst [vmem:[#allocation86_spill] sm:$0xff] %v9414_v2  ;;  %v9416_v48 = vpop.permute.xlu0 %1898 }
 0x1a2   : > { %15148 = vst [vmem:[#allocation87_spill] sm:$0xff] %v9416_v48 }
 0x1a5   : > { %2187 = vperm.xlu2 %8515, %v9308_v53  }
 0x1a6   : > { %2182 = vperm.xlu1 %8514, %v9310_v57  }
 0x1a7   : > { %2192 = vperm.xlu0 %8513, %v9312_v49   ;;  %v9421_v42 = vpop.permute.xlu2 %1953 }
 0x1a8   : > { %15149 = vst [vmem:[#allocation88_spill] sm:$0xff] %v9421_v42  ;;  %v9423_v47 = vpop.permute.xlu1 %1903 }
 0x1a9   : > { %15150 = vst [vmem:[#allocation89_spill] sm:$0xff] %v9423_v47  ;;  %v9425_v0 = vpop.permute.xlu0 %1913 }
 0x1aa   : > { %15151 = vst [vmem:[#allocation90_spill] sm:$0xff] %v9425_v0 }
 0x1ad   : > { %2202 = vperm.xlu2 %8515, %v9323_v50  }
 0x1ae   : > { %2197 = vperm.xlu1 %8514, %v9325_v54  }
 0x1af   : > { %2207 = vperm.xlu0 %8513, %v9327_v43   ;;  %v9430_v2 = vpop.permute.xlu2 %1968 }
 0x1b0   : > { %15152 = vst [vmem:[#allocation91_spill] sm:$0xff] %v9430_v2  ;;  %v9432_v48 = vpop.permute.xlu1 %1918 }
 0x1b1   : > { %15153 = vst [vmem:[#allocation92_spill] sm:$0xff] %v9432_v48  ;;  %v9434_v31 = vpop.permute.xlu0 %1928 }
 0x1b2   : > { %15154 = vst [vmem:[#allocation93_spill] sm:$0xff] %v9434_v31 }
 0x1b5   : > { %2217 = vperm.xlu2 %8515, %v9338_v44  }
 0x1b6   : > { %2212 = vperm.xlu1 %8514, %v9340_v51  }
 0x1b7   : > { %2222 = vperm.xlu0 %8513, %v9342_v37   ;;  %v9439_v47 = vpop.permute.xlu2 %1983 }
 0x1b8   : > { %15155 = vst [vmem:[#allocation94_spill] sm:$0xff] %v9439_v47  ;;  %v9441_v0 = vpop.permute.xlu1 %1933 }
 0x1b9   : > { %15156 = vst [vmem:[#allocation95_spill] sm:$0xff] %v9441_v0  ;;  %v9443_v42 = vpop.permute.xlu0 %1943 }
 0x1ba   : > { %15157 = vst [vmem:[#allocation96_spill] sm:$0xff] %v9443_v42 }
 0x1bd   : > { %2232 = vperm.xlu2 %8515, %v2076_v36  }
 0x1be   : > { %2227 = vperm.xlu1 %8514, %v9353_v38  }
 0x1bf   : > { %2237 = vperm.xlu0 %8513, %v2077_v45   ;;  %v9446_v48 = vpop.permute.xlu2 %1998 }
 0x1c0   : > { %15158 = vst [vmem:[#allocation97_spill] sm:$0xff] %v9446_v48  ;;  %v9448_v31 = vpop.permute.xlu1 %1948 }
 0x1c1   : > { %15159 = vst [vmem:[#allocation98_spill] sm:$0xff] %v9448_v31  ;;  %v9450_v2 = vpop.permute.xlu0 %1958  ;;  %v9682_v31 = vld [vmem:[#allocation2 + $0xf9] sm:$0xff] }
 0x1c2   : > { %15160 = vst [vmem:[#allocation99_spill] sm:$0xff] %v9450_v2 }
 0x1c5   : > { %2348 = vperm.xlu2 %8515, %v9218_v9  }
 0x1c6   : > { %2343 = vperm.xlu1 %8514, %v9220_v30  }
 0x1c7   : > { %2353 = vperm.xlu0 %8513, %v9222_v63   ;;  %v9455_v0 = vpop.permute.xlu2 %2082 }
 0x1c8   : > { %15161 = vst [vmem:[#allocation100_spill] sm:$0xff] %v9455_v0  ;;  %v9457_v47 = vpop.permute.xlu1 %1963 }
 0x1c9   : > { %15162 = vst [vmem:[#allocation101_spill] sm:$0xff] %v9457_v47  ;;  %v9459_v42 = vpop.permute.xlu0 %1973 }
 0x1ca   : > { %15163 = vst [vmem:[#allocation102_spill] sm:$0xff] %v9459_v42 }
 0x1cd   : > { %2363 = vperm.xlu2 %8515, %v9233_v24  }
 0x1ce   : > { %2358 = vperm.xlu1 %8514, %v9235_v58  }
 0x1cf   : > { %2368 = vperm.xlu0 %8513, %v9237_v62   ;;  %v9464_v48 = vpop.permute.xlu2 %2097 }
 0x1d0   : > { %15164 = vst [vmem:[#allocation103_spill] sm:$0xff] %v9464_v48  ;;  %v9466_v2 = vpop.permute.xlu1 %1978 }
 0x1d1   : > { %15165 = vst [vmem:[#allocation104_spill] sm:$0xff] %v9466_v2  ;;  %v9468_v9 = vpop.permute.xlu0 %1988  ;;  %v9667_v2 = vld [vmem:[#allocation2 + $0xe1] sm:$0xff] }
 0x1d2   : > { %15166 = vst [vmem:[#allocation105_spill] sm:$0xff] %v9468_v9  ;;  %v9548_v9 = vld [vmem:[#allocation2 + $0x21] sm:$0xff] }
 0x1d5   : > { %2378 = vperm.xlu2 %8515, %v9248_v26  }
 0x1d6   : > { %2373 = vperm.xlu1 %8514, %v9250_v34  }
 0x1d7   : > { %2383 = vperm.xlu0 %8513, %v9252_v29   ;;  %v9473_v30 = vpop.permute.xlu2 %2112 }
 0x1d8   : > { %15167 = vst [vmem:[#allocation106_spill] sm:$0xff] %v9473_v30  ;;  %v9475_v63 = vpop.permute.xlu1 %1993 }
 0x1d9   : > { %15168 = vst [vmem:[#allocation107_spill] sm:$0xff] %v9475_v63  ;;  %v9477_v24 = vpop.permute.xlu0 %2003 }
 0x1da   : > { %15169 = vst [vmem:[#allocation108_spill] sm:$0xff] %v9477_v24  ;;  %v2600_v24 = vld [vmem:[#allocation2 + $0x9] sm:$0xff] }
 0x1dd   : > { %2393 = vperm.xlu2 %8515, %v9263_v32  }
 0x1de   : > { %2388 = vperm.xlu1 %8514, %v9265_v33  }
 0x1df   : > { %2398 = vperm.xlu0 %8513, %v9267_v59   ;;  %v9482_v58 = vpop.permute.xlu2 %2127 }
 0x1e0   : > { %15170 = vst [vmem:[#allocation109_spill] sm:$0xff] %v9482_v58  ;;  %v9484_v62 = vpop.permute.xlu1 %2008 }
 0x1e1   : > { %15171 = vst [vmem:[#allocation110_spill] sm:$0xff] %v9484_v62  ;;  %v9486_v26 = vpop.permute.xlu0 %2087 }
 0x1e2   : > { %15172 = vst [vmem:[#allocation111_spill] sm:$0xff] %v9486_v26 }
 0x1e5   : > { %2408 = vperm.xlu2 %8515, %v9278_v60  }
 0x1e6   : > { %2403 = vperm.xlu1 %8514, %v9280_v61  }
 0x1e7   : > { %2413 = vperm.xlu0 %8513, %v9282_v55   ;;  %v9491_v34 = vpop.permute.xlu2 %2142 }
 0x1e8   : > { %15173 = vst [vmem:[#allocation112_spill] sm:$0xff] %v9491_v34  ;;  %v9493_v29 = vpop.permute.xlu1 %2092 }
 0x1e9   : > { %15174 = vst [vmem:[#allocation113_spill] sm:$0xff] %v9493_v29  ;;  %v9495_v32 = vpop.permute.xlu0 %2102  ;;  %v9652_v29 = vld [vmem:[#allocation2 + $0xc9] sm:$0xff] }
 0x1ea   : > { %15175 = vst [vmem:[#allocation114_spill] sm:$0xff] %v9495_v32 }
 0x1ed   : > { %2423 = vperm.xlu2 %8515, %v9293_v56  }
 0x1ee   : > { %2418 = vperm.xlu1 %8514, %v9295_v11  }
 0x1ef   : > { %2428 = vperm.xlu0 %8513, %v9297_v52   ;;  %v9500_v59 = vpop.permute.xlu2 %2157 }
 0x1f0   : > { %15176 = vst [vmem:[#allocation115_spill] sm:$0xff] %v9500_v59  ;;  %v9502_v33 = vpop.permute.xlu1 %2107 }
 0x1f1   : > { %15177 = vst [vmem:[#allocation116_spill] sm:$0xff] %v9502_v33  ;;  %v9504_v60 = vpop.permute.xlu0 %2117  ;;  %v9637_v33 = vld [vmem:[#allocation2 + $0xb1] sm:$0xff] }
 0x1f2   : > { %15178 = vst [vmem:[#allocation117_spill] sm:$0xff] %v9504_v60 }
 0x1f5   : > { %2438 = vperm.xlu2 %8515, %v9308_v53  }
 0x1f6   : > { %2433 = vperm.xlu1 %8514, %v9310_v57  }
 0x1f7   : > { %2443 = vperm.xlu0 %8513, %v9312_v49   ;;  %v9509_v55 = vpop.permute.xlu2 %2172 }
 0x1f8   : > { %15179 = vst [vmem:[#allocation118_spill] sm:$0xff] %v9509_v55  ;;  %v9511_v61 = vpop.permute.xlu1 %2122 }
 0x1f9   : > { %15180 = vst [vmem:[#allocation119_spill] sm:$0xff] %v9511_v61  ;;  %v9513_v56 = vpop.permute.xlu0 %2132  ;;  %v9622_v61 = vld [vmem:[#allocation2 + $0x99] sm:$0xff] }
 0x1fa   : > { %15181 = vst [vmem:[#allocation120_spill] sm:$0xff] %v9513_v56 }
 0x1fd   : > { %2453 = vperm.xlu2 %8515, %v9323_v50  }
 0x1fe   : > { %2448 = vperm.xlu1 %8514, %v9325_v54  }
 0x1ff   : > { %2458 = vperm.xlu0 %8513, %v9327_v43   ;;  %v9518_v52 = vpop.permute.xlu2 %2187 }
 0x200   : > { %15182 = vst [vmem:[#allocation121_spill] sm:$0xff] %v9518_v52  ;;  %v9520_v11 = vpop.permute.xlu1 %2137 }
 0x201   : > { %15183 = vst [vmem:[#allocation122_spill] sm:$0xff] %v9520_v11  ;;  %v9522_v53 = vpop.permute.xlu0 %2147  ;;  %v9607_v11 = vld [vmem:[#allocation2 + $0x81] sm:$0xff] }
 0x202   : > { %15184 = vst [vmem:[#allocation123_spill] sm:$0xff] %v9522_v53 }
 0x205   : > { %2468 = vperm.xlu2 %8515, %v9338_v44   ;;  %v2338_v44 = vld [vmem:[#allocation2 + $0x120] sm:$0xff] }
 0x206   : > { %2463 = vperm.xlu1 %8514, %v9340_v51   ;;  %v2337_v51 = vld [vmem:[#allocation2 + $0x118] sm:$0xff] }
 0x207   : > { %2473 = vperm.xlu0 %8513, %v9342_v37   ;;  %v9527_v49 = vpop.permute.xlu2 %2202 }
 0x208   : > { %15185 = vst [vmem:[#allocation124_spill] sm:$0xff] %v9527_v49  ;;  %v9529_v57 = vpop.permute.xlu1 %2152 }
 0x209   : > { %15186 = vst [vmem:[#allocation125_spill] sm:$0xff] %v9529_v57  ;;  %v9531_v50 = vpop.permute.xlu0 %2162 }
 0x20a   : > { %15187 = vst [vmem:[#allocation126_spill] sm:$0xff] %v9531_v50  ;;  %v9562_v50 = vld [vmem:[#allocation2 + $0x39] sm:$0xff] }
 0x20d   : > { %2483 = vperm.xlu2 %8515, %v2076_v36  }
 0x20e   : > { %2478 = vperm.xlu1 %8514, %v9353_v38   ;;  %v9546_v38 = vld [vmem:[#allocation2 + $0x19] sm:$0xff] }
 0x20f   : > { %2488 = vperm.xlu0 %8513, %v2077_v45   ;;  %v9534_v43 = vpop.permute.xlu2 %2217  ;;  %v2601_v45 = vld [vmem:[#allocation2 + $0x11] sm:$0xff] }
 0x210   : > { %15188 = vst [vmem:[#allocation127_spill] sm:$0xff] %v9534_v43  ;;  %v9536_v54 = vpop.permute.xlu1 %2167 }
 0x211   : > { %15189 = vst [vmem:[#allocation128_spill] sm:$0xff] %v9536_v54  ;;  %v9538_v62 = vpop.permute.xlu0 %2177  ;;  %v9592_v54 = vld [vmem:[#allocation2 + $0x69] sm:$0xff] }
 0x212   : > { %15190 = vst [vmem:[#allocation129_spill] sm:$0xff] %v9538_v62 }
 0x215   : > { %2498 = vperm.xlu2 %8515, %v2338_v44  }
 0x216   : > { %2493 = vperm.xlu1 %8514, %v2337_v51   ;;  %v9558_v51 = vld [vmem:[#allocation2 + $0x31] sm:$0xff] }
 0x217   : > { %2636 = vperm.xlu0 %8513, %v2600_v24   ;;  %v9540_v37 = vpop.permute.xlu2 %2232 }
 0x218   : > { %15191 = vst [vmem:[#allocation130_spill] sm:$0xff] %v9540_v37  ;;  %v9542_v63 = vpop.permute.xlu1 %2182  ;;  %v9560_v37 = vld [vmem:[#allocation2 + $0x29] sm:$0xff] }
 0x219   : > { %15192 = vst [vmem:[#allocation131_spill] sm:$0xff] %v9542_v63  ;;  %v9544_v36 = vpop.permute.xlu0 %2192 }
 0x21a   : > { %15193 = vst [vmem:[#allocation132_spill] sm:$0xff] %v9544_v36 }
 0x21d   : > { %2646 = vperm.xlu2 %8515, %v9546_v38  }
 0x21e   : > { %2641 = vperm.xlu1 %8514, %v2601_v45  }
 0x21f   : > { %2651 = vperm.xlu0 %8513, %v9548_v9   ;;  %v9552_v43 = vpop.permute.xlu2 %2348 }
 0x220   : > { %15194 = vst [vmem:[#allocation133_spill] sm:$0xff] %v9552_v43  ;;  %v9554_v44 = vpop.permute.xlu1 %2197  ;;  %v9577_v43 = vld [vmem:[#allocation2 + $0x51] sm:$0xff] }
 0x221   : > { %15195 = vst [vmem:[#allocation134_spill] sm:$0xff] %v9554_v44  ;;  %v9556_v24 = vpop.permute.xlu0 %2207  ;;  %v9573_v44 = vld [vmem:[#allocation2 + $0x49] sm:$0xff] }
 0x222   : > { %15196 = vst [vmem:[#allocation135_spill] sm:$0xff] %v9556_v24  ;;  %v9575_v24 = vld [vmem:[#allocation2 + $0x41] sm:$0xff] }
 0x225   : > { %2661 = vperm.xlu2 %8515, %v9558_v51  }
 0x226   : > { %2656 = vperm.xlu1 %8514, %v9560_v37  }
 0x227   : > { %2666 = vperm.xlu0 %8513, %v9562_v50   ;;  %v9567_v45 = vpop.permute.xlu2 %2363 }
 0x228   : > { %15197 = vst [vmem:[#allocation136_spill] sm:$0xff] %v9567_v45  ;;  %v9569_v36 = vpop.permute.xlu1 %2212 }
 0x229   : > { %15198 = vst [vmem:[#allocation137_spill] sm:$0xff] %v9569_v36  ;;  %v9571_v63 = vpop.permute.xlu0 %2222  ;;  %v9588_v36 = vld [vmem:[#allocation2 + $0x61] sm:$0xff] }
 0x22a   : > { %15199 = vst [vmem:[#allocation138_spill] sm:$0xff] %v9571_v63  ;;  %v9590_v63 = vld [vmem:[#allocation2 + $0x59] sm:$0xff] }
 0x22d   : > { %2676 = vperm.xlu2 %8515, %v9573_v44  }
 0x22e   : > { %2671 = vperm.xlu1 %8514, %v9575_v24  }
 0x22f   : > { %2681 = vperm.xlu0 %8513, %v9577_v43   ;;  %v9582_v49 = vpop.permute.xlu2 %2378 }
 0x230   : > { %15200 = vst [vmem:[#allocation139_spill] sm:$0xff] %v9582_v49  ;;  %v9584_v62 = vpop.permute.xlu1 %2227 }
 0x231   : > { %15201 = vst [vmem:[#allocation140_spill] sm:$0xff] %v9584_v62  ;;  %v9586_v45 = vpop.permute.xlu0 %2237  ;;  %v9603_v62 = vld [vmem:[#allocation2 + $0x79] sm:$0xff] }
 0x232   : > { %15202 = vst [vmem:[#allocation141_spill] sm:$0xff] %v9586_v45  ;;  %v9605_v45 = vld [vmem:[#allocation2 + $0x71] sm:$0xff] }
 0x235   : > { %2691 = vperm.xlu2 %8515, %v9588_v36  }
 0x236   : > { %2686 = vperm.xlu1 %8514, %v9590_v63  }
 0x237   : > { %2696 = vperm.xlu0 %8513, %v9592_v54   ;;  %v9597_v57 = vpop.permute.xlu2 %2393 }
 0x238   : > { %15203 = vst [vmem:[#allocation142_spill] sm:$0xff] %v9597_v57  ;;  %v9599_v53 = vpop.permute.xlu1 %2343 }
 0x239   : > { %15204 = vst [vmem:[#allocation143_spill] sm:$0xff] %v9599_v53  ;;  %v9601_v49 = vpop.permute.xlu0 %2353  ;;  %v9618_v53 = vld [vmem:[#allocation2 + $0x91] sm:$0xff] }
 0x23a   : > { %15205 = vst [vmem:[#allocation144_spill] sm:$0xff] %v9601_v49  ;;  %v9620_v49 = vld [vmem:[#allocation2 + $0x89] sm:$0xff] }
 0x23d   : > { %2706 = vperm.xlu2 %8515, %v9603_v62  }
 0x23e   : > { %2701 = vperm.xlu1 %8514, %v9605_v45  }
 0x23f   : > { %2711 = vperm.xlu0 %8513, %v9607_v11   ;;  %v9612_v52 = vpop.permute.xlu2 %2408 }
 0x240   : > { %15206 = vst [vmem:[#allocation145_spill] sm:$0xff] %v9612_v52  ;;  %v9614_v56 = vpop.permute.xlu1 %2358 }
 0x241   : > { %15207 = vst [vmem:[#allocation146_spill] sm:$0xff] %v9614_v56  ;;  %v9616_v57 = vpop.permute.xlu0 %2368  ;;  %v9633_v56 = vld [vmem:[#allocation2 + $0xa9] sm:$0xff] }
 0x242   : > { %15208 = vst [vmem:[#allocation147_spill] sm:$0xff] %v9616_v57  ;;  %v9635_v57 = vld [vmem:[#allocation2 + $0xa1] sm:$0xff] }
 0x245   : > { %2721 = vperm.xlu2 %8515, %v9618_v53  }
 0x246   : > { %2716 = vperm.xlu1 %8514, %v9620_v49  }
 0x247   : > { %2726 = vperm.xlu0 %8513, %v9622_v61   ;;  %v9627_v55 = vpop.permute.xlu2 %2423 }
 0x248   : > { %15209 = vst [vmem:[#allocation148_spill] sm:$0xff] %v9627_v55  ;;  %v9629_v60 = vpop.permute.xlu1 %2373 }
 0x249   : > { %15210 = vst [vmem:[#allocation149_spill] sm:$0xff] %v9629_v60  ;;  %v9631_v52 = vpop.permute.xlu0 %2383  ;;  %v9648_v60 = vld [vmem:[#allocation2 + $0xc1] sm:$0xff] }
 0x24a   : > { %15211 = vst [vmem:[#allocation150_spill] sm:$0xff] %v9631_v52  ;;  %v9650_v52 = vld [vmem:[#allocation2 + $0xb9] sm:$0xff] }
 0x24d   : > { %2736 = vperm.xlu2 %8515, %v9633_v56  }
 0x24e   : > { %2731 = vperm.xlu1 %8514, %v9635_v57  }
 0x24f   : > { %2741 = vperm.xlu0 %8513, %v9637_v33   ;;  %v9642_v59 = vpop.permute.xlu2 %2438 }
 0x250   : > { %15212 = vst [vmem:[#allocation151_spill] sm:$0xff] %v9642_v59  ;;  %v9644_v32 = vpop.permute.xlu1 %2388 }
 0x251   : > { %15213 = vst [vmem:[#allocation152_spill] sm:$0xff] %v9644_v32  ;;  %v9646_v55 = vpop.permute.xlu0 %2398  ;;  %v9663_v32 = vld [vmem:[#allocation2 + $0xd9] sm:$0xff] }
 0x252   : > { %15214 = vst [vmem:[#allocation153_spill] sm:$0xff] %v9646_v55  ;;  %v9665_v55 = vld [vmem:[#allocation2 + $0xd1] sm:$0xff] }
 0x255   : > { %2751 = vperm.xlu2 %8515, %v9648_v60  }
 0x256   : > { %2746 = vperm.xlu1 %8514, %v9650_v52  }
 0x257   : > { %2756 = vperm.xlu0 %8513, %v9652_v29   ;;  %v9657_v34 = vpop.permute.xlu2 %2453 }
 0x258   : > { %15215 = vst [vmem:[#allocation154_spill] sm:$0xff] %v9657_v34  ;;  %v9659_v26 = vpop.permute.xlu1 %2403 }
 0x259   : > { %15216 = vst [vmem:[#allocation155_spill] sm:$0xff] %v9659_v26  ;;  %v9661_v59 = vpop.permute.xlu0 %2413  ;;  %v9678_v26 = vld [vmem:[#allocation2 + $0xf1] sm:$0xff] }
 0x25a   : > { %15217 = vst [vmem:[#allocation156_spill] sm:$0xff] %v9661_v59  ;;  %v9680_v59 = vld [vmem:[#allocation2 + $0xe9] sm:$0xff] }
 0x25d   : > { %2766 = vperm.xlu2 %8515, %v9663_v32  }
 0x25e   : > { %2761 = vperm.xlu1 %8514, %v9665_v55  }
 0x25f   : > { %2771 = vperm.xlu0 %8513, %v9667_v2   ;;  %v9672_v42 = vpop.permute.xlu2 %2468 }
 0x260   : > { %15218 = vst [vmem:[#allocation157_spill] sm:$0xff] %v9672_v42  ;;  %v9674_v47 = vpop.permute.xlu1 %2418 }
 0x261   : > { %15219 = vst [vmem:[#allocation158_spill] sm:$0xff] %v9674_v47  ;;  %v9676_v34 = vpop.permute.xlu0 %2428  ;;  %v9693_v47 = vld [vmem:[#allocation2 + $0x101] sm:$0xff] }
 0x262   : > { %15220 = vst [vmem:[#allocation159_spill] sm:$0xff] %v9676_v34 }
 0x263   : > { %15224 = vst [vmem:[#allocation163_spill] sm:$0xff] %v9693_v47 }
 0x265   : > { %2781 = vperm.xlu2 %8515, %v9678_v26  }
 0x266   : > { %2776 = vperm.xlu1 %8514, %v9680_v59  }
 0x267   : > { %2786 = vperm.xlu0 %8513, %v9682_v31   ;;  %v9687_v58 = vpop.permute.xlu2 %2483 }
 0x268   : > { %15221 = vst [vmem:[#allocation160_spill] sm:$0xff] %v9687_v58  ;;  %v9689_v30 = vpop.permute.xlu1 %2433 }
 0x269   : > { %15222 = vst [vmem:[#allocation161_spill] sm:$0xff] %v9689_v30  ;;  %v9691_v42 = vpop.permute.xlu0 %2443 }
 0x26a   : > { %15223 = vst [vmem:[#allocation162_spill] sm:$0xff] %v9691_v42 }
 0x26d   : > { %2865 = vperm.xlu2 %8515, %v9546_v38  }
 0x26e   : > { %2791 = vperm.xlu1 %8514, %v9693_v47  }
 0x26f   : > { %2870 = vperm.xlu0 %8513, %v9548_v9   ;;  %v9698_v34 = vpop.permute.xlu2 %2498 }
 0x270   : > { %15225 = vst [vmem:[#allocation164_spill] sm:$0xff] %v9698_v34  ;;  %v9700_v48 = vpop.permute.xlu1 %2448 }
 0x271   : > { %15226 = vst [vmem:[#allocation165_spill] sm:$0xff] %v9700_v48  ;;  %v9702_v0 = vpop.permute.xlu0 %2458 }
 0x272   : > { %15227 = vst [vmem:[#allocation166_spill] sm:$0xff] %v9702_v0 }
 0x275   : > { %2880 = vperm.xlu2 %8515, %v9558_v51  }
 0x276   : > { %2875 = vperm.xlu1 %8514, %v9560_v37  }
 0x277   : > { %2885 = vperm.xlu0 %8513, %v9562_v50   ;;  %v9707_v58 = vpop.permute.xlu2 %2646 }
 0x278   : > { %15228 = vst [vmem:[#allocation167_spill] sm:$0xff] %v9707_v58  ;;  %v9709_v30 = vpop.permute.xlu1 %2463 }
 0x279   : > { %15229 = vst [vmem:[#allocation168_spill] sm:$0xff] %v9709_v30  ;;  %v9711_v38 = vpop.permute.xlu0 %2473 }
 0x27a   : > { %15230 = vst [vmem:[#allocation169_spill] sm:$0xff] %v9711_v38 }
 0x27d   : > { %2895 = vperm.xlu2 %8515, %v9573_v44  }
 0x27e   : > { %2890 = vperm.xlu1 %8514, %v9575_v24  }
 0x27f   : > { %2900 = vperm.xlu0 %8513, %v9577_v43   ;;  %v9716_v9 = vpop.permute.xlu2 %2661 }
 0x280   : > { %15231 = vst [vmem:[#allocation170_spill] sm:$0xff] %v9716_v9  ;;  %v9718_v34 = vpop.permute.xlu1 %2478 }
 0x281   : > { %15232 = vst [vmem:[#allocation171_spill] sm:$0xff] %v9718_v34  ;;  %v9720_v48 = vpop.permute.xlu0 %2488 }
 0x282   : > { %15233 = vst [vmem:[#allocation172_spill] sm:$0xff] %v9720_v48 }
 0x285   : > { %2910 = vperm.xlu2 %8515, %v9588_v36  }
 0x286   : > { %2905 = vperm.xlu1 %8514, %v9590_v63  }
 0x287   : > { %2915 = vperm.xlu0 %8513, %v9592_v54   ;;  %v9725_v30 = vpop.permute.xlu2 %2676 }
 0x288   : > { %15234 = vst [vmem:[#allocation173_spill] sm:$0xff] %v9725_v30  ;;  %v9727_v38 = vpop.permute.xlu1 %2493 }
 0x289   : > { %15235 = vst [vmem:[#allocation174_spill] sm:$0xff] %v9727_v38  ;;  %v9729_v58 = vpop.permute.xlu0 %2636 }
 0x28a   : > { %15236 = vst [vmem:[#allocation175_spill] sm:$0xff] %v9729_v58 }
 0x28d   : > { %2925 = vperm.xlu2 %8515, %v9603_v62  }
 0x28e   : > { %2920 = vperm.xlu1 %8514, %v9605_v45  }
 0x28f   : > { %2930 = vperm.xlu0 %8513, %v9607_v11   ;;  %v9734_v34 = vpop.permute.xlu2 %2691 }
 0x290   : > { %15237 = vst [vmem:[#allocation176_spill] sm:$0xff] %v9734_v34  ;;  %v9736_v48 = vpop.permute.xlu1 %2641 }
 0x291   : > { %15238 = vst [vmem:[#allocation177_spill] sm:$0xff] %v9736_v48  ;;  %v9738_v9 = vpop.permute.xlu0 %2651  ;;  %v2860_v48 = vld [vmem:[#allocation2 + $0x111] sm:$0xff] }
 0x292   : > { %15239 = vst [vmem:[#allocation178_spill] sm:$0xff] %v9738_v9 }
 0x295   : > { %2940 = vperm.xlu2 %8515, %v9618_v53  }
 0x296   : > { %2935 = vperm.xlu1 %8514, %v9620_v49  }
 0x297   : > { %2945 = vperm.xlu0 %8513, %v9622_v61   ;;  %v9743_v38 = vpop.permute.xlu2 %2706 }
 0x298   : > { %15240 = vst [vmem:[#allocation179_spill] sm:$0xff] %v9743_v38  ;;  %v9745_v30 = vpop.permute.xlu1 %2656 }
 0x299   : > { %15241 = vst [vmem:[#allocation180_spill] sm:$0xff] %v9745_v30  ;;  %v9747_v58 = vpop.permute.xlu0 %2666  ;;  %v2859_v30 = vld [vmem:[#allocation2 + $0x109] sm:$0xff] }
 0x29a   : > { %15242 = vst [vmem:[#allocation181_spill] sm:$0xff] %v9747_v58 }
 0x29d   : > { %2955 = vperm.xlu2 %8515, %v9633_v56  }
 0x29e   : > { %2950 = vperm.xlu1 %8514, %v9635_v57  }
 0x29f   : > { %2960 = vperm.xlu0 %8513, %v9637_v33   ;;  %v9752_v34 = vpop.permute.xlu2 %2721 }
 0x2a0   : > { %15243 = vst [vmem:[#allocation182_spill] sm:$0xff] %v9752_v34  ;;  %v9754_v9 = vpop.permute.xlu1 %2671 }
 0x2a1   : > { %15244 = vst [vmem:[#allocation183_spill] sm:$0xff] %v9754_v9  ;;  %v9756_v0 = vpop.permute.xlu0 %2681 }
 0x2a2   : > { %15245 = vst [vmem:[#allocation184_spill] sm:$0xff] %v9756_v0 }
 0x2a5   : > { %2970 = vperm.xlu2 %8515, %v9648_v60  }
 0x2a6   : > { %2965 = vperm.xlu1 %8514, %v9650_v52  }
 0x2a7   : > { %2975 = vperm.xlu0 %8513, %v9652_v29   ;;  %v9761_v38 = vpop.permute.xlu2 %2736 }
 0x2a8   : > { %15246 = vst [vmem:[#allocation185_spill] sm:$0xff] %v9761_v38  ;;  %v9763_v58 = vpop.permute.xlu1 %2686 }
 0x2a9   : > { %15247 = vst [vmem:[#allocation186_spill] sm:$0xff] %v9763_v58  ;;  %v9765_v42 = vpop.permute.xlu0 %2696 }
 0x2aa   : > { %15248 = vst [vmem:[#allocation187_spill] sm:$0xff] %v9765_v42 }
 0x2ad   : > { %2985 = vperm.xlu2 %8515, %v9663_v32  }
 0x2ae   : > { %2980 = vperm.xlu1 %8514, %v9665_v55  }
 0x2af   : > { %2990 = vperm.xlu0 %8513, %v9667_v2   ;;  %v9770_v34 = vpop.permute.xlu2 %2751 }
 0x2b0   : > { %15249 = vst [vmem:[#allocation188_spill] sm:$0xff] %v9770_v34  ;;  %v9772_v0 = vpop.permute.xlu1 %2701 }
 0x2b1   : > { %15250 = vst [vmem:[#allocation189_spill] sm:$0xff] %v9772_v0  ;;  %v9774_v9 = vpop.permute.xlu0 %2711 }
 0x2b2   : > { %15251 = vst [vmem:[#allocation190_spill] sm:$0xff] %v9774_v9 }
 0x2b5   : > { %3000 = vperm.xlu2 %8515, %v9678_v26  }
 0x2b6   : > { %2995 = vperm.xlu1 %8514, %v9680_v59  }
 0x2b7   : > { %3005 = vperm.xlu0 %8513, %v9682_v31   ;;  %v9779_v38 = vpop.permute.xlu2 %2766 }
 0x2b8   : > { %15252 = vst [vmem:[#allocation191_spill] sm:$0xff] %v9779_v38  ;;  %v9781_v42 = vpop.permute.xlu1 %2716 }
 0x2b9   : > { %15253 = vst [vmem:[#allocation192_spill] sm:$0xff] %v9781_v42  ;;  %v9783_v58 = vpop.permute.xlu0 %2726 }
 0x2ba   : > { %15254 = vst [vmem:[#allocation193_spill] sm:$0xff] %v9783_v58 }
 0x2bd   : > { %3015 = vperm.xlu2 %8515, %v2859_v30  }
 0x2be   : > { %3010 = vperm.xlu1 %8514, %v9693_v47   ;;  %v15283_v47 = vld [vmem:[#allocation25_spill] sm:$0xff] }
 0x2bf   : > { %3020 = vperm.xlu0 %8513, %v2860_v48   ;;  %v9786_v34 = vpop.permute.xlu2 %2781 }
 0x2c0   : > { %15255 = vst [vmem:[#allocation194_spill] sm:$0xff] %v9786_v34  ;;  %v9788_v9 = vpop.permute.xlu1 %2731 }
 0x2c1   : > { %15256 = vst [vmem:[#allocation195_spill] sm:$0xff] %v9788_v9  ;;  %v9790_v0 = vpop.permute.xlu0 %2741  ;;  %v15274_v9 = vld [vmem:[#allocation16_spill] sm:$0xff] }
 0x2c2   : > { %15257 = vst [vmem:[#allocation196_spill] sm:$0xff] %v9790_v0 }
 0x2c5   : > { %3131 = vperm.xlu2 %8515, %v9558_v51  }
 0x2c6   : > { %3126 = vperm.xlu1 %8514, %v9560_v37  }
 0x2c7   : > { %3136 = vperm.xlu0 %8513, %v9562_v50   ;;  %v9795_v38 = vpop.permute.xlu2 %2865  ;;  %v8686_v50 = vld [vmem:[%s14975_s1] ss:$0 sm:$0xff] }
 0x2c8   : > { %15258 = vst [vmem:[#allocation197_spill] sm:$0xff] %v9795_v38  ;;  %v9797_v42 = vpop.permute.xlu1 %2746  ;;  %v1234_v0 = vmul.f32 %v8686_v50, %v9064_v12  ;;  %v1243_v12 = vmul.f32 %v8686_v50, %v9085_v20  ;;  %v15279_v38 = vld [vmem:[#allocation21_spill] sm:$0xff] }
 0x2c9   : > { %15259 = vst [vmem:[#allocation198_spill] sm:$0xff] %v9797_v42  ;;  %v9799_v30 = vpop.permute.xlu0 %2756  ;;  %v426_v42 = vlaneseq }
 0x2ca   : > { %15260 = vst [vmem:[#allocation199_spill] sm:$0xff] %v9799_v30  ;;  %v9843_v30 = vmul.f32 %v8686_v50, %v9060_v10 }
 0x2cd   : > { %3146 = vperm.xlu2 %8515, %v9573_v44  }
 0x2ce   : > { %3141 = vperm.xlu1 %8514, %v9575_v24   ;;  %v9823_v24 = vmul.f32 %v8686_v50, %v9032_v1  ;;  %v1232_v1 = vmul.f32 %v8686_v50, %v9054_v8  ;;  %v1241_v8 = vmul.f32 %v8686_v50, %v9083_v19  ;;  %v9875_v19 = vmul.f32 %v8686_v50, %v9101_v27 }
 0x2cf   : > { %3151 = vperm.xlu0 %8513, %v9577_v43   ;;  %v9804_v48 = vpop.permute.xlu2 %2880 }
 0x2d0   : > { %15261 = vst [vmem:[#allocation200_spill] sm:$0xff] %v9804_v48  ;;  %v9806_v34 = vpop.permute.xlu1 %2761 }
 0x2d1   : > { %15262 = vst [vmem:[#allocation201_spill] sm:$0xff] %v9806_v34  ;;  %v9808_v51 = vpop.permute.xlu0 %2771  ;;  %v15273_v34 = vld [vmem:[#allocation9_spill] sm:$0xff] }
 0x2d2   : > { %15263 = vst [vmem:[#allocation202_spill] sm:$0xff] %v9808_v51  ;;  %v9834_v51 = vmul.f32 %v8686_v50, %v9042_v4  ;;  %v9848_v4 = vmul.f32 %v8686_v50, %v9071_v14  ;;  %v9865_v14 = vmul.f32 %v8686_v50, %v9092_v22  ;;  %v1249_v22 = vmul.f32 %v8686_v50, %v9103_v28 }
 0x2d5   : > { %3161 = vperm.xlu2 %8515, %v9588_v36   ;;  %v9828_v36 = vld [vmem:[%s14975_s1 + $0x3] ss:$0 sm:$0xff] }
 0x2d6   : > { %3156 = vperm.xlu1 %8514, %v9590_v63   ;;  %v9831_v63 = vmul.f32 %v8686_v50, %v9037_v3  ;;  %v1237_v3 = vmul.f32 %v8686_v50, %v9067_v13  ;;  %v1460_v10 = vmul.f32 %v9828_v36, %v9115_v40  ;;  %v9862_v13 = vmul.f32 %v8686_v50, %v9089_v21 }
 0x2d7   : > { %3166 = vperm.xlu0 %8513, %v9592_v54   ;;  %v9816_v37 = vpop.permute.xlu2 %2895  ;;  %v1231_v54 = vmul.f32 %v8686_v50, %v9045_v5  ;;  %v1238_v5 = vmul.f32 %v8686_v50, %v9074_v15  ;;  %v1246_v15 = vmul.f32 %v8686_v50, %v9094_v23  ;;  %v1463_v20 = vmul.f32 %v9828_v36, %v9124_v46 }
 0x2d8   : > { %15264 = vst [vmem:[#allocation203_spill] sm:$0xff] %v9816_v37  ;;  %v9818_v44 = vpop.permute.xlu1 %2776  ;;  %v9879_v21 = vshrl.u32 %v426_v42, 7  ;;  %v9885_v23 = vmul.f32 %v8686_v50, %v9108_v35  ;;  %v9895_v46 = vmul.f32 %v8686_v50, %v9117_v41  ;;  %v15270_v42 = vld [vmem:[#allocation13_spill] sm:$0xff]  ;;  %v15272_v35 = vld [vmem:[#allocation8_spill] sm:$0xff]  ;;  %v15276_v41 = vld [vmem:[#allocation18_spill] sm:$0xff] }
 0x2d9   : > { %15265 = vst [vmem:[#allocation204_spill] sm:$0xff] %v9818_v44  ;;  %v9820_v43 = vpop.permute.xlu0 %2786  ;;  %v9838_v44 = vmul.f32 %v8686_v50, %v9049_v6  ;;  %v1240_v6 = vmul.f32 %v8686_v50, %v9076_v16  ;;  %v9892_v27 = vadd.f32 %v1460_v10, %v1231_v54  ;;  %v1255_v58 = vmul.f32 %v8686_v50, %v15272_v35 }
 0x2da   : > { %15266 = vst [vmem:[#allocation205_spill] sm:$0xff] %v9820_v43  ;;  %v1233_v43 = vmul.f32 %v8686_v50, %v9052_v7  ;;  %v9854_v7 = vmul.f32 %v8686_v50, %v9080_v18  ;;  %v9872_v18 = vmul.f32 %v8686_v50, %v9098_v25  ;;  %v1466_v25 = vmul.f32 %v9828_v36, %v9133_v17 }
 0x2db   : > { %v1472_v17 = vmul.f32 %v9828_v36, %v15274_v9  ;;  %v9909_v10 = vadd.f32 %v1463_v20, %v1234_v0  ;;  %v1464_v37 = vmul.f32 %v9828_v36, %v15276_v41  ;;  %v1467_v9 = vmul.f32 %v9828_v36, %v15279_v38  ;;  %v15281_v41 = vld [vmem:[#allocation23_spill] sm:$0xff] }
 0x2dc   : > { %v9916_v35 = vadd.f32 %v1466_v25, %v1237_v3  ;;  %v15282_v3 = vld [vmem:[#allocation24_spill] sm:$0xff] }
 0x2dd   : > { %3176 = vperm.xlu2 %8515, %v9603_v62   ;;  %v1252_v62 = vmul.f32 %v8686_v50, %v9110_v39  ;;  %v9903_v39 = vmul.f32 %v8686_v50, %v15273_v34  ;;  %v15278_v34 = vld [vmem:[#allocation20_spill] sm:$0xff]  ;;  %v1470_v25 = vmul.f32 %v9828_v36, %v15282_v3 }
 0x2de   : > { %3171 = vperm.xlu1 %8514, %v9605_v45   ;;  %v1469_v45 = vmul.f32 %v9828_v36, %v15270_v42  ;;  %v15277_v42 = vld [vmem:[#allocation19_spill] sm:$0xff]  ;;  %v1465_v50 = vmul.f32 %v9828_v36, %v15278_v34  ;;  %v9934_v34 = vadd.f32 %v1472_v17, %v1243_v12 }
 0x2df   : > { %3181 = vperm.xlu0 %8513, %v9607_v11   ;;  %v9869_v16 = vpop.permute.xlu2 %2910  ;;  %v1475_v48 = vmul.f32 %v9828_v36, %v15277_v42  ;;  %v1468_v42 = vmul.f32 %v9828_v36, %v15281_v41 }
 0x2e0   : > { %15267 = vst [vmem:[#allocation206_spill] sm:$0xff] %v9869_v16  ;;  %v9881_v40 = vpop.permute.xlu1 %2791  ;;  %v15275_v16 = vld [vmem:[#allocation17_spill] sm:$0xff] }
 0x2e1   : > { %15268 = vst [vmem:[#allocation207_spill] sm:$0xff] %v9881_v40  ;;  %v9890_v11 = vpop.permute.xlu0 %2870  ;;  %v15271_v40 = vld [vmem:[#allocation15_spill] sm:$0xff]  ;;  %v1462_v54 = vmul.f32 %v9828_v36, %v15275_v16  ;;  %v9925_v16 = vadd.f32 %v1469_v45, %v1240_v6  ;;  %v1496_v45 = vadd.f32 %v1464_v37, %v9823_v24  ;;  %v9965_v37 = vadd.f32 %v1470_v25, %v1241_v8  ;;  %v15288_v24 = vld [vmem:[#allocation28_spill] sm:$0xff] }
 0x2e2   : > { %15269 = vst [vmem:[#allocation208_spill] sm:$0xff] %v9890_v11  ;;  %v1461_v28 = vmul.f32 %v9828_v36, %v15271_v40  ;;  %v431_v40 = vadd.s32 32, %v9879_v21  ;;  %v15280_v11 = vld [vmem:[#allocation22_spill] sm:$0xff] }
 0x2e3   : > { %v1478_v0 = vmul.f32 %v9828_v36, %v15280_v11  ;;  %v9936_v38 = vadd.f32 %v1462_v54, %v1233_v43  ;;  %v1481_v11 = vmul.f32 %v9828_v36, %v15283_v47  ;;  %v9952_v43 = vadd.f32 %v1465_v50, %v9831_v63  ;;  %v15287_v54 = vld [vmem:[#allocation27_spill] sm:$0xff] }
 0x2e4   : > { %v9927_v20 = vadd.f32 %v1461_v28, %v1232_v1  ;;  %v9946_v28 = vadd.f32 %v1475_v48, %v1246_v15  ;;  %v491_v41 = vand.u32 15, %v431_v40  ;;  %v9954_v47 = vadd.f32 %v1467_v9, %v1238_v5  ;;  %v15290_v9 = vld [vmem:[#allocation30_spill] sm:$0xff] }
 0x2e5   : > { %3191 = vperm.xlu2 %8515, %v9618_v53   ;;  %v15284_v53 = vld [vmem:[#allocation26_spill] sm:$0xff]  ;;  %v9956_v17 = vadd.f32 %v1478_v0, %v1249_v22  ;;  %v9963_v48 = vadd.f32 %v1468_v42, %v9834_v51  ;;  %v1484_v15 = vmul.f32 %v9828_v36, %v15288_v24  ;;  %v429_v63 = vadd.s32 16, %v9879_v21  ;;  %v15289_v22 = vld [vmem:[#allocation29_spill] sm:$0xff]  ;;  %v15291_v51 = vld [vmem:[#allocation32_spill] sm:$0xff] }
 0x2e6   : > { %3186 = vperm.xlu1 %8514, %v9620_v49   ;;  %v1471_v6 = vmul.f32 %v9828_v36, %v15284_v53  ;;  %v437_v49 = vadd.s32 80, %v9879_v21  ;;  %v9970_v40 = vadd.f32 %v1481_v11, %v1252_v62  ;;  %v1474_v50 = vmul.f32 %v9828_v36, %v15289_v22  ;;  %v15292_v42 = vld [vmem:[#allocation33_spill] sm:$0xff]  ;;  %v15293_v11 = vld [vmem:[#allocation35_spill] sm:$0xff] }
 0x2e7   : > { %3196 = vperm.xlu0 %8513, %v9622_v61   ;;  %v9943_v1 = vpop.permute.xlu2 %2925  ;;  %v1473_v61 = vmul.f32 %v9828_v36, %v15287_v54  ;;  %v1476_v0 = vmul.f32 %v9828_v36, %v15290_v9  ;;  %v1477_v8 = vmul.f32 %v9828_v36, %v15291_v51  ;;  %v1479_v25 = vmul.f32 %v9828_v36, %v15292_v42  ;;  %v9993_v24 = vld [vmem:[%s14975_s1 + $0x6] ss:$0 sm:$0xff] }
 0x2e8   : > { %15285 = vst [vmem:[#allocation13_spill] sm:$0xff] %v9943_v1  ;;  %v9949_v12 = vpop.permute.xlu1 %2875  ;;  %v9973_v5 = vadd.f32 %v1471_v6, %v9838_v44  ;;  %vm847_vm1 = vcmp.ne.s32.totalorder %v491_v41, 0  ;;  %v533_v53 = vand.u32 15, %v437_v49  ;;  %v1480_v44 = vmul.f32 %v9828_v36, %v15293_v11  ;;  %v15294_v6 = vld [vmem:[#allocation36_spill] sm:$0xff] }
 0x2e9   : > { %15286 = vst [vmem:[#allocation15_spill] sm:$0xff] %v9949_v12  ;;  %v9960_v3 = vpop.permute.xlu0 %2885  ;;  %v9984_v62 = vadd.f32 %v1473_v61, %v9865_v14  ;;  %v1482_v54 = vmul.f32 %v9828_v36, %v15294_v6  ;;  %v463_v22 = vand.u32 15, %v9879_v21  ;;  %v9997_v41 = vadd.f32 %v1484_v15, %v1255_v58 }
 0x2ea   : > { %v477_v49 = vand.u32 15, %v429_v63  ;;  %v443_v14 = vadd.s32 128, %v9879_v21  ;;  %v433_v61 = vadd.s32 48, %v9879_v21  ;;  %v10003_v9 = vadd.f32 %v1474_v50, %v9843_v30  ;;  %v15298_v30 = vld [vmem:[#allocation40_spill] sm:$0xff] }
 0x2eb   : > { %v10006_v51 = vadd.f32 %v1476_v0, %v9875_v19  ;;  %v15295_v42 = vmov 0.0   ;;  %v10016_v15 = vadd.f32 %v1477_v8, %v9848_v4  ;;  %v1725_v63 = vmul.f32 %v9993_v24, %v15298_v30  ;;  %v15302_v30 = vld [vmem:[#allocation39_spill] sm:$0xff] }
 0x2ec   : > { %v10009_v11 = vsel %vm847_vm1, 1.0, %v15295_v42  ;;  %vm853_vm2 = vcmp.ne.s32.totalorder %v533_v53, 0  ;;  %v10026_v50 = vadd.f32 %v1480_v44, %v9854_v7  ;;  %v10029_v0 = vadd.f32 %v1482_v54, %v9895_v46  ;;  %343 = vst.msk [vmem:[#allocation3] sm:$0xff] %vm342_vm10, %v15295_v42 }
 0x2ed   : > { %3211 = vperm.xlu2 %8515, %v9637_v33   ;;  %15296 = vst [vmem:[#allocation8_spill] sm:$0xff] %v10009_v11  ;;  %v435_v33 = vadd.s32 64, %v9879_v21  ;;  %vm843_vm3 = vcmp.ne.s32.totalorder %v463_v22, 0  ;;  %vm845_vm4 = vcmp.ne.s32.totalorder %v477_v49, 0  ;;  %v505_v53 = vand.u32 15, %v433_v61  ;;  %v15306_v61 = vld [vmem:[#allocation46_spill] sm:$0xff] }
 0x2ee   : > { %3201 = vperm.xlu1 %8514, %v9635_v57   ;;  %v10019_v57 = vadd.f32 %v1479_v25, %v9885_v23  ;;  %v15301_v23 = vld [vmem:[#allocation38_spill] sm:$0xff]  ;;  %v575_v25 = vand.u32 15, %v443_v14  ;;  %v10040_v7 = vsel %vm853_vm2, 1.0, %v15295_v42  ;;  %v449_v44 = vadd.s32 176, %v9879_v21  ;;  %344 = vst.msk [vmem:[#allocation3 + $0x8] sm:$0xff] %vm342_vm10, %v15295_v42 }
 0x2ef   : > { %3221 = vperm.xlu0 %8513, %v9648_v60   ;;  %v10013_v58 = vpop.permute.xlu2 %2940  ;;  %v15300_v60 = vld [vmem:[#allocation37_spill] sm:$0xff]  ;;  %v1483_v8 = vmul.f32 %v9828_v36, %v15301_v23  ;;  %15303 = vst [vmem:[#allocation17_spill] sm:$0xff] %v10040_v7  ;;  %v519_v46 = vand.u32 15, %v435_v33  ;;  %v1757_v54 = vadd.f32 %v1725_v63, %v1496_v45  ;;  %v10046_v1 = vsel %vm843_vm3, 1.0, %v15295_v42  ;;  %v15308_v45 = vld [vmem:[#allocation43_spill] sm:$0xff] }
 0x2f0   : > { %15297 = vst [vmem:[#allocation9_spill] sm:$0xff] %v10013_v58  ;;  %v10023_v19 = vpop.permute.xlu1 %2890  ;;  %v1722_v6 = vmul.f32 %v9993_v24, %v15300_v60  ;;  %v1485_v58 = vmul.f32 %v9828_v36, %v15302_v30  ;;  %v15304_v60 = vld [vmem:[#allocation41_spill] sm:$0xff]  ;;  %v439_v49 = vadd.s32 96, %v9879_v21  ;;  %v1731_v23 = vmul.f32 %v9993_v24, %v15306_v61 }
 0x2f1   : > { %15299 = vst [vmem:[#allocation16_spill] sm:$0xff] %v10023_v19  ;;  %v10033_v4 = vpop.permute.xlu0 %2900  ;;  %v1486_v22 = vmul.f32 %v9828_v36, %v15304_v60  ;;  %v10055_v30 = vsel %vm845_vm4, 1.0, %v15295_v42  ;;  %v441_v33 = vadd.s32 112, %v9879_v21  ;;  %v10060_v36 = vadd.f32 %v1483_v8, %v9862_v13  ;;  %v15417_v19 = vld [vmem:[#allocation116_spill] sm:$0xff] }
 0x2f2   : > { %15305 = vst [vmem:[#allocation18_spill] sm:$0xff] %v10046_v1  ;;  %v10050_v14 = vadd.f32 %v1722_v6, %v9927_v20  ;;  %v1728_v63 = vmul.f32 %v9993_v24, %v15308_v45  ;;  %vm859_vm5 = vcmp.ne.s32.totalorder %v575_v25, 0  ;;  %vm849_vm6 = vcmp.ne.s32.totalorder %v505_v53, 0  ;;  %v15309_v6 = vld [vmem:[#allocation47_spill] sm:$0xff] }
 0x2f3   : > { %15307 = vst [vmem:[#allocation19_spill] sm:$0xff] %v10055_v30  ;;  %v10066_v20 = vadd.f32 %v1485_v58, %v9903_v39  ;;  %v1721_v60 = vmul.f32 %v9993_v24, %v15309_v6  ;;  %vm10070_vm7 = vcmp.ne.s32.totalorder %v519_v46, 0  ;;  %v10078_v8 = vmul.f32 %v10009_v11, %v1757_v54  ;;  %v15314_v39 = vld [vmem:[#allocation48_spill] sm:$0xff] }
 0x2f4   : > { %v1723_v58 = vmul.f32 %v9993_v24, %v15314_v39  ;;  %v547_v25 = vand.u32 15, %v439_v49  ;;  %v1763_v46 = vadd.f32 %v1731_v23, %v9965_v37  ;;  %v561_v45 = vand.u32 15, %v441_v33  ;;  %v15321_v39 = vld [vmem:[#allocation54_spill] sm:$0xff]  ;;  %345 = vst.msk [vmem:[#allocation3 + $0x10] sm:$0xff] %vm342_vm10, %v15295_v42 }
 0x2f5   : > { %3226 = vperm.xlu2 %8515, %v9652_v29   ;;  %v617_v29 = vand.u32 15, %v449_v44  ;;  %v10089_v44 = vsel %vm859_vm5, 1.0, %v15295_v42  ;;  %v10104_v49 = vsel %vm10070_vm7, 1.0, %v15295_v42  ;;  %v445_v37 = vadd.s32 144, %v9879_v21  ;;  %346 = vst.msk [vmem:[#allocation3 + $0x118] sm:$0xff] %vm342_vm10, %v15295_v42 }
 0x2f6   : > { %3216 = vperm.xlu1 %8514, %v9650_v52   ;;  %v10081_v52 = vadd.f32 %v1486_v22, %v9872_v18  ;;  %15316 = vst [vmem:[#allocation23_spill] sm:$0xff] %v10089_v44  ;;  %v10097_v18 = vadd.f32 %v1728_v63, %v9954_v47  ;;  %v15319_v22 = vld [vmem:[#allocation53_spill] sm:$0xff]  ;;  %v1753_v23 = vadd.f32 %v1721_v60, %v9892_v27  ;;  %v447_v11 = vadd.s32 160, %v9879_v21  ;;  %v15325_v27 = vld [vmem:[#allocation50_spill] sm:$0xff] }
 0x2f7   : > { %3231 = vperm.xlu0 %8513, %v9665_v55   ;;  %v10075_v13 = vpop.permute.xlu2 %2955  ;;  %v10092_v55 = vsel %vm849_vm6, 1.0, %v15295_v42  ;;  %v1727_v6 = vmul.f32 %v9993_v24, %v15319_v22  ;;  %15320 = vst [vmem:[#allocation26_spill] sm:$0xff] %v10104_v49  ;;  %v1729_v33 = vmul.f32 %v9993_v24, %v15321_v39  ;;  %vm865_vm8 = vcmp.ne.s32.totalorder %v617_v29, 0  ;;  %v15322_v63 = vld [vmem:[#allocation49_spill] sm:$0xff]  ;;  %v15326_v39 = vld [vmem:[#allocation51_spill] sm:$0xff] }
 0x2f8   : > { %15312 = vst [vmem:[#allocation20_spill] sm:$0xff] %v10075_v13  ;;  %v10085_v53 = vpop.permute.xlu1 %2905  ;;  %v1755_v47 = vadd.f32 %v1723_v58, %v9936_v38  ;;  %v1734_v22 = vmul.f32 %v9993_v24, %v15322_v63  ;;  %vm10114_vm9 = vcmp.ne.s32.totalorder %v547_v25, 0  ;;  %v10119_v61 = vmul.f32 %v10040_v7, %v1763_v46  ;;  %v15329_v38 = vld [vmem:[#allocation52_spill] sm:$0xff]  ;;  %v15348_v7 = vld [vmem:[#allocation57_spill] sm:$0xff] }
 0x2f9   : > { %15313 = vst [vmem:[#allocation21_spill] sm:$0xff] %v10081_v52  ;;  %v10094_v54 = vpop.permute.xlu0 %2915  ;;  %v1724_v60 = vmul.f32 %v9993_v24, %v15325_v27  ;;  %v1726_v29 = vmul.f32 %v9993_v24, %v15326_v39  ;;  %vm10125_vm11 = vcmp.ne.s32.totalorder %v561_v45, 0  ;;  %v1737_v58 = vmul.f32 %v9993_v24, %v15329_v38  ;;  %v15402_v13 = vld [vmem:[#allocation109_spill] sm:$0xff] }
 0x2fa   : > { %15315 = vst [vmem:[#allocation22_spill] sm:$0xff] %v10085_v53  ;;  %v1759_v25 = vadd.f32 %v1727_v6, %v9916_v35  ;;  %v10136_v46 = vsel %vm865_vm8, 1.0, %v15295_v42  ;;  %v589_v63 = vand.u32 15, %v445_v37  ;;  %v10142_v45 = vmul.f32 %v10046_v1, %v1753_v23 }
 0x2fb   : > { %15317 = vst [vmem:[#allocation24_spill] sm:$0xff] %v10092_v55  ;;  %v10148_v27 = vsel %vm10114_vm9, 1.0, %v15295_v42  ;;  %v603_v35 = vand.u32 15, %v447_v11  ;;  %v10159_v37 = vadd.f32 %v1734_v22, %v9984_v62  ;;  %v10166_v11 = vsel %vm10125_vm11, 1.0, %v15295_v42  ;;  %v15336_v62 = vld [vmem:[#allocation59_spill] sm:$0xff]  ;;  %v15337_v22 = vld [vmem:[#allocation60_spill] sm:$0xff] }
 0x2fc   : > { %15318 = vst [vmem:[#allocation25_spill] sm:$0xff] %v10094_v54  ;;  %v10173_v44 = vadd.f32 %v1724_v60, %v9909_v10  ;;  %v1735_v39 = vmul.f32 %v9993_v24, %v15337_v22  ;;  %v10187_v38 = vadd.f32 %v1737_v58, %v10006_v51  ;;  %v10190_v10 = vmul.f32 %v10092_v55, %v1759_v25  ;;  %v15342_v60 = vld [vmem:[#allocation65_spill] sm:$0xff]  ;;  %v15346_v25 = vld [vmem:[#allocation66_spill] sm:$0xff]  ;;  %v15347_v22 = vld [vmem:[#allocation56_spill] sm:$0xff] }
 0x2fd   : > { %3241 = vperm.xlu2 %8515, %v9667_v2   ;;  %15330 = vst [vmem:[#allocation27_spill] sm:$0xff] %v10136_v46  ;;  %v1761_v2 = vadd.f32 %v1729_v33, %v9963_v48  ;;  %v15333_v48 = vld [vmem:[#allocation58_spill] sm:$0xff]  ;;  %v10176_v33 = vadd.f32 %v1726_v29, %v9952_v43  ;;  %vm10192_vm12 = vcmp.ne.s32.totalorder %v589_v63, 0  ;;  %v1739_v29 = vmul.f32 %v9993_v24, %v15342_v60  ;;  %v15350_v55 = vld [vmem:[#allocation61_spill] sm:$0xff]  ;;  %v10273_v58 = vld [vmem:[%s14975_s1 + $0x1] ss:$0 sm:$0xff] }
 0x2fe   : > { %3236 = vperm.xlu1 %8514, %v9663_v32   ;;  %15331 = vst [vmem:[#allocation28_spill] sm:$0xff] %v10148_v27  ;;  %v10156_v32 = vmul.f32 %v10055_v30, %v1755_v47  ;;  %v1743_v23 = vmul.f32 %v9993_v24, %v15333_v48  ;;  %v1733_v47 = vmul.f32 %v9993_v24, %v15336_v62  ;;  %v15343_v62 = vld [vmem:[#allocation55_spill] sm:$0xff]  ;;  %vm10205_vm13 = vcmp.ne.s32.totalorder %v603_v35, 0  ;;  %v15357_v43 = vld [vmem:[#allocation69_spill] sm:$0xff]  ;;  %v15423_v54 = vld [vmem:[#allocation122_spill] sm:$0xff] }
 0x2ff   : > { %3246 = vperm.xlu0 %8513, %v9680_v59   ;;  %v10151_v6 = vpop.permute.xlu2 %2970  ;;  %15334 = vst [vmem:[#allocation30_spill] sm:$0xff] %v10166_v11  ;;  %v10201_v48 = vmul.f32 %v10104_v49, %v1761_v2  ;;  %v1740_v51 = vmul.f32 %v9993_v24, %v15343_v62  ;;  %v1741_v63 = vmul.f32 %v9993_v24, %v15346_v25  ;;  %v10219_v62 = vadd.s32 192, %v9879_v21 }
 0x300   : > { %15332 = vst [vmem:[#allocation29_spill] sm:$0xff] %v10151_v6  ;;  %v10168_v59 = vpop.permute.xlu1 %2920  ;;  %v1730_v60 = vmul.f32 %v9993_v24, %v15347_v22  ;;  %v1732_v2 = vmul.f32 %v9993_v24, %v15348_v7  ;;  %v1775_v49 = vadd.f32 %v1743_v23, %v10029_v0  ;;  %v1765_v35 = vadd.f32 %v1733_v47, %v9934_v34  ;;  %v15352_v0 = vld [vmem:[#allocation62_spill] sm:$0xff]  ;;  %v15353_v23 = vld [vmem:[#allocation63_spill] sm:$0xff]  ;;  %v15356_v47 = vld [vmem:[#allocation68_spill] sm:$0xff] }
 0x301   : > { %15335 = vst [vmem:[#allocation32_spill] sm:$0xff] %v10168_v59  ;;  %v10182_v52 = vpop.permute.xlu0 %2930  ;;  %v1767_v25 = vadd.f32 %v1735_v39, %v10003_v9  ;;  %v1746_v30 = vmul.f32 %v9993_v24, %v15350_v55  ;;  %v10228_v22 = vadd.s32 208, %v9879_v21  ;;  %v1736_v7 = vmul.f32 %v9993_v24, %v15352_v0  ;;  %v15400_v6 = vld [vmem:[#allocation93_spill] sm:$0xff] }
 0x302   : > { %15338 = vst [vmem:[#allocation33_spill] sm:$0xff] %v10182_v52  ;;  %v1738_v1 = vmul.f32 %v9993_v24, %v15353_v23  ;;  %v10240_v34 = vsel %vm10192_vm12, 1.0, %v15295_v42  ;;  %v1771_v9 = vadd.f32 %v1739_v29, %v9956_v17  ;;  %v1773_v55 = vadd.f32 %v1741_v63, %v10026_v50 }
 0x303   : > { %347 = vst.msk [vmem:[#allocation3 + $0x120] sm:$0xff] %vm342_vm10, %v15295_v42  ;;  %v1742_v39 = vmul.f32 %v9993_v24, %v15356_v47  ;;  %v1744_v0 = vmul.f32 %v9993_v24, %v15357_v43  ;;  %v10265_v29 = vadd.f32 %v1730_v60, %v9925_v16  ;;  %v10268_v50 = vadd.f32 %v1732_v2, %v9973_v5  ;;  %v15383_v5 = vld [vmem:[#allocation81_spill] sm:$0xff] }
 0x304   : > { %15339 = vst [vmem:[#allocation35_spill] sm:$0xff] %v10187_v38  ;;  %v10285_v16 = vmul.f32 %v10148_v27, %v1765_v35  ;;  %v10292_v2 = vmul.f32 %v10166_v11, %v1767_v25  ;;  %v10298_v47 = vadd.f32 %v1736_v7, %v9946_v28  ;;  %v10304_v35 = vmul.f32 %v10240_v34, %v1771_v9  ;;  %v10318_v28 = vld [vmem:[%s14975_s1 + $0x4] ss:$0 sm:$0xff]  ;;  %v15379_v9 = vld [vmem:[#allocation76_spill] sm:$0xff] }
 0x305   : > { %348 = vst.msk [vmem:[#allocation3 + $0x128] sm:$0xff] %vm342_vm10, %v15295_v42  ;;  %3251 = vperm.xlu2 %8515, %v9678_v26   ;;  %v10249_v26 = vsel %vm10205_vm13, 1.0, %v15295_v42  ;;  %v10313_v25 = vadd.f32 %v1744_v0, %v10060_v36  ;;  %v15380_v36 = vld [vmem:[#allocation78_spill] sm:$0xff]  ;;  %v15388_v11 = vld [vmem:[#allocation163_spill] sm:$0xff] }
 0x306   : > { %356 = vst.msk [vmem:[#allocation5] sm:$0xff] %vm342_vm10, %v15295_v42  ;;  %3206 = vperm.xlu1 %8514, %v9633_v56   ;;  %v10262_v56 = vadd.f32 %v1740_v51, %v10019_v57  ;;  %v10282_v57 = vmul.f32 %v10136_v46, %v1775_v49  ;;  %v10301_v49 = vadd.f32 %v1738_v1, %v10016_v15  ;;  %v15382_v51 = vld [vmem:[#allocation80_spill] sm:$0xff]  ;;  %v15385_v46 = vld [vmem:[#allocation83_spill] sm:$0xff] }
 0x307   : > { %15349 = vst [vmem:[#allocation36_spill] sm:$0xff] %v10219_v62  ;;  %3256 = vperm.xlu0 %8513, %v9682_v31   ;;  %v10257_v17 = vpop.permute.xlu2 %2985  ;;  %v15362_v31 = vld [vmem:[#allocation71_spill] sm:$0xff]  ;;  %v10307_v43 = vmul.f32 %v10249_v26, %v1773_v55  ;;  %v2014_v55 = vmul.f32 %v10273_v58, %v15380_v36 }
 0x308   : > { %357 = vst.msk [vmem:[#allocation5 + $0x8] sm:$0xff] %vm342_vm10, %v15295_v42  ;;  %v1745_v63 = vmul.f32 %v9993_v24, %v15362_v31  ;;  %v10277_v23 = vpop.permute.xlu1 %2935  ;;  %v10295_v24 = vadd.f32 %v1746_v30, %v10066_v20  ;;  %v10310_v31 = vadd.f32 %v1742_v39, %v9970_v40  ;;  %v15376_v30 = vld [vmem:[#allocation70_spill] sm:$0xff]  ;;  %v15378_v20 = vld [vmem:[#allocation73_spill] sm:$0xff]  ;;  %v10329_v40 = vmul.f32 %v10273_v58, %v15379_v9  ;;  %v15381_v39 = vld [vmem:[#allocation79_spill] sm:$0xff] }
 0x309   : > { %15351 = vst [vmem:[#allocation40_spill] sm:$0xff] %v10228_v22  ;;  %v10289_v60 = vpop.permute.xlu0 %2945  ;;  %v2016_v1 = vmul.f32 %v10273_v58, %v15376_v30  ;;  %v2019_v7 = vmul.f32 %v10273_v58, %v15378_v20  ;;  %v10335_v0 = vmul.f32 %v10273_v58, %v15381_v39  ;;  %v2015_v30 = vmul.f32 %v10273_v58, %v15382_v51  ;;  %v15389_v51 = vld [vmem:[#allocation86_spill] sm:$0xff]  ;;  %v15406_v62 = vld [vmem:[#allocation99_spill] sm:$0xff] }
 0x30a   : > { %358 = vst.msk [vmem:[#allocation5 + $0x10] sm:$0xff] %vm342_vm10, %v15295_v42  ;;  %v10323_v15 = vadd.f32 %v1745_v63, %v9997_v41  ;;  %v2017_v41 = vmul.f32 %v10273_v58, %v15383_v5  ;;  %v15384_v63 = vld [vmem:[#allocation82_spill] sm:$0xff]  ;;  %v2018_v9 = vmul.f32 %v10273_v58, %v15385_v46  ;;  %v2021_v27 = vmul.f32 %v10273_v58, %v15389_v51  ;;  %v15390_v5 = vld [vmem:[#allocation87_spill] sm:$0xff]  ;;  %v15392_v46 = vld [vmem:[#allocation100_spill] sm:$0xff] }
 0x30b   : > { %15354 = vst [vmem:[#allocation37_spill] sm:$0xff] %v10240_v34  ;;  %v10343_v20 = vmul.f32 %v10273_v58, %v15384_v63  ;;  %v15387_v34 = vld [vmem:[#allocation85_spill] sm:$0xff]  ;;  %v2023_v38 = vmul.f32 %v10273_v58, %v15390_v5  ;;  %v15391_v63 = vld [vmem:[#allocation88_spill] sm:$0xff]  ;;  %v15397_v5 = vld [vmem:[#allocation103_spill] sm:$0xff] }
 0x30c   : > { %359 = vst.msk [vmem:[#allocation5 + $0x118] sm:$0xff] %vm342_vm10, %v15295_v42  ;;  %v10351_v39 = vmul.f32 %v10273_v58, %v15387_v34  ;;  %v2246_v22 = vmul.f32 %v10318_v28, %v15397_v5  ;;  %v15405_v5 = vld [vmem:[#allocation98_spill] sm:$0xff] }
 0x30d   : > { %15355 = vst [vmem:[#allocation38_spill] sm:$0xff] %v10249_v26  ;;  %v15386_v26 = vld [vmem:[#allocation84_spill] sm:$0xff] }
 0x30e   : > { %15358 = vst [vmem:[#allocation39_spill] sm:$0xff] %v10257_v17  ;;  %v2020_v36 = vmul.f32 %v10273_v58, %v15386_v26  ;;  %3261 = vperm.xlu1 %8514, %v15388_v11   ;;  %v15395_v17 = vld [vmem:[#allocation90_spill] sm:$0xff]  ;;  %v10410_v53 = vadd.f32 %v2246_v22, %v2017_v41  ;;  %v2248_v22 = vmul.f32 %v10318_v28, %v15417_v19  ;;  %v15418_v41 = vld [vmem:[#allocation117_spill] sm:$0xff] }
 0x30f   : > { %360 = vst.msk [vmem:[#allocation5 + $0x120] sm:$0xff] %vm342_vm10, %v15295_v42  ;;  %v10364_v26 = vpop.permute.xlu2 %3000  ;;  %v2026_v11 = vmul.f32 %v10273_v58, %v15395_v17  ;;  %v2252_v17 = vmul.f32 %v10318_v28, %v15402_v13  ;;  %v2254_v19 = vmul.f32 %v10318_v28, %v15423_v54  ;;  %v15428_v54 = vld [vmem:[#allocation125_spill] sm:$0xff] }
 0x310   : > { %15359 = vst [vmem:[#allocation41_spill] sm:$0xff] %v10262_v56  ;;  %v15401_v56 = vld [vmem:[#allocation106_spill] sm:$0xff] }
 0x311   : > { %15360 = vst [vmem:[#allocation46_spill] sm:$0xff] %v10268_v50 }
 0x312   : > { %15361 = vst [vmem:[#allocation43_spill] sm:$0xff] %v10273_v58 }
 0x313   : > { %15363 = vst [vmem:[#allocation47_spill] sm:$0xff] %v10277_v23  ;;  %v15407_v23 = vld [vmem:[#allocation101_spill] sm:$0xff] }
 0x314   : > { %361 = vst.msk [vmem:[#allocation5 + $0x128] sm:$0xff] %vm342_vm10, %v15295_v42 }
 0x315   : > { %15364 = vst [vmem:[#allocation48_spill] sm:$0xff] %v10282_v57  ;;  %v2243_v57 = vmul.f32 %v10318_v28, %v15392_v46 }
 0x316   : > { %15365 = vst [vmem:[#allocation53_spill] sm:$0xff] %v10285_v16  ;;  %v15425_v16 = vld [vmem:[#allocation123_spill] sm:$0xff] }
 0x317   : > { %15366 = vst [vmem:[#allocation54_spill] sm:$0xff] %v10289_v60  ;;  %v10360_v60 = vmul.f32 %v10273_v58, %v15391_v63  ;;  %v10376_v63 = vpop.permute.xlu1 %2950  ;;  %v10398_v59 = vadd.f32 %v2243_v57, %v2014_v55  ;;  %v15415_v55 = vld [vmem:[#allocation114_spill] sm:$0xff] }
 0x318   : > { %15367 = vst [vmem:[#allocation49_spill] sm:$0xff] %v10292_v2 }
 0x319   : > { %15368 = vst [vmem:[#allocation50_spill] sm:$0xff] %v10295_v24 }
 0x31a   : > { %15369 = vst [vmem:[#allocation51_spill] sm:$0xff] %v10298_v47  ;;  %v10386_v47 = vpop.permute.xlu0 %2960 }
 0x31b   : > { %15370 = vst [vmem:[#allocation52_spill] sm:$0xff] %v10301_v49  ;;  %v10439_v49 = vpop.permute.xlu2 %3015 }
 0x31c   : > { %15371 = vst [vmem:[#allocation58_spill] sm:$0xff] %v10304_v35  ;;  %v15399_v35 = vld [vmem:[#allocation92_spill] sm:$0xff] }
 0x31d   : > { %15372 = vst [vmem:[#allocation59_spill] sm:$0xff] %v10307_v43  ;;  %v2027_v46 = vmul.f32 %v10273_v58, %v15399_v35  ;;  %v2035_v35 = vmul.f32 %v10273_v58, %v15406_v62  ;;  %v15413_v62 = vld [vmem:[#allocation112_spill] sm:$0xff] }
 0x31e   : > { %15373 = vst [vmem:[#allocation60_spill] sm:$0xff] %v10310_v31  ;;  %v15396_v31 = vld [vmem:[#allocation91_spill] sm:$0xff]  ;;  %v2255_v52 = vmul.f32 %v10318_v28, %v15413_v62  ;;  %v15419_v62 = vld [vmem:[#allocation118_spill] sm:$0xff] }
 0x31f   : > { %15374 = vst [vmem:[#allocation65_spill] sm:$0xff] %v10313_v25  ;;  %v10372_v51 = vmul.f32 %v10273_v58, %v15396_v31  ;;  %v15404_v31 = vld [vmem:[#allocation96_spill] sm:$0xff]  ;;  %v2033_v25 = vmul.f32 %v10273_v58, %v15405_v5  ;;  %v2261_v12 = vmul.f32 %v10318_v28, %v15419_v62 }
 0x320   : > { %15375 = vst [vmem:[#allocation55_spill] sm:$0xff] %v10318_v28  ;;  %v2032_v24 = vmul.f32 %v10273_v58, %v15404_v31  ;;  %v15412_v31 = vld [vmem:[#allocation111_spill] sm:$0xff] }
 0x321   : > { %15377 = vst [vmem:[#allocation66_spill] sm:$0xff] %v10323_v15  ;;  %v15394_v15 = vld [vmem:[#allocation89_spill] sm:$0xff]  ;;  %v2244_v5 = vmul.f32 %v10318_v28, %v15412_v31  ;;  %v2250_v31 = vmul.f32 %v10318_v28, %v15418_v41  ;;  %v10441_v41 = vadd.f32 %v2255_v52, %v2026_v11  ;;  %v2257_v52 = vmul.f32 %v10318_v28, %v15428_v54  ;;  %v15429_v11 = vld [vmem:[#allocation128_spill] sm:$0xff] }
 0x322   : > { %15393 = vst [vmem:[#allocation56_spill] sm:$0xff] %v10364_v26  ;;  %v2024_v34 = vmul.f32 %v10273_v58, %v15394_v15  ;;  %v2029_v26 = vmul.f32 %v10273_v58, %v15400_v6  ;;  %v2249_v15 = vmul.f32 %v10318_v28, %v15401_v56  ;;  %v10396_v6 = vmul.f32 %v10273_v58, %v15407_v23  ;;  %v15409_v56 = vld [vmem:[#allocation102_spill] sm:$0xff]  ;;  %v15414_v23 = vld [vmem:[#allocation113_spill] sm:$0xff] }
 0x323   : > { %15398 = vst [vmem:[#allocation57_spill] sm:$0xff] %v10376_v63  ;;  %v10402_v13 = vmul.f32 %v10273_v58, %v15409_v56  ;;  %v2245_v57 = vmul.f32 %v10318_v28, %v15414_v23  ;;  %v15420_v23 = vld [vmem:[#allocation119_spill] sm:$0xff]  ;;  %v10475_v54 = vadd.f32 %v2254_v19, %v10335_v0 }
 0x324   : > { %15403 = vst [vmem:[#allocation61_spill] sm:$0xff] %v10386_v47  ;;  %v15411_v47 = vld [vmem:[#allocation104_spill] sm:$0xff]  ;;  %v10418_v56 = vadd.f32 %v2249_v15, %v2020_v36  ;;  %v2251_v43 = vmul.f32 %v10318_v28, %v15420_v23  ;;  %v428_v36 = vadd.s32 8, %v9879_v21  ;;  %v2276_v15 = vadd.f32 %v2244_v5, %v2015_v30  ;;  %v10448_v30 = vld [vmem:[%s14975_s1 + $0x7] ss:$0 sm:$0xff]  ;;  %v10450_v5 = vpop.permute.xlu1 %2965 }
 0x325   : > { %15408 = vst [vmem:[#allocation62_spill] sm:$0xff] %v10396_v6  ;;  %v10406_v63 = vmul.f32 %v10273_v58, %v15411_v47  ;;  %v2247_v6 = vmul.f32 %v10318_v28, %v15415_v55  ;;  %v15416_v47 = vld [vmem:[#allocation115_spill] sm:$0xff]  ;;  %v15422_v55 = vld [vmem:[#allocation121_spill] sm:$0xff]  ;;  %v2277_v62 = vadd.f32 %v2245_v57, %v2016_v1  ;;  %v2256_v23 = vmul.f32 %v10318_v28, %v15425_v16 }
 0x326   : > { %15410 = vst [vmem:[#allocation63_spill] sm:$0xff] %v10402_v13  ;;  %v10420_v13 = vadd.f32 %v2252_v17, %v2023_v38  ;;  %v2258_v58 = vmul.f32 %v10318_v28, %v15416_v47  ;;  %v15421_v38 = vld [vmem:[#allocation120_spill] sm:$0xff]  ;;  %v2264_v47 = vmul.f32 %v10318_v28, %v15422_v55  ;;  %v10454_v55 = vadd.f32 %v2248_v22, %v2019_v7 }
 0x327   : > { %v2253_v17 = vmul.f32 %v10318_v28, %v15421_v38  ;;  %15424 = vst [vmem:[#allocation68_spill] sm:$0xff] %v10439_v49  ;;  %v2279_v2 = vadd.f32 %v2247_v6, %v2018_v9  ;;  %v2260_v1 = vmul.f32 %v10318_v28, %v15429_v11  ;;  %v10460_v9 = vpop.permute.xlu0 %2975  ;;  %v2282_v16 = vadd.f32 %v2250_v31, %v2021_v27  ;;  %v15433_v11 = vld [vmem:[#allocation129_spill] sm:$0xff] }
 0x328   : > { %15426 = vst [vmem:[#allocation69_spill] sm:$0xff] %v10450_v5  ;;  %v10452_v38 = vadd.f32 %v2258_v58, %v2029_v26  ;;  %v10462_v6 = vadd.f32 %v2261_v12, %v2032_v24  ;;  %v10465_v57 = vadd.f32 %v2251_v43, %v10329_v40  ;;  %v10470_v58 = vld [vmem:[%s14975_s1 + $0x5] ss:$0 sm:$0xff]  ;;  %v470_v7 = vand.u32 15, %v428_v36  ;;  %v15434_v24 = vld [vmem:[#allocation124_spill] sm:$0xff]  ;;  %v15436_v40 = vld [vmem:[#allocation133_spill] sm:$0xff] }
 0x329   : > { %15430 = vst [vmem:[#allocation70_spill] sm:$0xff] %v10460_v9  ;;  %v2285_v26 = vadd.f32 %v2253_v17, %v2024_v34  ;;  %v10472_v22 = vadd.f32 %v2264_v47, %v2035_v35  ;;  %v2262_v27 = vmul.f32 %v10318_v28, %v15433_v11  ;;  %v2288_v12 = vadd.f32 %v2256_v23, %v2027_v46  ;;  %v10488_v34 = vld [vmem:[%s14975_s1 + $0x2] ss:$0 sm:$0xff]  ;;  %v15437_v35 = vld [vmem:[#allocation208_spill] sm:$0xff]  ;;  %v10495_v36 = vld [vmem:[%s14975_s1 + $0x8] ss:$0 sm:$0xff] }
 0x32a   : > { %15427 = vst [vmem:[#allocation71_spill] sm:$0xff] %v10452_v38  ;;  %v10481_v43 = vmul.f32 %v10318_v28, %v15434_v24  ;;  %v2505_v31 = vmul.f32 %v10448_v30, %v15436_v40  ;;  %v3027_v0 = vmul.f32 %v10470_v58, %v15437_v35  ;;  %v10498_v46 = vadd.f32 %v2257_v52, %v10343_v20  ;;  %v15438_v47 = vld [vmem:[#allocation131_spill] sm:$0xff]  ;;  %v15439_v23 = vld [vmem:[#allocation136_spill] sm:$0xff]  ;;  %v15440_v24 = vld [vmem:[#allocation134_spill] sm:$0xff] }
 0x32b   : > { %15431 = vst [vmem:[#allocation73_spill] sm:$0xff] %v10462_v6  ;;  %v10501_v17 = vadd.f32 %v2260_v1, %v10351_v39  ;;  %v2263_v19 = vmul.f32 %v10318_v28, %v15438_v47  ;;  %v2508_v11 = vmul.f32 %v10448_v30, %v15439_v23  ;;  %v2266_v40 = vmul.f32 %v10318_v28, %v15440_v24  ;;  %v15441_v35 = vld [vmem:[#allocation139_spill] sm:$0xff]  ;;  %v15442_v9 = vld [vmem:[#allocation177_spill] sm:$0xff]  ;;  %v15443_v39 = vld [vmem:[#allocation132_spill] sm:$0xff]  ;;  %v3132_v24 = vpop.permute.xlu2 %3131 }
 0x32c   : > { %15432 = vst [vmem:[#allocation76_spill] sm:$0xff] %v10472_v22  ;;  %v2511_v49 = vmul.f32 %v10448_v30, %v15441_v35  ;;  %vm940_vm14 = vcmp.ne.s32.totalorder %v470_v7, 15  ;;  %v10513_v20 = vadd.f32 %v2262_v27, %v2033_v25  ;;  %v10517_v52 = vmul.f32 %v10318_v28, %v15443_v39  ;;  %v15445_v1 = vld [vmem:[#allocation142_spill] sm:$0xff]  ;;  %v15446_v23 = vld [vmem:[#allocation143_spill] sm:$0xff]  ;;  %v10526_v25 = vpop.permute.xlu1 %2980  ;;  %v15448_v27 = vld [vmem:[#allocation144_spill] sm:$0xff] }
 0x32d   : > { %15435 = vst [vmem:[#allocation78_spill] sm:$0xff] %v10481_v43  ;;  %v2798_v43 = vmul.f32 %v10488_v34, %v15442_v9  ;;  %v2514_v47 = vmul.f32 %v10448_v30, %v15445_v1  ;;  %v2504_v22 = vmul.f32 %v10448_v30, %v15446_v23  ;;  %v2537_v6 = vadd.f32 %v2505_v31, %v2276_v15  ;;  %v15447_v5 = vld [vmem:[#allocation135_spill] sm:$0xff] }
 0x32e   : > { %15444 = vst [vmem:[#allocation79_spill] sm:$0xff] %v10517_v52  ;;  %v2268_v35 = vmul.f32 %v10318_v28, %v15447_v5  ;;  %v3288_v9 = vmul.f32 %v10495_v36, %v3132_v24  ;;  %v2540_v7 = vadd.f32 %v2508_v11, %v2279_v2  ;;  %v2506_v39 = vmul.f32 %v10448_v30, %v15448_v27  ;;  %v15449_v52 = vld [vmem:[#allocation145_spill] sm:$0xff]  ;;  %v15452_v11 = vld [vmem:[#allocation146_spill] sm:$0xff] }
 0x32f   : > { %v3059_v38 = vadd.f32 %v3027_v0, %v2798_v43  ;;  %v2517_v1 = vmul.f32 %v10448_v30, %v15449_v52  ;;  %v10533_v50 = vsel %vm940_vm14, 1.0, %v15295_v42  ;;  %v10535_v23 = vpop.permute.xlu0 %2990  ;;  %v10538_v15 = vadd.f32 %v2263_v19, %v10360_v60  ;;  %v15453_v52 = vld [vmem:[#allocation147_spill] sm:$0xff] }
 0x330   : > { %15450 = vst [vmem:[#allocation80_spill] sm:$0xff] %v10533_v50  ;;  %v10541_v5 = vadd.f32 %v2266_v40, %v10372_v51  ;;  %v2543_v43 = vadd.f32 %v2511_v49, %v2282_v16  ;;  %v2546_v2 = vadd.f32 %v2514_v47, %v2285_v26  ;;  %v2536_v0 = vadd.f32 %v2504_v22, %v10398_v59  ;;  %v10557_v49 = vld [vmem:[%s14976_s2] ss:$0 sm:$0xff]  ;;  %v15454_v26 = vld [vmem:[#allocation149_spill] sm:$0xff] }
 0x331   : > { %15451 = vst [vmem:[#allocation81_spill] sm:$0xff] %v10535_v23  ;;  %v3320_v31 = vadd.f32 %v3288_v9, %v3059_v38  ;;  %v2507_v24 = vmul.f32 %v10448_v30, %v15452_v11  ;;  %v2509_v27 = vmul.f32 %v10448_v30, %v15453_v52  ;;  %v2569_v28 = vadd.f32 %v2537_v6, %v10050_v14  ;;  %v15455_v6 = vld [vmem:[#allocation180_spill] sm:$0xff] }
 0x332   : > { %v10550_v23 = vadd.f32 %v2268_v35, %v10406_v63  ;;  %v3030_v60 = vmul.f32 %v10470_v58, %v9960_v3  ;;  %v2572_v51 = vadd.f32 %v2540_v7, %v10078_v8  ;;  %v2538_v38 = vadd.f32 %v2506_v39, %v2277_v62  ;;  %v15456_v35 = vld [vmem:[#allocation150_spill] sm:$0xff] }
 0x333   : > { %v3352_v59 = vmul.f32 %v10533_v50, %v3320_v31  ;;  %v2549_v16 = vadd.f32 %v2517_v1, %v2288_v12  ;;  %v2510_v14 = vmul.f32 %v10448_v30, %v15454_v26  ;;  %v10564_v63 = vadd.f32 %v2543_v43, %v10097_v18  ;;  %v3147_v12 = vpop.permute.xlu2 %3146  ;;  %v15458_v31 = vld [vmem:[#allocation153_spill] sm:$0xff] }
 0x334   : > { %v2801_v3 = vmul.f32 %v10488_v34, %v15455_v6  ;;  %v434_v19 = vadd.s32 56, %v9879_v21  ;;  %v10570_v40 = vadd.f32 %v2546_v2, %v10119_v61  ;;  %v10573_v47 = vadd.f32 %v2536_v0, %v10142_v45  ;;  %v10581_v39 = vpop.permute.xlu1 %2995 }
 0x335   : > { %v3384_v22 = vadd.f32 %v3352_v59, %v2569_v28  ;;  %v2539_v8 = vadd.f32 %v2507_v24, %v10410_v53  ;;  %v2541_v62 = vadd.f32 %v2509_v27, %v10454_v55  ;;  %v2512_v18 = vmul.f32 %v10448_v30, %v15456_v35  ;;  %v15457_v55 = vld [vmem:[#allocation152_spill] sm:$0xff] }
 0x336   : > { %v3062_v9 = vadd.f32 %v3030_v60, %v2801_v3  ;;  %v3291_v28 = vmul.f32 %v10495_v36, %v3147_v12  ;;  %v10584_v61 = vadd.f32 %v2538_v38, %v10156_v32  ;;  %v10587_v45 = vadd.f32 %v2549_v16, %v10159_v37  ;;  %v15459_v37 = vld [vmem:[#allocation155_spill] sm:$0xff]  ;;  %v15460_v27 = vld [vmem:[#allocation156_spill] sm:$0xff]  ;;  %v15465_v12 = vld [vmem:[#allocation157_spill] sm:$0xff] }
 0x337   : > { %v3420_v7 = vadd.f32 %v10557_v49, %v3384_v22  ;;  %v2542_v53 = vadd.f32 %v2510_v14, %v10418_v56  ;;  %v2513_v1 = vmul.f32 %v10448_v30, %v15457_v55  ;;  %v10592_v43 = vpop.permute.xlu0 %3005  ;;  %v2515_v2 = vmul.f32 %v10448_v30, %v15458_v31  ;;  %v15461_v38 = vld [vmem:[#allocation159_spill] sm:$0xff]  ;;  %v15463_v22 = vld [vmem:[#allocation162_spill] sm:$0xff] }
 0x338   : > { %v3323_v11 = vadd.f32 %v3291_v28, %v3062_v9  ;;  %v512_v24 = vand.u32 15, %v434_v19  ;;  %v10597_v52 = vadd.f32 %v2539_v8, %v10173_v44  ;;  %v10600_v32 = vadd.f32 %v2541_v62, %v10176_v33  ;;  %v15462_v14 = vld [vmem:[#allocation151_spill] sm:$0xff] }
 0x339   : > { %v3452_v0 = vmax.f32 %v3420_v7, 0.0  ;;  %v2516_v56 = vmul.f32 %v10448_v30, %v15459_v37  ;;  %v2518_v60 = vmul.f32 %v10448_v30, %v15460_v27  ;;  %v2544_v59 = vadd.f32 %v2512_v18, %v10465_v57  ;;  %v15464_v8 = vld [vmem:[#allocation183_spill] sm:$0xff]  ;;  %v15466_v18 = vld [vmem:[#allocation158_spill] sm:$0xff]  ;;  %v15470_v37 = vld [vmem:[#allocation53_spill] sm:$0xff] }
 0x33a   : > { %v2521_v16 = vmul.f32 %v10448_v30, %v15461_v38  ;;  %v3033_v26 = vmul.f32 %v10470_v58, %v10033_v4  ;;  %v3387_v44 = vadd.f32 %v3323_v11, %v2572_v51  ;;  %v10613_v33 = vadd.f32 %v2542_v53, %v10190_v10  ;;  %v15473_v38 = vld [vmem:[#allocation71_spill] sm:$0xff] }
 0x33b   : > { %3484 = vst.msk [vmem:[#allocation3 + $0x20] sm:$0xff] %vm342_vm10, %v3452_v0  ;;  %v2523_v6 = vmul.f32 %v10448_v30, %v15462_v14  ;;  %v2545_v3 = vadd.f32 %v2513_v1, %v10420_v13  ;;  %v2524_v57 = vmul.f32 %v10448_v30, %v15463_v22  ;;  %v2547_v19 = vadd.f32 %v2515_v2, %v10475_v54  ;;  %v3162_v9 = vpop.permute.xlu2 %3161  ;;  %v15468_v0 = vld [vmem:[#allocation46_spill] sm:$0xff]  ;;  %v15475_v14 = vld [vmem:[#allocation25_spill] sm:$0xff]  ;;  %v15476_v22 = vld [vmem:[#allocation59_spill] sm:$0xff] }
 0x33c   : > { %v2804_v62 = vmul.f32 %v10488_v34, %v15464_v8  ;;  %v3423_v4 = vadd.f32 %v10557_v49, %v3387_v44  ;;  %vm946_vm15 = vcmp.ne.s32.totalorder %v512_v24, 15  ;;  %v2548_v51 = vadd.f32 %v2516_v56, %v10441_v41  ;;  %v10632_v55 = vpop.permute.xlu1 %3010  ;;  %v15469_v24 = vld [vmem:[#allocation166_spill] sm:$0xff]  ;;  %v15478_v8 = vld [vmem:[#allocation15_spill] sm:$0xff] }
 0x33d   : > { %v2550_v10 = vadd.f32 %v2518_v60, %v10498_v46  ;;  %v2529_v35 = vmul.f32 %v10448_v30, %v15465_v12  ;;  %v2519_v13 = vmul.f32 %v10448_v30, %v15466_v18  ;;  %v2553_v7 = vadd.f32 %v2521_v16, %v10501_v17 }
 0x33e   : > { %v3065_v54 = vadd.f32 %v3033_v26, %v2804_v62  ;;  %v3455_v28 = vmax.f32 %v3423_v4, 0.0  ;;  %v3294_v53 = vmul.f32 %v10495_v36, %v3162_v9  ;;  %v10635_v1 = vadd.f32 %v2544_v59, %v10201_v48  ;;  %v15474_v26 = vld [vmem:[#allocation52_spill] sm:$0xff] }
 0x33f   : > { %v10638_v41 = vadd.f32 %v2523_v6, %v10513_v20  ;;  %v2556_v46 = vadd.f32 %v2524_v57, %v10538_v15  ;;  %v10642_v31 = vsel %vm946_vm15, 1.0, %v15295_v42  ;;  %v10644_v2 = vpop.permute.xlu0 %3020  ;;  %v10647_v17 = vadd.f32 %v2545_v3, %v10265_v29  ;;  %v15471_v15 = vld [vmem:[#allocation49_spill] sm:$0xff] }
 0x340   : > { %15467 = vst [vmem:[#allocation82_spill] sm:$0xff] %v10642_v31  ;;  %v10650_v11 = vadd.f32 %v2547_v19, %v15468_v0  ;;  %v2527_v48 = vmul.f32 %v10448_v30, %v15469_v24  ;;  %v3326_v20 = vadd.f32 %v3294_v53, %v3065_v54  ;;  %v10656_v56 = vadd.f32 %v2548_v51, %v15470_v37  ;;  %v15472_v29 = vld [vmem:[#allocation197_spill] sm:$0xff]  ;;  %v15477_v19 = vld [vmem:[#allocation175_spill] sm:$0xff]  ;;  %v15483_v37 = vld [vmem:[#allocation200_spill] sm:$0xff] }
 0x341   : > { %3487 = vst.msk [vmem:[#allocation3 + $0x38] sm:$0xff] %vm342_vm10, %v3455_v28  ;;  %v10659_v27 = vadd.f32 %v2550_v10, %v15471_v15  ;;  %v10662_v60 = vadd.f32 %v2529_v35, %v10550_v23  ;;  %v3026_v59 = vmul.f32 %v10470_v58, %v15472_v29  ;;  %v10667_v16 = vadd.f32 %v2519_v13, %v15473_v38  ;;  %v15479_v10 = vld [vmem:[#allocation186_spill] sm:$0xff]  ;;  %v15480_v13 = vld [vmem:[#allocation167_spill] sm:$0xff]  ;;  %v15482_v28 = vld [vmem:[#allocation173_spill] sm:$0xff] }
 0x342   : > { %v10670_v44 = vadd.f32 %v2553_v7, %v15474_v26  ;;  %v3036_v6 = vmul.f32 %v10470_v58, %v15475_v14  ;;  %v3358_v3 = vmul.f32 %v10642_v31, %v3326_v20  ;;  %v10676_v57 = vadd.f32 %v2556_v46, %v15476_v22  ;;  %v15481_v7 = vld [vmem:[#allocation170_spill] sm:$0xff] }
 0x343   : > { %v2797_v23 = vmul.f32 %v10488_v34, %v15477_v19  ;;  %v3028_v62 = vmul.f32 %v10470_v58, %v15478_v8  ;;  %v440_v4 = vadd.s32 104, %v9879_v21  ;;  %v10684_v51 = vadd.f32 %v2527_v48, %v10541_v5  ;;  %v3177_v5 = vpop.permute.xlu2 %3176  ;;  %v15484_v19 = vld [vmem:[#allocation178_spill] sm:$0xff]  ;;  %v15485_v8 = vld [vmem:[#allocation16_spill] sm:$0xff] }
 0x344   : > { %v2807_v12 = vmul.f32 %v10488_v34, %v15479_v10  ;;  %v3390_v35 = vadd.f32 %v3358_v3, %v10564_v63  ;;  %v430_v18 = vadd.s32 24, %v9879_v21  ;;  %v2799_v9 = vmul.f32 %v10488_v34, %v15480_v13  ;;  %v3127_v63 = vpop.permute.xlu1 %3126 }
 0x345   : > { %v2802_v54 = vmul.f32 %v10488_v34, %v15481_v7  ;;  %v10696_v53 = vmul.f32 %v10488_v34, %v15482_v28  ;;  %v3058_v46 = vadd.f32 %v3026_v59, %v2797_v23  ;;  %v3297_v48 = vmul.f32 %v10495_v36, %v3177_v5  ;;  %v15488_v28 = vld [vmem:[#allocation189_spill] sm:$0xff] }
 0x346   : > { %v3068_v0 = vadd.f32 %v3036_v6, %v2807_v12  ;;  %v3426_v24 = vadd.f32 %v10557_v49, %v3390_v35  ;;  %v432_v20 = vadd.s32 40, %v9879_v21  ;;  %v3029_v15 = vmul.f32 %v10470_v58, %v15483_v37  ;;  %v15486_v12 = vld [vmem:[#allocation33_spill] sm:$0xff] }
 0x347   : > { %v3060_v29 = vadd.f32 %v3028_v62, %v2799_v9  ;;  %v3287_v38 = vmul.f32 %v10495_v36, %v3127_v63  ;;  %v3137_v26 = vpop.permute.xlu0 %3136  ;;  %v554_v14 = vand.u32 15, %v440_v4  ;;  %v484_v6 = vand.u32 15, %v430_v18  ;;  %v15487_v62 = vld [vmem:[#allocation176_spill] sm:$0xff] }
 0x348   : > { %v3458_v3 = vmax.f32 %v3426_v24, 0.0  ;;  %v3329_v22 = vadd.f32 %v3297_v48, %v3068_v0  ;;  %v3289_v59 = vmul.f32 %v10495_v36, %v3137_v26  ;;  %v2800_v23 = vmul.f32 %v10488_v34, %v15484_v19 }
 0x349   : > { %v3031_v10 = vmul.f32 %v10470_v58, %v15485_v8  ;;  %v3039_v35 = vmul.f32 %v10470_v58, %v15486_v12  ;;  %v3319_v13 = vadd.f32 %v3287_v38, %v3058_v46  ;;  %v10713_v9 = vmul.f32 %v10488_v34, %v15487_v62  ;;  %v15495_v62 = vld [vmem:[#allocation57_spill] sm:$0xff] }
 0x34a   : > { %3490 = vst.msk [vmem:[#allocation3 + $0x50] sm:$0xff] %vm342_vm10, %v3458_v3  ;;  %v3393_v4 = vadd.f32 %v3329_v22, %v10570_v40  ;;  %v3321_v7 = vadd.f32 %v3289_v59, %v3060_v29  ;;  %v498_v18 = vand.u32 15, %v432_v20  ;;  %v2810_v5 = vmul.f32 %v10488_v34, %v15488_v28  ;;  %v15491_v40 = vld [vmem:[#allocation203_spill] sm:$0xff] }
 0x34b   : > { %v3061_v0 = vadd.f32 %v3029_v15, %v2800_v23  ;;  %v3383_v24 = vadd.f32 %v3319_v13, %v10573_v47  ;;  %vm10720_vm1 = vcmp.ne.s32.totalorder %v554_v14, 15  ;;  %vm942_vm2 = vcmp.ne.s32.totalorder %v484_v6, 15  ;;  %v3192_v26 = vpop.permute.xlu2 %3191  ;;  %v15497_v28 = vld [vmem:[#allocation179_spill] sm:$0xff] }
 0x34c   : > { %v3429_v46 = vadd.f32 %v10557_v49, %v3393_v4  ;;  %v3385_v63 = vadd.f32 %v3321_v7, %v10584_v61  ;;  %v444_v37 = vadd.s32 136, %v9879_v21  ;;  %v3032_v20 = vmul.f32 %v10470_v58, %v15491_v40  ;;  %v3142_v22 = vpop.permute.xlu1 %3141 }
 0x34d   : > { %v3063_v29 = vadd.f32 %v3031_v10, %v2802_v54  ;;  %v3071_v38 = vadd.f32 %v3039_v35, %v2810_v5  ;;  %v3419_v15 = vadd.f32 %v10557_v49, %v3383_v24  ;;  %v3300_v3 = vmul.f32 %v10495_v36, %v3192_v26  ;;  %v15494_v35 = vld [vmem:[#allocation22_spill] sm:$0xff]  ;;  %v15498_v24 = vld [vmem:[#allocation181_spill] sm:$0xff] }
 0x34e   : > { %v3461_v47 = vmax.f32 %v3429_v46, 0.0  ;;  %v3421_v14 = vadd.f32 %v10557_v49, %v3385_v63  ;;  %vm944_vm3 = vcmp.ne.s32.totalorder %v498_v18, 15  ;;  %v10735_v61 = vsel %vm10720_vm1, 1.0, %v15295_v42 }
 0x34f   : > { %v3451_v59 = vmax.f32 %v3419_v15, 0.0  ;;  %15492 = vst [vmem:[#allocation83_spill] sm:$0xff] %v10735_v61  ;;  %v10738_v6 = vsel %vm942_vm2, 1.0, %v15295_v42  ;;  %v3290_v54 = vmul.f32 %v10495_v36, %v3142_v22  ;;  %v3152_v19 = vpop.permute.xlu0 %3151  ;;  %v3332_v8 = vadd.f32 %v3300_v3, %v3071_v38  ;;  %v15500_v38 = vld [vmem:[#allocation184_spill] sm:$0xff]  ;;  %v15501_v22 = vld [vmem:[#allocation206_spill] sm:$0xff] }
 0x350   : > { %15493 = vst [vmem:[#allocation84_spill] sm:$0xff] %v10738_v6  ;;  %v3453_v23 = vmax.f32 %v3421_v14, 0.0  ;;  %v3292_v10 = vmul.f32 %v10495_v36, %v3152_v19  ;;  %v582_v12 = vand.u32 15, %v444_v37  ;;  %v3034_v13 = vmul.f32 %v10470_v58, %v15494_v35  ;;  %v15499_v37 = vld [vmem:[#allocation182_spill] sm:$0xff] }
 0x351   : > { %3493 = vst.msk [vmem:[#allocation3 + $0x68] sm:$0xff] %vm342_vm10, %v3461_v47  ;;  %v3043_v4 = vmul.f32 %v10470_v58, %v15495_v62  ;;  %v3322_v7 = vadd.f32 %v3290_v54, %v3061_v0  ;;  %v10749_v18 = vsel %vm944_vm3, 1.0, %v15295_v42  ;;  %v10753_v5 = vmul.f32 %v10488_v34, %v15497_v28 }
 0x352   : > { %3483 = vst.msk [vmem:[#allocation3 + $0x18] sm:$0xff] %vm342_vm10, %v3451_v59  ;;  %v2803_v48 = vmul.f32 %v10488_v34, %v15498_v24  ;;  %v3364_v46 = vmul.f32 %v10735_v61, %v3332_v8  ;;  %v3324_v63 = vadd.f32 %v3292_v10, %v3063_v29  ;;  %v2814_v40 = vmul.f32 %v10488_v34, %v15499_v37  ;;  %v15503_v24 = vld [vmem:[#allocation32_spill] sm:$0xff] }
 0x353   : > { %15496 = vst [vmem:[#allocation85_spill] sm:$0xff] %v10749_v18  ;;  %v2806_v0 = vmul.f32 %v10488_v34, %v15500_v38  ;;  %v3354_v15 = vmul.f32 %v10738_v6, %v3322_v7  ;;  %v436_v26 = vadd.s32 72, %v9879_v21  ;;  %vm956_vm4 = vcmp.ne.s32.totalorder %v582_v12, 15 }
 0x354   : > { %3485 = vst.msk [vmem:[#allocation3 + $0x28] sm:$0xff] %vm342_vm10, %v3453_v23  ;;  %v3064_v47 = vadd.f32 %v3032_v20, %v2803_v48  ;;  %v3396_v14 = vadd.f32 %v3364_v46, %v10587_v45  ;;  %v3356_v3 = vmul.f32 %v10749_v18, %v3324_v63  ;;  %v3035_v59 = vmul.f32 %v10470_v58, %v15501_v22  ;;  %v3212_v23 = vpop.permute.xlu2 %3211  ;;  %v3157_v35 = vpop.permute.xlu1 %3156  ;;  %v15504_v46 = vld [vmem:[#allocation69_spill] sm:$0xff] }
 0x355   : > { %v3066_v29 = vadd.f32 %v3034_v13, %v10696_v53  ;;  %v3075_v54 = vadd.f32 %v3043_v4, %v2814_v40  ;;  %v3386_v19 = vadd.f32 %v3354_v15, %v10597_v52  ;;  %v3304_v20 = vmul.f32 %v10495_v36, %v3212_v23 }
 0x356   : > { %v3432_v8 = vadd.f32 %v10557_v49, %v3396_v14  ;;  %v3388_v10 = vadd.f32 %v3356_v3, %v10600_v32  ;;  %v438_v45 = vadd.s32 88, %v9879_v21  ;;  %v10777_v62 = vsel %vm956_vm4, 1.0, %v15295_v42  ;;  %v15505_v3 = vld [vmem:[#allocation185_spill] sm:$0xff] }
 0x357   : > { %v3422_v12 = vadd.f32 %v10557_v49, %v3386_v19  ;;  %15502 = vst [vmem:[#allocation163_spill] sm:$0xff] %v10777_v62  ;;  %v3293_v53 = vmul.f32 %v10495_v36, %v3157_v35  ;;  %v3167_v13 = vpop.permute.xlu0 %3166  ;;  %v526_v4 = vand.u32 15, %v436_v26  ;;  %v3336_v28 = vadd.f32 %v3304_v20, %v3075_v54  ;;  %v15506_v54 = vld [vmem:[#allocation187_spill] sm:$0xff]  ;;  %v15507_v20 = vld [vmem:[#allocation13_spill] sm:$0xff] }
 0x358   : > { %v3464_v52 = vmax.f32 %v3432_v8, 0.0  ;;  %v3424_v7 = vadd.f32 %v10557_v49, %v3388_v10  ;;  %v3295_v32 = vmul.f32 %v10495_v36, %v3167_v13  ;;  %v3037_v48 = vmul.f32 %v10470_v58, %v15503_v24 }
 0x359   : > { %v3046_v63 = vmul.f32 %v10470_v58, %v15504_v46  ;;  %v3454_v37 = vmax.f32 %v3422_v12, 0.0  ;;  %v3325_v40 = vadd.f32 %v3293_v53, %v3064_v47  ;;  %v3368_v15 = vmul.f32 %v10777_v62, %v3336_v28  ;;  %v15509_v46 = vld [vmem:[#allocation188_spill] sm:$0xff] }
 0x35a   : > { %3496 = vst.msk [vmem:[#allocation3 + $0x80] sm:$0xff] %vm342_vm10, %v3464_v52  ;;  %v3456_v38 = vmax.f32 %v3424_v7, 0.0  ;;  %v3327_v26 = vadd.f32 %v3295_v32, %v3066_v29  ;;  %v540_v14 = vand.u32 15, %v438_v45  ;;  %v2817_v22 = vmul.f32 %v10488_v34, %v15505_v3 }
 0x35b   : > { %v2809_v19 = vmul.f32 %v10488_v34, %v15506_v54  ;;  %3486 = vst.msk [vmem:[#allocation3 + $0x30] sm:$0xff] %vm342_vm10, %v3454_v37  ;;  %v3389_v23 = vadd.f32 %v3325_v40, %v10613_v33  ;;  %v450_v8 = vadd.s32 184, %v9879_v21  ;;  %v3067_v47 = vadd.f32 %v3035_v59, %v2806_v0  ;;  %v15510_v37 = vld [vmem:[#allocation47_spill] sm:$0xff] }
 0x35c   : > { %3488 = vst.msk [vmem:[#allocation3 + $0x40] sm:$0xff] %vm342_vm10, %v3456_v38  ;;  %v3400_v10 = vadd.f32 %v3368_v15, %v10670_v44  ;;  %v3391_v29 = vadd.f32 %v3327_v26, %v10635_v1  ;;  %vm948_vm5 = vcmp.ne.s32.totalorder %v526_v4, 15  ;;  %v3038_v35 = vmul.f32 %v10470_v58, %v15507_v20  ;;  %v3227_v13 = vpop.permute.xlu2 %3226  ;;  %v3172_v52 = vpop.permute.xlu1 %3171  ;;  %v15512_v26 = vld [vmem:[#allocation190_spill] sm:$0xff] }
 0x35d   : > { %v3069_v45 = vadd.f32 %v3037_v48, %v10713_v9  ;;  %v3078_v12 = vadd.f32 %v3046_v63, %v2817_v22  ;;  %v3425_v53 = vadd.f32 %v10557_v49, %v3389_v23  ;;  %v3307_v59 = vmul.f32 %v10495_v36, %v3227_v13 }
 0x35e   : > { %v3436_v33 = vadd.f32 %v10557_v49, %v3400_v10  ;;  %v3427_v0 = vadd.f32 %v10557_v49, %v3391_v29  ;;  %vm950_vm6 = vcmp.ne.s32.totalorder %v540_v14, 15  ;;  %v10806_v1 = vsel %vm948_vm5, 1.0, %v15295_v42 }
 0x35f   : > { %v3457_v44 = vmax.f32 %v3425_v53, 0.0  ;;  %15508 = vst [vmem:[#allocation86_spill] sm:$0xff] %v10806_v1  ;;  %v3296_v4 = vmul.f32 %v10495_v36, %v3172_v52  ;;  %v3182_v7 = vpop.permute.xlu0 %3181  ;;  %v624_v9 = vand.u32 15, %v450_v8  ;;  %v3339_v24 = vadd.f32 %v3307_v59, %v3078_v12  ;;  %v15513_v8 = vld [vmem:[#allocation9_spill] sm:$0xff] }
 0x360   : > { %v3468_v28 = vmax.f32 %v3436_v33, 0.0  ;;  %v3459_v32 = vmax.f32 %v3427_v0, 0.0  ;;  %v3298_v48 = vmul.f32 %v10495_v36, %v3182_v7  ;;  %v2820_v63 = vmul.f32 %v10488_v34, %v15509_v46 }
 0x361   : > { %v3040_v40 = vmul.f32 %v10470_v58, %v15510_v37  ;;  %3489 = vst.msk [vmem:[#allocation3 + $0x48] sm:$0xff] %vm342_vm10, %v3457_v44  ;;  %v3328_v38 = vadd.f32 %v3296_v4, %v3067_v47  ;;  %v10816_v15 = vsel %vm950_vm6, 1.0, %v15295_v42  ;;  %v2812_v14 = vmul.f32 %v10488_v34, %v15512_v26  ;;  %v15520_v37 = vld [vmem:[#allocation81_spill] sm:$0xff] }
 0x362   : > { %15511 = vst [vmem:[#allocation87_spill] sm:$0xff] %v10816_v15  ;;  %v3049_v3 = vmul.f32 %v10470_v58, %v10526_v25  ;;  %v3403_v22 = vadd.f32 %v3339_v24, %v10676_v57  ;;  %v3330_v54 = vadd.f32 %v3298_v48, %v3069_v45  ;;  %v3070_v23 = vadd.f32 %v3038_v35, %v2809_v19  ;;  %v15514_v45 = vld [vmem:[#allocation61_spill] sm:$0xff] }
 0x363   : > { %3500 = vst.msk [vmem:[#allocation3 + $0xa0] sm:$0xff] %vm342_vm10, %v3468_v28  ;;  %v3041_v10 = vmul.f32 %v10470_v58, %v15513_v8  ;;  %v3360_v47 = vmul.f32 %v10806_v1, %v3328_v38  ;;  %v452_v29 = vadd.s32 200, %v9879_v21  ;;  %vm962_vm7 = vcmp.ne.s32.totalorder %v624_v9, 15 }
 0x364   : > { %3491 = vst.msk [vmem:[#allocation3 + $0x58] sm:$0xff] %vm342_vm10, %v3459_v32  ;;  %v3439_v20 = vadd.f32 %v10557_v49, %v3403_v22  ;;  %v3362_v12 = vmul.f32 %v10816_v15, %v3330_v54  ;;  %v442_v25 = vadd.s32 120, %v9879_v21  ;;  %v3072_v57 = vadd.f32 %v3040_v40, %v10753_v5  ;;  %v3242_v53 = vpop.permute.xlu2 %3241  ;;  %v3187_v44 = vpop.permute.xlu1 %3186  ;;  %v15521_v22 = vld [vmem:[#allocation65_spill] sm:$0xff]  ;;  %v15616_v15 = vld [vmem:[#allocation172_spill] sm:$0xff] }
 0x365   : > { %v3045_v19 = vmul.f32 %v10470_v58, %v15514_v45  ;;  %v3392_v35 = vadd.f32 %v3360_v47, %v10647_v17  ;;  %v446_v13 = vadd.s32 152, %v9879_v21  ;;  %v3081_v33 = vadd.f32 %v3049_v3, %v2820_v63  ;;  %v15516_v17 = vld [vmem:[#allocation36_spill] sm:$0xff]  ;;  %v15523_v45 = vld [vmem:[#allocation201_spill] sm:$0xff] }
 0x366   : > { %v3471_v0 = vmax.f32 %v3439_v20, 0.0  ;;  %v3394_v59 = vadd.f32 %v3362_v12, %v10650_v11  ;;  %v3310_v52 = vmul.f32 %v10495_v36, %v3242_v53  ;;  %v10841_v7 = vsel %vm962_vm7, 1.0, %v15295_v42  ;;  %v15522_v20 = vld [vmem:[#allocation195_spill] sm:$0xff] }
 0x367   : > { %v3428_v4 = vadd.f32 %v10557_v49, %v3392_v35  ;;  %15515 = vst [vmem:[#allocation88_spill] sm:$0xff] %v10841_v7  ;;  %v3299_v5 = vmul.f32 %v10495_v36, %v3187_v44  ;;  %v3197_v9 = vpop.permute.xlu0 %3196  ;;  %v638_v28 = vand.u32 15, %v452_v29  ;;  %v15517_v32 = vand.u32 15, %v15516_v17 }
 0x368   : > { %3503 = vst.msk [vmem:[#allocation3 + $0xb8] sm:$0xff] %vm342_vm10, %v3471_v0  ;;  %v3430_v11 = vadd.f32 %v10557_v49, %v3394_v59  ;;  %v3342_v48 = vadd.f32 %v3310_v52, %v3081_v33  ;;  %v3301_v46 = vmul.f32 %v10495_v36, %v3197_v9  ;;  %v568_v63 = vand.u32 15, %v442_v25 }
 0x369   : > { %vm10846_vm8 = vcmp.ne.s32.totalorder %v15517_v32, 0  ;;  %v3051_v40 = vmul.f32 %v10470_v58, %v15520_v37  ;;  %v3460_v38 = vmax.f32 %v3428_v4, 0.0  ;;  %v3331_v26 = vadd.f32 %v3299_v5, %v3070_v23 }
 0x36a   : > { %v596_v3 = vand.u32 15, %v446_v13  ;;  %v2591_v54 = vadd.f32 %v10684_v51, %v15521_v22  ;;  %v3462_v8 = vmax.f32 %v3430_v11, 0.0  ;;  %v3374_v47 = vmul.f32 %v10841_v7, %v3342_v48  ;;  %v15528_v48 = vld [vmem:[#allocation50_spill] sm:$0xff]  ;;  %v11705_v62 = vld [vmem:[#allocation3 + $0xa0] sm:$0xff] }
 0x36b   : > { %v3333_v29 = vadd.f32 %v3301_v46, %v3072_v57  ;;  %v2816_v12 = vmul.f32 %v10488_v34, %v15522_v20  ;;  %v2822_v35 = vmul.f32 %v10488_v34, %v15523_v45  ;;  %v3073_v25 = vadd.f32 %v3041_v10, %v2812_v14  ;;  %3492 = vst.msk [vmem:[#allocation3 + $0x60] sm:$0xff] %vm342_vm10, %v3460_v38 }
 0x36c   : > { %v3395_v53 = vadd.f32 %v3331_v26, %v10656_v56  ;;  %3494 = vst.msk [vmem:[#allocation3 + $0x70] sm:$0xff] %vm342_vm10, %v3462_v8  ;;  %v3406_v23 = vadd.f32 %v3374_v47, %v2591_v54  ;;  %vm964_vm9 = vcmp.ne.s32.totalorder %v638_v28, 15  ;;  %vm954_vm11 = vcmp.ne.s32.totalorder %v568_v63, 15  ;;  %v3252_v0 = vpop.permute.xlu2 %3251  ;;  %v3202_v52 = vpop.permute.xlu1 %3201  ;;  %v15529_v63 = vld [vmem:[#allocation161_spill] sm:$0xff]  ;;  %v15531_v26 = vld [vmem:[#allocation51_spill] sm:$0xff] }
 0x36d   : > { %v3397_v51 = vadd.f32 %v3333_v29, %v10659_v27  ;;  %v3077_v13 = vadd.f32 %v3045_v19, %v2816_v12  ;;  %v3083_v57 = vadd.f32 %v3051_v40, %v2822_v35  ;;  %vm10867_vm12 = vcmp.ne.s32.totalorder %v596_v3, 15  ;;  %v15533_v29 = vld [vmem:[#allocation165_spill] sm:$0xff]  ;;  %v15534_v12 = vld [vmem:[#allocation20_spill] sm:$0xff]  ;;  %15602 = vst [vmem:[#allocation120_spill] sm:$0xff] %v11705_v62 }
 0x36e   : > { %v3431_v33 = vadd.f32 %v10557_v49, %v3395_v53  ;;  %v3442_v14 = vadd.f32 %v10557_v49, %v3406_v23  ;;  %v3312_v10 = vmul.f32 %v10495_v36, %v3252_v0  ;;  %v448_v27 = vadd.s32 168, %v9879_v21  ;;  %v15536_v53 = vld [vmem:[#allocation29_spill] sm:$0xff] }
 0x36f   : > { %v3433_v56 = vadd.f32 %v10557_v49, %v3397_v51  ;;  %v10876_v19 = vsel %vm964_vm9, 1.0, %v15295_v42  ;;  %v10879_v4 = vsel %vm954_vm11, 1.0, %v15295_v42  ;;  %v3302_v5 = vmul.f32 %v10495_v36, %v3202_v52  ;;  %v3222_v9 = vpop.permute.xlu0 %3221  ;;  %v15538_v0 = vld [vmem:[#allocation73_spill] sm:$0xff] }
 0x370   : > { %v3463_v44 = vmax.f32 %v3431_v33, 0.0  ;;  %15526 = vst [vmem:[#allocation100_spill] sm:$0xff] %v10876_v19  ;;  %v3474_v28 = vmax.f32 %v3442_v14, 0.0  ;;  %v3344_v32 = vadd.f32 %v3312_v10, %v3083_v57  ;;  %v3306_v11 = vmul.f32 %v10495_v36, %v3222_v9  ;;  %v15537_v57 = vld [vmem:[#allocation154_spill] sm:$0xff]  ;;  %v15539_v14 = vld [vmem:[#allocation193_spill] sm:$0xff]  ;;  %v15541_v9 = vld [vmem:[#allocation76_spill] sm:$0xff] }
 0x371   : > { %15527 = vst [vmem:[#allocation89_spill] sm:$0xff] %v10879_v4  ;;  %v3465_v17 = vmax.f32 %v3433_v56, 0.0  ;;  %v2593_v46 = vadd.f32 %v10662_v60, %v15528_v48  ;;  %v2522_v37 = vmul.f32 %v10448_v30, %v15529_v63  ;;  %v3334_v40 = vadd.f32 %v3302_v5, %v3073_v25  ;;  %v15535_v25 = vld [vmem:[#allocation41_spill] sm:$0xff] }
 0x372   : > { %3495 = vst.msk [vmem:[#allocation3 + $0x78] sm:$0xff] %vm342_vm10, %v3463_v44  ;;  %v10891_v38 = vsel %vm10867_vm12, 1.0, %v15295_v42  ;;  %v2583_v3 = vadd.f32 %v10667_v16, %v15531_v26  ;;  %v3376_v22 = vmul.f32 %v10876_v19, %v3344_v32  ;;  %v3338_v54 = vadd.f32 %v3306_v11, %v3077_v13  ;;  %v10897_v60 = vld [vmem:[#allocation3 + $0x5f] sm:$0xff]  ;;  %v15542_v26 = vld [vmem:[#allocation58_spill] sm:$0xff] }
 0x373   : > { %15530 = vst [vmem:[#allocation90_spill] sm:$0xff] %v10891_v38  ;;  %v610_v8 = vand.u32 15, %v448_v27  ;;  %v10902_v47 = vsel %vm10846_vm8, 1.0, %v15295_v42  ;;  %v2525_v20 = vmul.f32 %v10448_v30, %v15533_v29  ;;  %v3044_v45 = vmul.f32 %v10470_v58, %v15534_v12  ;;  %3601 = vrot.lane.b32.xlu2 %v10897_v60, %s8793_s17  ;;  %v10912_v35 = vld [vmem:[#allocation3 + $0x6f] sm:$0xff] }
 0x374   : > { %3506 = vst.msk [vmem:[#allocation3 + $0xd0] sm:$0xff] %vm342_vm10, %v3474_v28  ;;  %v3366_v16 = vmul.f32 %v10879_v4, %v3334_v40  ;;  %v2587_v24 = vadd.f32 %v10638_v41, %v15535_v25  ;;  %v3047_v23 = vmul.f32 %v10470_v58, %v15536_v53  ;;  %v3408_v51 = vadd.f32 %v3376_v22, %v2593_v46  ;;  %v15540_v41 = vld [vmem:[#allocation196_spill] sm:$0xff]  ;;  %v3217_v5 = vpop.permute.xlu1 %3216  ;;  %v10941_v29 = vld [vmem:[%s14975_s1 + $0x6] ss:$0 sm:$0xff] }
 0x375   : > { %15532 = vst [vmem:[#allocation91_spill] sm:$0xff] %v10902_v47  ;;  %v3370_v13 = vmul.f32 %v10891_v38, %v3338_v54  ;;  %3699 = vrot.lane.b32.xlu0 %v10912_v35, %s8794_s18  ;;  %v2526_v33 = vmul.f32 %v10448_v30, %v15537_v57  ;;  %v2554_v59 = vadd.f32 %v2522_v37, %v15538_v0  ;;  %vm960_vm13 = vcmp.ne.s32.totalorder %v610_v8, 15  ;;  %v15546_v53 = vld [vmem:[#allocation63_spill] sm:$0xff] }
 0x376   : > { %3497 = vst.msk [vmem:[#allocation3 + $0x88] sm:$0xff] %vm342_vm10, %v3465_v17  ;;  %v2815_v56 = vmul.f32 %v10488_v34, %v15539_v14  ;;  %v3398_v10 = vadd.f32 %v3366_v16, %v2583_v3  ;;  %v2818_v52 = vmul.f32 %v10488_v34, %v15540_v41  ;;  %v3444_v27 = vadd.f32 %v10557_v49, %v3408_v51  ;;  %v15549_v57 = vld [vmem:[#allocation79_spill] sm:$0xff]  ;;  %v15551_v41 = vld [vmem:[#allocation40_spill] sm:$0xff] }
 0x377   : > { %v3402_v44 = vadd.f32 %v3370_v13, %v2587_v24  ;;  %v2557_v28 = vadd.f32 %v2525_v20, %v15541_v9  ;;  %v3305_v11 = vmul.f32 %v10495_v36, %v3217_v5  ;;  %v3232_v48 = vpop.permute.xlu0 %3231  ;;  %v2586_v3 = vadd.f32 %v2554_v59, %v15542_v26  ;;  %v15544_v20 = vld [vmem:[#allocation72_spill] sm:$0xff]  ;;  %v15548_v13 = vld [vmem:[#allocation62_spill] sm:$0xff]  ;;  %v15556_v9 = vld [vmem:[#allocation39_spill] sm:$0xff] }
 0x378   : > { %v3076_v17 = vadd.f32 %v3044_v45, %v2815_v56  ;;  %v3434_v32 = vadd.f32 %v10557_v49, %v3398_v10  ;;  %v3079_v46 = vadd.f32 %v3047_v23, %v2818_v52  ;;  %v3476_v63 = vmax.f32 %v3444_v27, 0.0  ;;  %v15545_v45 = vld [vmem:[#allocation168_spill] sm:$0xff]  ;;  %v15547_v23 = vld [vmem:[#allocation78_spill] sm:$0xff]  ;;  %v15560_v26 = vld [vmem:[#allocation43_spill] sm:$0xff] }
 0x379   : > { %v3438_v37 = vadd.f32 %v10557_v49, %v3402_v44  ;;  %v3308_v40 = vmul.f32 %v10495_v36, %v3232_v48  ;;  %v10936_v8 = vsel %vm960_vm13, 1.0, %v15295_v42  ;;  %v1747_v12 = vmul.f32 %v10941_v29, %v15544_v20  ;;  %v15550_v59 = vld [vmem:[#allocation70_spill] sm:$0xff]  ;;  %v15555_v44 = vld [vmem:[#allocation60_spill] sm:$0xff] }
 0x37a   : > { %v3466_v22 = vmax.f32 %v3434_v32, 0.0  ;;  %v3337_v54 = vadd.f32 %v3305_v11, %v3076_v17  ;;  %15543 = vst [vmem:[#allocation103_spill] sm:$0xff] %v10936_v8  ;;  %v2528_v16 = vmul.f32 %v10448_v30, %v15545_v45  ;;  %v2299_v51 = vadd.f32 %v15547_v23, %v15546_v53  ;;  %v10955_v10 = vld [vmem:[#allocation3 + $0x67] sm:$0xff]  ;;  %v15563_v53 = vld [vmem:[#allocation55_spill] sm:$0xff] }
 0x37b   : > { %3508 = vst.msk [vmem:[#allocation3 + $0xe0] sm:$0xff] %vm342_vm10, %v3476_v63  ;;  %v3470_v25 = vmax.f32 %v3438_v37, 0.0  ;;  %v3340_v24 = vadd.f32 %v3308_v40, %v3079_v46  ;;  %v2297_v0 = vadd.f32 %v15549_v57, %v15548_v13  ;;  %v3048_v14 = vmul.f32 %v10470_v58, %v15550_v59  ;;  %v15557_v11 = vld [vmem:[#allocation66_spill] sm:$0xff]  ;;  %v15564_v59 = vld [vmem:[#allocation137_spill] sm:$0xff] }
 0x37c   : > { %3498 = vst.msk [vmem:[#allocation3 + $0x90] sm:$0xff] %vm342_vm10, %v3466_v22  ;;  %v3401_v56 = vadd.f32 %v3337_v54, %v2586_v3  ;;  %v15552_v52 = vand.u32 15, %v15551_v41  ;;  %v2589_v5 = vadd.f32 %v2557_v28, %v15555_v44  ;;  %v3050_v17 = vmul.f32 %v10470_v58, %v15556_v9  ;;  %v15558_v63 = vld [vmem:[#allocation198_spill] sm:$0xff]  ;;  %v15561_v54 = vld [vmem:[#allocation199_spill] sm:$0xff] }
 0x37d   : > { %3502 = vst.msk [vmem:[#allocation3 + $0xb0] sm:$0xff] %vm342_vm10, %v3470_v25  ;;  %v3372_v32 = vmul.f32 %v10936_v8, %v3340_v24  ;;  %3603 = vrot.lane.b32.xlu0 %v10955_v10, %s8793_s17  ;;  %v1809_v48 = vmul.f32 %v10902_v47, %v15557_v11  ;;  %v2558_v46 = vadd.f32 %v2526_v33, %v2297_v0  ;;  %v15559_v28 = vld [vmem:[#allocation94_spill] sm:$0xff]  ;;  %v3237_v25 = vpop.permute.xlu1 %3236  ;;  %v454_v27 = vadd.s32 216, %v9879_v21 }
 0x37e   : > { %vm10959_vm14 = vcmp.ne.s32.totalorder %v15552_v52, 0  ;;  %v2819_v37 = vmul.f32 %v10488_v34, %v15558_v63  ;;  %v3437_v40 = vadd.f32 %v10557_v49, %v3401_v56  ;;  %v2040_v3 = vmul.f32 %v15560_v26, %v15559_v28  ;;  %v15562_v24 = vld [vmem:[#allocation126_spill] sm:$0xff] }
 0x37f   : > { %v2560_v22 = vadd.f32 %v2528_v16, %v2299_v51  ;;  %v2821_v20 = vmul.f32 %v10488_v34, %v15561_v54  ;;  %v3404_v45 = vadd.f32 %v3372_v32, %v2589_v5  ;;  %v2259_v23 = vmul.f32 %v15563_v53, %v15562_v24  ;;  %v3247_v0 = vpop.permute.xlu0 %3246  ;;  %v15565_v51 = vld [vmem:[#allocation95_spill] sm:$0xff]  ;;  %v15566_v5 = vld [vmem:[#allocation148_spill] sm:$0xff]  ;;  %v15569_v54 = vld [vmem:[#allocation21_spill] sm:$0xff] }
 0x380   : > { %v3080_v13 = vadd.f32 %v3048_v14, %v2819_v37  ;;  %v3469_v57 = vmax.f32 %v3437_v40, 0.0  ;;  %v3309_v33 = vmul.f32 %v10495_v36, %v3237_v25  ;;  %v2269_v56 = vmul.f32 %v15563_v53, %v15564_v59  ;;  %v15567_v32 = vld [vmem:[#allocation48_spill] sm:$0xff]  ;;  %v15568_v37 = vld [vmem:[#allocation169_spill] sm:$0xff]  ;;  %v15570_v25 = vld [vmem:[#allocation54_spill] sm:$0xff] }
 0x381   : > { %v3082_v41 = vadd.f32 %v3050_v17, %v2821_v20  ;;  %v3440_v52 = vadd.f32 %v10557_v49, %v3404_v45  ;;  %v3311_v16 = vmul.f32 %v10495_v36, %v3247_v0  ;;  %v2030_v44 = vmul.f32 %v15560_v26, %v15565_v51  ;;  %v15573_v59 = vld [vmem:[#allocation191_spill] sm:$0xff] }
 0x382   : > { %v2520_v9 = vmul.f32 %v10448_v30, %v15566_v5  ;;  %v2590_v14 = vadd.f32 %v2558_v46, %v15567_v32  ;;  %3501 = vst.msk [vmem:[#allocation3 + $0xa8] sm:$0xff] %vm342_vm10, %v3469_v57  ;;  %v3341_v11 = vadd.f32 %v3309_v33, %v3080_v13  ;;  %v2592_v63 = vadd.f32 %v2560_v22, %v1809_v48 }
 0x383   : > { %v2530_v40 = vmul.f32 %v10448_v30, %v15568_v37  ;;  %v3472_v17 = vmax.f32 %v3440_v52, 0.0  ;;  %v3343_v28 = vadd.f32 %v3311_v16, %v3082_v41  ;;  %v1779_v20 = vadd.f32 %v1747_v12, %v15569_v54  ;;  %v15574_v41 = vld [vmem:[#allocation35_spill] sm:$0xff] }
 0x384   : > { %v2291_v45 = vadd.f32 %v2259_v23, %v2030_v44  ;;  %v3042_v26 = vmul.f32 %v10470_v58, %v15570_v25  ;;  %v3405_v24 = vadd.f32 %v3341_v11, %v2590_v14  ;;  %v10997_v53 = vld [vmem:[#allocation3 + $0xb7] sm:$0xff]  ;;  %v11002_v46 = vsel %vm10959_vm14, 1.0, %v15295_v42  ;;  %v8710_v25 = vld [vmem:[%s14975_s1 + $0x3] ss:$0 sm:$0xff] }
 0x385   : > { %15571 = vst [vmem:[#allocation92_spill] sm:$0xff] %v11002_v46  ;;  %v2301_v48 = vadd.f32 %v2269_v56, %v2040_v3  ;;  %v3052_v22 = vmul.f32 %v10470_v58, %v10581_v39  ;;  %v3407_v13 = vadd.f32 %v3343_v28, %v2592_v63  ;;  %3717 = vrot.lane.b32.xlu2 %v10997_v53, %s8794_s18  ;;  %v15572_v23 = vld [vmem:[#allocation192_spill] sm:$0xff]  ;;  %v3207_v56 = vpop.permute.xlu1 %3206  ;;  %v15575_v52 = vld [vmem:[#allocation23_spill] sm:$0xff]  ;;  %vm349_vm1 = vcmask 523264  }
 0x386   : > { %3504 = vst.msk [vmem:[#allocation3 + $0xc0] sm:$0xff] %vm342_vm10, %v3472_v17  ;;  %v2552_v12 = vadd.f32 %v2520_v9, %v2291_v45  ;;  %v2813_v57 = vmul.f32 %v10488_v34, %v15572_v23  ;;  %v3441_v33 = vadd.f32 %v10557_v49, %v3405_v24  ;;  %v2823_v3 = vmul.f32 %v10488_v34, %v15573_v59  ;;  %v15576_v17 = vld [vmem:[#allocation127_spill] sm:$0xff] }
 0x387   : > { %v2562_v0 = vadd.f32 %v2530_v40, %v2301_v48  ;;  %v3443_v39 = vadd.f32 %v10557_v49, %v3407_v13  ;;  %v1801_v16 = vmul.f32 %v15575_v52, %v15574_v41  ;;  %v3303_v5 = vmul.f32 %v10495_v36, %v3207_v56  ;;  %v3257_v9 = vpop.permute.xlu0 %3256  ;;  %v8709_v40 = vld [vmem:[%s14975_s1 + $0x4] ss:$0 sm:$0xff]  ;;  %v8711_v13 = vld [vmem:[%s14975_s1 + $0x1] ss:$0 sm:$0xff]  ;;  %v15581_v41 = vld [vmem:[#allocation10_spill] sm:$0xff]  ;;  %350 = vst.msk [vmem:[#allocation4] sm:$0xff] %vm349_vm1, %v15295_v42 }
 0x388   : > { %v3074_v51 = vadd.f32 %v3042_v26, %v2813_v57  ;;  %v3473_v44 = vmax.f32 %v3441_v33, 0.0  ;;  %v1811_v32 = vmul.f32 %v11002_v46, %v1779_v20  ;;  %v3084_v14 = vadd.f32 %v3052_v22, %v2823_v3  ;;  %v15577_v26 = vld [vmem:[#allocation31_spill] sm:$0xff]  ;;  %351 = vst.msk [vmem:[#allocation4 + $0x8] sm:$0xff] %vm349_vm1, %v15295_v42 }
 0x389   : > { %v3475_v11 = vmax.f32 %v3443_v39, 0.0  ;;  %v3313_v63 = vmul.f32 %v10495_v36, %v3257_v9  ;;  %v11021_v37 = vld [vmem:[#allocation3 + $0xa7] sm:$0xff]  ;;  %v2270_v28 = vmul.f32 %v8709_v40, %v15576_v17  ;;  %v2584_v54 = vadd.f32 %v2552_v12, %v1801_v16  ;;  %v15579_v57 = vld [vmem:[#allocation171_spill] sm:$0xff]  ;;  %352 = vst.msk [vmem:[#allocation4 + $0x10] sm:$0xff] %vm349_vm1, %v15295_v42 }
 0x38a   : > { %3505 = vst.msk [vmem:[#allocation3 + $0xc8] sm:$0xff] %vm342_vm10, %v3473_v44  ;;  %v3335_v45 = vadd.f32 %v3303_v5, %v3074_v51  ;;  %3619 = vrot.lane.b32.xlu1 %v11021_v37, %s8793_s17  ;;  %v652_v20 = vand.u32 15, %v454_v27  ;;  %v1487_v24 = vmul.f32 %v8710_v25, %v15577_v26  ;;  %v2594_v48 = vadd.f32 %v2562_v0, %v1811_v32  ;;  %v15578_v12 = vld [vmem:[#allocation105_spill] sm:$0xff]  ;;  %v15580_v27 = vld [vmem:[#allocation56_spill] sm:$0xff]  ;;  %v11045_v56 = vld [vmem:[#allocation3 + $0xaf] sm:$0xff] }
 0x38b   : > { %3507 = vst.msk [vmem:[#allocation3 + $0xd8] sm:$0xff] %vm342_vm10, %v3475_v11  ;;  %v3345_v22 = vadd.f32 %v3313_v63, %v3084_v14  ;;  %v2041_v23 = vmul.f32 %v8711_v13, %v15578_v12  ;;  %v2531_v33 = vmul.f32 %v10448_v30, %v15579_v57  ;;  %v3053_v59 = vmul.f32 %v10470_v58, %v15580_v27  ;;  %v8712_v0 = vld [vmem:[%s14975_s1] ss:$0 sm:$0xff]  ;;  %v11082_v12 = vld [vmem:[#allocation3 + $0x87] sm:$0xff]  ;;  %v11266_v46 = vld [vmem:[#allocation3 + $0x38] sm:$0xff] }
 0x38c   : > { %v3399_v3 = vadd.f32 %v3335_v45, %v2584_v54  ;;  %v1258_v16 = vmul.f32 %v8712_v0, %v15581_v41  ;;  %v15582_v51 = vld [vmem:[#allocation74_spill] sm:$0xff]  ;;  %vm966_vm15 = vcmp.ne.s32.totalorder %v652_v20, 15  ;;  %v3850_v0 = vld [vmem:[%s14977_s3 + $0x48] sm:$0xff]  ;;  %353 = vst.msk [vmem:[#allocation4 + $0x118] sm:$0xff] %vm349_vm1, %v15295_v42  ;;  %vm3853_vm2 = vcmask 785408  }
 0x38d   : > { %v11043_v39 = vld [vmem:[#allocation3 + $0xbf] sm:$0xff]  ;;  %v1748_v44 = vmul.f32 %v10941_v29, %v15582_v51  ;;  %v3409_v5 = vadd.f32 %v3345_v22, %v2594_v48  ;;  %3621 = vrot.lane.b32.xlu2 %v11045_v56, %s8793_s17  ;;  %v2302_v30 = vadd.f32 %v2270_v28, %v2041_v23  ;;  %v15583_v58 = vld [vmem:[#allocation202_spill] sm:$0xff]  ;;  %v3262_v63 = vpop.permute.xlu1 %3261  ;;  %v11063_v25 = vsel %vm966_vm15, 1.0, %v15295_v42  ;;  %v11065_v28 = vld [vmem:[#allocation3 + $0x77] sm:$0xff]  ;;  %354 = vst.msk [vmem:[#allocation4 + $0x120] sm:$0xff] %vm349_vm1, %v15295_v42 }
 0x38e   : > { %3719 = vrot.lane.b32.xlu0 %v11043_v39, %s8794_s18  ;;  %v2824_v9 = vmul.f32 %v10488_v34, %v15583_v58  ;;  %v3435_v32 = vadd.f32 %v10557_v49, %v3399_v3  ;;  %v1519_v14 = vadd.f32 %v1487_v24, %v1258_v16  ;;  %v3314_v54 = vmul.f32 %v10495_v36, %v3262_v63  ;;  %v11072_v48 = vld [vmem:[#allocation3 + $0x7f] sm:$0xff]  ;;  %v3852_v27 = vld [vmem:[%s14977_s3 + $0x58] sm:$0xff]  ;;  %v3849_v41 = vld [vmem:[%s14977_s3 + $0x40] sm:$0xff] }
 0x38f   : > { %v3445_v11 = vadd.f32 %v10557_v49, %v3409_v5  ;;  %v2563_v40 = vadd.f32 %v2531_v33, %v2302_v30  ;;  %15584 = vst [vmem:[#allocation93_spill] sm:$0xff] %v11063_v25  ;;  %v11106_v33 = vld [vmem:[#allocation3 + $0x8f] sm:$0xff]  ;;  %8457 = vmatpush.msra.mxu1 %v3852_v27  ;;  %8458 = vmatpush.msra.mxu2 %v3852_v27  ;;  %v3847_v51 = vld [vmem:[%s14977_s3 + $0x30] sm:$0xff]  ;;  %v3846_v5 = vld [vmem:[%s14977_s3 + $0x28] sm:$0xff] }
 0x390   : > { %v3085_v29 = vadd.f32 %v3053_v59, %v2824_v9  ;;  %v3467_v17 = vmax.f32 %v3435_v32, 0.0  ;;  %v1780_v26 = vadd.f32 %v1748_v44, %v1519_v14  ;;  %v3851_v59 = vld [vmem:[%s14977_s3 + $0x50] sm:$0xff]  ;;  %3954 = vmatpush.msra.mxu0 %v3852_v27  ;;  %8459 = vmatpush.msra.mxu3 %v3852_v27  ;;  %v3848_v16 = vld [vmem:[%s14977_s3 + $0x38] sm:$0xff]  ;;  %v3845_v30 = vld [vmem:[%s14977_s3 + $0x20] sm:$0xff]  ;;  %355 = vst.msk [vmem:[#allocation4 + $0x128] sm:$0xff] %vm349_vm1, %v15295_v42 }
 0x391   : > { %v3477_v45 = vmax.f32 %v3445_v11, 0.0  ;;  %v11088_v23 = vld [vmem:[#allocation3 + $0xc7] sm:$0xff]  ;;  %8460 = vmatpush.msra.mxu1 %v3851_v59  ;;  %8461 = vmatpush.msra.mxu2 %v3851_v59  ;;  %v3842_v11 = vld [vmem:[%s14977_s3 + $0x8] sm:$0xff]  ;;  %v3841_v63 = vld [vmem:[%s14977_s3] sm:$0xff] }
 0x392   : > { %3499 = vst.msk [vmem:[#allocation3 + $0x98] sm:$0xff] %vm342_vm10, %v3467_v17  ;;  %v3346_v34 = vadd.f32 %v3314_v54, %v3085_v29  ;;  %3701 = vrot.lane.b32.xlu1 %v11065_v28, %s8794_s18  ;;  %v2595_v20 = vadd.f32 %v2563_v40, %v1780_v26  ;;  %v11100_v57 = vld [vmem:[#allocation3 + $0xd7] sm:$0xff]  ;;  %3955 = vmatpush.msra.mxu0 %v3851_v59  ;;  %v3542_v58 = vld [vmem:[#allocation3 + $0xdf] sm:$0xff]  ;;  %v3844_v9 = vld [vmem:[%s14977_s3 + $0x18] sm:$0xff] }
 0x393   : > { %3509 = vst.msk [vmem:[#allocation3 + $0xe8] sm:$0xff] %vm342_vm10, %v3477_v45  ;;  %8462 = vmatpush.msra.mxu3 %v3851_v59  ;;  %8463 = vmatpush.msra.mxu1 %v3850_v0  ;;  %v3843_v32 = vld [vmem:[%s14977_s3 + $0x10] sm:$0xff]  ;;  %v11196_v54 = vld [vmem:[#allocation3 + $0x17] sm:$0xff] }
 0x394   : > { %v3378_v24 = vmul.f32 %v11063_v25, %v3346_v34  ;;  %8464 = vmatpush.msra.mxu2 %v3850_v0  ;;  %3956 = vmatpush.msra.mxu0 %v3850_v0  ;;  %v11188_v29 = vld [vmem:[#allocation3 + $0x19] sm:$0xff]  ;;  %v11198_v45 = vld [vmem:[#allocation3 + $0x27] sm:$0xff]  ;;  %v15611_v52 = vld [vmem:[#allocation11_spill] sm:$0xff] }
 0x395   : > { %3703 = vrot.lane.b32.xlu2 %v11072_v48, %s8794_s18  ;;  %8465 = vmatpush.msra.mxu3 %v3850_v0  ;;  %v11204_v34 = vld [vmem:[#allocation3 + $0x29] sm:$0xff]  ;;  %v11222_v59 = vld [vmem:[#allocation3 + $0x18] sm:$0xff] }
 0x396   : > { %3623 = vrot.lane.b32.xlu0 %v10997_v53, %s8793_s17  ;;  %v3410_v36 = vadd.f32 %v3378_v24, %v2595_v20  ;;  %8466 = vmatpush.msra.mxu1 %v3849_v41  ;;  %v11208_v20 = vld [vmem:[#allocation3 + $0x28] sm:$0xff]  ;;  %v11226_v0 = vld [vmem:[#allocation3 + $0x1f] sm:$0xff]  ;;  %v11262_v25 = vld [vmem:[#allocation3 + $0x57] sm:$0xff] }
 0x397   : > { %8467 = vmatpush.msra.mxu2 %v3849_v41  ;;  %3957 = vmatpush.msra.mxu0 %v3849_v41  ;;  %v11210_v24 = vld [vmem:[#allocation3 + $0x21] sm:$0xff] }
 0x398   : > { %v3446_v22 = vadd.f32 %v10557_v49, %v3410_v36  ;;  %v11092_v49 = vld [vmem:[#allocation3 + $0xcf] sm:$0xff]  ;;  %8469 = vmatpush.msra.mxu1 %v3848_v16  ;;  %8468 = vmatpush.msra.mxu3 %v3849_v41 }
 0x399   : > { %v11116_v3 = vld [vmem:[#allocation3 + $0x97] sm:$0xff]  ;;  %v11136_v44 = vld [vmem:[#allocation3 + $0x9f] sm:$0xff]  ;;  %8470 = vmatpush.msra.mxu2 %v3848_v16  ;;  %3958 = vmatpush.msra.mxu0 %v3848_v16  ;;  %v11216_v36 = vld [vmem:[#allocation3 + $0x4f] sm:$0xff] }
 0x39a   : > { %v3478_v13 = vmax.f32 %v3446_v22, 0.0  ;;  %3605 = vrot.lane.b32.xlu1 %v10912_v35, %s8793_s17  ;;  %8472 = vmatpush.msra.mxu1 %v3847_v51  ;;  %v11155_v14 = vld [vmem:[#allocation3 + $0xe7] sm:$0xff]  ;;  %v11228_v41 = vld [vmem:[#allocation3 + $0x2f] sm:$0xff] }
 0x39b   : > { %8471 = vmatpush.msra.mxu3 %v3848_v16  ;;  %8473 = vmatpush.msra.mxu2 %v3847_v51 }
 0x39c   : > { %3510 = vst.msk [vmem:[#allocation3 + $0xf0] sm:$0xff] %vm342_vm10, %v3478_v13  ;;  %8475 = vmatpush.msra.mxu1 %v3846_v5  ;;  %3959 = vmatpush.msra.mxu0 %v3847_v51 }
 0x39d   : > { %3607 = vrot.lane.b32.xlu2 %v11065_v28, %s8793_s17  ;;  %8474 = vmatpush.msra.mxu3 %v3847_v51  ;;  %v11234_v51 = vld [vmem:[#allocation3 + $0x31] sm:$0xff] }
 0x39e   : > { %3705 = vrot.lane.b32.xlu0 %v11082_v12, %s8794_s18  ;;  %8478 = vmatpush.msra.mxu1 %v3845_v30 }
 0x39f   : > { %8476 = vmatpush.msra.mxu2 %v3846_v5  ;;  %3960 = vmatpush.msra.mxu0 %v3846_v5 }
 0x3a0   : > { %8481 = vmatpush.msra.mxu1 %v3844_v9  ;;  %8477 = vmatpush.msra.mxu3 %v3846_v5  ;;  %v11238_v5 = vld [vmem:[#allocation3 + $0x30] sm:$0xff] }
 0x3a1   : > { %8479 = vmatpush.msra.mxu2 %v3845_v30  ;;  %3961 = vmatpush.msra.mxu0 %v3845_v30 }
 0x3a2   : > { %3721 = vrot.lane.b32.xlu1 %v11088_v23, %s8794_s18  ;;  %8484 = vmatpush.msra.mxu1 %v3843_v32 }
 0x3a3   : > { %8480 = vmatpush.msra.mxu3 %v3845_v30  ;;  %8482 = vmatpush.msra.mxu2 %v3844_v9  ;;  %v11175_v40 = vld [vmem:[#allocation3 + $0xef] sm:$0xff] }
 0x3a4   : > { %8487 = vmatpush.msra.mxu1 %v3842_v11  ;;  %3962 = vmatpush.msra.mxu0 %v3844_v9 }
 0x3a5   : > { %3723 = vrot.lane.b32.xlu2 %v11092_v49, %s8794_s18  ;;  %8483 = vmatpush.msra.mxu3 %v3844_v9  ;;  %v11244_v9 = vld [vmem:[#allocation3 + $0x20] sm:$0xff] }
 0x3a6   : > { %3609 = vrot.lane.b32.xlu0 %v11072_v48, %s8793_s17  ;;  %8490 = vmatpush.msra.mxu1 %v3841_v63 }
 0x3a7   : > { %8485 = vmatpush.msra.mxu2 %v3843_v32  ;;  %3963 = vmatpush.msra.mxu0 %v3843_v32 }
 0x3a8   : > { %8486 = vmatpush.msra.mxu3 %v3843_v32 }
 0x3a9   : > { %8488 = vmatpush.msra.mxu2 %v3842_v11  ;;  %3964 = vmatpush.msra.mxu0 %v3842_v11 }
 0x3aa   : > { %3625 = vrot.lane.b32.xlu1 %v11043_v39, %s8793_s17  ;;  %8489 = vmatpush.msra.mxu3 %v3842_v11  ;;  %v11248_v11 = vld [vmem:[#allocation3 + $0x37] sm:$0xff] }
 0x3ab   : > { %8491 = vmatpush.msra.mxu2 %v3841_v63  ;;  %3965 = vmatpush.msra.mxu0 %v3841_v63 }
 0x3ac   : > { %8492 = vmatpush.msra.mxu3 %v3841_v63 }
 0x3ad   : > { %3627 = vrot.lane.b32.xlu2 %v11088_v23, %s8793_s17 }
 0x3ae   : > { %3725 = vrot.lane.b32.xlu0 %v11100_v57, %s8794_s18 }
 0x3b2   : > { %3707 = vrot.lane.b32.xlu1 %v11106_v33, %s8794_s18 }
 0x3b5   : > { %3709 = vrot.lane.b32.xlu2 %v11116_v3, %s8794_s18 }
 0x3b6   : > { %3629 = vrot.lane.b32.xlu0 %v11092_v49, %s8793_s17 }
 0x3ba   : > { %3611 = vrot.lane.b32.xlu1 %v11082_v12, %s8793_s17 }
 0x3bd   : > { %3613 = vrot.lane.b32.xlu2 %v11106_v33, %s8793_s17 }
 0x3be   : > { %3711 = vrot.lane.b32.xlu0 %v11136_v44, %s8794_s18 }
 0x3c2   : > { %3727 = vrot.lane.b32.xlu1 %v3542_v58, %s8794_s18 }
 0x3c5   : > { %3729 = vrot.lane.b32.xlu2 %v11155_v14, %s8794_s18 }
 0x3c6   : > { %3615 = vrot.lane.b32.xlu0 %v11116_v3, %s8793_s17 }
 0x3ca   : > { %3631 = vrot.lane.b32.xlu1 %v11100_v57, %s8793_s17 }
 0x3cd   : > { %3633 = vrot.lane.b32.xlu2 %v3542_v58, %s8793_s17  ;;  %v3602_v17 = vpop.permute.xlu2 %3601 }
 0x3ce   : > { %3731 = vrot.lane.b32.xlu0 %v11175_v40, %s8794_s18  ;;  %v3786_v22 = vsel %vm342_vm10, %v11216_v36, %v3602_v17 }
 0x3d2   : > { %3713 = vrot.lane.b32.xlu1 %v11021_v37, %s8794_s18 }
 0x3d5   : > { %3715 = vrot.lane.b32.xlu2 %v11045_v56, %s8794_s18 }
 0x3d6   : > { %4743 = vrot.lane.b32.xlu0 %v11188_v29, %s8793_s17 }
 0x3da   : > { %3617 = vrot.lane.b32.xlu1 %v11136_v44, %s8793_s17 }
 0x3dd   : > { %3583 = vrot.lane.b32.xlu2 %v11196_v54, %s8793_s17 }
 0x3de   : > { %3681 = vrot.lane.b32.xlu0 %v11198_v45, %s8794_s18 }
 0x3df   : > { %v3718_v26 = vpop.permute.xlu2 %3717 }
 0x3e2   : > { %4841 = vrot.lane.b32.xlu1 %v11204_v34, %s8794_s18 }
 0x3e5   : > { %4261 = vrot.lane.b32.xlu2 %v11208_v20, %s8794_s18 }
 0x3e6   : > { %4745 = vrot.lane.b32.xlu0 %v11210_v24, %s8793_s17 }
 0x3e7   : > { %v3700_v13 = vpop.permute.xlu0 %3699  ;;  %v3622_v57 = vpop.permute.xlu2 %3621 }
 0x3e8   : > { %v3818_v27 = vsel %vm349_vm1, %v3786_v22, %v3700_v13 }
 0x3e9   : > { %8190 = vmatmul.msk.f32.vlgmr.msra.gmra.mxu1 %vm3853_vm2, %v3818_v27  ;;  %v11258_v27 = vld [vmem:[#allocation3 + $0x39] sm:$0xff] }
 0x3ea   : > { %4163 = vrot.lane.b32.xlu1 %v11222_v59, %s8793_s17 }
 0x3ed   : > { %3585 = vrot.lane.b32.xlu2 %v11226_v0, %s8793_s17 }
 0x3ee   : > { %3683 = vrot.lane.b32.xlu0 %v11228_v41, %s8794_s18 }
 0x3ef   : > { %v3704_v16 = vpop.permute.xlu2 %3703  ;;  %v3604_v30 = vpop.permute.xlu0 %3603 }
 0x3f2   : > { %4843 = vrot.lane.b32.xlu1 %v11234_v51, %s8794_s18 }
 0x3f5   : > { %4263 = vrot.lane.b32.xlu2 %v11238_v5, %s8794_s18 }
 0x3f6   : > { %4747 = vrot.lane.b32.xlu0 %v11204_v34, %s8793_s17 }
 0x3f7   : > { %v3608_v58 = vpop.permute.xlu2 %3607 }
 0x3f8   : > { %v3789_v7 = vsel %vm342_vm10, %v10955_v10, %v3608_v58 }
 0x3fa   : > { %4165 = vrot.lane.b32.xlu1 %v11244_v9, %s8793_s17 }
 0x3fc   : > { %v3620_v32 = vpop.permute.xlu1 %3619 }
 0x3fd   : > { %v3795_v63 = vsel %vm342_vm10, %v11116_v3, %v3620_v32  ;;  %3587 = vrot.lane.b32.xlu2 %v11198_v45, %s8793_s17  ;;  %v3787_v3 = vsel %vm342_vm10, %v11262_v25, %v3604_v30 }
 0x3fe   : > { %3685 = vrot.lane.b32.xlu0 %v11248_v11, %s8794_s18  ;;  %v3827_v17 = vsel %vm349_vm1, %v3795_v63, %v3718_v26  ;;  %v3796_v26 = vsel %vm342_vm10, %v11136_v44, %v3622_v57  ;;  %v11280_v57 = vld [vmem:[#allocation3 + $0x3f] sm:$0xff] }
 0x3ff   : > { %8199 = vmatmul.msk.f32.vlgmr.msra.gmra.mxu2 %vm3853_vm2, %v3827_v17  ;;  %v3724_v13 = vpop.permute.xlu2 %3723 }
 0x400   : > { %v3720_v22 = vpop.permute.xlu0 %3719 }
 0x401   : > { %v3828_v17 = vsel %vm349_vm1, %v3796_v26, %v3720_v22  ;;  %v11292_v26 = vld [vmem:[#allocation3 + $0x41] sm:$0xff] }
 0x402   : > { %4845 = vrot.lane.b32.xlu1 %v11258_v27, %s8794_s18 }
 0x404   : > { %v3702_v32 = vpop.permute.xlu1 %3701 }
 0x405   : > { %4265 = vrot.lane.b32.xlu2 %v11266_v46, %s8794_s18  ;;  %v3819_v63 = vsel %vm349_vm1, %v3787_v3, %v3702_v32 }
 0x406   : > { %4749 = vrot.lane.b32.xlu0 %v11234_v51, %s8793_s17  ;;  %8191 = vmatmul.msk.f32.gmra.mxu1 %vm3853_vm2, %v3819_v63 }
 0x407   : > { %8200 = vmatmul.msk.f32.gmra.mxu2 %vm3853_vm2, %v3828_v17  ;;  %v3628_v19 = vpop.permute.xlu2 %3627 }
 0x408   : > { %v3624_v30 = vpop.permute.xlu0 %3623 }
 0x409   : > { %v3797_v63 = vsel %vm342_vm10, %v11021_v37, %v3624_v30 }
 0x40a   : > { %4167 = vrot.lane.b32.xlu1 %v11208_v20, %s8793_s17 }
 0x40c   : > { %v3606_v44 = vpop.permute.xlu1 %3605 }
 0x40d   : > { %v3788_v47 = vsel %vm342_vm10, %v10897_v60, %v3606_v44  ;;  %3589 = vrot.lane.b32.xlu2 %v11228_v41, %s8793_s17  ;;  %v11298_v44 = vld [vmem:[#allocation3 + $0x40] sm:$0xff] }
 0x40e   : > { %3687 = vrot.lane.b32.xlu0 %v11280_v57, %s8794_s18  ;;  %v3820_v22 = vsel %vm349_vm1, %v3788_v47, %v3704_v16 }
 0x40f   : > { %8192 = vmatmul.msk.f32.gmra.mxu1 %vm3853_vm2, %v3820_v22  ;;  %v11290_v32 = vpop.permute.xlu2 %3709  ;;  %v11314_v22 = vld [vmem:[#allocation3 + $0x47] sm:$0xff] }
 0x410   : > { %v3706_v3 = vpop.permute.xlu0 %3705 }
 0x411   : > { %v3821_v16 = vsel %vm349_vm1, %v3789_v7, %v3706_v3 }
 0x412   : > { %4847 = vrot.lane.b32.xlu1 %v11292_v26, %s8794_s18 }
 0x414   : > { %v3722_v17 = vpop.permute.xlu1 %3721 }
 0x415   : > { %4267 = vrot.lane.b32.xlu2 %v11298_v44, %s8794_s18  ;;  %v3829_v47 = vsel %vm349_vm1, %v3797_v63, %v3722_v17  ;;  %v8268_v17 = vld [vmem:[%s14977_s3 + $0x118] sm:$0xff] }
 0x416   : > { %4751 = vrot.lane.b32.xlu0 %v11258_v27, %s8793_s17  ;;  %8201 = vmatmul.msk.f32.gmra.mxu2 %vm3853_vm2, %v3829_v47  ;;  %v11332_v47 = vld [vmem:[#allocation3 + $0x49] sm:$0xff] }
 0x417   : > { %8193 = vmatmul.msk.f32.gmra.mxu1 %vm3853_vm2, %v3821_v16  ;;  %v11310_v30 = vpop.permute.xlu2 %3613  ;;  %5114 = vmatpush.msrb.mxu2 %v8268_v17  ;;  %v3799_v17 = vsel %vm342_vm10, %v10997_v53, %v3628_v19  ;;  %v8264_v19 = vld [vmem:[%s14977_s3 + $0xf8] sm:$0xff] }
 0x418   : > { %v3610_v37 = vpop.permute.xlu0 %3609  ;;  %v8224_v53 = vld [vmem:[%s14977_s3 + $0xb8] sm:$0xff] }
 0x419   : > { %4534 = vmatpush.msrb.mxu1 %v8224_v53 }
 0x41a   : > { %4169 = vrot.lane.b32.xlu1 %v11238_v5, %s8793_s17 }
 0x41c   : > { %v3626_v58 = vpop.permute.xlu1 %3625 }
 0x41d   : > { %v3798_v8 = vsel %vm342_vm10, %v11045_v56, %v3626_v58  ;;  %3591 = vrot.lane.b32.xlu2 %v11248_v11, %s8793_s17  ;;  %v8267_v56 = vld [vmem:[%s14977_s3 + $0x110] sm:$0xff]  ;;  %v11341_v58 = vld [vmem:[#allocation3 + $0x48] sm:$0xff] }
 0x41e   : > { %3689 = vrot.lane.b32.xlu0 %v11314_v22, %s8794_s18  ;;  %v3830_v7 = vsel %vm349_vm1, %v3798_v8, %v3724_v13  ;;  %5115 = vmatpush.msrb.mxu2 %v8267_v56  ;;  %v8266_v8 = vld [vmem:[%s14977_s3 + $0x108] sm:$0xff]  ;;  %v3790_v13 = vsel %vm342_vm10, %v10912_v35, %v3610_v37 }
 0x41f   : > { %8202 = vmatmul.msk.f32.gmra.mxu2 %vm3853_vm2, %v3830_v7  ;;  %v11324_v63 = vpop.permute.xlu2 %3729  ;;  %v8265_v7 = vld [vmem:[%s14977_s3 + $0x100] sm:$0xff] }
 0x420   : > { %v3726_v3 = vpop.permute.xlu0 %3725  ;;  %5116 = vmatpush.msrb.mxu2 %v8266_v8 }
 0x421   : > { %v3831_v35 = vsel %vm349_vm1, %v3799_v17, %v3726_v3  ;;  %v8263_v3 = vld [vmem:[%s14977_s3 + $0xf0] sm:$0xff] }
 0x422   : > { %4849 = vrot.lane.b32.xlu1 %v11332_v47, %s8794_s18  ;;  %5117 = vmatpush.msrb.mxu2 %v8265_v7  ;;  %v8222_v7 = vld [vmem:[%s14977_s3 + $0xa8] sm:$0xff] }
 0x424   : > { %v3708_v16 = vpop.permute.xlu1 %3707  ;;  %5118 = vmatpush.msrb.mxu2 %v8264_v19  ;;  %v8221_v19 = vld [vmem:[%s14977_s3 + $0xa0] sm:$0xff] }
 0x425   : > { %4269 = vrot.lane.b32.xlu2 %v11341_v58, %s8794_s18  ;;  %v3822_v56 = vsel %vm349_vm1, %v3790_v13, %v3708_v16  ;;  %v8223_v13 = vld [vmem:[%s14977_s3 + $0xb0] sm:$0xff]  ;;  %v8262_v16 = vld [vmem:[%s14977_s3 + $0xe8] sm:$0xff] }
 0x426   : > { %4753 = vrot.lane.b32.xlu0 %v11292_v26, %s8793_s17  ;;  %8194 = vmatmul.msk.f32.gmra.mxu1 %vm3853_vm2, %v3822_v56 }
 0x427   : > { %8203 = vmatmul.msk.f32.gmra.mxu2 %vm3853_vm2, %v3831_v35  ;;  %v11356_v8 = vpop.permute.xlu2 %3633  ;;  %4535 = vmatpush.msrb.mxu1 %v8223_v13  ;;  %v8261_v35 = vld [vmem:[%s14977_s3 + $0xe0] sm:$0xff]  ;;  %v8260_v13 = vld [vmem:[%s14977_s3 + $0xd8] sm:$0xff] }
 0x428   : > { %v3630_v37 = vpop.permute.xlu0 %3629  ;;  %5119 = vmatpush.msrb.mxu2 %v8263_v3 }
 0x429   : > { %4536 = vmatpush.msrb.mxu1 %v8222_v7  ;;  %v11404_v7 = vld [vmem:[#allocation3 + $0x51] sm:$0xff] }
 0x42a   : > { %4171 = vrot.lane.b32.xlu1 %v11266_v46, %s8793_s17  ;;  %5120 = vmatpush.msrb.mxu2 %v8262_v16  ;;  %v8220_v16 = vld [vmem:[%s14977_s3 + $0x98] sm:$0xff] }
 0x42b   : > { %4537 = vmatpush.msrb.mxu1 %v8221_v19 }
 0x42c   : > { %v3612_v17 = vpop.permute.xlu1 %3611  ;;  %5121 = vmatpush.msrb.mxu2 %v8261_v35  ;;  %v3800_v35 = vsel %vm342_vm10, %v11043_v39, %v3630_v37  ;;  %v8217_v37 = vld [vmem:[%s14977_s3 + $0x80] sm:$0xff] }
 0x42d   : > { %v3791_v56 = vsel %vm342_vm10, %v11065_v28, %v3612_v17  ;;  %3593 = vrot.lane.b32.xlu2 %v11280_v57, %s8793_s17  ;;  %v8219_v17 = vld [vmem:[%s14977_s3 + $0x90] sm:$0xff]  ;;  %4538 = vmatpush.msrb.mxu1 %v8220_v16  ;;  %v3792_v16 = vsel %vm342_vm10, %v11072_v48, %v11310_v30  ;;  %v8257_v48 = vld [vmem:[%s14977_s3 + $0xc0] sm:$0xff] }
 0x42e   : > { %3691 = vrot.lane.b32.xlu0 %v11216_v36, %s8794_s18  ;;  %v3823_v53 = vsel %vm349_vm1, %v3791_v56, %v11290_v32  ;;  %5122 = vmatpush.msrb.mxu2 %v8260_v13  ;;  %v8259_v32 = vld [vmem:[%s14977_s3 + $0xd0] sm:$0xff]  ;;  %v8218_v56 = vld [vmem:[%s14977_s3 + $0x88] sm:$0xff] }
 0x42f   : > { %8195 = vmatmul.msk.f32.gmra.mxu1 %vm3853_vm2, %v3823_v53  ;;  %v11393_v3 = vpop.permute.xlu2 %3715  ;;  %v11416_v53 = vld [vmem:[#allocation3 + $0x50] sm:$0xff]  ;;  %v8258_v13 = vld [vmem:[%s14977_s3 + $0xc8] sm:$0xff] }
 0x430   : > { %v3712_v28 = vpop.permute.xlu0 %3711  ;;  %5123 = vmatpush.msrb.mxu2 %v8259_v32  ;;  %4539 = vmatpush.msrb.mxu1 %v8219_v17 }
 0x431   : > { %v3824_v32 = vsel %vm349_vm1, %v3792_v16, %v3712_v28  ;;  %v8215_v28 = vld [vmem:[%s14977_s3 + $0x70] sm:$0xff]  ;;  %v8213_v16 = vld [vmem:[%s14977_s3 + $0x60] sm:$0xff] }
 0x432   : > { %4851 = vrot.lane.b32.xlu1 %v11404_v7, %s8794_s18  ;;  %4540 = vmatpush.msrb.mxu1 %v8218_v56  ;;  %v8214_v56 = vld [vmem:[%s14977_s3 + $0x68] sm:$0xff] }
 0x433   : > { %5124 = vmatpush.msrb.mxu2 %v8258_v13 }
 0x434   : > { %v3728_v19 = vpop.permute.xlu1 %3727  ;;  %4541 = vmatpush.msrb.mxu1 %v8217_v37 }
 0x435   : > { %4271 = vrot.lane.b32.xlu2 %v11416_v53, %s8794_s18  ;;  %v3832_v39 = vsel %vm349_vm1, %v3800_v35, %v3728_v19  ;;  %v8216_v35 = vld [vmem:[%s14977_s3 + $0x78] sm:$0xff]  ;;  %5125 = vmatpush.msrb.mxu2 %v8257_v48 }
 0x436   : > { %4755 = vrot.lane.b32.xlu0 %v11332_v47, %s8793_s17  ;;  %8204 = vmatmul.msk.f32.gmra.mxu2 %vm3853_vm2, %v3832_v39 }
 0x437   : > { %8196 = vmatmul.msk.f32.gmra.mxu1 %vm3853_vm2, %v3824_v32  ;;  %v3584_v17 = vpop.permute.xlu2 %3583 }
 0x438   : > { %v3616_v30 = vpop.permute.xlu0 %3615  ;;  %4542 = vmatpush.msrb.mxu1 %v8216_v35 }
 0x439   : > { %v3793_v48 = vsel %vm342_vm10, %v11082_v12, %v3616_v30 }
 0x43a   : > { %4173 = vrot.lane.b32.xlu1 %v11298_v44, %s8793_s17  ;;  %4543 = vmatpush.msrb.mxu1 %v8215_v28  ;;  %v11467_v28 = vld [vmem:[#allocation3 + $0x58] sm:$0xff] }
 0x43c   : > { %v3632_v19 = vpop.permute.xlu1 %3631  ;;  %4544 = vmatpush.msrb.mxu1 %v8214_v56 }
 0x43d   : > { %v3801_v13 = vsel %vm342_vm10, %v11088_v23, %v3632_v19  ;;  %3595 = vrot.lane.b32.xlu2 %v11314_v22, %s8793_s17  ;;  %v11461_v23 = vld [vmem:[#allocation3 + $0x59] sm:$0xff] }
 0x43e   : > { %3693 = vrot.lane.b32.xlu0 %v11262_v25, %s8794_s18  ;;  %v3833_v39 = vsel %vm349_vm1, %v3801_v13, %v11324_v63  ;;  %4545 = vmatpush.msrb.mxu1 %v8213_v16  ;;  %v3802_v63 = vsel %vm342_vm10, %v11092_v49, %v11356_v8  ;;  %v3515_v49 = vld [vmem:[#allocation3 + $0x7] sm:$0xff] }
 0x43f   : > { %8205 = vmatmul.msk.f32.gmra.mxu2 %vm3853_vm2, %v3833_v39  ;;  %v4262_v37 = vpop.permute.xlu2 %4261  ;;  %v3777_v39 = vsel %vm342_vm10, %v3515_v49, %v3584_v17  ;;  %v4095_v49 = vld [vmem:[#allocation3 + $0x8] sm:$0xff] }
 0x440   : > { %v3732_v32 = vpop.permute.xlu0 %3731 }
 0x441   : > { %v3834_v19 = vsel %vm349_vm1, %v3802_v63, %v3732_v32  ;;  %v4675_v63 = vld [vmem:[#allocation3 + $0x9] sm:$0xff] }
 0x442   : > { %4853 = vrot.lane.b32.xlu1 %v11461_v23, %s8794_s18 }
 0x444   : > { %v3714_v35 = vpop.permute.xlu1 %3713 }
 0x445   : > { %4273 = vrot.lane.b32.xlu2 %v11467_v28, %s8794_s18  ;;  %v3825_v56 = vsel %vm349_vm1, %v3793_v48, %v3714_v35 }
 0x446   : > { %4757 = vrot.lane.b32.xlu0 %v11404_v7, %s8793_s17  ;;  %8197 = vmatmul.msk.f32.gmra.mxu1 %vm3853_vm2, %v3825_v56  ;;  %v11493_v56 = vld [vmem:[#allocation3 + $0x61] sm:$0xff] }
 0x447   : > { %8206 = vmatmul.msk.f32.gmra.mxu2 %vm3853_vm2, %v3834_v19  ;;  %v3586_v12 = vpop.permute.xlu2 %3585 }
 0x448   : > { %v4744_v30 = vpop.permute.xlu0 %4743 }
 0x44a   : > { %4175 = vrot.lane.b32.xlu1 %v11341_v58, %s8793_s17 }
 0x44c   : > { %v3618_v8 = vpop.permute.xlu1 %3617 }
 0x44d   : > { %v3794_v13 = vsel %vm342_vm10, %v11106_v33, %v3618_v8  ;;  %3597 = vrot.lane.b32.xlu2 %v11216_v36, %s8793_s17  ;;  %v11499_v36 = vld [vmem:[#allocation3 + $0x60] sm:$0xff] }
 0x44e   : > { %3695 = vrot.lane.b32.xlu0 %v10897_v60, %s8794_s18  ;;  %v3826_v16 = vsel %vm349_vm1, %v3794_v13, %v11393_v3  ;;  %v4937_v60 = vsel %vm342_vm10, %v4675_v63, %v4744_v30  ;;  %v3516_v30 = vld [vmem:[#allocation3 + $0xf] sm:$0xff] }
 0x44f   : > { %8198 = vmatmul.msk.f32.gmra.mxu1 %vm3853_vm2, %v3826_v16  ;;  %v4264_v32 = vpop.permute.xlu2 %4263 }
 0x450   : > { %v3682_v48 = vpop.permute.xlu0 %3681 }
 0x451   : > { %v3809_v35 = vsel %vm349_vm1, %v3777_v39, %v3682_v48  ;;  %v3778_v39 = vsel %vm342_vm10, %v3516_v30, %v3586_v12  ;;  %v4096_v30 = vld [vmem:[#allocation3 + $0x10] sm:$0xff] }
 0x452   : > { %8181 = vmatmul.msk.f32.vlgmr.msra.gmra.mxu0 %vm3853_vm2, %v3809_v35  ;;  %4855 = vrot.lane.b32.xlu1 %v11493_v56, %s8794_s18 }
 0x454   : > { %v4842_v33 = vpop.permute.xlu1 %4841 }
 0x455   : > { %v4969_v3 = vsel %vm349_vm1, %v4937_v60, %v4842_v33  ;;  %4275 = vrot.lane.b32.xlu2 %v11499_v36, %s8794_s18  ;;  %v11518_v60 = vld [vmem:[#allocation3 + $0x69] sm:$0xff] }
 0x456   : > { %4759 = vrot.lane.b32.xlu0 %v11461_v23, %s8793_s17  ;;  %8269 = vmatmul.msk.f32.vlgmr.msrb.gmra.mxu2 %vm3853_vm2, %v4969_v3 }
 0x457   : > { %v3588_v17 = vpop.permute.xlu2 %3587 }
 0x458   : > { %v4746_v19 = vpop.permute.xlu0 %4745 }
 0x45a   : > { %4177 = vrot.lane.b32.xlu1 %v11416_v53, %s8793_s17 }
 0x45c   : > { %v4164_v8 = vpop.permute.xlu1 %4163 }
 0x45d   : > { %v4357_v13 = vsel %vm342_vm10, %v4095_v49, %v4164_v8  ;;  %3599 = vrot.lane.b32.xlu2 %v11262_v25, %s8793_s17  ;;  %v4676_v25 = vld [vmem:[#allocation3 + $0x11] sm:$0xff] }
 0x45e   : > { %3697 = vrot.lane.b32.xlu0 %v10955_v10, %s8794_s18  ;;  %v4389_v16 = vsel %vm349_vm1, %v4357_v13, %v4262_v37  ;;  %v4938_v10 = vsel %vm342_vm10, %v4676_v25, %v4746_v19  ;;  %v11524_v37 = vld [vmem:[#allocation3 + $0x68] sm:$0xff]  ;;  %v11534_v8 = vld [vmem:[#allocation3 + $0x70] sm:$0xff] }
 0x45f   : > { %8225 = vmatmul.msk.f32.vlgmr.msrb.gmra.mxu1 %vm3853_vm2, %v4389_v16  ;;  %v4266_v48 = vpop.permute.xlu2 %4265 }
 0x460   : > { %v3684_v35 = vpop.permute.xlu0 %3683 }
 0x461   : > { %v3810_v63 = vsel %vm349_vm1, %v3778_v39, %v3684_v35  ;;  %v3779_v39 = vsel %vm342_vm10, %v11196_v54, %v3588_v17 }
 0x462   : > { %8182 = vmatmul.msk.f32.gmra.mxu0 %vm3853_vm2, %v3810_v63  ;;  %4857 = vrot.lane.b32.xlu1 %v11518_v60, %s8794_s18 }
 0x464   : > { %v4844_v33 = vpop.permute.xlu1 %4843 }
 0x465   : > { %4277 = vrot.lane.b32.xlu2 %v11524_v37, %s8794_s18  ;;  %v4970_v12 = vsel %vm349_vm1, %v4938_v10, %v4844_v33  ;;  %v11546_v10 = vld [vmem:[#allocation3 + $0x71] sm:$0xff]  ;;  %v3118_v33 = vld [vmem:[#allocation2 + $0x109] sm:$0xff] }
 0x466   : > { %4761 = vrot.lane.b32.xlu0 %v11493_v56, %s8793_s17  ;;  %8270 = vmatmul.msk.f32.gmra.mxu2 %vm3853_vm2, %v4970_v12 }
 0x467   : > { %v3590_v3 = vpop.permute.xlu2 %3589 }
 0x468   : > { %v4748_v49 = vpop.permute.xlu0 %4747 }
 0x46a   : > { %4179 = vrot.lane.b32.xlu1 %v11467_v28, %s8793_s17 }
 0x46c   : > { %v4166_v19 = vpop.permute.xlu1 %4165 }
 0x46d   : > { %v4358_v13 = vsel %vm342_vm10, %v4096_v30, %v4166_v19  ;;  %4181 = vrot.lane.b32.xlu2 %v11499_v36, %s8793_s17  ;;  %v11553_v30 = vld [vmem:[#allocation3 + $0x79] sm:$0xff] }
 0x46e   : > { %4279 = vrot.lane.b32.xlu0 %v11534_v8, %s8794_s18  ;;  %v4390_v16 = vsel %vm349_vm1, %v4358_v13, %v4264_v32  ;;  %v4939_v32 = vsel %vm342_vm10, %v11188_v29, %v4748_v49 }
 0x46f   : > { %8226 = vmatmul.msk.f32.gmra.mxu1 %vm3853_vm2, %v4390_v16  ;;  %v4268_v35 = vpop.permute.xlu2 %4267  ;;  %v11561_v16 = vld [vmem:[#allocation3 + $0x78] sm:$0xff] }
 0x470   : > { %v3686_v63 = vpop.permute.xlu0 %3685 }
 0x471   : > { %v3811_v25 = vsel %vm349_vm1, %v3779_v39, %v3686_v63  ;;  %v3780_v39 = vsel %vm342_vm10, %v11226_v0, %v3590_v3 }
 0x472   : > { %8183 = vmatmul.msk.f32.gmra.mxu0 %vm3853_vm2, %v3811_v25  ;;  %4859 = vrot.lane.b32.xlu1 %v11546_v10, %s8794_s18 }
 0x474   : > { %v4846_v12 = vpop.permute.xlu1 %4845 }
 0x475   : > { %4861 = vrot.lane.b32.xlu2 %v11553_v30, %s8794_s18  ;;  %v4971_v54 = vsel %vm349_vm1, %v4939_v32, %v4846_v12 }
 0x476   : > { %3266 = vperm.xlu0 %8513, %v3118_v33   ;;  %8271 = vmatmul.msk.f32.gmra.mxu2 %vm3853_vm2, %v4971_v54  ;;  %v11583_v54 = vld [vmem:[#allocation3 + $0x81] sm:$0xff] }
 0x477   : > { %v3592_v17 = vpop.permute.xlu2 %3591 }
 0x478   : > { %v4750_v19 = vpop.permute.xlu0 %4749 }
 0x479   : > { %v4940_v32 = vsel %vm342_vm10, %v11210_v24, %v4750_v19  ;;  %v11589_v24 = vld [vmem:[#allocation3 + $0x89] sm:$0xff] }
 0x47a   : > { %4763 = vrot.lane.b32.xlu1 %v11518_v60, %s8793_s17  ;;  %15586 = vst [vmem:[#allocation109_spill] sm:$0xff] %v11589_v24 }
 0x47c   : > { %v4168_v13 = vpop.permute.xlu1 %4167 }
 0x47d   : > { %v4359_v29 = vsel %vm342_vm10, %v11222_v59, %v4168_v13  ;;  %4281 = vrot.lane.b32.xlu2 %v11561_v16, %s8794_s18  ;;  %v3119_v59 = vld [vmem:[#allocation2 + $0x111] sm:$0xff]  ;;  %v11585_v13 = vpop.f32.mrf.mxu1 }
 0x47e   : > { %4765 = vrot.lane.b32.xlu0 %v11546_v10, %s8793_s17  ;;  %v4391_v49 = vsel %vm349_vm1, %v4359_v29, %v4266_v48  ;;  %15585 = vst [vmem:[#allocation106_spill] sm:$0xff] %v11585_v13  ;;  %v11824_v13 = vld [vmem:[%s14978_s4] ss:$0 sm:$0xff] }
 0x47f   : > { %8227 = vmatmul.msk.f32.gmra.mxu1 %vm3853_vm2, %v4391_v49  ;;  %v4270_v63 = vpop.permute.xlu2 %4269 }
 0x480   : > { %v3688_v25 = vpop.permute.xlu0 %3687 }
 0x481   : > { %v3812_v33 = vsel %vm349_vm1, %v3780_v39, %v3688_v25  ;;  %v3781_v39 = vsel %vm342_vm10, %v11198_v45, %v3592_v17  ;;  %v11613_v17 = vld [vmem:[#allocation3 + $0x88] sm:$0xff] }
 0x482   : > { %8184 = vmatmul.msk.f32.gmra.mxu0 %vm3853_vm2, %v3812_v33  ;;  %4183 = vrot.lane.b32.xlu1 %v11524_v37, %s8793_s17  ;;  %15589 = vst [vmem:[#allocation99_spill] sm:$0xff] %v11613_v17 }
 0x484   : > { %v4848_v12 = vpop.permute.xlu1 %4847 }
 0x485   : > { %3271 = vperm.xlu2 %8515, %v3119_v59   ;;  %v4972_v0 = vsel %vm349_vm1, %v4940_v32, %v4848_v12  ;;  %v11602_v32 = vld [vmem:[#allocation3 + $0x80] sm:$0xff]  ;;  %v11609_v12 = vpop.f32.mrf.mxu2 }
 0x486   : > { %4185 = vrot.lane.b32.xlu0 %v11534_v8, %s8793_s17  ;;  %8272 = vmatmul.msk.f32.gmra.mxu2 %vm3853_vm2, %v4972_v0  ;;  %15588 = vst [vmem:[#allocation98_spill] sm:$0xff] %v11609_v12 }
 0x487   : > { %v3594_v48 = vpop.permute.xlu2 %3593 }
 0x488   : > { %v4752_v3 = vpop.permute.xlu0 %4751 }
 0x489   : > { %v4941_v45 = vsel %vm342_vm10, %v11204_v34, %v4752_v3  ;;  %v11623_v3 = vld [vmem:[#allocation3 + $0x91] sm:$0xff] }
 0x48a   : > { %4863 = vrot.lane.b32.xlu1 %v11583_v54, %s8794_s18  ;;  %15591 = vst [vmem:[#allocation102_spill] sm:$0xff] %v11623_v3 }
 0x48c   : > { %v4170_v29 = vpop.permute.xlu1 %4169 }
 0x48d   : > { %v4360_v19 = vsel %vm342_vm10, %v11244_v9, %v4170_v29  ;;  %4767 = vrot.lane.b32.xlu2 %v11553_v30, %s8793_s17  ;;  %v11605_v9 = vpop.f32.mrf.mxu1 }
 0x48e   : > { %4865 = vrot.lane.b32.xlu0 %v11589_v24, %s8794_s18  ;;  %v4392_v49 = vsel %vm349_vm1, %v4360_v19, %v4268_v35  ;;  %15587 = vst [vmem:[#allocation96_spill] sm:$0xff] %v11605_v9 }
 0x48f   : > { %8228 = vmatmul.msk.f32.gmra.mxu1 %vm3853_vm2, %v4392_v49  ;;  %v4272_v25 = vpop.permute.xlu2 %4271  ;;  %v3120_v49 = vld [vmem:[#allocation2 + $0x119] sm:$0xff] }
 0x490   : > { %v3690_v33 = vpop.permute.xlu0 %3689 }
 0x491   : > { %v3813_v59 = vsel %vm349_vm1, %v3781_v39, %v3690_v33  ;;  %v3121_v39 = vld [vmem:[#allocation2 + $0x121] sm:$0xff] }
 0x492   : > { %8185 = vmatmul.msk.f32.gmra.mxu0 %vm3853_vm2, %v3813_v59  ;;  %4283 = vrot.lane.b32.xlu1 %v11602_v32, %s8794_s18 }
 0x494   : > { %v4850_v35 = vpop.permute.xlu1 %4849 }
 0x495   : > { %4187 = vrot.lane.b32.xlu2 %v11561_v16, %s8793_s17  ;;  %v4973_v0 = vsel %vm349_vm1, %v4941_v45, %v4850_v35  ;;  %v11621_v33 = vpop.f32.mrf.mxu1  ;;  %v11629_v45 = vpop.f32.mrf.mxu2 }
 0x496   : > { %4285 = vrot.lane.b32.xlu0 %v11613_v17, %s8794_s18  ;;  %8273 = vmatmul.msk.f32.gmra.mxu2 %vm3853_vm2, %v4973_v0  ;;  %15590 = vst [vmem:[#allocation101_spill] sm:$0xff] %v11621_v33  ;;  %v3782_v0 = vsel %vm342_vm10, %v11228_v41, %v3594_v48  ;;  %v11803_v33 = vld [vmem:[%s14975_s1 + $0x7] ss:$0 sm:$0xff] }
 0x497   : > { %v3596_v29 = vpop.permute.xlu2 %3595  ;;  %15592 = vst [vmem:[#allocation104_spill] sm:$0xff] %v11629_v45 }
 0x498   : > { %v4754_v19 = vpop.permute.xlu0 %4753 }
 0x49a   : > { %3276 = vperm.xlu1 %8514, %v3120_v49  }
 0x49c   : > { %v4172_v34 = vpop.permute.xlu1 %4171 }
 0x49d   : > { %v4361_v59 = vsel %vm342_vm10, %v11208_v20, %v4172_v34  ;;  %4867 = vrot.lane.b32.xlu2 %v11623_v3, %s8794_s18  ;;  %v4942_v20 = vsel %vm342_vm10, %v11234_v51, %v4754_v19  ;;  %v11641_v34 = vld [vmem:[#allocation3 + $0x90] sm:$0xff]  ;;  %v11655_v19 = vld [vmem:[#allocation3 + $0x98] sm:$0xff] }
 0x49e   : > { %3281 = vperm.xlu0 %8513, %v3121_v39   ;;  %v4393_v35 = vsel %vm349_vm1, %v4361_v59, %v4270_v63  ;;  %15593 = vst [vmem:[#allocation111_spill] sm:$0xff] %v11641_v34  ;;  %v11650_v63 = vpop.f32.mrf.mxu2 }
 0x49f   : > { %8229 = vmatmul.msk.f32.gmra.mxu1 %vm3853_vm2, %v4393_v35  ;;  %v4274_v49 = vpop.permute.xlu2 %4273  ;;  %15595 = vst [vmem:[#allocation113_spill] sm:$0xff] %v11650_v63 }
 0x4a0   : > { %v3692_v38 = vpop.permute.xlu0 %3691  ;;  %15596 = vst [vmem:[#allocation114_spill] sm:$0xff] %v11655_v19 }
 0x4a1   : > { %v3814_v12 = vsel %vm349_vm1, %v3782_v0, %v3692_v38  ;;  %v11648_v38 = vpop.f32.mrf.mxu1 }
 0x4a2   : > { %8186 = vmatmul.msk.f32.gmra.mxu0 %vm3853_vm2, %v3814_v12  ;;  %4769 = vrot.lane.b32.xlu1 %v11583_v54, %s8793_s17  ;;  %15594 = vst [vmem:[#allocation112_spill] sm:$0xff] %v11648_v38  ;;  %v15615_v38 = vld [vmem:[#allocation97_spill] sm:$0xff] }
 0x4a4   : > { %v4852_v39 = vpop.permute.xlu1 %4851 }
 0x4a5   : > { %4287 = vrot.lane.b32.xlu2 %v11641_v34, %s8794_s18  ;;  %v4974_v41 = vsel %vm349_vm1, %v4942_v20, %v4852_v39  ;;  %v3783_v20 = vsel %vm342_vm10, %v11248_v11, %v3596_v29  ;;  %v4694_v11 = vld [vmem:[#allocation3 + $0xa1] sm:$0xff] }
 0x4a6   : > { %4771 = vrot.lane.b32.xlu0 %v11589_v24, %s8793_s17  ;;  %8274 = vmatmul.msk.f32.gmra.mxu2 %vm3853_vm2, %v4974_v41  ;;  %v11669_v63 = vpop.f32.mrf.mxu2 }
 0x4a7   : > { %v3598_v48 = vpop.permute.xlu2 %3597  ;;  %15598 = vst [vmem:[#allocation116_spill] sm:$0xff] %v11669_v63 }
 0x4a8   : > { %v4756_v12 = vpop.permute.xlu0 %4755 }
 0x4a9   : > { %v11663_v35 = vpop.f32.mrf.mxu1 }
 0x4aa   : > { %4189 = vrot.lane.b32.xlu1 %v11602_v32, %s8793_s17  ;;  %15597 = vst [vmem:[#allocation115_spill] sm:$0xff] %v11663_v35  ;;  %v15614_v35 = vld [vmem:[#allocation44_spill] sm:$0xff] }
 0x4ac   : > { %v4174_v51 = vpop.permute.xlu1 %4173 }
 0x4ad   : > { %v4362_v59 = vsel %vm342_vm10, %v11238_v5, %v4174_v51  ;;  %4191 = vrot.lane.b32.xlu2 %v11613_v17, %s8793_s17  ;;  %v11672_v51 = vld [vmem:[#allocation3 + $0x99] sm:$0xff] }
 0x4ae   : > { %4289 = vrot.lane.b32.xlu0 %v11655_v19, %s8794_s18  ;;  %v4394_v0 = vsel %vm349_vm1, %v4362_v59, %v4272_v25  ;;  %15599 = vst [vmem:[#allocation117_spill] sm:$0xff] %v11672_v51  ;;  %v4943_v25 = vsel %vm342_vm10, %v11258_v27, %v4756_v12  ;;  %v11690_v12 = vld [vmem:[#allocation3 + $0xa9] sm:$0xff] }
 0x4af   : > { %8230 = vmatmul.msk.f32.gmra.mxu1 %vm3853_vm2, %v4394_v0  ;;  %v4276_v39 = vpop.permute.xlu2 %4275 }
 0x4b0   : > { %v3694_v41 = vpop.permute.xlu0 %3693 }
 0x4b1   : > { %v3815_v5 = vsel %vm349_vm1, %v3783_v20, %v3694_v41  ;;  %v11684_v41 = vpop.f32.mrf.mxu1 }
 0x4b2   : > { %8187 = vmatmul.msk.f32.gmra.mxu0 %vm3853_vm2, %v3815_v5  ;;  %4869 = vrot.lane.b32.xlu1 %v11672_v51, %s8794_s18  ;;  %15600 = vst [vmem:[#allocation118_spill] sm:$0xff] %v11684_v41  ;;  %v11686_v5 = vpop.f32.mrf.mxu2 }
 0x4b3   : > { %15601 = vst [vmem:[#allocation119_spill] sm:$0xff] %v11686_v5 }
 0x4b4   : > { %v4854_v59 = vpop.permute.xlu1 %4853 }
 0x4b5   : > { %4871 = vrot.lane.b32.xlu2 %v4694_v11, %s8794_s18  ;;  %v4975_v29 = vsel %vm349_vm1, %v4943_v25, %v4854_v59  ;;  %v3784_v59 = vsel %vm342_vm10, %v11280_v57, %v3598_v48 }
 0x4b6   : > { %4193 = vrot.lane.b32.xlu0 %v11641_v34, %s8793_s17  ;;  %8275 = vmatmul.msk.f32.gmra.mxu2 %vm3853_vm2, %v4975_v29  ;;  %v15618_v34 = vld [vmem:[#allocation194_spill] sm:$0xff] }
 0x4b7   : > { %v3600_v0 = vpop.permute.xlu2 %3599 }
 0x4b8   : > { %v4758_v20 = vpop.permute.xlu0 %4757 }
 0x4b9   : > { %v4944_v57 = vsel %vm342_vm10, %v11292_v26, %v4758_v20 }
 0x4ba   : > { %4773 = vrot.lane.b32.xlu1 %v11623_v3, %s8793_s17 }
 0x4bc   : > { %v4176_v27 = vpop.permute.xlu1 %4175 }
 0x4bd   : > { %v4363_v63 = vsel %vm342_vm10, %v11266_v46, %v4176_v27  ;;  %4775 = vrot.lane.b32.xlu2 %v11672_v51, %s8793_s17  ;;  %v11708_v46 = vpop.f32.mrf.mxu1  ;;  %v11710_v27 = vpop.f32.mrf.mxu2 }
 0x4be   : > { %4873 = vrot.lane.b32.xlu0 %v11690_v12, %s8794_s18  ;;  %v4395_v25 = vsel %vm349_vm1, %v4363_v63, %v4274_v49  ;;  %15603 = vst [vmem:[#allocation121_spill] sm:$0xff] %v11708_v46  ;;  %v11716_v63 = vld [vmem:[#allocation3 + $0xa8] sm:$0xff]  ;;  %v11786_v46 = vld [vmem:[%s14975_s1 + $0x3] ss:$0 sm:$0xff] }
 0x4bf   : > { %8231 = vmatmul.msk.f32.gmra.mxu1 %vm3853_vm2, %v4395_v25  ;;  %v11702_v29 = vpop.permute.xlu2 %4277  ;;  %15604 = vst [vmem:[#allocation122_spill] sm:$0xff] %v11710_v27  ;;  %v1489_v61 = vmul.f32 %v11786_v46, %v15614_v35  ;;  %v11810_v35 = vld [vmem:[%s14975_s1 + $0x5] ss:$0 sm:$0xff] }
 0x4c0   : > { %v3696_v5 = vpop.permute.xlu0 %3695 }
 0x4c1   : > { %v3816_v45 = vsel %vm349_vm1, %v3784_v59, %v3696_v5 }
 0x4c2   : > { %8188 = vmatmul.msk.f32.gmra.mxu0 %vm3853_vm2, %v3816_v45  ;;  %4291 = vrot.lane.b32.xlu1 %v11705_v62, %s8794_s18 }
 0x4c4   : > { %v4856_v49 = vpop.permute.xlu1 %4855 }
 0x4c5   : > { %4293 = vrot.lane.b32.xlu2 %v11716_v63, %s8794_s18  ;;  %v4976_v45 = vsel %vm349_vm1, %v4944_v57, %v4856_v49  ;;  %v11725_v25 = vpop.f32.mrf.mxu1  ;;  %v11729_v26 = vpop.f32.mrf.mxu2  ;;  %v3785_v57 = vsel %vm342_vm10, %v11314_v22, %v3600_v0 }
 0x4c6   : > { %4777 = vrot.lane.b32.xlu0 %v4694_v11, %s8793_s17  ;;  %8276 = vmatmul.msk.f32.gmra.mxu2 %vm3853_vm2, %v4976_v45  ;;  %15605 = vst [vmem:[#allocation123_spill] sm:$0xff] %v11725_v25 }
 0x4c7   : > { %v11723_v48 = vpop.permute.xlu2 %4181  ;;  %15606 = vst [vmem:[#allocation125_spill] sm:$0xff] %v11729_v26  ;;  %v11742_v26 = vld [vmem:[#allocation3 + $0xb1] sm:$0xff] }
 0x4c8   : > { %v4760_v5 = vpop.permute.xlu0 %4759 }
 0x4ca   : > { %4195 = vrot.lane.b32.xlu1 %v11655_v19, %s8793_s17  ;;  %v11833_v19 = vld [vmem:[%s14975_s1 + $0x2] ss:$0 sm:$0xff] }
 0x4cc   : > { %v4178_v20 = vpop.permute.xlu1 %4177 }
 0x4cd   : > { %v4364_v59 = vsel %vm342_vm10, %v11298_v44, %v4178_v20  ;;  %3635 = vrot.lane.b32.xlu2 %v11155_v14, %s8793_s17  ;;  %v4945_v14 = vsel %vm342_vm10, %v11332_v47, %v4760_v5  ;;  %v11749_v44 = vpop.f32.mrf.mxu1  ;;  %v11756_v20 = vpop.f32.mrf.mxu2  ;;  %v455_v5 = vadd.s32 224, %v9879_v21 }
 0x4ce   : > { %v4396_v11 = vsel %vm349_vm1, %v4364_v59, %v4276_v39  ;;  %15607 = vst [vmem:[#allocation128_spill] sm:$0xff] %v11749_v44  ;;  %v11751_v39 = vld [vmem:[#allocation3 + $0xb0] sm:$0xff] }
 0x4cf   : > { %8232 = vmatmul.msk.f32.gmra.mxu1 %vm3853_vm2, %v4396_v11  ;;  %v11739_v49 = vpop.permute.xlu2 %4861  ;;  %15608 = vst [vmem:[#allocation129_spill] sm:$0xff] %v11756_v20  ;;  %v3967_v47 = vpop.f32.mrf.mxu0  ;;  %v15610_v20 = vld [vmem:[#allocation7_spill] sm:$0xff]  ;;  %v659_v9 = vand.u32 15, %v455_v5 }
 0x4d0   : > { %v3698_v45 = vpop.permute.xlu0 %3697 }
 0x4d1   : > { %v3817_v27 = vsel %vm349_vm1, %v3785_v57, %v3698_v45  ;;  %v11768_v57 = vld [vmem:[%s14975_s1 + $0x4] ss:$0 sm:$0xff]  ;;  %v15609_v45 = vld [vmem:[#allocation140_spill] sm:$0xff]  ;;  %vm11872_vm4 = vcmp.ne.s32.totalorder %v659_v9, 0  ;;  %v3054_v9 = vmul.f32 %v11810_v35, %v10592_v43  ;;  %v4366_v43 = vsel %vm342_vm10, %v11416_v53, %v11723_v48  ;;  %v5602_v53 = vld [vmem:[%s14979_s5 + $0x98] sm:$0xff] }
 0x4d2   : > { %8189 = vmatmul.msk.f32.gmra.mxu0 %vm3853_vm2, %v3817_v27  ;;  %4875 = vrot.lane.b32.xlu1 %v11742_v26, %s8794_s18  ;;  %v456_v27 = vadd.s32 232, %v9879_v21 }
 0x4d4   : > { %v4858_v22 = vpop.permute.xlu1 %4857 }
 0x4d5   : > { %4295 = vrot.lane.b32.xlu2 %v11751_v39, %s8794_s18  ;;  %v4977_v0 = vsel %vm349_vm1, %v4945_v14, %v4858_v22  ;;  %v2272_v14 = vmul.f32 %v11768_v57, %v15609_v45  ;;  %v666_v22 = vand.u32 15, %v456_v27  ;;  %v15612_v45 = vld [vmem:[#allocation42_spill] sm:$0xff] }
 0x4d6   : > { %8277 = vmatmul.msk.f32.gmra.mxu2 %vm3853_vm2, %v4977_v0  ;;  %v11777_v0 = vld [vmem:[%s14975_s1] ss:$0 sm:$0xff]  ;;  %v1488_v4 = vmul.f32 %v11786_v46, %v15612_v45  ;;  %v2533_v45 = vmul.f32 %v11803_v33, %v15616_v15 }
 0x4d7   : > { %v11760_v59 = vpop.permute.xlu2 %4281  ;;  %v1260_v44 = vmul.f32 %v11777_v0, %v15610_v20  ;;  %v1259_v25 = vmul.f32 %v11777_v0, %v15611_v52  ;;  %v15613_v27 = vld [vmem:[#allocation18_spill] sm:$0xff]  ;;  %v11796_v20 = vld [vmem:[%s14975_s1 + $0x1] ss:$0 sm:$0xff]  ;;  %vm11839_vm3 = vcmp.ne.s32.totalorder %v666_v22, 15 }
 0x4d8   : > { %v11762_v11 = vpop.permute.xlu0 %4761  ;;  %v4063_v41 = vmul.f32 %v15613_v27, %v3967_v47  ;;  %v2043_v52 = vmul.f32 %v11796_v20, %v15615_v38  ;;  %v3055_v47 = vmul.f32 %v11810_v35, %v10632_v55  ;;  %v11817_v38 = vld [vmem:[%s14975_s1 + $0x6] ss:$0 sm:$0xff] }
 0x4d9   : > { %v1521_v22 = vadd.f32 %v1489_v61, %v1260_v44  ;;  %v11865_v61 = vsel %vm11839_vm3, 1.0, %v15295_v42  ;;  %v11867_v44 = vld [vmem:[#allocation3 + $0xb9] sm:$0xff] }
 0x4da   : > { %4197 = vrot.lane.b32.xlu1 %v11705_v62, %s8793_s17  ;;  %v15617_v62 = vld [vmem:[#allocation75_spill] sm:$0xff]  ;;  %v2304_v5 = vadd.f32 %v2272_v14, %v2043_v52  ;;  %v15622_v14 = vld [vmem:[#allocation138_spill] sm:$0xff]  ;;  %15625 = vst [vmem:[#allocation124_spill] sm:$0xff] %v11865_v61 }
 0x4db   : > { %v1750_v1 = vmul.f32 %v11817_v38, %v15617_v62  ;;  %v2826_v62 = vmul.f32 %v11833_v19, %v15618_v34  ;;  %v2271_v52 = vmul.f32 %v11768_v57, %v15622_v14 }
 0x4dc   : > { %v4547_v27 = vpop.f32.mrf.mxu1  ;;  %v4180_v51 = vpop.permute.xlu1 %4179 }
 0x4dd   : > { %v4643_v15 = vadd.f32 %v4547_v27, %v4063_v41  ;;  %v4365_v55 = vsel %vm342_vm10, %v11341_v58, %v4180_v51  ;;  %3637 = vrot.lane.b32.xlu2 %v11175_v40, %s8793_s17  ;;  %v5127_v41 = vpop.f32.mrf.mxu2  ;;  %v1520_v58 = vadd.f32 %v1488_v4, %v1259_v25  ;;  %v15621_v51 = vld [vmem:[#allocation64_spill] sm:$0xff]  ;;  %v3087_v24 = vadd.f32 %v3055_v47, %v2826_v62  ;;  %v11854_v4 = vld [vmem:[%s14975_s1 + $0x8] ss:$0 sm:$0xff] }
 0x4de   : > { %v4397_v27 = vsel %vm349_vm1, %v4365_v55, %v11702_v29  ;;  %v1749_v40 = vmul.f32 %v11817_v38, %v15621_v51  ;;  %v5606_v29 = vld [vmem:[%s14979_s5 + $0xb8] sm:$0xff]  ;;  %v2565_v55 = vadd.f32 %v2533_v45, %v2304_v5  ;;  %v1782_v47 = vadd.f32 %v1750_v1, %v1521_v22 }
 0x4df   : > { %v5255_v3 = vadd.f32 %v5127_v41, %v4643_v15  ;;  %8233 = vmatmul.msk.f32.gmra.mxu1 %vm3853_vm2, %v4397_v27  ;;  %v3272_v17 = vpop.permute.xlu2 %3271  ;;  %5794 = vmatpush.msrb.mxu0 %v5606_v29  ;;  %v15623_v15 = vld [vmem:[#allocation107_spill] sm:$0xff]  ;;  %v15624_v27 = vld [vmem:[#allocation160_spill] sm:$0xff]  ;;  %v4946_v1 = vsel %vm342_vm10, %v11404_v7, %v11762_v11 }
 0x4e0   : > { %v4280_v34 = vpop.permute.xlu0 %4279  ;;  %v3316_v25 = vmul.f32 %v11854_v4, %v3272_v17  ;;  %v2042_v41 = vmul.f32 %v11796_v20, %v15623_v15  ;;  %v2532_v51 = vmul.f32 %v11803_v33, %v15624_v27  ;;  %v5605_v17 = vld [vmem:[%s14979_s5 + $0xb0] sm:$0xff]  ;;  %v5604_v29 = vld [vmem:[%s14979_s5 + $0xa8] sm:$0xff]  ;;  %v2597_v15 = vadd.f32 %v2565_v55, %v1782_v47  ;;  %v5603_v11 = vld [vmem:[%s14979_s5 + $0xa0] sm:$0xff] }
 0x4e1   : > { %v5291_v14 = vadd.f32 %v11824_v13, %v5255_v3  ;;  %5795 = vmatpush.msrb.mxu0 %v5605_v17  ;;  %v1781_v3 = vadd.f32 %v1749_v40, %v1520_v58  ;;  %v11892_v58 = vsel %vm11872_vm4, 1.0, %v15295_v42  ;;  %v4398_v27 = vsel %vm349_vm1, %v4366_v43, %v4280_v34  ;;  %v11921_v34 = vld [vmem:[%s14976_s2] ss:$0 sm:$0xff] }
 0x4e2   : > { %v3348_v5 = vadd.f32 %v3316_v25, %v3087_v24  ;;  %4877 = vrot.lane.b32.xlu1 %v11867_v44, %s8794_s18  ;;  %v2303_v31 = vadd.f32 %v2271_v52, %v2042_v41  ;;  %v11887_v25 = vld [vmem:[#allocation3 + $0xb8] sm:$0xff]  ;;  %15628 = vst [vmem:[#allocation133_spill] sm:$0xff] %v11892_v58 }
 0x4e3   : > { %v5323_v62 = vmax.f32 %v5291_v14, 0.0  ;;  %5796 = vmatpush.msrb.mxu0 %v5604_v29  ;;  %v15629_v52 = vld [vmem:[#allocation204_spill] sm:$0xff]  ;;  %v1813_v17 = vmul.f32 %v11892_v58, %v1781_v3 }
 0x4e4   : > { %v3380_v24 = vmul.f32 %v11865_v61, %v3348_v5  ;;  %v4860_v22 = vpop.permute.xlu1 %4859  ;;  %v2564_v40 = vadd.f32 %v2532_v51, %v2303_v31  ;;  %v2825_v55 = vmul.f32 %v11833_v19, %v15629_v52  ;;  %v5601_v14 = vld [vmem:[%s14979_s5 + $0x90] sm:$0xff]  ;;  %v5600_v3 = vld [vmem:[%s14979_s5 + $0x88] sm:$0xff] }
 0x4e5   : > { %5355 = vst.msk [vmem:[#allocation4 + $0x18] sm:$0xff] %vm349_vm1, %v5323_v62  ;;  %4297 = vrot.lane.b32.xlu2 %v11887_v25, %s8794_s18  ;;  %v4978_v7 = vsel %vm349_vm1, %v4946_v1, %v4860_v22  ;;  %5797 = vmatpush.msrb.mxu0 %v5603_v11  ;;  %v5599_v11 = vld [vmem:[%s14979_s5 + $0x80] sm:$0xff] }
 0x4e6   : > { %v3412_v41 = vadd.f32 %v3380_v24, %v2597_v15  ;;  %8278 = vmatmul.msk.f32.gmra.mxu2 %vm3853_vm2, %v4978_v7  ;;  %v3086_v45 = vadd.f32 %v3054_v9, %v2825_v55  ;;  %v2596_v31 = vadd.f32 %v2564_v40, %v1813_v17  ;;  %v3970_v9 = vpop.f32.mrf.mxu0 }
 0x4e7   : > { %8234 = vmatmul.msk.f32.gmra.mxu1 %vm3853_vm2, %v4398_v27  ;;  %v11912_v48 = vpop.permute.xlu2 %4767  ;;  %5798 = vmatpush.msrb.mxu0 %v5602_v53 }
 0x4e8   : > { %v3267_v51 = vpop.permute.xlu0 %3266  ;;  %v3448_v47 = vadd.f32 %v11921_v34, %v3412_v41 }
 0x4e9   : > { %v3315_v5 = vmul.f32 %v11854_v4, %v3267_v51  ;;  %v5130_v15 = vpop.f32.mrf.mxu2  ;;  %5799 = vmatpush.msrb.mxu0 %v5601_v14 }
 0x4ea   : > { %v3480_v62 = vmax.f32 %v3448_v47, 0.0  ;;  %4199 = vrot.lane.b32.xlu1 %v11716_v63, %s8793_s17  ;;  %v5224_v40 = vmul.f32 %v10533_v50, %v5130_v15  ;;  %v15630_v15 = vld [vmem:[#allocation19_spill] sm:$0xff] }
 0x4eb   : > { %v3347_v29 = vadd.f32 %v3315_v5, %v3086_v45  ;;  %5800 = vmatpush.msrb.mxu0 %v5600_v3 }
 0x4ec   : > { %3512 = vst.msk [vmem:[#allocation3 + $0x100] sm:$0xff] %vm342_vm10, %v3480_v62  ;;  %v4550_v24 = vpop.f32.mrf.mxu1  ;;  %v4764_v22 = vpop.permute.xlu1 %4763 }
 0x4ed   : > { %v3411_v1 = vadd.f32 %v3347_v29, %v2596_v31  ;;  %v4644_v43 = vadd.f32 %v4550_v24, %v3970_v9  ;;  %v4947_v7 = vsel %vm342_vm10, %v11461_v23, %v4764_v22  ;;  %5801 = vmatpush.msrb.mxu0 %v5599_v11  ;;  %v11944_v23 = vld [vmem:[#allocation3 + $0xc1] sm:$0xff] }
 0x4ee   : > { %v4979_v55 = vsel %vm349_vm1, %v4947_v7, %v11739_v49 }
 0x4ef   : > { %v3447_v52 = vadd.f32 %v11921_v34, %v3411_v1  ;;  %v5256_v41 = vadd.f32 %v5224_v40, %v4644_v43  ;;  %8279 = vmatmul.msk.f32.gmra.mxu2 %vm3853_vm2, %v4979_v55  ;;  %v11941_v27 = vpop.permute.xlu2 %4187  ;;  %v3973_v62 = vpop.f32.mrf.mxu0  ;;  %v457_v1 = vadd.s32 240, %v9879_v21 }
 0x4f0   : > { %v4766_v53 = vpop.permute.xlu0 %4765  ;;  %v4065_v3 = vmul.f32 %v15630_v15, %v3973_v62 }
 0x4f1   : > { %v3479_v51 = vmax.f32 %v3447_v52, 0.0  ;;  %v5292_v14 = vadd.f32 %v11824_v13, %v5256_v41  ;;  %v15631_v52 = vld [vmem:[#allocation34_spill] sm:$0xff]  ;;  %v673_v41 = vand.u32 15, %v457_v1 }
 0x4f2   : > { %4879 = vrot.lane.b32.xlu1 %v11944_v23, %s8794_s18  ;;  %v1490_v55 = vmul.f32 %v11786_v46, %v15631_v52 }
 0x4f3   : > { %3511 = vst.msk [vmem:[#allocation3 + $0xf8] sm:$0xff] %vm342_vm10, %v3479_v51  ;;  %v5324_v17 = vmax.f32 %v5292_v14, 0.0  ;;  %v11978_v51 = vld [vmem:[#allocation3 + $0xc0] sm:$0xff]  ;;  %vm873_vm5 = vcmp.ne.s32.totalorder %v673_v41, 0 }
 0x4f4   : > { %v4184_v45 = vpop.permute.xlu1 %4183  ;;  %v15632_v14 = vld [vmem:[#allocation12_spill] sm:$0xff] }
 0x4f5   : > { %5356 = vst.msk [vmem:[#allocation4 + $0x20] sm:$0xff] %vm349_vm1, %v5324_v17  ;;  %v4367_v49 = vsel %vm342_vm10, %v11467_v28, %v4184_v45  ;;  %v4948_v28 = vsel %vm342_vm10, %v11493_v56, %v4766_v53  ;;  %v11976_v53 = vld [vmem:[#allocation3 + $0xc9] sm:$0xff]  ;;  %v1261_v17 = vmul.f32 %v11777_v0, %v15632_v14  ;;  %v15633_v45 = vld [vmem:[#allocation77_spill] sm:$0xff] }
 0x4f6   : > { %v4399_v47 = vsel %vm349_vm1, %v4367_v49, %v11760_v59  ;;  %v1751_v49 = vmul.f32 %v11817_v38, %v15633_v45  ;;  %v15640_v45 = vld [vmem:[#allocation141_spill] sm:$0xff] }
 0x4f7   : > { %8235 = vmatmul.msk.f32.gmra.mxu1 %vm3853_vm2, %v4399_v47  ;;  %v11955_v5 = vpop.permute.xlu2 %4867  ;;  %v1522_v62 = vadd.f32 %v1490_v55, %v1261_v17  ;;  %v12010_v55 = vsel %vm873_vm5, 1.0, %v15295_v42 }
 0x4f8   : > { %v4186_v31 = vpop.permute.xlu0 %4185  ;;  %15637 = vst [vmem:[#allocation208_spill] sm:$0xff] %v12010_v55 }
 0x4f9   : > { %v5133_v40 = vpop.f32.mrf.mxu2 }
 0x4fa   : > { %v11957_v29 = vld [vmem:[#allocation3 + $0xf7] sm:$0xff]  ;;  %4201 = vrot.lane.b32.xlu1 %v11751_v39, %s8793_s17  ;;  %v12014_v14 = vld [vmem:[#allocation3 + $0xff] sm:$0xff] }
 0x4fb   : > { %3639 = vrot.lane.b32.xlu2 %v11957_v29, %s8793_s17  ;;  %3733 = vrot.lane.b32.xlu0 %v11957_v29, %s8794_s18 }
 0x4fc   : > { %v4553_v59 = vpop.f32.mrf.mxu1  ;;  %v4864_v9 = vpop.permute.xlu1 %4863 }
 0x4fd   : > { %v4645_v24 = vadd.f32 %v4553_v59, %v4065_v3  ;;  %v4980_v22 = vsel %vm349_vm1, %v4948_v28, %v4864_v9  ;;  %v4949_v3 = vsel %vm342_vm10, %v11518_v60, %v11912_v48  ;;  %v4368_v28 = vsel %vm342_vm10, %v11499_v36, %v4186_v31  ;;  %v15634_v9 = vld [vmem:[#allocation130_spill] sm:$0xff]  ;;  %v15635_v48 = vld [vmem:[#allocation108_spill] sm:$0xff] }
 0x4fe   : > { %8280 = vmatmul.msk.f32.gmra.mxu2 %vm3853_vm2, %v4980_v22  ;;  %v2273_v1 = vmul.f32 %v11768_v57, %v15634_v9  ;;  %v458_v60 = vadd.s32 248, %v9879_v21  ;;  %v2044_v36 = vmul.f32 %v11796_v20, %v15635_v48  ;;  %v15636_v31 = vld [vmem:[#allocation174_spill] sm:$0xff]  ;;  %v15644_v48 = vld [vmem:[#allocation164_spill] sm:$0xff] }
 0x4ff   : > { %v5257_v43 = vadd.f32 %v5133_v40, %v4645_v24  ;;  %v11971_v7 = vpop.permute.xlu2 %4287  ;;  %v2534_v40 = vmul.f32 %v11803_v33, %v15636_v31  ;;  %v15639_v21 = vld [vmem:[#allocation14_spill] sm:$0xff] }
 0x500   : > { %v4866_v11 = vpop.permute.xlu0 %4865  ;;  %v1262_v17 = vmul.f32 %v11777_v0, %v15639_v21  ;;  %v15643_v0 = vld [vmem:[#allocation110_spill] sm:$0xff] }
 0x501   : > { %v5293_v56 = vadd.f32 %v11824_v13, %v5257_v43  ;;  %v4981_v22 = vsel %vm349_vm1, %v4949_v3, %v4866_v11  ;;  %v15638_v11 = vld [vmem:[#allocation68_spill] sm:$0xff] }
 0x502   : > { %4881 = vrot.lane.b32.xlu1 %v11976_v53, %s8794_s18  ;;  %v3056_v41 = vmul.f32 %v11810_v35, %v15638_v11 }
 0x503   : > { %4299 = vrot.lane.b32.xlu2 %v11978_v51, %s8794_s18  ;;  %v5325_v47 = vmax.f32 %v5293_v56, 0.0  ;;  %4779 = vrot.lane.b32.xlu0 %v11690_v12, %s8793_s17  ;;  %v1783_v12 = vadd.f32 %v1751_v49, %v1522_v62  ;;  %v2305_v56 = vadd.f32 %v2273_v1, %v2044_v36  ;;  %v2274_v49 = vmul.f32 %v11768_v57, %v15640_v45  ;;  %v15646_v45 = vld [vmem:[#allocation207_spill] sm:$0xff] }
 0x504   : > { %v4284_v59 = vpop.permute.xlu1 %4283  ;;  %v2535_v36 = vmul.f32 %v11803_v33, %v15644_v48 }
 0x505   : > { %5357 = vst.msk [vmem:[#allocation4 + $0x28] sm:$0xff] %vm349_vm1, %v5325_v47  ;;  %v4400_v24 = vsel %vm349_vm1, %v4368_v28, %v4284_v59  ;;  %v15641_v47 = vld [vmem:[#allocation205_spill] sm:$0xff]  ;;  %v680_v28 = vand.u32 15, %v458_v60  ;;  %v1815_v1 = vmul.f32 %v12010_v55, %v1783_v12  ;;  %v2566_v57 = vadd.f32 %v2534_v40, %v2305_v56 }
 0x506   : > { %8236 = vmatmul.msk.f32.gmra.mxu1 %vm3853_vm2, %v4400_v24  ;;  %8281 = vmatmul.msk.f32.gmra.mxu2 %vm3853_vm2, %v4981_v22  ;;  %v2827_v62 = vmul.f32 %v11833_v19, %v15641_v47  ;;  %v15642_v59 = vld [vmem:[#allocation45_spill] sm:$0xff]  ;;  %v2045_v24 = vmul.f32 %v11796_v20, %v15643_v0  ;;  %v3976_v22 = vpop.f32.mrf.mxu0  ;;  %v3057_v60 = vmul.f32 %v11810_v35, %v10644_v2 }
 0x507   : > { %v12007_v43 = vpop.permute.xlu2 %4191  ;;  %v1491_v9 = vmul.f32 %v11786_v46, %v15642_v59  ;;  %v4369_v46 = vsel %vm342_vm10, %v11524_v37, %v11941_v27  ;;  %v2828_v37 = vmul.f32 %v11833_v19, %v15646_v45  ;;  %vm970_vm6 = vcmp.ne.s32.totalorder %v680_v28, 15  ;;  %v12059_v19 = vld [vmem:[#allocation3 + $0xd1] sm:$0xff]  ;;  %v12061_v28 = vld [vmem:[#allocation3 + $0xc8] sm:$0xff] }
 0x508   : > { %v4286_v52 = vpop.permute.xlu0 %4285  ;;  %v3088_v31 = vadd.f32 %v3056_v41, %v2827_v62  ;;  %v15645_v41 = vld [vmem:[#allocation67_spill] sm:$0xff]  ;;  %v2306_v35 = vadd.f32 %v2274_v49, %v2045_v24  ;;  %v2598_v27 = vadd.f32 %v2566_v57, %v1815_v1  ;;  %v12057_v24 = vsel %vm970_vm6, 1.0, %v15295_v42 }
 0x509   : > { %v5136_v3 = vpop.f32.mrf.mxu2  ;;  %v4401_v33 = vsel %vm349_vm1, %v4369_v46, %v4286_v52  ;;  %v1752_v2 = vmul.f32 %v11817_v38, %v15645_v41  ;;  %v1523_v0 = vadd.f32 %v1491_v9, %v1262_v17  ;;  %v3089_v48 = vadd.f32 %v3057_v60, %v2828_v37  ;;  %15647 = vst [vmem:[#allocation131_spill] sm:$0xff] %v12057_v24 }
 0x50a   : > { %4203 = vrot.lane.b32.xlu1 %v11887_v25, %s8793_s17  ;;  %v5226_v20 = vmul.f32 %v10738_v6, %v5136_v3  ;;  %v15676_v6 = vld [vmem:[#allocation128_spill] sm:$0xff] }
 0x50b   : > { %3641 = vrot.lane.b32.xlu2 %v12014_v14, %s8793_s17  ;;  %3735 = vrot.lane.b32.xlu0 %v12014_v14, %s8794_s18  ;;  %v1784_v1 = vadd.f32 %v1752_v2, %v1523_v0  ;;  %v12097_v0 = vld [vmem:[#allocation3 + $0xd9] sm:$0xff] }
 0x50c   : > { %v4556_v12 = vpop.f32.mrf.mxu1  ;;  %v3277_v11 = vpop.permute.xlu1 %3276  ;;  %v12040_v21 = vld [vmem:[#allocation4 + $0x27] sm:$0xff] }
 0x50d   : > { %v4646_v40 = vadd.f32 %v4556_v12, %v3976_v22  ;;  %v3317_v56 = vmul.f32 %v11854_v4, %v3277_v11  ;;  %8301 = vmatmul.msk.f32.vlgmr.msrb.gmra.mxu0 %vm349_vm1, %v12040_v21  ;;  %v2567_v22 = vadd.f32 %v2535_v36, %v2306_v35 }
 0x50e   : > { %8237 = vmatmul.msk.f32.gmra.mxu1 %vm3853_vm2, %v4401_v33  ;;  %v15648_v33 = vld [vmem:[#allocation8_spill] sm:$0xff] }
 0x50f   : > { %v5258_v47 = vadd.f32 %v5226_v20, %v4646_v40  ;;  %v3349_v62 = vadd.f32 %v3317_v56, %v3088_v31  ;;  %v12052_v3 = vpop.permute.xlu2 %4871  ;;  %v2599_v42 = vadd.f32 %v2567_v22, %v1784_v1 }
 0x510   : > { %v3282_v59 = vpop.permute.xlu0 %3281 }
 0x511   : > { %v3318_v52 = vmul.f32 %v11854_v4, %v3282_v59  ;;  %v5294_v38 = vadd.f32 %v11824_v13, %v5258_v47  ;;  %v3413_v49 = vadd.f32 %v3349_v62, %v2598_v27 }
 0x512   : > { %4883 = vrot.lane.b32.xlu1 %v12059_v19, %s8794_s18 }
 0x513   : > { %v3350_v57 = vadd.f32 %v3318_v52, %v3089_v48  ;;  %4301 = vrot.lane.b32.xlu2 %v12061_v28, %s8794_s18  ;;  %v5326_v17 = vmax.f32 %v5294_v38, 0.0  ;;  %v3449_v4 = vadd.f32 %v11921_v34, %v3413_v49  ;;  %4781 = vrot.lane.b32.xlu0 %v11742_v26, %s8793_s17  ;;  %v3979_v26 = vpop.f32.mrf.mxu0  ;;  %v4371_v38 = vsel %vm342_vm10, %v11561_v16, %v12007_v43  ;;  %v12111_v49 = vld [vmem:[#allocation3 + $0xd0] sm:$0xff] }
 0x514   : > { %v4770_v36 = vpop.permute.xlu1 %4769 }
 0x515   : > { %v3382_v9 = vmul.f32 %v12057_v24, %v3350_v57  ;;  %5358 = vst.msk [vmem:[#allocation4 + $0x30] sm:$0xff] %vm349_vm1, %v5326_v17  ;;  %v3481_v31 = vmax.f32 %v3449_v4, 0.0  ;;  %v4950_v60 = vsel %vm342_vm10, %v11546_v10, %v4770_v36  ;;  %v4067_v10 = vmul.f32 %v15648_v33, %v3979_v26 }
 0x516   : > { %v4982_v12 = vsel %vm349_vm1, %v4950_v60, %v11955_v5 }
 0x517   : > { %v3414_v46 = vadd.f32 %v3382_v9, %v2599_v42  ;;  %3513 = vst.msk [vmem:[#allocation3 + $0x108] sm:$0xff] %vm342_vm10, %v3481_v31  ;;  %8282 = vmatmul.msk.f32.gmra.mxu2 %vm3853_vm2, %v4982_v12  ;;  %v12079_v40 = vpop.permute.xlu2 %4775 }
 0x518   : > { %v4772_v11 = vpop.permute.xlu0 %4771 }
 0x519   : > { %v3450_v20 = vadd.f32 %v11921_v34, %v3414_v46  ;;  %v5139_v34 = vpop.f32.mrf.mxu2 }
 0x51a   : > { %4205 = vrot.lane.b32.xlu1 %v11978_v51, %s8793_s17 }
 0x51b   : > { %v3482_v56 = vmax.f32 %v3450_v20, 0.0 }
 0x51c   : > { %v4559_v41 = vpop.f32.mrf.mxu1  ;;  %v4190_v5 = vpop.permute.xlu1 %4189  ;;  %v12085_v2 = vld [vmem:[#allocation4 + $0x2f] sm:$0xff] }
 0x51d   : > { %3514 = vst.msk [vmem:[#allocation3 + $0x110] sm:$0xff] %vm342_vm10, %v3482_v56  ;;  %v4647_v35 = vadd.f32 %v4559_v41, %v4067_v10  ;;  %v4370_v45 = vsel %vm342_vm10, %v11534_v8, %v4190_v5  ;;  %8302 = vmatmul.msk.f32.gmra.mxu0 %vm349_vm1, %v12085_v2  ;;  %v15649_v10 = vld [vmem:[#allocation109_spill] sm:$0xff]  ;;  %v12148_v5 = vld [vmem:[#allocation3 + $0xd8] sm:$0xff] }
 0x51e   : > { %v3547_v37 = vld [vmem:[#allocation3 + $0x107] sm:$0xff]  ;;  %v4402_v27 = vsel %vm349_vm1, %v4370_v45, %v11971_v7  ;;  %v4951_v7 = vsel %vm342_vm10, %v11553_v30, %v4772_v11  ;;  %v4953_v41 = vsel %vm342_vm10, %v15649_v10, %v12079_v40  ;;  %v12160_v40 = vld [vmem:[#allocation4 + $0x1f] sm:$0xff] }
 0x51f   : > { %v5259_v47 = vadd.f32 %v5139_v34, %v4647_v35  ;;  %3643 = vrot.lane.b32.xlu2 %v3547_v37, %s8793_s17  ;;  %3737 = vrot.lane.b32.xlu0 %v3547_v37, %s8794_s18  ;;  %v12101_v22 = vpop.permute.xlu2 %4293  ;;  %v3982_v16 = vpop.f32.mrf.mxu0  ;;  %v12136_v11 = vld [vmem:[#allocation3 + $0xe1] sm:$0xff]  ;;  %v15650_v37 = vld [vmem:[#allocation24_spill] sm:$0xff]  ;;  %v15653_v10 = vld [vmem:[#allocation82_spill] sm:$0xff] }
 0x520   : > { %8238 = vmatmul.msk.f32.gmra.mxu1 %vm3853_vm2, %v4402_v27  ;;  %v4290_v62 = vpop.permute.xlu0 %4289  ;;  %v12156_v34 = vld [vmem:[#allocation3 + $0xe0] sm:$0xff] }
 0x521   : > { %v5295_v59 = vadd.f32 %v11824_v13, %v5259_v47  ;;  %v4403_v30 = vsel %vm349_vm1, %v4371_v38, %v4290_v62 }
 0x522   : > { %4885 = vrot.lane.b32.xlu1 %v12097_v0, %s8794_s18 }
 0x523   : > { %v5327_v8 = vmax.f32 %v5295_v59, 0.0 }
 0x524   : > { %v4870_v48 = vpop.permute.xlu1 %4869  ;;  %v3548_v31 = vld [vmem:[#allocation3 + $0x10f] sm:$0xff] }
 0x525   : > { %5359 = vst.msk [vmem:[#allocation4 + $0x38] sm:$0xff] %vm349_vm1, %v5327_v8  ;;  %v4983_v52 = vsel %vm349_vm1, %v4951_v7, %v4870_v48  ;;  %v12165_v8 = vld [vmem:[#allocation4 + $0x17] sm:$0xff] }
 0x526   : > { %8283 = vmatmul.msk.f32.gmra.mxu2 %vm3853_vm2, %v4983_v52  ;;  %v8516_v52 = vpack.i.bf16 %v12160_v40, %v12165_v8 }
 0x527   : > { %4303 = vrot.lane.b32.xlu2 %v12111_v49, %s8794_s18  ;;  %4783 = vrot.lane.b32.xlu0 %v11867_v44, %s8793_s17  ;;  %v12123_v42 = vpop.permute.xlu2 %3635 }
 0x528   : > { %8239 = vmatmul.msk.f32.gmra.mxu1 %vm3853_vm2, %v4403_v30  ;;  %v4194_v1 = vpop.permute.xlu0 %4193  ;;  %v3549_v30 = vld [vmem:[#allocation3 + $0x117] sm:$0xff] }
 0x529   : > { %v5142_v57 = vpop.f32.mrf.mxu2  ;;  %v4372_v26 = vsel %vm342_vm10, %v11602_v32, %v4194_v1 }
 0x52a   : > { %4207 = vrot.lane.b32.xlu1 %v12061_v28, %s8793_s17  ;;  %v5228_v9 = vmul.f32 %v10749_v18, %v5142_v57  ;;  %v4707_v18 = vld [vmem:[#allocation3 + $0x109] sm:$0xff] }
 0x52c   : > { %v4562_v43 = vpop.f32.mrf.mxu1  ;;  %v4774_v17 = vpop.permute.xlu1 %4773  ;;  %v12121_v4 = vld [vmem:[#allocation4 + $0x37] sm:$0xff] }
 0x52d   : > { %v4648_v36 = vadd.f32 %v4562_v43, %v3982_v16  ;;  %v4952_v44 = vsel %vm342_vm10, %v11583_v54, %v4774_v17  ;;  %8303 = vmatmul.msk.f32.gmra.mxu0 %vm349_vm1, %v12121_v4 }
 0x52e   : > { %v4984_v60 = vsel %vm349_vm1, %v4952_v44, %v12052_v3 }
 0x52f   : > { %v5260_v46 = vadd.f32 %v5228_v9, %v4648_v36  ;;  %3645 = vrot.lane.b32.xlu2 %v3548_v31, %s8793_s17  ;;  %3739 = vrot.lane.b32.xlu0 %v3548_v31, %s8794_s18  ;;  %v4296_v35 = vpop.permute.xlu2 %4295  ;;  %v3985_v32 = vpop.f32.mrf.mxu0  ;;  %v15652_v36 = vld [vmem:[#allocation102_spill] sm:$0xff] }
 0x530   : > { %8284 = vmatmul.msk.f32.gmra.mxu2 %vm3853_vm2, %v4984_v60  ;;  %v4874_v20 = vpop.permute.xlu0 %4873  ;;  %v4069_v27 = vmul.f32 %v15650_v37, %v3985_v32  ;;  %v12192_v60 = vld [vmem:[#allocation3 + $0xf1] sm:$0xff] }
 0x531   : > { %v5296_v12 = vadd.f32 %v11824_v13, %v5260_v46  ;;  %v4985_v45 = vsel %vm349_vm1, %v4953_v41, %v4874_v20  ;;  %v15654_v32 = vld [vmem:[#allocation111_spill] sm:$0xff] }
 0x532   : > { %4887 = vrot.lane.b32.xlu1 %v12136_v11, %s8794_s18 }
 0x533   : > { %v5328_v54 = vmax.f32 %v5296_v12, 0.0 }
 0x534   : > { %v4292_v3 = vpop.permute.xlu1 %4291 }
 0x535   : > { %5360 = vst.msk [vmem:[#allocation4 + $0x40] sm:$0xff] %vm349_vm1, %v5328_v54  ;;  %v4404_v56 = vsel %vm349_vm1, %v4372_v26, %v4292_v3 }
 0x536   : > { %8240 = vmatmul.msk.f32.gmra.mxu1 %vm3853_vm2, %v4404_v56  ;;  %v3550_v56 = vld [vmem:[#allocation3 + $0x11f] sm:$0xff] }
 0x537   : > { %4305 = vrot.lane.b32.xlu2 %v12148_v5, %s8794_s18  ;;  %4785 = vrot.lane.b32.xlu0 %v11944_v23, %s8793_s17  ;;  %v15651_v23 = vld [vmem:[#allocation99_spill] sm:$0xff]  ;;  %v12178_v16 = vpop.permute.xlu2 %3637 }
 0x538   : > { %8285 = vmatmul.msk.f32.gmra.mxu2 %vm3853_vm2, %v4985_v45  ;;  %v4778_v43 = vpop.permute.xlu0 %4777 }
 0x539   : > { %v5145_v38 = vpop.f32.mrf.mxu2  ;;  %v4954_v44 = vsel %vm342_vm10, %v15652_v36, %v4778_v43 }
 0x53a   : > { %4307 = vrot.lane.b32.xlu1 %v12156_v34, %s8794_s18 }
 0x53c   : > { %v4565_v47 = vpop.f32.mrf.mxu1  ;;  %v4196_v62 = vpop.permute.xlu1 %4195  ;;  %v12163_v59 = vld [vmem:[#allocation4 + $0x3f] sm:$0xff] }
 0x53d   : > { %v4649_v7 = vadd.f32 %v4565_v47, %v4069_v27  ;;  %v4373_v48 = vsel %vm342_vm10, %v15651_v23, %v4196_v62  ;;  %8304 = vmatmul.msk.f32.gmra.mxu0 %vm349_vm1, %v12163_v59  ;;  %v12211_v23 = vld [vmem:[#allocation3 + $0xf0] sm:$0xff] }
 0x53e   : > { %v4405_v1 = vsel %vm349_vm1, %v4373_v48, %v12101_v22 }
 0x53f   : > { %v5261_v57 = vadd.f32 %v5145_v38, %v4649_v7  ;;  %8517 = vrot.lane.b32.xlu2 %v8516_v52, %s8794_s18  ;;  %3741 = vrot.lane.b32.xlu0 %v3549_v30, %s8794_s18  ;;  %v3988_v12 = vpop.f32.mrf.mxu0  ;;  %v4298_v54 = vpop.permute.xlu2 %4297 }
 0x540   : > { %8241 = vmatmul.msk.f32.gmra.mxu1 %vm3853_vm2, %v4405_v1  ;;  %v15655_v1 = vld [vmem:[#allocation26_spill] sm:$0xff] }
 0x541   : > { %v5297_v17 = vadd.f32 %v11824_v13, %v5261_v57 }
 0x542   : > { %4211 = vrot.lane.b32.xlu1 %v12148_v5, %s8793_s17 }
 0x543   : > { %v5329_v9 = vmax.f32 %v5297_v17, 0.0 }
 0x544   : > { %v4876_v22 = vpop.permute.xlu1 %4875 }
 0x545   : > { %5361 = vst.msk [vmem:[#allocation4 + $0x48] sm:$0xff] %vm349_vm1, %v5329_v9  ;;  %v4986_v31 = vsel %vm349_vm1, %v4954_v44, %v4876_v22  ;;  %v15656_v44 = vld [vmem:[#allocation114_spill] sm:$0xff] }
 0x546   : > { %8286 = vmatmul.msk.f32.gmra.mxu2 %vm3853_vm2, %v4986_v31 }
 0x547   : > { %4791 = vrot.lane.b32.xlu2 %v12097_v0, %s8793_s17  ;;  %4787 = vrot.lane.b32.xlu0 %v11976_v53, %s8793_s17  ;;  %v12203_v53 = vld [vmem:[#allocation3 + $0xe8] sm:$0xff] }
 0x549   : > { %v5148_v46 = vpop.f32.mrf.mxu2 }
 0x54a   : > { %4891 = vrot.lane.b32.xlu1 %v12192_v60, %s8794_s18  ;;  %v5230_v41 = vmul.f32 %v15653_v10, %v5148_v46 }
 0x54c   : > { %v4568_v26 = vpop.f32.mrf.mxu1  ;;  %v4198_v20 = vpop.permute.xlu1 %4197  ;;  %v12196_v3 = vld [vmem:[#allocation4 + $0x47] sm:$0xff] }
 0x54d   : > { %v4650_v45 = vadd.f32 %v4568_v26, %v3988_v12  ;;  %v4374_v27 = vsel %vm342_vm10, %v15654_v32, %v4198_v20  ;;  %8305 = vmatmul.msk.f32.gmra.mxu0 %vm349_vm1, %v12196_v3  ;;  %v12234_v12 = vld [vmem:[#allocation3 + $0xe9] sm:$0xff] }
 0x54e   : > { %v4406_v47 = vsel %vm349_vm1, %v4374_v27, %v4296_v35  ;;  %v8521_v35 = vpack.i.bf16 %v12085_v2, %v12040_v21 }
 0x54f   : > { %v5262_v62 = vadd.f32 %v5230_v41, %v4650_v45  ;;  %4309 = vrot.lane.b32.xlu2 %v12203_v53, %s8794_s18  ;;  %3743 = vrot.lane.b32.xlu0 %v3550_v56, %s8794_s18  ;;  %v3991_v30 = vpop.f32.mrf.mxu0  ;;  %v12243_v41 = vld [vmem:[#allocation3 + $0x101] sm:$0xff] }
 0x550   : > { %8242 = vmatmul.msk.f32.gmra.mxu1 %vm3853_vm2, %v4406_v47  ;;  %v4071_v57 = vmul.f32 %v15655_v1, %v3991_v30  ;;  %v15658_v30 = vld [vmem:[#allocation86_spill] sm:$0xff]  ;;  %v15666_v1 = vld [vmem:[#allocation28_spill] sm:$0xff] }
 0x551   : > { %v5298_v7 = vadd.f32 %v11824_v13, %v5262_v62 }
 0x552   : > { %4311 = vrot.lane.b32.xlu1 %v12211_v23, %s8794_s18 }
 0x553   : > { %v5330_v48 = vmax.f32 %v5298_v7, 0.0  ;;  %v12258_v7 = vld [vmem:[#allocation3 + $0x100] sm:$0xff] }
 0x554   : > { %v12215_v52 = vpop.permute.xlu1 %4877 }
 0x555   : > { %v12217_v38 = vpop.permute.xlu2 %3639  ;;  %5362 = vst.msk [vmem:[#allocation4 + $0x50] sm:$0xff] %vm349_vm1, %v5330_v48  ;;  %v15657_v48 = vld [vmem:[#allocation106_spill] sm:$0xff] }
 0x557   : > { %8522 = vrot.lane.b32.xlu2 %v8521_v35, %s8794_s18  ;;  %4789 = vrot.lane.b32.xlu0 %v12059_v19, %s8793_s17 }
 0x559   : > { %v5151_v46 = vpop.f32.mrf.mxu2 }
 0x55a   : > { %4215 = vrot.lane.b32.xlu1 %v12203_v53, %s8793_s17 }
 0x55c   : > { %v4571_v43 = vpop.f32.mrf.mxu1  ;;  %v4200_v17 = vpop.permute.xlu1 %4199  ;;  %v12228_v9 = vld [vmem:[#allocation4 + $0x4f] sm:$0xff] }
 0x55d   : > { %v4651_v36 = vadd.f32 %v4571_v43, %v4071_v57  ;;  %v4375_v22 = vsel %vm342_vm10, %v15656_v44, %v4200_v17  ;;  %v4300_v31 = vpop.permute.xlu2 %4299  ;;  %8306 = vmatmul.msk.f32.gmra.mxu0 %vm349_vm1, %v12228_v9  ;;  %v8723_v44 = vld [vmem:[#allocation3 + $0xd7] sm:$0xff] }
 0x55e   : > { %v4407_v26 = vsel %vm349_vm1, %v4375_v22, %v4298_v54  ;;  %v12250_v54 = vld [vmem:[#allocation3 + $0xf8] sm:$0xff]  ;;  %v3803_v22 = vsel %vm342_vm10, %v8723_v44, %v12123_v42 }
 0x55f   : > { %v5263_v20 = vadd.f32 %v5151_v46, %v4651_v36  ;;  %4795 = vrot.lane.b32.xlu2 %v12234_v12, %s8793_s17  ;;  %4209 = vrot.lane.b32.xlu0 %v12111_v49, %s8793_s17  ;;  %v8526_v46 = vpack.i.bf16 %v12163_v59, %v12121_v4 }
 0x560   : > { %8243 = vmatmul.msk.f32.gmra.mxu1 %vm3853_vm2, %v4407_v26  ;;  %v15659_v26 = vld [vmem:[#allocation120_spill] sm:$0xff] }
 0x561   : > { %v5299_v56 = vadd.f32 %v11824_v13, %v5263_v20 }
 0x562   : > { %4895 = vrot.lane.b32.xlu1 %v12243_v41, %s8794_s18 }
 0x563   : > { %v5331_v45 = vmax.f32 %v5299_v56, 0.0 }
 0x564   : > { %v12247_v32 = vpop.permute.xlu1 %4879  ;;  %v4574_v27 = vpop.f32.mrf.mxu1 }
 0x565   : > { %5363 = vst.msk [vmem:[#allocation4 + $0x58] sm:$0xff] %vm349_vm1, %v5331_v45  ;;  %v12252_v47 = vpop.permute.xlu2 %3641  ;;  %v4652_v35 = vadd.f32 %v4574_v27, %v15657_v48 }
 0x567   : > { %4313 = vrot.lane.b32.xlu2 %v12250_v54, %s8794_s18  ;;  %4889 = vrot.lane.b32.xlu0 %v12234_v12, %s8794_s18 }
 0x569   : > { %v5154_v62 = vpop.f32.mrf.mxu2 }
 0x56a   : > { %v5232_v57 = vmul.f32 %v15658_v30, %v5154_v62  ;;  %4315 = vrot.lane.b32.xlu1 %v12258_v7, %s8794_s18 }
 0x56c   : > { %v5264_v43 = vadd.f32 %v5232_v57, %v4652_v35  ;;  %v4202_v17 = vpop.permute.xlu1 %4201  ;;  %v12264_v36 = vld [vmem:[#allocation4 + $0x57] sm:$0xff]  ;;  %v15660_v35 = vld [vmem:[#allocation96_spill] sm:$0xff] }
 0x56d   : > { %v4376_v20 = vsel %vm342_vm10, %v15659_v26, %v4202_v17  ;;  %v3734_v56 = vpop.permute.xlu0 %3733  ;;  %8307 = vmatmul.msk.f32.gmra.mxu0 %vm349_vm1, %v12264_v36  ;;  %v4302_v48 = vpop.permute.xlu2 %4301  ;;  %v15661_v57 = vld [vmem:[#allocation17_spill] sm:$0xff] }
 0x56e   : > { %v5300_v45 = vadd.f32 %v11824_v13, %v5264_v43  ;;  %v3835_v27 = vsel %vm349_vm1, %v3803_v22, %v3734_v56  ;;  %v4408_v62 = vsel %vm349_vm1, %v4376_v20, %v4300_v31  ;;  %v4073_v43 = vmul.f32 %v15661_v57, %v15660_v35  ;;  %v15662_v26 = vld [vmem:[#allocation117_spill] sm:$0xff]  ;;  %v12291_v56 = vld [vmem:[#allocation3 + $0xf9] sm:$0xff] }
 0x56f   : > { %8207 = vmatmul.msk.f32.vlgmr.msra.gmra.mxu3 %vm3853_vm2, %v3835_v27  ;;  %8527 = vrot.lane.b32.xlu2 %v8526_v46, %s8794_s18  ;;  %v8725_v57 = vld [vmem:[#allocation3 + $0xa1] sm:$0xff] }
 0x570   : > { %v5332_v42 = vmax.f32 %v5300_v45, 0.0  ;;  %4793 = vrot.lane.b32.xlu0 %v12136_v11, %s8793_s17  ;;  %8244 = vmatmul.msk.f32.gmra.mxu1 %vm3853_vm2, %v4408_v62 }
 0x572   : > { %5364 = vst.msk [vmem:[#allocation4 + $0x60] sm:$0xff] %vm349_vm1, %v5332_v42  ;;  %4219 = vrot.lane.b32.xlu1 %v12250_v54, %s8793_s17  ;;  %v5157_v46 = vpop.f32.mrf.mxu2 }
 0x574   : > { %v4577_v31 = vpop.f32.mrf.mxu1  ;;  %v12287_v17 = vpop.permute.xlu1 %4881 }
 0x575   : > { %v4653_v44 = vadd.f32 %v4577_v31, %v4073_v43  ;;  %v4780_v22 = vpop.permute.xlu0 %4779  ;;  %v12305_v43 = vld [vmem:[#allocation3 + $0x111] sm:$0xff] }
 0x576   : > { %v4955_v20 = vsel %vm342_vm10, %v15662_v26, %v4780_v22 }
 0x577   : > { %v5265_v45 = vadd.f32 %v5157_v46, %v4653_v44  ;;  %4799 = vrot.lane.b32.xlu2 %v12291_v56, %s8793_s17  ;;  %v4987_v27 = vsel %vm349_vm1, %v4955_v20, %v12215_v52  ;;  %v8724_v44 = vld [vmem:[#allocation3 + $0xdf] sm:$0xff] }
 0x578   : > { %4213 = vrot.lane.b32.xlu0 %v12156_v34, %s8793_s17  ;;  %8287 = vmatmul.msk.f32.gmra.mxu2 %vm3853_vm2, %v4987_v27  ;;  %v3804_v22 = vsel %vm342_vm10, %v8724_v44, %v12178_v16 }
 0x579   : > { %v5301_v62 = vadd.f32 %v11824_v13, %v5265_v45  ;;  %v12301_v42 = vpop.permute.xlu2 %3643  ;;  %v12303_v35 = vld [vmem:[#allocation4 + $0x5f] sm:$0xff] }
 0x57a   : > { %8308 = vmatmul.msk.f32.gmra.mxu0 %vm349_vm1, %v12303_v35  ;;  %4899 = vrot.lane.b32.xlu1 %v12305_v43, %s8794_s18  ;;  %v4127_v45 = vld [vmem:[#allocation3 + $0x108] sm:$0xff] }
 0x57b   : > { %v5333_v52 = vmax.f32 %v5301_v62, 0.0 }
 0x57c   : > { %v4204_v31 = vpop.permute.xlu1 %4203 }
 0x57d   : > { %5365 = vst.msk [vmem:[#allocation4 + $0x68] sm:$0xff] %vm349_vm1, %v5333_v52  ;;  %v4377_v46 = vsel %vm342_vm10, %v11716_v63, %v4204_v31  ;;  %v3736_v26 = vpop.permute.xlu0 %3735  ;;  %v12323_v52 = vld [vmem:[#allocation3 + $0x110] sm:$0xff] }
 0x57e   : > { %v3836_v20 = vsel %vm349_vm1, %v3804_v22, %v3736_v26  ;;  %v4409_v27 = vsel %vm349_vm1, %v4377_v46, %v4302_v48  ;;  %v15663_v31 = vld [vmem:[#allocation87_spill] sm:$0xff]  ;;  %v15664_v48 = vld [vmem:[#allocation101_spill] sm:$0xff] }
 0x57f   : > { %8208 = vmatmul.msk.f32.gmra.mxu3 %vm3853_vm2, %v3836_v20  ;;  %4317 = vrot.lane.b32.xlu2 %v4127_v45, %s8794_s18  ;;  %v8531_v20 = vpack.i.bf16 %v12228_v9, %v12196_v3 }
 0x580   : > { %4893 = vrot.lane.b32.xlu0 %v12291_v56, %s8794_s18  ;;  %8245 = vmatmul.msk.f32.gmra.mxu1 %vm3853_vm2, %v4409_v27 }
 0x581   : > { %v5160_v16 = vpop.f32.mrf.mxu2  ;;  %v4304_v62 = vpop.permute.xlu2 %4303 }
 0x582   : > { %4319 = vrot.lane.b32.xlu1 %v12323_v52, %s8794_s18  ;;  %v5234_v44 = vmul.f32 %v15663_v31, %v5160_v16  ;;  %v15665_v31 = vld [vmem:[#allocation112_spill] sm:$0xff] }
 0x583   : > { %v4580_v63 = vpop.f32.mrf.mxu1 }
 0x584   : > { %v4654_v22 = vadd.f32 %v4580_v63, %v15664_v48  ;;  %v12329_v46 = vpop.permute.xlu1 %4883  ;;  %v12331_v26 = vld [vmem:[#allocation4 + $0x67] sm:$0xff] }
 0x585   : > { %v4782_v27 = vpop.permute.xlu0 %4781  ;;  %8309 = vmatmul.msk.f32.gmra.mxu0 %vm349_vm1, %v12331_v26 }
 0x586   : > { %v5266_v30 = vadd.f32 %v5234_v44, %v4654_v22  ;;  %v4956_v10 = vsel %vm342_vm10, %v8725_v57, %v4782_v27  ;;  %v4075_v44 = vmul.f32 %v15666_v1, %v15665_v31  ;;  %v5598_v27 = vld [vmem:[%s14979_s5 + $0x78] sm:$0xff] }
 0x587   : > { %8532 = vrot.lane.b32.xlu2 %v8531_v20, %s8794_s18  ;;  %v4988_v16 = vsel %vm349_vm1, %v4956_v10, %v12247_v32  ;;  %5673 = vmatpush.msrb.mxu3 %v5598_v27  ;;  %v4129_v27 = vld [vmem:[#allocation3 + $0x118] sm:$0xff] }
 0x588   : > { %v5302_v63 = vadd.f32 %v11824_v13, %v5266_v30  ;;  %4797 = vrot.lane.b32.xlu0 %v12192_v60, %s8793_s17  ;;  %8288 = vmatmul.msk.f32.gmra.mxu2 %vm3853_vm2, %v4988_v16 }
 0x589   : > { %v12345_v48 = vpop.permute.xlu2 %3645  ;;  %v5163_v32 = vpop.f32.mrf.mxu2 }
 0x58a   : > { %v5334_v22 = vmax.f32 %v5302_v63, 0.0  ;;  %4223 = vrot.lane.b32.xlu1 %v4127_v45, %s8793_s17  ;;  %v4710_v45 = vld [vmem:[#allocation3 + $0x121] sm:$0xff] }
 0x58b   : > { %v4583_v57 = vpop.f32.mrf.mxu1  ;;  %v5597_v63 = vld [vmem:[%s14979_s5 + $0x70] sm:$0xff] }
 0x58c   : > { %5366 = vst.msk [vmem:[#allocation4 + $0x70] sm:$0xff] %vm349_vm1, %v5334_v22  ;;  %v4655_v20 = vadd.f32 %v4583_v57, %v4075_v44  ;;  %v4206_v10 = vpop.permute.xlu1 %4205  ;;  %5674 = vmatpush.msrb.mxu3 %v5597_v63  ;;  %v8726_v44 = vld [vmem:[#allocation3 + $0xe7] sm:$0xff] }
 0x58d   : > { %v4378_v30 = vsel %vm342_vm10, %v11751_v39, %v4206_v10 }
 0x58e   : > { %v5267_v16 = vadd.f32 %v5163_v32, %v4655_v20  ;;  %v4410_v31 = vsel %vm349_vm1, %v4378_v30, %v4304_v62  ;;  %v3805_v62 = vsel %vm342_vm10, %v8726_v44, %v12217_v38  ;;  %v5596_v20 = vld [vmem:[%s14979_s5 + $0x68] sm:$0xff]  ;;  %v5595_v38 = vld [vmem:[%s14979_s5 + $0x60] sm:$0xff] }
 0x58f   : > { %4803 = vrot.lane.b32.xlu2 %v4707_v18, %s8793_s17  ;;  %8246 = vmatmul.msk.f32.gmra.mxu1 %vm3853_vm2, %v4410_v31  ;;  %v4130_v31 = vld [vmem:[#allocation3 + $0x120] sm:$0xff]  ;;  %v5592_v44 = vld [vmem:[%s14979_s5 + $0x48] sm:$0xff] }
 0x590   : > { %v5303_v39 = vadd.f32 %v11824_v13, %v5267_v16  ;;  %4217 = vrot.lane.b32.xlu0 %v12211_v23, %s8793_s17  ;;  %5675 = vmatpush.msrb.mxu3 %v5596_v20  ;;  %v5594_v16 = vld [vmem:[%s14979_s5 + $0x58] sm:$0xff] }
 0x591   : > { %v4306_v22 = vpop.permute.xlu2 %4305  ;;  %v3738_v57 = vpop.permute.xlu0 %3737 }
 0x592   : > { %v5335_v10 = vmax.f32 %v5303_v39, 0.0  ;;  %4903 = vrot.lane.b32.xlu1 %v4710_v45, %s8794_s18  ;;  %v3837_v32 = vsel %vm349_vm1, %v3805_v62, %v3738_v57  ;;  %5676 = vmatpush.msrb.mxu3 %v5595_v38  ;;  %v5593_v45 = vld [vmem:[%s14979_s5 + $0x50] sm:$0xff]  ;;  %v8727_v62 = vld [vmem:[#allocation3 + $0xa9] sm:$0xff] }
 0x593   : > { %8209 = vmatmul.msk.f32.gmra.mxu3 %vm3853_vm2, %v3837_v32  ;;  %v12373_v13 = vld [vmem:[#allocation4 + $0x6f] sm:$0xff] }
 0x594   : > { %5367 = vst.msk [vmem:[#allocation4 + $0x78] sm:$0xff] %vm349_vm1, %v5335_v10  ;;  %8310 = vmatmul.msk.f32.gmra.mxu0 %vm349_vm1, %v12373_v13  ;;  %v12381_v30 = vpop.permute.xlu1 %4885  ;;  %5677 = vmatpush.msrb.mxu3 %v5594_v16 }
 0x596   : > { %5678 = vmatpush.msrb.mxu3 %v5593_v45 }
 0x597   : > { %4321 = vrot.lane.b32.xlu2 %v4129_v27, %s8794_s18 }
 0x598   : > { %4897 = vrot.lane.b32.xlu0 %v4707_v18, %s8794_s18  ;;  %5679 = vmatpush.msrb.mxu3 %v5592_v44  ;;  %v5591_v18 = vld [vmem:[%s14979_s5 + $0x40] sm:$0xff] }
 0x599   : > { %v12391_v63 = vpop.permute.xlu2 %8517  ;;  %v4784_v39 = vpop.permute.xlu0 %4783 }
 0x59a   : > { %v4957_v57 = vsel %vm342_vm10, %v8727_v62, %v4784_v39  ;;  %4323 = vrot.lane.b32.xlu1 %v4130_v31, %s8794_s18  ;;  %v5166_v20 = vpop.f32.mrf.mxu2  ;;  %5680 = vmatpush.msrb.mxu3 %v5591_v18  ;;  %v15667_v31 = vld [vmem:[#allocation83_spill] sm:$0xff] }
 0x59b   : > { %v4989_v10 = vsel %vm349_vm1, %v4957_v57, %v12287_v17  ;;  %v12400_v32 = vld [vmem:[#allocation4 + $0x77] sm:$0xff]  ;;  %v5236_v45 = vmul.f32 %v15667_v31, %v5166_v20  ;;  %v15668_v39 = vld [vmem:[#allocation115_spill] sm:$0xff] }
 0x59c   : > { %8289 = vmatmul.msk.f32.gmra.mxu2 %vm3853_vm2, %v4989_v10  ;;  %8311 = vmatmul.msk.f32.gmra.mxu0 %vm349_vm1, %v12400_v32  ;;  %v4208_v38 = vpop.permute.xlu1 %4207  ;;  %v5590_v17 = vld [vmem:[%s14979_s5 + $0x38] sm:$0xff] }
 0x59d   : > { %v4586_v27 = vpop.f32.mrf.mxu1  ;;  %v4379_v16 = vsel %vm342_vm10, %v11887_v25, %v4208_v38  ;;  %v5589_v25 = vld [vmem:[%s14979_s5 + $0x30] sm:$0xff]  ;;  %5681 = vmatpush.msrb.mxu3 %v5590_v17  ;;  %v8728_v10 = vld [vmem:[#allocation3 + $0xef] sm:$0xff]  ;;  %v5588_v38 = vld [vmem:[%s14979_s5 + $0x28] sm:$0xff] }
 0x59e   : > { %v4656_v44 = vadd.f32 %v4586_v27, %v15668_v39  ;;  %v4411_v62 = vsel %vm349_vm1, %v4379_v16, %v4306_v22  ;;  %v3806_v20 = vsel %vm342_vm10, %v8728_v10, %v12252_v47  ;;  %v12434_v27 = vld [vmem:[%s14978_s4] ss:$0 sm:$0xff]  ;;  %v5586_v39 = vld [vmem:[%s14979_s5 + $0x18] sm:$0xff] }
 0x59f   : > { %5471 = vrot.lane.b32.xlu2 %v12264_v36, %s8794_s18  ;;  %8247 = vmatmul.msk.f32.gmra.mxu1 %vm3853_vm2, %v4411_v62  ;;  %v5587_v47 = vld [vmem:[%s14979_s5 + $0x20] sm:$0xff] }
 0x5a0   : > { %v5268_v57 = vadd.f32 %v5236_v45, %v4656_v44  ;;  %4801 = vrot.lane.b32.xlu0 %v12243_v41, %s8793_s17  ;;  %5682 = vmatpush.msrb.mxu3 %v5589_v25  ;;  %v15669_v62 = vld [vmem:[#allocation118_spill] sm:$0xff]  ;;  %v5585_v25 = vld [vmem:[%s14979_s5 + $0x10] sm:$0xff] }
 0x5a1   : > { %v12426_v18 = vpop.permute.xlu2 %4791  ;;  %v3740_v22 = vpop.permute.xlu0 %3739 }
 0x5a2   : > { %v5304_v16 = vadd.f32 %v12434_v27, %v5268_v57  ;;  %5477 = vrot.lane.b32.xlu1 %v12373_v13, %s8794_s18  ;;  %v3838_v17 = vsel %vm349_vm1, %v3806_v20, %v3740_v22  ;;  %5683 = vmatpush.msrb.mxu3 %v5588_v38  ;;  %v15670_v57 = vld [vmem:[#allocation30_spill] sm:$0xff] }
 0x5a3   : > { %8210 = vmatmul.msk.f32.gmra.mxu3 %vm3853_vm2, %v3838_v17  ;;  %v4077_v10 = vmul.f32 %v15670_v57, %v15669_v62  ;;  %v8730_v17 = vld [vmem:[#allocation3 + $0xb1] sm:$0xff]  ;;  %v4709_v57 = vld [vmem:[#allocation3 + $0x119] sm:$0xff] }
 0x5a4   : > { %v5336_v45 = vmax.f32 %v5304_v16, 0.0  ;;  %5684 = vmatpush.msrb.mxu3 %v5587_v47  ;;  %v5584_v16 = vld [vmem:[%s14979_s5 + $0x8] sm:$0xff] }
 0x5a5   : > { %v4589_v44 = vpop.f32.mrf.mxu1 }
 0x5a6   : > { %5368 = vst.msk [vmem:[#allocation4 + $0x80] sm:$0xff] %vm349_vm1, %v5336_v45  ;;  %5685 = vmatpush.msrb.mxu3 %v5586_v39  ;;  %v4657_v20 = vadd.f32 %v4589_v44, %v4077_v10  ;;  %v5583_v39 = vld [vmem:[%s14979_s5] sm:$0xff] }
 0x5a7   : > { %5473 = vrot.lane.b32.xlu2 %v12303_v35, %s8794_s18 }
 0x5a8   : > { %4221 = vrot.lane.b32.xlu0 %v12258_v7, %s8793_s17  ;;  %5686 = vmatpush.msrb.mxu3 %v5585_v25 }
 0x5a9   : > { %v12457_v22 = vpop.permute.xlu2 %4309  ;;  %v4786_v38 = vpop.permute.xlu0 %4785 }
 0x5aa   : > { %v4958_v47 = vsel %vm342_vm10, %v8730_v17, %v4786_v38  ;;  %v5169_v45 = vpop.f32.mrf.mxu2  ;;  %5687 = vmatpush.msrb.mxu3 %v5584_v16 }
 0x5ab   : > { %v5269_v62 = vadd.f32 %v5169_v45, %v4657_v20  ;;  %v4990_v31 = vsel %vm349_vm1, %v4958_v47, %v12329_v46  ;;  %v4888_v46 = vpop.permute.xlu1 %4887  ;;  %v15671_v45 = vld [vmem:[#allocation89_spill] sm:$0xff] }
 0x5ac   : > { %8290 = vmatmul.msk.f32.gmra.mxu2 %vm3853_vm2, %v4990_v31  ;;  %5688 = vmatpush.msrb.mxu3 %v5583_v39  ;;  %v3807_v31 = vsel %vm342_vm10, %v11957_v29, %v12301_v42  ;;  %v15672_v39 = vld [vmem:[#allocation121_spill] sm:$0xff] }
 0x5ad   : > { %v5305_v44 = vadd.f32 %v12434_v27, %v5269_v62  ;;  %v12470_v10 = vld [vmem:[#allocation4 + $0x7f] sm:$0xff] }
 0x5ae   : > { %8312 = vmatmul.msk.f32.gmra.mxu0 %vm349_vm1, %v12470_v10 }
 0x5af   : > { %v5337_v25 = vmax.f32 %v5305_v44, 0.0  ;;  %5479 = vrot.lane.b32.xlu2 %v12400_v32, %s8794_s18 }
 0x5b0   : > { %4901 = vrot.lane.b32.xlu0 %v4709_v57, %s8794_s18 }
 0x5b1   : > { %5369 = vst.msk [vmem:[#allocation4 + $0x88] sm:$0xff] %vm349_vm1, %v5337_v25  ;;  %v12481_v20 = vpop.permute.xlu2 %8522  ;;  %v3742_v38 = vpop.permute.xlu0 %3741 }
 0x5b2   : > { %v3839_v16 = vsel %vm349_vm1, %v3807_v31, %v3742_v38 }
 0x5b3   : > { %v5172_v17 = vpop.f32.mrf.mxu2  ;;  %8211 = vmatmul.msk.f32.gmra.mxu3 %vm3853_vm2, %v3839_v16  ;;  %v4592_v47 = vpop.f32.mrf.mxu1  ;;  %v8731_v16 = vld [vmem:[#allocation3 + $0xb9] sm:$0xff] }
 0x5b4   : > { %v5238_v62 = vmul.f32 %v15671_v45, %v5172_v17  ;;  %v4658_v44 = vadd.f32 %v4592_v47, %v15672_v39  ;;  %v4308_v31 = vpop.permute.xlu1 %4307 }
 0x5b6   : > { %v5270_v57 = vadd.f32 %v5238_v62, %v4658_v44  ;;  %v15674_v62 = vld [vmem:[#allocation23_spill] sm:$0xff] }
 0x5b8   : > { %v5306_v1 = vadd.f32 %v12434_v27, %v5270_v57  ;;  %4805 = vrot.lane.b32.xlu0 %v12305_v43, %s8793_s17  ;;  %v12490_v29 = vld [vmem:[#allocation4 + $0x87] sm:$0xff] }
 0x5b9   : > { %5483 = vrot.lane.b32.xlu1 %v12490_v29, %s8794_s18  ;;  %8313 = vmatmul.msk.f32.gmra.mxu0 %vm349_vm1, %v12490_v29  ;;  %v12496_v42 = vpop.permute.xlu2 %4795  ;;  %v4788_v25 = vpop.permute.xlu0 %4787  ;;  %v15673_v43 = vld [vmem:[#allocation123_spill] sm:$0xff] }
 0x5ba   : > { %v5338_v38 = vmax.f32 %v5306_v1, 0.0  ;;  %v4959_v17 = vsel %vm342_vm10, %v8731_v16, %v4788_v25  ;;  %v4079_v39 = vmul.f32 %v15674_v62, %v15673_v43  ;;  %v3808_v1 = vsel %vm342_vm10, %v12014_v14, %v12345_v48  ;;  %v8732_v43 = vld [vmem:[#allocation3 + $0xc1] sm:$0xff]  ;;  %v15675_v62 = vld [vmem:[#allocation163_spill] sm:$0xff] }
 0x5bb   : > { %v4991_v47 = vsel %vm349_vm1, %v4959_v17, %v12381_v30  ;;  %v5175_v45 = vpop.f32.mrf.mxu2  ;;  %v8519_v14 = vunpack.i.l.bf16 %v12391_v63 }
 0x5bc   : > { %5370 = vst.msk [vmem:[#allocation4 + $0x90] sm:$0xff] %vm349_vm1, %v5338_v38  ;;  %8291 = vmatmul.msk.f32.gmra.mxu2 %vm3853_vm2, %v4991_v47  ;;  %v4212_v47 = vpop.permute.xlu1 %4211 }
 0x5bd   : > { %v4595_v44 = vpop.f32.mrf.mxu1 }
 0x5be   : > { %v4659_v57 = vadd.f32 %v4595_v44, %v4079_v39 }
 0x5c0   : > { %v5271_v37 = vadd.f32 %v5175_v45, %v4659_v57  ;;  %4225 = vrot.lane.b32.xlu0 %v12323_v52, %s8793_s17  ;;  %v5387_v52 = vld [vmem:[#allocation4 + $0x7] sm:$0xff] }
 0x5c1   : > { %v12510_v25 = vpop.permute.xlu2 %4313  ;;  %v3744_v30 = vpop.permute.xlu0 %3743  ;;  %v5551_v44 = vsel %vm349_vm1, %v5387_v52, %v8519_v14  ;;  %v5388_v14 = vld [vmem:[#allocation4 + $0xf] sm:$0xff] }
 0x5c2   : > { %v5307_v16 = vadd.f32 %v12434_v27, %v5271_v37  ;;  %v3840_v38 = vsel %vm349_vm1, %v3808_v1, %v3744_v30 }
 0x5c3   : > { %8212 = vmatmul.msk.f32.gmra.mxu3 %vm3853_vm2, %v3840_v38  ;;  %v12515_v17 = vld [vmem:[#allocation4 + $0x8f] sm:$0xff]  ;;  %v8520_v38 = vunpack.i.h.bf16 %v12391_v63 }
 0x5c4   : > { %v5339_v45 = vmax.f32 %v5307_v16, 0.0  ;;  %5485 = vrot.lane.b32.xlu2 %v12515_v17, %s8794_s18  ;;  %8314 = vmatmul.msk.f32.gmra.mxu0 %vm349_vm1, %v12515_v17 }
 0x5c5   : > { %v5552_v63 = vsel %vm349_vm1, %v5388_v14, %v8520_v38 }
 0x5c6   : > { %5371 = vst.msk [vmem:[#allocation4 + $0x98] sm:$0xff] %vm349_vm1, %v5339_v45  ;;  %v4892_v45 = vpop.permute.xlu1 %4891 }
 0x5c8   : > { %5475 = vrot.lane.b32.xlu0 %v12331_v26, %s8794_s18 }
 0x5c9   : > { %v12525_v37 = vpop.permute.xlu2 %8527  ;;  %v4790_v48 = vpop.permute.xlu0 %4789 }
 0x5ca   : > { %v4960_v39 = vsel %vm342_vm10, %v8732_v43, %v4790_v48  ;;  %v5178_v57 = vpop.f32.mrf.mxu2 }
 0x5cb   : > { %5689 = vmatmul.f32.vlgmr.msrb.gmra.mxu3 %v5551_v44  ;;  %v4992_v1 = vsel %vm349_vm1, %v4960_v39, %v4888_v46  ;;  %v5240_v33 = vmul.f32 %v15675_v62, %v5178_v57  ;;  %v13083_v62 = vld [vmem:[#allocation4 + $0x51] sm:$0xff] }
 0x5cc   : > { %8292 = vmatmul.msk.f32.gmra.mxu2 %vm3853_vm2, %v4992_v1 }
 0x5cd   : > { %v4598_v30 = vpop.f32.mrf.mxu1  ;;  %v12531_v16 = vld [vmem:[#allocation4 + $0x97] sm:$0xff] }
 0x5ce   : > { %v4660_v15 = vadd.f32 %v4598_v30, %v15676_v6  ;;  %8315 = vmatmul.msk.f32.gmra.mxu0 %vm349_vm1, %v12531_v16  ;;  %v4312_v57 = vpop.permute.xlu1 %4311 }
 0x5d0   : > { %v5272_v52 = vadd.f32 %v5240_v33, %v4660_v15  ;;  %5481 = vrot.lane.b32.xlu0 %v12470_v10, %s8794_s18  ;;  %v8524_v15 = vunpack.i.l.bf16 %v12481_v20  ;;  %v4381_v33 = vsel %vm342_vm10, %v12061_v28, %v4212_v47 }
 0x5d1   : > { %v4210_v46 = vpop.permute.xlu0 %4209  ;;  %v12544_v39 = vpop.permute.xlu2 %4799  ;;  %v4413_v28 = vsel %vm349_vm1, %v4381_v33, %v12457_v22 }
 0x5d2   : > { %v5308_v48 = vadd.f32 %v12434_v27, %v5272_v52  ;;  %v4380_v43 = vsel %vm342_vm10, %v11978_v51, %v4210_v46  ;;  %v8733_v51 = vld [vmem:[#allocation3 + $0xc9] sm:$0xff]  ;;  %v5553_v38 = vsel %vm349_vm1, %v12165_v8, %v8524_v15 }
 0x5d3   : > { %5692 = vmatmul.f32.gmra.mxu3 %v5552_v63  ;;  %v4412_v6 = vsel %vm349_vm1, %v4380_v43, %v4308_v31  ;;  %v4961_v1 = vsel %vm342_vm10, %v8733_v51, %v12426_v18  ;;  %v8525_v18 = vunpack.i.h.bf16 %v12481_v20  ;;  %v8529_v20 = vunpack.i.l.bf16 %v12525_v37 }
 0x5d4   : > { %v5340_v44 = vmax.f32 %v5308_v48, 0.0  ;;  %8248 = vmatmul.msk.f32.gmra.mxu1 %vm3853_vm2, %v4412_v6 }
 0x5d5   : > { %v5554_v46 = vsel %vm349_vm1, %v12160_v40, %v8525_v18  ;;  %v5555_v6 = vsel %vm349_vm1, %v12040_v21, %v8529_v20  ;;  %v4963_v21 = vsel %vm342_vm10, %v12097_v0, %v12496_v42 }
 0x5d6   : > { %5372 = vst.msk [vmem:[#allocation4 + $0xa0] sm:$0xff] %vm349_vm1, %v5340_v44  ;;  %v4216_v8 = vpop.permute.xlu1 %4215 }
 0x5d8   : > { %5487 = vrot.lane.b32.xlu0 %v12531_v16, %s8794_s18 }
 0x5d9   : > { %v4890_v30 = vpop.permute.xlu0 %4889  ;;  %v12563_v47 = vpop.permute.xlu2 %4317 }
 0x5da   : > { %v4993_v31 = vsel %vm349_vm1, %v4961_v1, %v4890_v30 }
 0x5db   : > { %8293 = vmatmul.msk.f32.gmra.mxu2 %vm3853_vm2, %v4993_v31  ;;  %5695 = vmatmul.f32.gmra.mxu3 %v5553_v38  ;;  %v15677_v31 = vld [vmem:[#allocation98_spill] sm:$0xff]  ;;  %v15678_v38 = vld [vmem:[#allocation37_spill] sm:$0xff] }
 0x5dc   : > { %8249 = vmatmul.msk.f32.gmra.mxu1 %vm3853_vm2, %v4413_v28  ;;  %v4081_v0 = vmul.f32 %v15678_v38, %v15677_v31 }
 0x5dd   : > { %v12565_v14 = vld [vmem:[#allocation4 + $0x9f] sm:$0xff]  ;;  %v4601_v30 = vpop.f32.mrf.mxu1 }
 0x5de   : > { %5489 = vrot.lane.b32.xlu1 %v12565_v14, %s8794_s18  ;;  %8316 = vmatmul.msk.f32.gmra.mxu0 %vm349_vm1, %v12565_v14  ;;  %v4896_v40 = vpop.permute.xlu1 %4895  ;;  %v4661_v42 = vadd.f32 %v4601_v30, %v4081_v0 }
 0x5e1   : > { %v8533_v43 = vpop.permute.xlu2 %8532 }
 0x5e2   : > { %v4794_v52 = vpop.permute.xlu0 %4793 }
 0x5e3   : > { %v4962_v22 = vsel %vm342_vm10, %v12059_v19, %v4794_v52  ;;  %5698 = vmatmul.f32.gmra.mxu3 %v5554_v46  ;;  %v8530_v19 = vunpack.i.h.bf16 %v12525_v37 }
 0x5e4   : > { %v4994_v48 = vsel %vm349_vm1, %v4962_v22, %v4892_v45  ;;  %v4383_v45 = vsel %vm342_vm10, %v12148_v5, %v4216_v8  ;;  %v8535_v22 = vunpack.i.h.bf16 %v8533_v43 }
 0x5e5   : > { %8294 = vmatmul.msk.f32.gmra.mxu2 %vm3853_vm2, %v4994_v48  ;;  %v4415_v37 = vsel %vm349_vm1, %v4383_v45, %v12510_v25 }
 0x5e6   : > { %v4316_v5 = vpop.permute.xlu1 %4315 }
 0x5e9   : > { %v12588_v33 = vpop.permute.xlu2 %4803 }
 0x5ea   : > { %v4214_v63 = vpop.permute.xlu0 %4213 }
 0x5eb   : > { %v4382_v44 = vsel %vm342_vm10, %v12111_v49, %v4214_v63  ;;  %5701 = vmatmul.f32.gmra.mxu3 %v5555_v6  ;;  %v5556_v49 = vsel %vm349_vm1, %v12085_v2, %v8530_v19  ;;  %v5558_v6 = vsel %vm349_vm1, %v12163_v59, %v8535_v22  ;;  %v8354_v59 = vld [vmem:[%s14979_s5 + $0x168] sm:$0xff] }
 0x5ec   : > { %v4414_v15 = vsel %vm349_vm1, %v4382_v44, %v4312_v57  ;;  %v8534_v57 = vunpack.i.l.bf16 %v8533_v43  ;;  %v8356_v43 = vld [vmem:[%s14979_s5 + $0x178] sm:$0xff] }
 0x5ed   : > { %8250 = vmatmul.msk.f32.gmra.mxu1 %vm3853_vm2, %v4414_v15  ;;  %v8355_v15 = vld [vmem:[%s14979_s5 + $0x170] sm:$0xff]  ;;  %6339 = vmatpush.msra.mxu2 %v8356_v43  ;;  %v4604_v19 = vpop.f32.mrf.mxu1  ;;  %v8404_v43 = vld [vmem:[%s14979_s5 + $0x1f8] sm:$0xff] }
 0x5ee   : > { %v5557_v2 = vsel %vm349_vm1, %v12121_v4, %v8534_v57  ;;  %v4220_v20 = vpop.permute.xlu1 %4219  ;;  %v15680_v57 = vld [vmem:[#allocation90_spill] sm:$0xff]  ;;  %6763 = vmatpush.msra.mxu3 %v8404_v43 }
 0x5ef   : > { %6340 = vmatpush.msra.mxu2 %v8355_v15 }
 0x5f1   : > { %v12604_v18 = vpop.permute.xlu2 %4321  ;;  %6341 = vmatpush.msra.mxu2 %v8354_v59 }
 0x5f2   : > { %v4894_v51 = vpop.permute.xlu0 %4893 }
 0x5f3   : > { %v4995_v1 = vsel %vm349_vm1, %v4963_v21, %v4894_v51  ;;  %5704 = vmatmul.f32.gmra.mxu3 %v5556_v49  ;;  %v4965_v21 = vsel %vm342_vm10, %v12234_v12, %v12544_v39  ;;  %v8353_v12 = vld [vmem:[%s14979_s5 + $0x160] sm:$0xff]  ;;  %v15679_v39 = vld [vmem:[#allocation104_spill] sm:$0xff] }
 0x5f4   : > { %8295 = vmatmul.msk.f32.gmra.mxu2 %vm3853_vm2, %v4995_v1 }
 0x5f5   : > { %8251 = vmatmul.msk.f32.gmra.mxu1 %vm3853_vm2, %v4415_v37  ;;  %6342 = vmatpush.msra.mxu2 %v8353_v12 }
 0x5f6   : > { %v4900_v51 = vpop.permute.xlu1 %4899 }
 0x5fa   : > { %v4798_v28 = vpop.permute.xlu0 %4797 }
 0x5fb   : > { %v4964_v8 = vsel %vm342_vm10, %v12136_v11, %v4798_v28  ;;  %v5181_v52 = vpop.f32.mrf.mxu2  ;;  %5707 = vmatmul.f32.gmra.mxu3 %v5557_v2  ;;  %v8351_v2 = vld [vmem:[%s14979_s5 + $0x150] sm:$0xff] }
 0x5fc   : > { %v5273_v25 = vadd.f32 %v5181_v52, %v4661_v42  ;;  %v4996_v46 = vsel %vm349_vm1, %v4964_v8, %v4896_v40  ;;  %v5472_v40 = vpop.permute.xlu2 %5471 }
 0x5fd   : > { %8296 = vmatmul.msk.f32.gmra.mxu2 %vm3853_vm2, %v4996_v46  ;;  %v5559_v1 = vsel %vm349_vm1, %v12196_v3, %v5472_v40  ;;  %v8352_v3 = vld [vmem:[%s14979_s5 + $0x158] sm:$0xff] }
 0x5fe   : > { %v5309_v48 = vadd.f32 %v12434_v27, %v5273_v25  ;;  %6343 = vmatpush.msra.mxu2 %v8352_v3  ;;  %v8350_v25 = vld [vmem:[%s14979_s5 + $0x148] sm:$0xff]  ;;  %v4320_v22 = vpop.permute.xlu1 %4319 }
 0x5ff   : > { %v15684_v3 = vld [vmem:[#allocation103_spill] sm:$0xff] }
 0x600   : > { %v5341_v63 = vmax.f32 %v5309_v48, 0.0  ;;  %6344 = vmatpush.msra.mxu2 %v8351_v2 }
 0x602   : > { %5373 = vst.msk [vmem:[#allocation4 + $0xa8] sm:$0xff] %vm349_vm1, %v5341_v63  ;;  %v4218_v4 = vpop.permute.xlu0 %4217  ;;  %6345 = vmatpush.msra.mxu2 %v8350_v25  ;;  %v4607_v63 = vpop.f32.mrf.mxu1 }
 0x603   : > { %v4384_v11 = vsel %vm342_vm10, %v12156_v34, %v4218_v4  ;;  %5710 = vmatmul.f32.gmra.mxu3 %v5558_v6  ;;  %v4385_v34 = vsel %vm342_vm10, %v12203_v53, %v4220_v20  ;;  %v8349_v20 = vld [vmem:[%s14979_s5 + $0x140] sm:$0xff]  ;;  %v15681_v6 = vld [vmem:[#allocation113_spill] sm:$0xff] }
 0x604   : > { %v4416_v44 = vsel %vm349_vm1, %v4384_v11, %v4316_v5  ;;  %v4662_v5 = vadd.f32 %v4604_v19, %v15679_v39  ;;  %v4417_v31 = vsel %vm349_vm1, %v4385_v34, %v12563_v47  ;;  %v5474_v42 = vpop.permute.xlu2 %5473  ;;  %6346 = vmatpush.msra.mxu2 %v8349_v20  ;;  %v15682_v11 = vld [vmem:[#allocation38_spill] sm:$0xff] }
 0x605   : > { %8252 = vmatmul.msk.f32.gmra.mxu1 %vm3853_vm2, %v4416_v44  ;;  %v5560_v47 = vsel %vm349_vm1, %v12228_v9, %v5474_v42  ;;  %v4083_v44 = vmul.f32 %v15682_v11, %v15681_v6  ;;  %v8348_v39 = vld [vmem:[%s14979_s5 + $0x138] sm:$0xff]  ;;  %v8403_v42 = vld [vmem:[%s14979_s5 + $0x1f0] sm:$0xff] }
 0x606   : > { %v4224_v15 = vpop.permute.xlu1 %4223  ;;  %6218 = vmatpush.msra.mxu1 %v8348_v39  ;;  %6764 = vmatpush.msra.mxu3 %v8403_v42  ;;  %v12728_v20 = vld [vmem:[%s14979_s5 + $0x238] sm:$0xff] }
 0x607   : > { %v4387_v19 = vsel %vm342_vm10, %v12250_v54, %v4224_v15  ;;  %6884 = vmatpush.msra.mxu0 %v12728_v20  ;;  %v13060_v11 = vld [vmem:[#allocation4 + $0x39] sm:$0xff] }
 0x609   : > { %v12629_v45 = vld [vmem:[#allocation4 + $0xa7] sm:$0xff] }
 0x60a   : > { %v4898_v49 = vpop.permute.xlu0 %4897  ;;  %5491 = vrot.lane.b32.xlu2 %v12629_v45, %s8794_s18  ;;  %8317 = vmatmul.msk.f32.gmra.mxu0 %vm349_vm1, %v12629_v45 }
 0x60b   : > { %v4997_v53 = vsel %vm349_vm1, %v4965_v21, %v4898_v49  ;;  %v5184_v37 = vpop.f32.mrf.mxu2  ;;  %5713 = vmatmul.f32.gmra.mxu3 %v5559_v1  ;;  %v4967_v21 = vsel %vm342_vm10, %v12291_v56, %v12588_v33 }
 0x60c   : > { %v5242_v30 = vmul.f32 %v15680_v57, %v5184_v37  ;;  %8297 = vmatmul.msk.f32.gmra.mxu2 %vm3853_vm2, %v4997_v53  ;;  %v4419_v37 = vsel %vm349_vm1, %v4387_v19, %v12604_v18 }
 0x60d   : > { %8253 = vmatmul.msk.f32.gmra.mxu1 %vm3853_vm2, %v4417_v31 }
 0x60e   : > { %v5274_v0 = vadd.f32 %v5242_v30, %v4662_v5  ;;  %v4904_v54 = vpop.permute.xlu1 %4903  ;;  %v4610_v5 = vpop.f32.mrf.mxu1 }
 0x610   : > { %v5310_v28 = vadd.f32 %v12434_v27, %v5274_v0 }
 0x612   : > { %v5342_v8 = vmax.f32 %v5310_v28, 0.0  ;;  %v4802_v52 = vpop.permute.xlu0 %4801 }
 0x613   : > { %v4966_v46 = vsel %vm342_vm10, %v12192_v60, %v4802_v52  ;;  %5716 = vmatmul.f32.gmra.mxu3 %v5560_v47 }
 0x614   : > { %5374 = vst.msk [vmem:[#allocation4 + $0xb0] sm:$0xff] %vm349_vm1, %v5342_v8  ;;  %v4998_v48 = vsel %vm349_vm1, %v4966_v46, %v4900_v51  ;;  %v12719_v46 = vld [vmem:[#allocation4 + $0x28] sm:$0xff] }
 0x615   : > { %8298 = vmatmul.msk.f32.gmra.mxu2 %vm3853_vm2, %v4998_v48 }
 0x616   : > { %v4324_v8 = vpop.permute.xlu1 %4323 }
 0x61a   : > { %v4222_v9 = vpop.permute.xlu0 %4221 }
 0x61b   : > { %v4386_v4 = vsel %vm342_vm10, %v12211_v23, %v4222_v9  ;;  %v12672_v60 = vld [vmem:[#allocation4 + $0xaf] sm:$0xff]  ;;  %v4663_v23 = vadd.f32 %v4607_v63, %v4083_v44  ;;  %v15685_v63 = vld [vmem:[#allocation119_spill] sm:$0xff] }
 0x61c   : > { %5493 = vrot.lane.b32.xlu0 %v12672_v60, %s8794_s18  ;;  %v4418_v40 = vsel %vm349_vm1, %v4386_v4, %v4320_v22  ;;  %8318 = vmatmul.msk.f32.gmra.mxu0 %vm349_vm1, %v12672_v60  ;;  %v15686_v4 = vld [vmem:[#allocation27_spill] sm:$0xff]  ;;  %v12735_v44 = vld [vmem:[#allocation4 + $0x30] sm:$0xff] }
 0x61d   : > { %8254 = vmatmul.msk.f32.gmra.mxu1 %vm3853_vm2, %v4418_v40  ;;  %v4085_v6 = vmul.f32 %v15686_v4, %v15685_v63  ;;  %v8347_v40 = vld [vmem:[%s14979_s5 + $0x130] sm:$0xff] }
 0x61e   : > { %6219 = vmatpush.msra.mxu1 %v8347_v40 }
 0x61f   : > { %v5187_v59 = vpop.f32.mrf.mxu2 }
 0x620   : > { %v5275_v34 = vadd.f32 %v5187_v59, %v4663_v23 }
 0x622   : > { %v5311_v51 = vadd.f32 %v12434_v27, %v5275_v34  ;;  %v4902_v49 = vpop.permute.xlu0 %4901 }
 0x623   : > { %v4999_v1 = vsel %vm349_vm1, %v4967_v21, %v4902_v49  ;;  %v8402_v49 = vld [vmem:[%s14979_s5 + $0x1e8] sm:$0xff] }
 0x624   : > { %v5343_v53 = vmax.f32 %v5311_v51, 0.0  ;;  %8299 = vmatmul.msk.f32.gmra.mxu2 %vm3853_vm2, %v4999_v1  ;;  %v12751_v51 = vld [vmem:[#allocation4 + $0x38] sm:$0xff]  ;;  %6765 = vmatpush.msra.mxu3 %v8402_v49  ;;  %v5480_v1 = vpop.permute.xlu2 %5479 }
 0x625   : > { %8255 = vmatmul.msk.f32.gmra.mxu1 %vm3853_vm2, %v4419_v37 }
 0x626   : > { %5375 = vst.msk [vmem:[#allocation4 + $0xb8] sm:$0xff] %vm349_vm1, %v5343_v53  ;;  %v5563_v53 = vsel %vm349_vm1, %v12331_v26, %v5480_v1  ;;  %v15688_v26 = vld [vmem:[#allocation122_spill] sm:$0xff] }
 0x62a   : > { %v4806_v12 = vpop.permute.xlu0 %4805 }
 0x62b   : > { %v4968_v56 = vsel %vm342_vm10, %v12243_v41, %v4806_v12  ;;  %v15683_v41 = vld [vmem:[#allocation116_spill] sm:$0xff] }
 0x62c   : > { %v5000_v33 = vsel %vm349_vm1, %v4968_v56, %v4904_v54  ;;  %v4664_v31 = vadd.f32 %v4610_v5, %v15683_v41  ;;  %v8346_v41 = vld [vmem:[%s14979_s5 + $0x128] sm:$0xff] }
 0x62d   : > { %8300 = vmatmul.msk.f32.gmra.mxu2 %vm3853_vm2, %v5000_v33  ;;  %v12704_v30 = vld [vmem:[#allocation4 + $0xb7] sm:$0xff]  ;;  %v15687_v33 = vld [vmem:[#allocation88_spill] sm:$0xff]  ;;  %6220 = vmatpush.msra.mxu1 %v8346_v41 }
 0x62e   : > { %5495 = vrot.lane.b32.xlu1 %v12704_v30, %s8794_s18  ;;  %8319 = vmatmul.msk.f32.gmra.mxu0 %vm349_vm1, %v12704_v30 }
 0x62f   : > { %v5190_v18 = vpop.f32.mrf.mxu2 }
 0x630   : > { %v5244_v0 = vmul.f32 %v15684_v3, %v5190_v18 }
 0x632   : > { %v5276_v28 = vadd.f32 %v5244_v0, %v4664_v31  ;;  %v4226_v2 = vpop.permute.xlu0 %4225  ;;  %v8401_v31 = vld [vmem:[%s14979_s5 + $0x1e0] sm:$0xff]  ;;  %v12784_v0 = vld [vmem:[%s14979_s5 + $0x230] sm:$0xff] }
 0x633   : > { %v4388_v52 = vsel %vm342_vm10, %v12258_v7, %v4226_v2  ;;  %v4613_v7 = vpop.f32.mrf.mxu1  ;;  %6766 = vmatpush.msra.mxu3 %v8401_v31  ;;  %6885 = vmatpush.msra.mxu0 %v12784_v0 }
 0x634   : > { %v5312_v47 = vadd.f32 %v12434_v27, %v5276_v28  ;;  %v4420_v25 = vsel %vm349_vm1, %v4388_v52, %v4324_v8  ;;  %v4665_v43 = vadd.f32 %v4613_v7, %v4085_v6  ;;  %v12786_v28 = vld [vmem:[#allocation4 + $0x48] sm:$0xff]  ;;  %v12797_v7 = vld [vmem:[#allocation4 + $0x50] sm:$0xff]  ;;  %v8345_v6 = vld [vmem:[%s14979_s5 + $0x120] sm:$0xff] }
 0x635   : > { %8256 = vmatmul.msk.f32.gmra.mxu1 %vm3853_vm2, %v4420_v25  ;;  %8357 = vmatmul.msk.f32.vlgmr.msra.gmra.mxu2 %vm349_vm1, %v12719_v46  ;;  %v15690_v25 = vld [vmem:[#allocation91_spill] sm:$0xff] }
 0x636   : > { %v5344_v22 = vmax.f32 %v5312_v47, 0.0  ;;  %v15689_v47 = vld [vmem:[#allocation125_spill] sm:$0xff]  ;;  %6221 = vmatpush.msra.mxu1 %v8345_v6  ;;  %v12853_v6 = vld [vmem:[%s14979_s5 + $0x228] sm:$0xff] }
 0x637   : > { %6886 = vmatpush.msra.mxu0 %v12853_v6 }
 0x638   : > { %5376 = vst.msk [vmem:[#allocation4 + $0xc0] sm:$0xff] %vm349_vm1, %v5344_v22  ;;  %v4087_v22 = vmul.f32 %v15690_v25, %v15689_v47  ;;  %v15693_v47 = vld [vmem:[#allocation92_spill] sm:$0xff] }
 0x639   : > { %v13050_v25 = vld [vmem:[#allocation4 + $0x49] sm:$0xff] }
 0x63a   : > { %v5476_v48 = vpop.permute.xlu0 %5475  ;;  %v8556_v3 = vpack.i.bf16 %v13050_v25, %v12751_v51 }
 0x63b   : > { %v5561_v9 = vsel %vm349_vm1, %v12264_v36, %v5476_v48  ;;  %v5478_v36 = vpop.permute.xlu1 %5477 }
 0x63c   : > { %5719 = vmatmul.f32.gmra.mxu3 %v5561_v9  ;;  %v5562_v19 = vsel %vm349_vm1, %v12303_v35, %v5478_v36  ;;  %v12761_v35 = vld [vmem:[#allocation4 + $0x40] sm:$0xff] }
 0x63d   : > { %8358 = vmatmul.msk.f32.gmra.mxu2 %vm349_vm1, %v12735_v44 }
 0x63f   : > { %v5193_v23 = vpop.f32.mrf.mxu2  ;;  %v12742_v15 = vld [vmem:[#allocation4 + $0xbf] sm:$0xff] }
 0x640   : > { %v5277_v59 = vadd.f32 %v5193_v23, %v4665_v43  ;;  %5497 = vrot.lane.b32.xlu2 %v12742_v15, %s8794_s18  ;;  %8320 = vmatmul.msk.f32.gmra.mxu0 %vm349_vm1, %v12742_v15  ;;  %v5486_v43 = vpop.permute.xlu2 %5485 }
 0x642   : > { %v5313_v34 = vadd.f32 %v12434_v27, %v5277_v59  ;;  %v5482_v12 = vpop.permute.xlu0 %5481 }
 0x643   : > { %v5564_v18 = vsel %vm349_vm1, %v12373_v13, %v5482_v12  ;;  %v5484_v2 = vpop.permute.xlu1 %5483 }
 0x644   : > { %v5345_v21 = vmax.f32 %v5313_v34, 0.0  ;;  %5722 = vmatmul.f32.gmra.mxu3 %v5562_v19  ;;  %v5565_v48 = vsel %vm349_vm1, %v12400_v32, %v5484_v2  ;;  %v8400_v32 = vld [vmem:[%s14979_s5 + $0x1d8] sm:$0xff]  ;;  %v5566_v34 = vsel %vm349_vm1, %v12470_v10, %v5486_v43  ;;  %v8399_v2 = vld [vmem:[%s14979_s5 + $0x1d0] sm:$0xff] }
 0x645   : > { %8359 = vmatmul.msk.f32.gmra.mxu2 %vm349_vm1, %v12751_v51  ;;  %6767 = vmatpush.msra.mxu3 %v8400_v32  ;;  %v12816_v19 = vld [vmem:[#allocation4 + $0x58] sm:$0xff] }
 0x646   : > { %5377 = vst.msk [vmem:[#allocation4 + $0xc8] sm:$0xff] %vm349_vm1, %v5345_v21  ;;  %v4045_v21 = vpop.f32.mrf.mxu3  ;;  %v13070_v51 = vld [vmem:[#allocation4 + $0xb8] sm:$0xff] }
 0x647   : > { %6768 = vmatpush.msra.mxu3 %v8399_v2 }
 0x64a   : > { %v5488_v49 = vpop.permute.xlu0 %5487 }
 0x64b   : > { %v5567_v10 = vsel %vm349_vm1, %v12490_v29, %v5488_v49  ;;  %v12867_v49 = vld [vmem:[#allocation4 + $0x70] sm:$0xff] }
 0x64c   : > { %5725 = vmatmul.f32.gmra.mxu3 %v5563_v53 }
 0x64d   : > { %8360 = vmatmul.msk.f32.gmra.mxu2 %vm349_vm1, %v12761_v35  ;;  %v12765_v37 = vld [vmem:[#allocation4 + $0xc7] sm:$0xff] }
 0x64e   : > { %5499 = vrot.lane.b32.xlu0 %v12765_v37, %s8794_s18  ;;  %8321 = vmatmul.msk.f32.gmra.mxu0 %vm349_vm1, %v12765_v37  ;;  %v4048_v31 = vpop.f32.mrf.mxu3 }
 0x64f   : > { %v5196_v54 = vpop.f32.mrf.mxu2 }
 0x650   : > { %v5246_v39 = vmul.f32 %v15687_v33, %v5196_v54  ;;  %v15691_v54 = vld [vmem:[#allocation100_spill] sm:$0xff] }
 0x651   : > { %v4616_v56 = vpop.f32.mrf.mxu1  ;;  %v8339_v33 = vld [vmem:[%s14979_s5 + $0xf0] sm:$0xff] }
 0x652   : > { %v4666_v5 = vadd.f32 %v4616_v56, %v15688_v26  ;;  %v15692_v56 = vld [vmem:[#allocation129_spill] sm:$0xff] }
 0x653   : > { %v8344_v26 = vld [vmem:[%s14979_s5 + $0x118] sm:$0xff] }
 0x654   : > { %v5278_v42 = vadd.f32 %v5246_v39, %v4666_v5  ;;  %5728 = vmatmul.f32.gmra.mxu3 %v5564_v18  ;;  %v12828_v5 = vld [vmem:[#allocation4 + $0x60] sm:$0xff]  ;;  %6222 = vmatpush.msra.mxu1 %v8344_v26  ;;  %v8398_v26 = vld [vmem:[%s14979_s5 + $0x1c8] sm:$0xff] }
 0x655   : > { %8361 = vmatmul.msk.f32.gmra.mxu2 %vm349_vm1, %v12786_v28  ;;  %6769 = vmatpush.msra.mxu3 %v8398_v26 }
 0x656   : > { %v5314_v13 = vadd.f32 %v12434_v27, %v5278_v42  ;;  %v5490_v42 = vpop.permute.xlu1 %5489 }
 0x658   : > { %v5346_v8 = vmax.f32 %v5314_v13, 0.0 }
 0x659   : > { %v4619_v52 = vpop.f32.mrf.mxu1 }
 0x65a   : > { %5378 = vst.msk [vmem:[#allocation4 + $0xd0] sm:$0xff] %vm349_vm1, %v5346_v8  ;;  %v4667_v9 = vadd.f32 %v4619_v52, %v4087_v22  ;;  %v5568_v52 = vsel %vm349_vm1, %v12515_v17, %v5490_v42  ;;  %v4089_v22 = vmul.f32 %v15693_v47, %v4045_v21 }
 0x65c   : > { %5731 = vmatmul.f32.gmra.mxu3 %v5565_v48  ;;  %v12846_v48 = vld [vmem:[#allocation4 + $0x68] sm:$0xff] }
 0x65d   : > { %8362 = vmatmul.msk.f32.gmra.mxu2 %vm349_vm1, %v12797_v7 }
 0x65e   : > { %v5199_v63 = vpop.f32.mrf.mxu2 }
 0x65f   : > { %v5279_v40 = vadd.f32 %v5199_v63, %v4667_v9  ;;  %v4051_v9 = vpop.f32.mrf.mxu3 }
 0x661   : > { %v5315_v23 = vadd.f32 %v12434_v27, %v5279_v40  ;;  %v12805_v36 = vld [vmem:[#allocation4 + $0xcf] sm:$0xff] }
 0x662   : > { %5501 = vrot.lane.b32.xlu1 %v12805_v36, %s8794_s18  ;;  %8322 = vmatmul.msk.f32.gmra.mxu0 %vm349_vm1, %v12805_v36 }
 0x663   : > { %v5347_v59 = vmax.f32 %v5315_v23, 0.0 }
 0x664   : > { %5734 = vmatmul.f32.gmra.mxu3 %v5566_v34  ;;  %v5492_v43 = vpop.permute.xlu2 %5491  ;;  %v12865_v34 = vpop.f32.mrf.mxu0 }
 0x665   : > { %5379 = vst.msk [vmem:[#allocation4 + $0xd8] sm:$0xff] %vm349_vm1, %v5347_v59  ;;  %8363 = vmatmul.msk.f32.gmra.mxu2 %vm349_vm1, %v12816_v19  ;;  %v5569_v59 = vsel %vm349_vm1, %v12531_v16, %v5492_v43  ;;  %v8343_v16 = vld [vmem:[%s14979_s5 + $0x110] sm:$0xff] }
 0x666   : > { %6223 = vmatpush.msra.mxu1 %v8343_v16 }
 0x668   : > { %v5202_v1 = vpop.f32.mrf.mxu2 }
 0x669   : > { %v5248_v12 = vmul.f32 %v15691_v54, %v5202_v1  ;;  %v4054_v1 = vpop.f32.mrf.mxu3 }
 0x66a   : > { %v4622_v53 = vpop.f32.mrf.mxu1 }
 0x66b   : > { %v4668_v39 = vadd.f32 %v4622_v53, %v15692_v56  ;;  %v15694_v56 = vld [vmem:[#allocation93_spill] sm:$0xff] }
 0x66c   : > { %5737 = vmatmul.f32.gmra.mxu3 %v5567_v10  ;;  %v12830_v18 = vld [vmem:[#allocation4 + $0xd7] sm:$0xff] }
 0x66d   : > { %v5280_v41 = vadd.f32 %v5248_v12, %v4668_v39  ;;  %8364 = vmatmul.msk.f32.gmra.mxu2 %vm349_vm1, %v12828_v5  ;;  %5503 = vrot.lane.b32.xlu2 %v12830_v18, %s8794_s18 }
 0x66e   : > { %8323 = vmatmul.msk.f32.gmra.mxu0 %vm349_vm1, %v12830_v18 }
 0x66f   : > { %v5316_v29 = vadd.f32 %v12434_v27, %v5280_v41  ;;  %v12879_v41 = vpop.f32.mrf.mxu0 }
 0x670   : > { %15695 = vst [vmem:[#allocation136_spill] sm:$0xff] %v12879_v41 }
 0x671   : > { %v5348_v13 = vmax.f32 %v5316_v29, 0.0  ;;  %v12881_v29 = vld [vmem:[#allocation4 + $0x78] sm:$0xff] }
 0x672   : > { %v4625_v8 = vpop.f32.mrf.mxu1 }
 0x673   : > { %5380 = vst.msk [vmem:[#allocation4 + $0xe0] sm:$0xff] %vm349_vm1, %v5348_v13  ;;  %v4669_v63 = vadd.f32 %v4625_v8, %v4089_v22 }
 0x674   : > { %5740 = vmatmul.f32.gmra.mxu3 %v5568_v52 }
 0x675   : > { %8365 = vmatmul.msk.f32.gmra.mxu2 %vm349_vm1, %v12846_v48 }
 0x677   : > { %v5205_v40 = vpop.f32.mrf.mxu2  ;;  %v12893_v22 = vpop.f32.mrf.mxu0 }
 0x678   : > { %v5281_v17 = vadd.f32 %v5205_v40, %v4669_v63  ;;  %15696 = vst [vmem:[#allocation134_spill] sm:$0xff] %v12893_v22  ;;  %v4091_v63 = vmul.f32 %v11892_v58, %v4051_v9  ;;  %v12896_v40 = vld [vmem:[#allocation4 + $0x80] sm:$0xff] }
 0x67a   : > { %v5317_v23 = vadd.f32 %v12434_v27, %v5281_v17  ;;  %v12857_v32 = vld [vmem:[#allocation4 + $0xdf] sm:$0xff] }
 0x67b   : > { %5505 = vrot.lane.b32.xlu0 %v12857_v32, %s8794_s18  ;;  %8324 = vmatmul.msk.f32.gmra.mxu0 %vm349_vm1, %v12857_v32 }
 0x67c   : > { %v5349_v21 = vmax.f32 %v5317_v23, 0.0  ;;  %5743 = vmatmul.f32.gmra.mxu3 %v5569_v59  ;;  %v8342_v59 = vld [vmem:[%s14979_s5 + $0x108] sm:$0xff] }
 0x67d   : > { %8366 = vmatmul.msk.f32.gmra.mxu2 %vm349_vm1, %v12867_v49  ;;  %6224 = vmatpush.msra.mxu1 %v8342_v59 }
 0x67e   : > { %5381 = vst.msk [vmem:[#allocation4 + $0xe8] sm:$0xff] %vm349_vm1, %v5349_v21  ;;  %v8397_v21 = vld [vmem:[%s14979_s5 + $0x1c0] sm:$0xff] }
 0x67f   : > { %6770 = vmatpush.msra.mxu3 %v8397_v21  ;;  %v12917_v16 = vpop.f32.mrf.mxu0  ;;  %v12937_v21 = vld [vmem:[#allocation4 + $0x90] sm:$0xff] }
 0x680   : > { %v5208_v53 = vpop.f32.mrf.mxu2  ;;  %15697 = vst [vmem:[#allocation139_spill] sm:$0xff] %v12917_v16 }
 0x681   : > { %v5250_v39 = vmul.f32 %v15694_v56, %v5208_v53  ;;  %15700 = vst [vmem:[#allocation142_spill] sm:$0xff] %v12937_v21 }
 0x682   : > { %v4628_v12 = vpop.f32.mrf.mxu1 }
 0x683   : > { %v4670_v10 = vadd.f32 %v4628_v12, %v4048_v31  ;;  %v4057_v31 = vpop.f32.mrf.mxu3 }
 0x685   : > { %v5282_v42 = vadd.f32 %v5250_v39, %v4670_v10  ;;  %8367 = vmatmul.msk.f32.gmra.mxu2 %vm349_vm1, %v12881_v29  ;;  %v12885_v13 = vld [vmem:[#allocation4 + $0xe7] sm:$0xff] }
 0x686   : > { %5507 = vrot.lane.b32.xlu1 %v12885_v13, %s8794_s18  ;;  %8325 = vmatmul.msk.f32.gmra.mxu0 %vm349_vm1, %v12885_v13 }
 0x687   : > { %v5318_v2 = vadd.f32 %v12434_v27, %v5282_v42  ;;  %v12919_v42 = vld [vmem:[#allocation4 + $0x88] sm:$0xff]  ;;  %v12935_v59 = vpop.f32.mrf.mxu0 }
 0x688   : > { %15698 = vst [vmem:[#allocation177_spill] sm:$0xff] %v12919_v42 }
 0x689   : > { %v5350_v8 = vmax.f32 %v5318_v2, 0.0  ;;  %15699 = vst [vmem:[#allocation132_spill] sm:$0xff] %v12935_v59 }
 0x68a   : > { %v4631_v52 = vpop.f32.mrf.mxu1 }
 0x68b   : > { %5382 = vst.msk [vmem:[#allocation4 + $0xf0] sm:$0xff] %vm349_vm1, %v5350_v8  ;;  %v12900_v43 = vpop.f32.mrf.mxu3  ;;  %v4671_v17 = vadd.f32 %v4631_v52, %v4091_v63 }
 0x68d   : > { %8368 = vmatmul.msk.f32.gmra.mxu2 %vm349_vm1, %v12896_v40 }
 0x68e   : > { %v5494_v23 = vpop.permute.xlu0 %5493 }
 0x68f   : > { %v5211_v53 = vpop.f32.mrf.mxu2  ;;  %v5570_v9 = vsel %vm349_vm1, %v12565_v14, %v5494_v23  ;;  %v8341_v23 = vld [vmem:[%s14979_s5 + $0x100] sm:$0xff] }
 0x690   : > { %v5283_v12 = vadd.f32 %v5211_v53, %v4671_v17  ;;  %5746 = vmatmul.f32.gmra.mxu3 %v5570_v9  ;;  %v12930_v17 = vld [vmem:[%s14979_s5 + $0x220] sm:$0xff]  ;;  %6225 = vmatpush.msra.mxu1 %v8341_v23  ;;  %v4093_v23 = vmul.f32 %v12010_v55, %v4057_v31 }
 0x691   : > { %6887 = vmatpush.msra.mxu0 %v12930_v17 }
 0x692   : > { %v5319_v39 = vadd.f32 %v12434_v27, %v5283_v12  ;;  %v12911_v10 = vld [vmem:[#allocation4 + $0xef] sm:$0xff] }
 0x693   : > { %5509 = vrot.lane.b32.xlu2 %v12911_v10, %s8794_s18  ;;  %8326 = vmatmul.msk.f32.gmra.mxu0 %vm349_vm1, %v12911_v10  ;;  %v12924_v14 = vpop.f32.mrf.mxu3 }
 0x694   : > { %v5351_v26 = vmax.f32 %v5319_v39, 0.0 }
 0x695   : > { %8369 = vmatmul.msk.f32.gmra.mxu2 %vm349_vm1, %v12919_v42 }
 0x696   : > { %5383 = vst.msk [vmem:[#allocation4 + $0xf8] sm:$0xff] %vm349_vm1, %v5351_v26 }
 0x698   : > { %v5214_v2 = vpop.f32.mrf.mxu2 }
 0x699   : > { %v5252_v52 = vmul.f32 %v11865_v61, %v5214_v2 }
 0x69a   : > { %v4634_v8 = vpop.f32.mrf.mxu1 }
 0x69b   : > { %v4672_v63 = vadd.f32 %v4634_v8, %v4054_v1  ;;  %v12951_v2 = vpop.f32.mrf.mxu3  ;;  %v8396_v8 = vld [vmem:[%s14979_s5 + $0x1b8] sm:$0xff] }
 0x69c   : > { %15701 = vst [vmem:[#allocation143_spill] sm:$0xff] %v12951_v2  ;;  %6771 = vmatpush.msra.mxu3 %v8396_v8 }
 0x69d   : > { %v5284_v53 = vadd.f32 %v5252_v52, %v4672_v63  ;;  %8370 = vmatmul.msk.f32.gmra.mxu2 %vm349_vm1, %v12937_v21  ;;  %v12942_v1 = vld [vmem:[#allocation4 + $0xf7] sm:$0xff]  ;;  %v12957_v63 = vpop.f32.mrf.mxu0 }
 0x69e   : > { %5511 = vrot.lane.b32.xlu0 %v12942_v1, %s8794_s18  ;;  %8327 = vmatmul.msk.f32.gmra.mxu0 %vm349_vm1, %v12942_v1  ;;  %15702 = vst [vmem:[#allocation135_spill] sm:$0xff] %v12957_v63 }
 0x69f   : > { %v5320_v9 = vadd.f32 %v12434_v27, %v5284_v53  ;;  %v12960_v53 = vld [vmem:[#allocation4 + $0x98] sm:$0xff] }
 0x6a0   : > { %v5496_v12 = vpop.permute.xlu1 %5495  ;;  %15703 = vst [vmem:[#allocation144_spill] sm:$0xff] %v12960_v53 }
 0x6a1   : > { %v5352_v39 = vmax.f32 %v5320_v9, 0.0  ;;  %v5571_v26 = vsel %vm349_vm1, %v12629_v45, %v5496_v12  ;;  %v5498_v45 = vpop.permute.xlu2 %5497 }
 0x6a2   : > { %5749 = vmatmul.f32.gmra.mxu3 %v5571_v26  ;;  %v4637_v52 = vpop.f32.mrf.mxu1  ;;  %v5572_v61 = vsel %vm349_vm1, %v12672_v60, %v5498_v45  ;;  %v12985_v45 = vld [vmem:[#allocation4 + $0x19] sm:$0xff] }
 0x6a3   : > { %5384 = vst.msk [vmem:[#allocation4 + $0x100] sm:$0xff] %vm349_vm1, %v5352_v39  ;;  %v4673_v9 = vadd.f32 %v4637_v52, %v4093_v23  ;;  %v12975_v8 = vpop.f32.mrf.mxu3  ;;  %v12977_v23 = vld [vmem:[#allocation4 + $0xa0] sm:$0xff] }
 0x6a4   : > { %15705 = vst [vmem:[#allocation146_spill] sm:$0xff] %v12975_v8  ;;  %v13229_v8 = vld [vmem:[#allocation4 + $0xc9] sm:$0xff] }
 0x6a5   : > { %8371 = vmatmul.msk.f32.gmra.mxu2 %vm349_vm1, %v12960_v53  ;;  %v12973_v31 = vpop.f32.mrf.mxu0  ;;  %15706 = vst [vmem:[#allocation147_spill] sm:$0xff] %v12977_v23 }
 0x6a6   : > { %15704 = vst [vmem:[#allocation145_spill] sm:$0xff] %v12973_v31 }
 0x6a7   : > { %v5217_v12 = vpop.f32.mrf.mxu2 }
 0x6a8   : > { %v5285_v26 = vadd.f32 %v5217_v12, %v4673_v9  ;;  %v8395_v9 = vld [vmem:[%s14979_s5 + $0x1b0] sm:$0xff]  ;;  %v12993_v12 = vld [vmem:[%s14979_s5 + $0x218] sm:$0xff] }
 0x6a9   : > { %6772 = vmatpush.msra.mxu3 %v8395_v9  ;;  %6888 = vmatpush.msra.mxu0 %v12993_v12  ;;  %v8734_v9 = vld [vmem:[%s14978_s4] ss:$0 sm:$0xff] }
 0x6aa   : > { %v5321_v39 = vadd.f32 %v12434_v27, %v5285_v26  ;;  %v12967_v56 = vld [vmem:[#allocation4 + $0xff] sm:$0xff]  ;;  %5752 = vmatmul.f32.gmra.mxu3 %v5572_v61 }
 0x6ab   : > { %5513 = vrot.lane.b32.xlu1 %v12967_v56, %s8794_s18  ;;  %8328 = vmatmul.msk.f32.gmra.mxu0 %vm349_vm1, %v12967_v56  ;;  %v8340_v27 = vld [vmem:[%s14979_s5 + $0xf8] sm:$0xff] }
 0x6ac   : > { %v5353_v52 = vmax.f32 %v5321_v39, 0.0  ;;  %6226 = vmatpush.msra.mxu1 %v8340_v27  ;;  %v13001_v27 = vld [vmem:[#allocation4 + $0xa8] sm:$0xff] }
 0x6ad   : > { %8372 = vmatmul.msk.f32.gmra.mxu2 %vm349_vm1, %v12977_v23  ;;  %15708 = vst [vmem:[#allocation180_spill] sm:$0xff] %v13001_v27 }
 0x6ae   : > { %5385 = vst.msk [vmem:[#allocation4 + $0x108] sm:$0xff] %vm349_vm1, %v5353_v52  ;;  %v12999_v52 = vpop.f32.mrf.mxu0  ;;  %6227 = vmatpush.msra.mxu1 %v8339_v33  ;;  %v8394_v33 = vld [vmem:[%s14979_s5 + $0x1a8] sm:$0xff] }
 0x6af   : > { %15707 = vst [vmem:[#allocation149_spill] sm:$0xff] %v12999_v52  ;;  %6773 = vmatpush.msra.mxu3 %v8394_v33  ;;  %v13096_v52 = vld [vmem:[#allocation4 + $0xc0] sm:$0xff] }
 0x6b0   : > { %v5220_v61 = vpop.f32.mrf.mxu2 }
 0x6b1   : > { %v5254_v26 = vmul.f32 %v12057_v24, %v5220_v61  ;;  %v13009_v61 = vld [vmem:[%s14979_s5 + $0x210] sm:$0xff]  ;;  %v13026_v24 = vld [vmem:[%s14979_s5 + $0x208] sm:$0xff] }
 0x6b2   : > { %v4640_v60 = vpop.f32.mrf.mxu1  ;;  %6889 = vmatpush.msra.mxu0 %v13009_v61 }
 0x6b3   : > { %v4674_v39 = vadd.f32 %v4640_v60, %v12900_v43  ;;  %6544 = vrot.lane.b32.xlu1 %v12985_v45, %s8794_s18  ;;  %v13011_v43 = vpop.f32.mrf.mxu3  ;;  %v13015_v60 = vld [vmem:[#allocation4 + $0x31] sm:$0xff] }
 0x6b4   : > { %15709 = vst [vmem:[#allocation150_spill] sm:$0xff] %v13011_v43  ;;  %6890 = vmatpush.msra.mxu0 %v13026_v24  ;;  %v13171_v43 = vld [vmem:[#allocation4 + $0x99] sm:$0xff] }
 0x6b5   : > { %v5286_v55 = vadd.f32 %v5254_v26, %v4674_v39  ;;  %8373 = vmatmul.msk.f32.gmra.mxu2 %vm349_vm1, %v13001_v27  ;;  %v5419_v58 = vld [vmem:[#allocation4 + $0x107] sm:$0xff] }
 0x6b6   : > { %5515 = vrot.lane.b32.xlu2 %v5419_v58, %s8794_s18  ;;  %8329 = vmatmul.msk.f32.gmra.mxu0 %vm349_vm1, %v5419_v58  ;;  %v13021_v39 = vld [vmem:[#allocation4 + $0x20] sm:$0xff] }
 0x6b7   : > { %v5322_v26 = vadd.f32 %v8734_v9, %v5286_v55  ;;  %v13031_v58 = vld [vmem:[%s14979_s5 + $0x200] sm:$0xff]  ;;  %v8541_v47 = vpack.i.bf16 %v13015_v60, %v13021_v39  ;;  %v13039_v55 = vpop.f32.mrf.mxu0  ;;  %v13041_v9 = vld [vmem:[#allocation4 + $0xb0] sm:$0xff] }
 0x6b8   : > { %6891 = vmatpush.msra.mxu0 %v13031_v58  ;;  %15710 = vst [vmem:[#allocation152_spill] sm:$0xff] %v13039_v55 }
 0x6b9   : > { %v5354_v54 = vmax.f32 %v5322_v26, 0.0  ;;  %v13048_v26 = vld [vmem:[#allocation4 + $0x21] sm:$0xff] }
 0x6bb   : > { %5386 = vst.msk [vmem:[#allocation4 + $0x110] sm:$0xff] %vm349_vm1, %v5354_v54  ;;  %8542 = vrot.lane.b32.xlu1 %v8541_v47, %s8794_s18  ;;  %v13054_v54 = vpop.f32.mrf.mxu3 }
 0x6bc   : > { %15711 = vst [vmem:[#allocation153_spill] sm:$0xff] %v13054_v54  ;;  %v13136_v54 = vld [vmem:[#allocation4 + $0x91] sm:$0xff] }
 0x6bd   : > { %8374 = vmatmul.msk.f32.gmra.mxu2 %vm349_vm1, %v13041_v9 }
 0x6be   : > { %6546 = vrot.lane.b32.xlu2 %v13048_v26, %s8794_s18 }
 0x6bf   : > { %v13067_v38 = vpop.f32.mrf.mxu0 }
 0x6c0   : > { %v5500_v47 = vpop.permute.xlu0 %5499  ;;  %15712 = vst [vmem:[#allocation155_spill] sm:$0xff] %v13067_v38 }
 0x6c1   : > { %v5573_v4 = vsel %vm349_vm1, %v12704_v30, %v5500_v47  ;;  %v8546_v30 = vpack.i.bf16 %v13060_v11, %v12719_v46  ;;  %v13081_v47 = vld [vmem:[#allocation4 + $0x18] sm:$0xff] }
 0x6c2   : > { %v5420_v57 = vld [vmem:[#allocation4 + $0x10f] sm:$0xff]  ;;  %5755 = vmatmul.f32.gmra.mxu3 %v5573_v4  ;;  %v13076_v4 = vld [vmem:[#allocation4 + $0x61] sm:$0xff]  ;;  %v5421_v38 = vld [vmem:[#allocation4 + $0x117] sm:$0xff] }
 0x6c3   : > { %8557 = vrot.lane.b32.xlu1 %v8556_v3, %s8794_s18  ;;  %5517 = vrot.lane.b32.xlu0 %v5420_v57, %s8794_s18  ;;  %v13079_v3 = vld [vmem:[#allocation4 + $0x29] sm:$0xff]  ;;  %v13089_v33 = vpop.f32.mrf.mxu3 }
 0x6c4   : > { %8330 = vmatmul.msk.f32.gmra.mxu0 %vm349_vm1, %v5420_v57  ;;  %v8571_v57 = vpack.i.bf16 %v13076_v4, %v12797_v7  ;;  %v8536_v46 = vpack.i.bf16 %v13079_v3, %v13081_v47  ;;  %15713 = vst [vmem:[#allocation156_spill] sm:$0xff] %v13089_v33  ;;  %v8338_v7 = vld [vmem:[%s14979_s5 + $0xe8] sm:$0xff]  ;;  %v5422_v33 = vld [vmem:[#allocation4 + $0x11f] sm:$0xff] }
 0x6c5   : > { %8375 = vmatmul.msk.f32.gmra.mxu2 %vm349_vm1, %v13070_v51  ;;  %6228 = vmatpush.msra.mxu1 %v8338_v7  ;;  %v8393_v7 = vld [vmem:[%s14979_s5 + $0x1a0] sm:$0xff] }
 0x6c6   : > { %8547 = vrot.lane.b32.xlu2 %v8546_v30, %s8794_s18  ;;  %v8561_v30 = vpack.i.bf16 %v13083_v62, %v12761_v35  ;;  %v13112_v35 = vld [vmem:[#allocation4 + $0x69] sm:$0xff]  ;;  %6774 = vmatpush.msra.mxu3 %v8393_v7  ;;  %v8601_v7 = vpack.i.bf16 %v13136_v54, %v12896_v40 }
 0x6c7   : > { %v13103_v55 = vpop.f32.mrf.mxu0 }
 0x6c8   : > { %15714 = vst [vmem:[#allocation159_spill] sm:$0xff] %v13103_v55 }
 0x6cb   : > { %8572 = vrot.lane.b32.xlu1 %v8571_v57, %s8794_s18  ;;  %8537 = vrot.lane.b32.xlu0 %v8536_v46, %s8794_s18  ;;  %v13105_v57 = vld [vmem:[#allocation4 + $0x41] sm:$0xff]  ;;  %v13107_v46 = vld [vmem:[#allocation4 + $0x79] sm:$0xff]  ;;  %v13123_v55 = vpop.f32.mrf.mxu3 }
 0x6cc   : > { %8331 = vmatmul.msk.f32.gmra.mxu0 %vm349_vm1, %v5421_v38  ;;  %v8551_v38 = vpack.i.bf16 %v13105_v57, %v12735_v44  ;;  %v8586_v63 = vpack.i.bf16 %v13107_v46, %v12846_v48  ;;  %15715 = vst [vmem:[#allocation151_spill] sm:$0xff] %v13123_v55  ;;  %v13126_v44 = vld [vmem:[#allocation4 + $0xc8] sm:$0xff]  ;;  %v5504_v55 = vpop.permute.xlu2 %5503 }
 0x6cd   : > { %8376 = vmatmul.msk.f32.gmra.mxu2 %vm349_vm1, %v13096_v52 }
 0x6ce   : > { %8562 = vrot.lane.b32.xlu2 %v8561_v30, %s8794_s18  ;;  %v8576_v30 = vpack.i.bf16 %v13112_v35, %v12816_v19 }
 0x6d3   : > { %8587 = vrot.lane.b32.xlu1 %v8586_v63, %s8794_s18  ;;  %8552 = vrot.lane.b32.xlu0 %v8551_v38, %s8794_s18  ;;  %v13132_v63 = vpop.f32.mrf.mxu0  ;;  %v13134_v38 = vld [vmem:[#allocation4 + $0x59] sm:$0xff] }
 0x6d4   : > { %8332 = vmatmul.msk.f32.gmra.mxu0 %vm349_vm1, %v5422_v33  ;;  %v5502_v31 = vpop.permute.xlu1 %5501  ;;  %15716 = vst [vmem:[#allocation162_spill] sm:$0xff] %v13132_v63  ;;  %v8566_v19 = vpack.i.bf16 %v13134_v38, %v12786_v28  ;;  %v13141_v33 = vld [vmem:[#allocation4 + $0x81] sm:$0xff]  ;;  %v13166_v63 = vld [vmem:[#allocation4 + $0xa9] sm:$0xff] }
 0x6d5   : > { %8377 = vmatmul.msk.f32.gmra.mxu2 %vm349_vm1, %v13126_v44  ;;  %v5574_v59 = vsel %vm349_vm1, %v12742_v15, %v5502_v31  ;;  %v8591_v15 = vpack.i.bf16 %v13141_v33, %v12867_v49  ;;  %v8337_v28 = vld [vmem:[%s14979_s5 + $0xe0] sm:$0xff]  ;;  %v5575_v31 = vsel %vm349_vm1, %v12765_v37, %v5504_v55  ;;  %v8616_v37 = vpack.i.bf16 %v13166_v63, %v12960_v53  ;;  %v8392_v55 = vld [vmem:[%s14979_s5 + $0x198] sm:$0xff]  ;;  %v13203_v53 = vpop.f32.mrf.mxu2 }
 0x6d6   : > { %8577 = vrot.lane.b32.xlu2 %v8576_v30, %s8794_s18  ;;  %5758 = vmatmul.f32.gmra.mxu3 %v5574_v59  ;;  %v13151_v59 = vld [vmem:[#allocation4 + $0xd0] sm:$0xff] }
 0x6d7   : > { %6229 = vmatpush.msra.mxu1 %v8337_v28  ;;  %6775 = vmatpush.msra.mxu3 %v8392_v55 }
 0x6db   : > { %8602 = vrot.lane.b32.xlu1 %v8601_v7, %s8794_s18  ;;  %8567 = vrot.lane.b32.xlu0 %v8566_v19, %s8794_s18  ;;  %v13160_v30 = vpop.f32.mrf.mxu0  ;;  %v13162_v19 = vld [vmem:[#allocation4 + $0x71] sm:$0xff]  ;;  %v13164_v7 = vpop.f32.mrf.mxu3 }
 0x6dc   : > { %8413 = vmatmul.msk.f32.vlgmr.msra.gmra.mxu0 %vm349_vm1, %v13079_v3  ;;  %15717 = vst [vmem:[#allocation183_spill] sm:$0xff] %v13160_v30  ;;  %v8581_v16 = vpack.i.bf16 %v13162_v19, %v12828_v5  ;;  %v13184_v5 = vld [vmem:[#allocation4 + $0xd8] sm:$0xff]  ;;  %v13192_v30 = vld [vmem:[#allocation4 + $0xc1] sm:$0xff] }
 0x6dd   : > { %8378 = vmatmul.msk.f32.gmra.mxu2 %vm349_vm1, %v13151_v59  ;;  %15718 = vst [vmem:[#allocation157_spill] sm:$0xff] %v13164_v7  ;;  %v13199_v7 = vld [vmem:[#allocation4 + $0xb1] sm:$0xff]  ;;  %v8631_v55 = vpack.i.bf16 %v13192_v30, %v13041_v9  ;;  %v13215_v9 = vld [vmem:[#allocation4 + $0xa1] sm:$0xff] }
 0x6de   : > { %8592 = vrot.lane.b32.xlu2 %v8591_v15, %s8794_s18  ;;  %5761 = vmatmul.f32.gmra.mxu3 %v5575_v31  ;;  %v8606_v15 = vpack.i.bf16 %v13171_v43, %v12919_v42  ;;  %v13190_v31 = vld [vmem:[#allocation4 + $0x89] sm:$0xff] }
 0x6e3   : > { %8617 = vrot.lane.b32.xlu1 %v8616_v37, %s8794_s18  ;;  %8582 = vrot.lane.b32.xlu0 %v8581_v16, %s8794_s18  ;;  %v13188_v28 = vpop.f32.mrf.mxu0  ;;  %v13195_v16 = vpop.f32.mrf.mxu3  ;;  %v8596_v37 = vpack.i.bf16 %v13190_v31, %v12881_v29 }
 0x6e4   : > { %8414 = vmatmul.msk.f32.gmra.mxu0 %vm349_vm1, %v13015_v60  ;;  %15719 = vst [vmem:[#allocation158_spill] sm:$0xff] %v13188_v28  ;;  %v8621_v28 = vpack.i.bf16 %v13199_v7, %v12977_v23  ;;  %v8391_v23 = vld [vmem:[%s14979_s5 + $0x190] sm:$0xff] }
 0x6e5   : > { %8379 = vmatmul.msk.f32.gmra.mxu2 %vm349_vm1, %v13184_v5  ;;  %15720 = vst [vmem:[#allocation46_spill] sm:$0xff] %v13195_v16  ;;  %v8336_v16 = vld [vmem:[%s14979_s5 + $0xd8] sm:$0xff]  ;;  %6776 = vmatpush.msra.mxu3 %v8391_v23  ;;  %v13241_v23 = vpop.f32.mrf.mxu2 }
 0x6e6   : > { %8607 = vrot.lane.b32.xlu2 %v8606_v15, %s8794_s18  ;;  %v5958_v15 = vld [vmem:[#allocation4 + $0xe0] sm:$0xff]  ;;  %6230 = vmatpush.msra.mxu1 %v8336_v16  ;;  %v8611_v16 = vpack.i.bf16 %v13215_v9, %v12937_v21  ;;  %15723 = vst [vmem:[#allocation49_spill] sm:$0xff] %v13241_v23 }
 0x6eb   : > { %8632 = vrot.lane.b32.xlu1 %v8631_v55, %s8794_s18  ;;  %8597 = vrot.lane.b32.xlu0 %v8596_v37, %s8794_s18  ;;  %v13217_v55 = vld [vmem:[#allocation4 + $0xd9] sm:$0xff]  ;;  %v13225_v22 = vpop.f32.mrf.mxu0 }
 0x6ec   : > { %8415 = vmatmul.msk.f32.gmra.mxu0 %vm349_vm1, %v13060_v11  ;;  %15721 = vst [vmem:[#allocation166_spill] sm:$0xff] %v13225_v22  ;;  %v8646_v41 = vpack.i.bf16 %v13217_v55, %v13126_v44  ;;  %v13247_v44 = vld [vmem:[#allocation4 + $0xb9] sm:$0xff] }
 0x6ed   : > { %v5506_v50 = vpop.permute.xlu0 %5505  ;;  %8380 = vmatmul.msk.f32.gmra.mxu2 %vm349_vm1, %v5958_v15 }
 0x6ee   : > { %8622 = vrot.lane.b32.xlu2 %v8621_v28, %s8794_s18  ;;  %v5576_v37 = vsel %vm349_vm1, %v12805_v36, %v5506_v50  ;;  %v13233_v28 = vpop.f32.mrf.mxu3  ;;  %v8636_v50 = vpack.i.bf16 %v13229_v8, %v13070_v51  ;;  %v5959_v36 = vld [vmem:[#allocation4 + $0xe8] sm:$0xff] }
 0x6ef   : > { %5764 = vmatmul.f32.gmra.mxu3 %v5576_v37  ;;  %15722 = vst [vmem:[#allocation53_spill] sm:$0xff] %v13233_v28  ;;  %v13244_v37 = vld [vmem:[#allocation4 + $0xf1] sm:$0xff]  ;;  %v8626_v28 = vpack.i.bf16 %v13247_v44, %v13001_v27  ;;  %v13282_v27 = vld [vmem:[#allocation4 + $0xf9] sm:$0xff] }
 0x6f0   : > { %v8661_v51 = vpack.i.bf16 %v13244_v37, %v5958_v15  ;;  %v5960_v15 = vld [vmem:[#allocation4 + $0xf0] sm:$0xff]  ;;  %v8666_v42 = vpack.i.bf16 %v13282_v27, %v5959_v36 }
 0x6f3   : > { %8647 = vrot.lane.b32.xlu1 %v8646_v41, %s8794_s18  ;;  %8612 = vrot.lane.b32.xlu0 %v8611_v16, %s8794_s18  ;;  %v13249_v41 = vpop.f32.mrf.mxu0  ;;  %v13251_v16 = vld [vmem:[#allocation4 + $0xe1] sm:$0xff] }
 0x6f4   : > { %8416 = vmatmul.msk.f32.gmra.mxu0 %vm349_vm1, %v13105_v57  ;;  %15724 = vst [vmem:[#allocation197_spill] sm:$0xff] %v13249_v41  ;;  %v8335_v41 = vld [vmem:[%s14979_s5 + $0xd0] sm:$0xff] }
 0x6f5   : > { %8381 = vmatmul.msk.f32.gmra.mxu2 %vm349_vm1, %v5959_v36  ;;  %6231 = vmatpush.msra.mxu1 %v8335_v41 }
 0x6f6   : > { %8637 = vrot.lane.b32.xlu2 %v8636_v50, %s8794_s18  ;;  %v13256_v2 = vpop.f32.mrf.mxu3  ;;  %v8651_v50 = vpack.i.bf16 %v13251_v16, %v13151_v59  ;;  %v13275_v59 = vld [vmem:[#allocation4 + $0xd1] sm:$0xff] }
 0x6f7   : > { %15725 = vst [vmem:[#allocation71_spill] sm:$0xff] %v13256_v2  ;;  %v5961_v2 = vld [vmem:[#allocation4 + $0xf8] sm:$0xff] }
 0x6f8   : > { %v5508_v22 = vpop.permute.xlu1 %5507 }
 0x6f9   : > { %v5577_v23 = vsel %vm349_vm1, %v12830_v18, %v5508_v22  ;;  %v13271_v18 = vld [vmem:[#allocation4 + $0x109] sm:$0xff]  ;;  %v13273_v22 = vpop.f32.mrf.mxu2 }
 0x6fa   : > { %5767 = vmatmul.f32.gmra.mxu3 %v5577_v23  ;;  %15726 = vst [vmem:[#allocation52_spill] sm:$0xff] %v13273_v22  ;;  %v8390_v23 = vld [vmem:[%s14979_s5 + $0x188] sm:$0xff]  ;;  %v8676_v41 = vpack.i.bf16 %v13271_v18, %v5961_v2 }
 0x6fb   : > { %8662 = vrot.lane.b32.xlu1 %v8661_v51, %s8794_s18  ;;  %8627 = vrot.lane.b32.xlu0 %v8626_v28, %s8794_s18  ;;  %v5510_v28 = vpop.permute.xlu2 %5509  ;;  %v13280_v51 = vpop.f32.mrf.mxu0 }
 0x6fc   : > { %8417 = vmatmul.msk.f32.gmra.mxu0 %vm349_vm1, %v13050_v25  ;;  %15727 = vst [vmem:[#allocation25_spill] sm:$0xff] %v13280_v51  ;;  %6777 = vmatpush.msra.mxu3 %v8390_v23  ;;  %v5578_v22 = vsel %vm349_vm1, %v12857_v32, %v5510_v28  ;;  %v5964_v28 = vld [vmem:[#allocation4 + $0x110] sm:$0xff] }
 0x6fd   : > { %8382 = vmatmul.msk.f32.gmra.mxu2 %vm349_vm1, %v5960_v15 }
 0x6fe   : > { %8652 = vrot.lane.b32.xlu2 %v8651_v50, %s8794_s18  ;;  %v8641_v50 = vpack.i.bf16 %v13275_v59, %v13096_v52  ;;  %v13290_v21 = vpop.f32.mrf.mxu3  ;;  %v13298_v52 = vld [vmem:[#allocation4 + $0xe9] sm:$0xff] }
 0x6ff   : > { %15728 = vst [vmem:[#allocation59_spill] sm:$0xff] %v13290_v21  ;;  %v8656_v36 = vpack.i.bf16 %v13298_v52, %v13184_v5  ;;  %v8389_v5 = vld [vmem:[%s14979_s5 + $0x180] sm:$0xff] }
 0x700   : > { %6778 = vmatpush.msra.mxu3 %v8389_v5 }
 0x701   : > { %v13302_v32 = vpop.f32.mrf.mxu2 }
 0x702   : > { %5770 = vmatmul.f32.gmra.mxu3 %v5578_v22  ;;  %v13304_v22 = vld [vmem:[#allocation4 + $0x111] sm:$0xff] }
 0x703   : > { %8677 = vrot.lane.b32.xlu1 %v8676_v41, %s8794_s18  ;;  %8642 = vrot.lane.b32.xlu0 %v8641_v50, %s8794_s18  ;;  %v13300_v23 = vpop.f32.mrf.mxu0  ;;  %v5962_v41 = vld [vmem:[#allocation4 + $0x100] sm:$0xff] }
 0x704   : > { %8418 = vmatmul.msk.f32.gmra.mxu0 %vm349_vm1, %v13083_v62  ;;  %15729 = vst [vmem:[#allocation175_spill] sm:$0xff] %v13300_v23  ;;  %8493 = vmatpush.msrb.mxu3 %v12728_v20 }
 0x705   : > { %8383 = vmatmul.msk.f32.gmra.mxu2 %vm349_vm1, %v5961_v2  ;;  %v8334_v2 = vld [vmem:[%s14979_s5 + $0xc8] sm:$0xff] }
 0x706   : > { %8667 = vrot.lane.b32.xlu2 %v8666_v42, %s8794_s18  ;;  %v8681_v42 = vpack.i.bf16 %v13304_v22, %v5962_v41  ;;  %6232 = vmatpush.msra.mxu1 %v8334_v2  ;;  %v13317_v50 = vpop.f32.mrf.mxu3 }
 0x707   : > { %15730 = vst [vmem:[#allocation15_spill] sm:$0xff] %v13317_v50  ;;  %8494 = vmatpush.msrb.mxu3 %v12784_v0  ;;  %v8333_v0 = vld [vmem:[%s14979_s5 + $0xc0] sm:$0xff] }
 0x708   : > { %6233 = vmatpush.msra.mxu1 %v8333_v0  ;;  %v6476_v0 = vld [vmem:[#allocation4 + $0x9] sm:$0xff] }
 0x709   : > { %v13331_v21 = vpop.f32.mrf.mxu2  ;;  %8495 = vmatpush.msrb.mxu3 %v12853_v6 }
 0x70b   : > { %6061 = vrot.lane.b32.xlu1 %v5964_v28, %s8794_s18  ;;  %8657 = vrot.lane.b32.xlu0 %v8656_v36, %s8794_s18  ;;  %v13323_v36 = vld [vmem:[#allocation4 + $0x101] sm:$0xff]  ;;  %v13325_v23 = vpop.f32.mrf.mxu0 }
 0x70c   : > { %8419 = vmatmul.msk.f32.gmra.mxu0 %vm349_vm1, %v13134_v38  ;;  %15731 = vst [vmem:[#allocation186_spill] sm:$0xff] %v13325_v23  ;;  %v8671_v2 = vpack.i.bf16 %v13323_v36, %v5960_v15  ;;  %8496 = vmatpush.msrb.mxu3 %v12930_v17 }
 0x70d   : > { %8384 = vmatmul.msk.f32.gmra.mxu2 %vm349_vm1, %v5962_v41 }
 0x70e   : > { %8682 = vrot.lane.b32.xlu2 %v8681_v42, %s8794_s18  ;;  %v5963_v42 = vld [vmem:[#allocation4 + $0x108] sm:$0xff]  ;;  %8497 = vmatpush.msrb.mxu3 %v12993_v12 }
 0x710   : > { %v5512_v51 = vpop.permute.xlu0 %5511  ;;  %8498 = vmatpush.msrb.mxu3 %v13009_v61 }
 0x711   : > { %v5579_v41 = vsel %vm349_vm1, %v12885_v13, %v5512_v51  ;;  %v13342_v13 = vpop.f32.mrf.mxu3  ;;  %v13352_v6 = vpop.f32.mrf.mxu2 }
 0x712   : > { %5773 = vmatmul.f32.gmra.mxu3 %v5579_v41  ;;  %15733 = vst [vmem:[#allocation170_spill] sm:$0xff] %v13342_v13  ;;  %v5516_v51 = vpop.permute.xlu2 %5515 }
 0x713   : > { %8672 = vrot.lane.b32.xlu0 %v8671_v2, %s8794_s18  ;;  %v13340_v20 = vpop.f32.mrf.mxu0  ;;  %8499 = vmatpush.msrb.mxu3 %v13026_v24 }
 0x714   : > { %8420 = vmatmul.msk.f32.gmra.mxu0 %vm349_vm1, %v13076_v4  ;;  %15732 = vst [vmem:[#allocation167_spill] sm:$0xff] %v13340_v20  ;;  %v5932_v20 = vld [vmem:[#allocation4 + $0x10] sm:$0xff] }
 0x715   : > { %8385 = vmatmul.msk.f32.gmra.mxu2 %vm349_vm1, %v5963_v42  ;;  %8500 = vmatpush.msrb.mxu3 %v13031_v58 }
 0x719   : > { %v13361_v15 = vpop.f32.mrf.mxu3 }
 0x71a   : > { %15735 = vst [vmem:[#allocation200_spill] sm:$0xff] %v13361_v15 }
 0x71b   : > { %6059 = vrot.lane.b32.xlu0 %v5963_v42, %s8794_s18  ;;  %v13358_v61 = vpop.f32.mrf.mxu0 }
 0x71c   : > { %8421 = vmatmul.msk.f32.gmra.mxu0 %vm349_vm1, %v13112_v35  ;;  %15734 = vst [vmem:[#allocation173_spill] sm:$0xff] %v13358_v61 }
 0x71d   : > { %8386 = vmatmul.msk.f32.gmra.mxu2 %vm349_vm1, %v5964_v28  ;;  %v5514_v17 = vpop.permute.xlu1 %5513  ;;  %v5581_v28 = vsel %vm349_vm1, %v12942_v1, %v5516_v51 }
 0x71e   : > { %v5580_v12 = vsel %vm349_vm1, %v12911_v10, %v5514_v17 }
 0x71f   : > { %5776 = vmatmul.f32.gmra.mxu3 %v5580_v12  ;;  %v5931_v12 = vld [vmem:[#allocation4 + $0x8] sm:$0xff] }
 0x721   : > { %v13369_v10 = vpop.f32.mrf.mxu3 }
 0x722   : > { %15737 = vst [vmem:[#allocation16_spill] sm:$0xff] %v13369_v10 }
 0x723   : > { %v13367_v5 = vpop.f32.mrf.mxu0 }
 0x724   : > { %8422 = vmatmul.msk.f32.gmra.mxu0 %vm349_vm1, %v13162_v19  ;;  %15736 = vst [vmem:[#allocation178_spill] sm:$0xff] %v13367_v5  ;;  %v6547_v5 = vpop.permute.xlu2 %6546 }
 0x725   : > { %v6545_v1 = vpop.permute.xlu1 %6544 }
 0x726   : > { %v6640_v51 = vsel %vm349_vm1, %v6476_v0, %v6545_v1 }
 0x727   : > { %5779 = vmatmul.f32.gmra.mxu3 %v5581_v28 }
 0x729   : > { %v13377_v41 = vpop.f32.mrf.mxu3 }
 0x72a   : > { %15739 = vst [vmem:[#allocation176_spill] sm:$0xff] %v13377_v41 }
 0x72b   : > { %v13373_v24 = vpop.f32.mrf.mxu0 }
 0x72c   : > { %8423 = vmatmul.msk.f32.gmra.mxu0 %vm349_vm1, %v13107_v46  ;;  %15738 = vst [vmem:[#allocation33_spill] sm:$0xff] %v13373_v24 }
 0x731   : > { %v13386_v24 = vpop.f32.mrf.mxu3 }
 0x732   : > { %15741 = vst [vmem:[#allocation203_spill] sm:$0xff] %v13386_v24 }
 0x733   : > { %v13381_v42 = vpop.f32.mrf.mxu0 }
 0x734   : > { %8424 = vmatmul.msk.f32.gmra.mxu0 %vm349_vm1, %v13141_v33  ;;  %15740 = vst [vmem:[#allocation189_spill] sm:$0xff] %v13381_v42  ;;  %v6477_v42 = vld [vmem:[#allocation4 + $0x11] sm:$0xff] }
 0x735   : > { %v5518_v58 = vpop.permute.xlu0 %5517  ;;  %v6641_v23 = vsel %vm349_vm1, %v6477_v42, %v6547_v5 }
 0x736   : > { %v5582_v2 = vsel %vm349_vm1, %v12967_v56, %v5518_v58  ;;  %v8543_v58 = vpop.permute.xlu1 %8542 }
 0x737   : > { %5782 = vmatmul.f32.gmra.mxu3 %v5582_v2  ;;  %v8544_v2 = vunpack.i.l.bf16 %v8543_v58  ;;  %v8545_v42 = vunpack.i.h.bf16 %v8543_v58 }
 0x739   : > { %v6096_v0 = vsel %vm349_vm1, %v5932_v20, %v8544_v2 }
 0x73b   : > { %v13388_v61 = vpop.f32.mrf.mxu0 }
 0x73c   : > { %8425 = vmatmul.msk.f32.gmra.mxu0 %vm349_vm1, %v13190_v31  ;;  %15742 = vst [vmem:[#allocation22_spill] sm:$0xff] %v13388_v61  ;;  %v13397_v61 = vpop.f32.mrf.mxu3 }
 0x73d   : > { %v8538_v17 = vpop.permute.xlu0 %8537  ;;  %15744 = vst [vmem:[#allocation179_spill] sm:$0xff] %v13397_v61 }
 0x73e   : > { %v8539_v28 = vunpack.i.l.bf16 %v8538_v17 }
 0x73f   : > { %6779 = vmatmul.f32.vlgmr.msra.gmra.mxu3 %v6640_v51  ;;  %v8548_v51 = vpop.permute.xlu2 %8547 }
 0x740   : > { %v6095_v56 = vsel %vm349_vm1, %v5931_v12, %v8539_v28  ;;  %v8540_v12 = vunpack.i.h.bf16 %v8538_v17  ;;  %v8549_v28 = vunpack.i.l.bf16 %v8548_v51  ;;  %v6643_v17 = vsel %vm349_vm1, %v13048_v26, %v8545_v42 }
 0x741   : > { %6234 = vmatmul.f32.vlgmr.msra.gmra.mxu1 %v6095_v56 }
 0x742   : > { %v6642_v56 = vsel %vm349_vm1, %v12985_v45, %v8540_v12  ;;  %v8558_v12 = vpop.permute.xlu1 %8557 }
 0x743   : > { %v13394_v1 = vpop.f32.mrf.mxu0 }
 0x744   : > { %8426 = vmatmul.msk.f32.gmra.mxu0 %vm349_vm1, %v13136_v54  ;;  %15743 = vst [vmem:[#allocation57_spill] sm:$0xff] %v13394_v1  ;;  %v13407_v20 = vpop.f32.mrf.mxu3 }
 0x745   : > { %v8553_v5 = vpop.permute.xlu0 %8552  ;;  %15746 = vst [vmem:[#allocation182_spill] sm:$0xff] %v13407_v20 }
 0x746   : > { %v8554_v2 = vunpack.i.l.bf16 %v8553_v5 }
 0x747   : > { %6782 = vmatmul.f32.gmra.mxu3 %v6641_v23  ;;  %v6097_v23 = vsel %vm349_vm1, %v13081_v47, %v8549_v28  ;;  %v8550_v47 = vunpack.i.h.bf16 %v8548_v51 }
 0x749   : > { %6237 = vmatmul.f32.gmra.mxu1 %v6096_v0  ;;  %v6098_v0 = vsel %vm349_vm1, %v13021_v39, %v8554_v2  ;;  %v6644_v58 = vsel %vm349_vm1, %v13079_v3, %v8550_v47  ;;  %v8555_v39 = vunpack.i.h.bf16 %v8553_v5  ;;  %v8736_v47 = vld [vmem:[#allocation4 + $0x30] sm:$0xff] }
 0x74b   : > { %v13403_v24 = vpop.f32.mrf.mxu0 }
 0x74c   : > { %8427 = vmatmul.msk.f32.gmra.mxu0 %vm349_vm1, %v13171_v43  ;;  %15745 = vst [vmem:[#allocation181_spill] sm:$0xff] %v13403_v24  ;;  %v13417_v28 = vpop.f32.mrf.mxu3  ;;  %v8743_v24 = vld [vmem:[#allocation4 + $0xb0] sm:$0xff] }
 0x74d   : > { %15748 = vst [vmem:[#allocation206_spill] sm:$0xff] %v13417_v28 }
 0x74f   : > { %6785 = vmatmul.f32.gmra.mxu3 %v6642_v56  ;;  %v8559_v56 = vunpack.i.l.bf16 %v8558_v12 }
 0x751   : > { %6240 = vmatmul.f32.gmra.mxu1 %v6097_v23  ;;  %v8735_v23 = vld [vmem:[#allocation4 + $0x28] sm:$0xff] }
 0x752   : > { %v6099_v42 = vsel %vm349_vm1, %v8735_v23, %v8559_v56  ;;  %v8560_v56 = vunpack.i.h.bf16 %v8558_v12 }
 0x753   : > { %v13413_v45 = vpop.f32.mrf.mxu0 }
 0x754   : > { %8428 = vmatmul.msk.f32.gmra.mxu0 %vm349_vm1, %v13215_v9  ;;  %15747 = vst [vmem:[#allocation184_spill] sm:$0xff] %v13413_v45  ;;  %v13426_v51 = vpop.f32.mrf.mxu3  ;;  %v8568_v45 = vpop.permute.xlu0 %8567 }
 0x755   : > { %15750 = vst [vmem:[#allocation69_spill] sm:$0xff] %v13426_v51  ;;  %v8569_v5 = vunpack.i.l.bf16 %v8568_v45 }
 0x757   : > { %6788 = vmatmul.f32.gmra.mxu3 %v6643_v17  ;;  %v8563_v17 = vpop.permute.xlu2 %8562 }
 0x758   : > { %v8564_v2 = vunpack.i.l.bf16 %v8563_v17 }
 0x759   : > { %6243 = vmatmul.f32.gmra.mxu1 %v6098_v0  ;;  %v6645_v0 = vsel %vm349_vm1, %v13015_v60, %v8555_v39  ;;  %v8737_v60 = vld [vmem:[#allocation4 + $0x38] sm:$0xff] }
 0x75a   : > { %v6101_v39 = vsel %vm349_vm1, %v8737_v60, %v8569_v5  ;;  %v8570_v5 = vunpack.i.h.bf16 %v8568_v45 }
 0x75b   : > { %v13423_v26 = vpop.f32.mrf.mxu0 }
 0x75c   : > { %8429 = vmatmul.msk.f32.gmra.mxu0 %vm349_vm1, %v13166_v63  ;;  %15749 = vst [vmem:[#allocation32_spill] sm:$0xff] %v13423_v26  ;;  %v13435_v23 = vpop.f32.mrf.mxu3 }
 0x75d   : > { %15752 = vst [vmem:[#allocation187_spill] sm:$0xff] %v13435_v23  ;;  %v15790_v23 = vld [vmem:[#allocation24_spill] sm:$0xff] }
 0x75f   : > { %6791 = vmatmul.f32.gmra.mxu3 %v6644_v58  ;;  %v6100_v58 = vsel %vm349_vm1, %v8736_v47, %v8564_v2 }
 0x761   : > { %6246 = vmatmul.f32.gmra.mxu1 %v6099_v42  ;;  %v6646_v42 = vsel %vm349_vm1, %v13060_v11, %v8560_v56  ;;  %v8738_v11 = vld [vmem:[#allocation4 + $0x40] sm:$0xff] }
 0x763   : > { %v13432_v3 = vpop.f32.mrf.mxu0 }
 0x764   : > { %8430 = vmatmul.msk.f32.gmra.mxu0 %vm349_vm1, %v13199_v7  ;;  %15751 = vst [vmem:[#allocation185_spill] sm:$0xff] %v13432_v3  ;;  %v8565_v3 = vunpack.i.h.bf16 %v8563_v17  ;;  %v13444_v12 = vpop.f32.mrf.mxu3 }
 0x765   : > { %15754 = vst [vmem:[#allocation188_spill] sm:$0xff] %v13444_v12  ;;  %v7154_v12 = vld [vmem:[#allocation5 + $0xf] sm:$0xff] }
 0x767   : > { %6794 = vmatmul.f32.gmra.mxu3 %v6645_v0  ;;  %v8573_v0 = vpop.permute.xlu1 %8572 }
 0x768   : > { %v8574_v47 = vunpack.i.l.bf16 %v8573_v0 }
 0x769   : > { %6249 = vmatmul.f32.gmra.mxu1 %v6100_v58  ;;  %v6647_v58 = vsel %vm349_vm1, %v13105_v57, %v8565_v3  ;;  %v8739_v57 = vld [vmem:[#allocation4 + $0x48] sm:$0xff] }
 0x76a   : > { %v6102_v56 = vsel %vm349_vm1, %v8738_v11, %v8574_v47  ;;  %v8575_v47 = vunpack.i.h.bf16 %v8573_v0 }
 0x76b   : > { %v13442_v2 = vpop.f32.mrf.mxu0 }
 0x76c   : > { %8431 = vmatmul.msk.f32.gmra.mxu0 %vm349_vm1, %v13247_v44  ;;  %15753 = vst [vmem:[#allocation13_spill] sm:$0xff] %v13442_v2 }
 0x76f   : > { %6797 = vmatmul.f32.gmra.mxu3 %v6646_v42  ;;  %v8578_v42 = vpop.permute.xlu2 %8577 }
 0x770   : > { %v8579_v60 = vunpack.i.l.bf16 %v8578_v42 }
 0x771   : > { %6252 = vmatmul.f32.gmra.mxu1 %v6101_v39  ;;  %v13455_v39 = vpop.f32.mrf.mxu3 }
 0x772   : > { %15756 = vst [vmem:[#allocation190_spill] sm:$0xff] %v13455_v39  ;;  %v6103_v3 = vsel %vm349_vm1, %v8739_v57, %v8579_v60  ;;  %v8580_v60 = vunpack.i.h.bf16 %v8578_v42  ;;  %v7396_v39 = vld [vmem:[#allocation5 + $0x10] sm:$0xff] }
 0x773   : > { %v13451_v17 = vpop.f32.mrf.mxu0 }
 0x774   : > { %8432 = vmatmul.msk.f32.gmra.mxu0 %vm349_vm1, %v13192_v30  ;;  %15755 = vst [vmem:[#allocation47_spill] sm:$0xff] %v13451_v17  ;;  %v6648_v30 = vsel %vm349_vm1, %v13050_v25, %v8570_v5  ;;  %v6649_v17 = vsel %vm349_vm1, %v13083_v62, %v8575_v47  ;;  %v8740_v25 = vld [vmem:[#allocation4 + $0x50] sm:$0xff]  ;;  %v8741_v62 = vld [vmem:[#allocation4 + $0x58] sm:$0xff] }
 0x777   : > { %6800 = vmatmul.f32.gmra.mxu3 %v6647_v58  ;;  %v8583_v58 = vpop.permute.xlu0 %8582  ;;  %v8593_v47 = vpop.permute.xlu2 %8592 }
 0x778   : > { %v8584_v11 = vunpack.i.l.bf16 %v8583_v58 }
 0x779   : > { %6255 = vmatmul.f32.gmra.mxu1 %v6102_v56  ;;  %v13464_v56 = vpop.f32.mrf.mxu3 }
 0x77a   : > { %15757 = vst [vmem:[#allocation9_spill] sm:$0xff] %v13464_v56  ;;  %v6104_v5 = vsel %vm349_vm1, %v8740_v25, %v8584_v11  ;;  %v8585_v11 = vunpack.i.h.bf16 %v8583_v58  ;;  %v8594_v25 = vunpack.i.l.bf16 %v8593_v47 }
 0x77b   : > { %v13462_v45 = vpop.f32.mrf.mxu0 }
 0x77c   : > { %8433 = vmatmul.msk.f32.gmra.mxu0 %vm349_vm1, %v13229_v8 }
 0x77f   : > { %6803 = vmatmul.f32.gmra.mxu3 %v6648_v30  ;;  %v8588_v30 = vpop.permute.xlu1 %8587 }
 0x780   : > { %v8589_v57 = vunpack.i.l.bf16 %v8588_v30 }
 0x781   : > { %6258 = vmatmul.f32.gmra.mxu1 %v6103_v3  ;;  %v13471_v0 = vpop.f32.mrf.mxu3 }
 0x782   : > { %15758 = vst [vmem:[#allocation61_spill] sm:$0xff] %v13471_v0 }
 0x783   : > { %v13475_v3 = vpop.f32.mrf.mxu0 }
 0x784   : > { %8434 = vmatmul.msk.f32.gmra.mxu0 %vm349_vm1, %v13275_v59  ;;  %v6650_v59 = vsel %vm349_vm1, %v13134_v38, %v8580_v60  ;;  %v8742_v38 = vld [vmem:[#allocation4 + $0x60] sm:$0xff]  ;;  %v8598_v60 = vpop.permute.xlu0 %8597 }
 0x787   : > { %6806 = vmatmul.f32.gmra.mxu3 %v6649_v17  ;;  %v6105_v17 = vsel %vm349_vm1, %v8741_v62, %v8589_v57  ;;  %v8599_v62 = vunpack.i.l.bf16 %v8598_v60 }
 0x789   : > { %6261 = vmatmul.f32.gmra.mxu1 %v6104_v5  ;;  %v13482_v42 = vpop.f32.mrf.mxu3  ;;  %v6106_v5 = vsel %vm349_vm1, %v8742_v38, %v8594_v25  ;;  %v6107_v58 = vsel %vm349_vm1, %v12846_v48, %v8599_v62  ;;  %v8608_v38 = vpop.permute.xlu2 %8607  ;;  %v8600_v48 = vunpack.i.h.bf16 %v8598_v60 }
 0x78a   : > { %15759 = vst [vmem:[#allocation36_spill] sm:$0xff] %v13482_v42  ;;  %v15786_v42 = vld [vmem:[#allocation145_spill] sm:$0xff] }
 0x78b   : > { %v13485_v57 = vpop.f32.mrf.mxu0 }
 0x78c   : > { %8435 = vmatmul.msk.f32.gmra.mxu0 %vm349_vm1, %v13217_v55  ;;  %v6651_v55 = vsel %vm349_vm1, %v13076_v4, %v8585_v11  ;;  %v8595_v11 = vunpack.i.h.bf16 %v8593_v47 }
 0x78f   : > { %6809 = vmatmul.f32.gmra.mxu3 %v6650_v59  ;;  %v8590_v59 = vunpack.i.h.bf16 %v8588_v30 }
 0x791   : > { %6264 = vmatmul.f32.gmra.mxu1 %v6105_v17  ;;  %v8603_v17 = vpop.permute.xlu1 %8602 }
 0x792   : > { %v8604_v25 = vunpack.i.l.bf16 %v8603_v17  ;;  %v8605_v62 = vunpack.i.h.bf16 %v8603_v17 }
 0x793   : > { %v13495_v30 = vpop.f32.mrf.mxu0 }
 0x794   : > { %8436 = vmatmul.msk.f32.gmra.mxu0 %vm349_vm1, %v13251_v16  ;;  %v6652_v16 = vsel %vm349_vm1, %v13112_v35, %v8590_v59  ;;  %v8613_v59 = vpop.permute.xlu0 %8612 }
 0x795   : > { %v13491_v4 = vpop.f32.mrf.mxu3 }
 0x796   : > { %15760 = vst [vmem:[#allocation81_spill] sm:$0xff] %v13491_v4 }
 0x797   : > { %6812 = vmatmul.f32.gmra.mxu3 %v6651_v55  ;;  %v6108_v55 = vsel %vm349_vm1, %v12867_v49, %v8604_v25  ;;  %v13529_v25 = vpop.f32.mrf.mxu2 }
 0x799   : > { %6267 = vmatmul.f32.gmra.mxu1 %v6106_v5  ;;  %v8609_v5 = vunpack.i.l.bf16 %v8608_v38 }
 0x79b   : > { %v13507_v47 = vpop.f32.mrf.mxu0 }
 0x79c   : > { %8437 = vmatmul.msk.f32.gmra.mxu0 %vm349_vm1, %v13298_v52  ;;  %v6653_v52 = vsel %vm349_vm1, %v13162_v19, %v8595_v11  ;;  %v6109_v19 = vsel %vm349_vm1, %v12881_v29, %v8609_v5  ;;  %v8610_v29 = vunpack.i.h.bf16 %v8608_v38 }
 0x79f   : > { %6815 = vmatmul.f32.gmra.mxu3 %v6652_v16  ;;  %v8614_v16 = vunpack.i.l.bf16 %v8613_v59 }
 0x7a1   : > { %6270 = vmatmul.f32.gmra.mxu1 %v6107_v58  ;;  %v8618_v58 = vpop.permute.xlu1 %8617 }
 0x7a2   : > { %v13501_v35 = vpop.f32.mrf.mxu3  ;;  %v8619_v17 = vunpack.i.l.bf16 %v8618_v58 }
 0x7a3   : > { %15761 = vst [vmem:[#allocation65_spill] sm:$0xff] %v13501_v35  ;;  %v13519_v60 = vpop.f32.mrf.mxu0 }
 0x7a4   : > { %8438 = vmatmul.msk.f32.gmra.mxu0 %vm349_vm1, %v13244_v37  ;;  %v6654_v37 = vsel %vm349_vm1, %v13107_v46, %v8600_v48  ;;  %v6110_v46 = vsel %vm349_vm1, %v12896_v40, %v8614_v16  ;;  %v15765_v48 = vld [vmem:[#allocation18_spill] sm:$0xff] }
 0x7a7   : > { %6818 = vmatmul.f32.gmra.mxu3 %v6653_v52  ;;  %v6656_v52 = vsel %vm349_vm1, %v13190_v31, %v8610_v29  ;;  %v13543_v31 = vld [vmem:[%s14980_s6] ss:$0 sm:$0xff]  ;;  %v13550_v29 = vpop.f32.mrf.mxu2 }
 0x7a9   : > { %6273 = vmatmul.f32.gmra.mxu1 %v6108_v55  ;;  %v15764_v55 = vld [vmem:[#allocation177_spill] sm:$0xff] }
 0x7aa   : > { %v13513_v49 = vpop.f32.mrf.mxu3  ;;  %v6111_v38 = vsel %vm349_vm1, %v15764_v55, %v8619_v17  ;;  %v8620_v55 = vunpack.i.h.bf16 %v8618_v58 }
 0x7ab   : > { %15762 = vst [vmem:[#allocation195_spill] sm:$0xff] %v13513_v49  ;;  %v15785_v49 = vld [vmem:[#allocation151_spill] sm:$0xff] }
 0x7ac   : > { %8439 = vmatmul.msk.f32.gmra.mxu0 %vm349_vm1, %v13282_v27  ;;  %v6655_v27 = vsel %vm349_vm1, %v13141_v33, %v8605_v62  ;;  %v6658_v58 = vsel %vm349_vm1, %v13171_v43, %v8620_v55  ;;  %v5822_v26 = vadd.f32 %v15786_v42, %v15785_v49 }
 0x7af   : > { %6821 = vmatmul.f32.gmra.mxu3 %v6654_v37  ;;  %v8623_v37 = vpop.permute.xlu2 %8622 }
 0x7b1   : > { %6276 = vmatmul.f32.gmra.mxu1 %v6109_v19  ;;  %v13537_v19 = vpop.f32.mrf.mxu0 }
 0x7b4   : > { %8440 = vmatmul.msk.f32.gmra.mxu0 %vm349_vm1, %v13323_v36  ;;  %v5804_v36 = vadd.f32 %v12865_v34, %v12924_v14 }
 0x7b6   : > { %v5899_v5 = vmul.f32 %v15765_v48, %v5804_v36  ;;  %v8628_v36 = vpop.permute.xlu0 %8627 }
 0x7b7   : > { %6824 = vmatmul.f32.gmra.mxu3 %v6655_v27 }
 0x7b9   : > { %6279 = vmatmul.f32.gmra.mxu1 %v6110_v46 }
 0x7ba   : > { %v13523_v11 = vpop.f32.mrf.mxu3 }
 0x7bb   : > { %15763 = vst [vmem:[#allocation201_spill] sm:$0xff] %v13523_v11  ;;  %v13570_v11 = vpop.permute.xlu1 %8632 }
 0x7bc   : > { %8441 = vmatmul.msk.f32.gmra.mxu0 %vm349_vm1, %v13271_v18  ;;  %v8615_v18 = vunpack.i.h.bf16 %v8613_v59 }
 0x7be   : > { %v6235_v33 = vpop.f32.mrf.mxu1  ;;  %v6657_v59 = vsel %vm349_vm1, %v13136_v54, %v8615_v18  ;;  %v8629_v18 = vunpack.i.l.bf16 %v8628_v36 }
 0x7bf   : > { %v6349_v40 = vadd.f32 %v13203_v53, %v6235_v33  ;;  %6827 = vmatmul.f32.gmra.mxu3 %v6656_v52  ;;  %v8624_v53 = vunpack.i.l.bf16 %v8623_v37  ;;  %v15767_v52 = vld [vmem:[#allocation49_spill] sm:$0xff] }
 0x7c1   : > { %6282 = vmatmul.f32.gmra.mxu1 %v6111_v38  ;;  %v6444_v14 = vadd.f32 %v6349_v40, %v5899_v5  ;;  %v15768_v38 = vld [vmem:[#allocation143_spill] sm:$0xff]  ;;  %v15769_v5 = vld [vmem:[#allocation136_spill] sm:$0xff] }
 0x7c2   : > { %v6780_v34 = vpop.f32.mrf.mxu3 }
 0x7c3   : > { %v6894_v62 = vadd.f32 %v13462_v45, %v6780_v34  ;;  %v15766_v45 = vld [vmem:[#allocation142_spill] sm:$0xff]  ;;  %v5807_v34 = vadd.f32 %v15769_v5, %v15768_v38 }
 0x7c4   : > { %8442 = vmatmul.msk.f32.gmra.mxu0 %vm349_vm1, %v13304_v22  ;;  %v6112_v17 = vsel %vm349_vm1, %v15766_v45, %v8624_v53 }
 0x7c5   : > { %v7021_v16 = vadd.f32 %v6894_v62, %v6444_v14  ;;  %v13559_v14 = vpop.f32.mrf.mxu0  ;;  %v15770_v62 = vld [vmem:[#allocation146_spill] sm:$0xff] }
 0x7c6   : > { %v6238_v27 = vpop.f32.mrf.mxu1 }
 0x7c7   : > { %v7057_v46 = vadd.f32 %v13543_v31, %v7021_v16  ;;  %6830 = vmatmul.f32.gmra.mxu3 %v6657_v59  ;;  %v6352_v40 = vadd.f32 %v15767_v52, %v6238_v27  ;;  %v15771_v16 = vld [vmem:[#allocation134_spill] sm:$0xff]  ;;  %v15773_v52 = vld [vmem:[#allocation52_spill] sm:$0xff] }
 0x7c8   : > { %v5810_v53 = vadd.f32 %v15771_v16, %v15770_v62 }
 0x7c9   : > { %v7089_v33 = vmax.f32 %v7057_v46, 0.0  ;;  %6285 = vmatmul.f32.gmra.mxu1 %v6112_v17  ;;  %v6445_v59 = vadd.f32 %v6352_v40, %v5807_v34  ;;  %v15772_v46 = vld [vmem:[#allocation80_spill] sm:$0xff]  ;;  %v13573_v40 = vpop.f32.mrf.mxu2  ;;  %v8625_v34 = vunpack.i.h.bf16 %v8623_v37  ;;  %v15776_v37 = vld [vmem:[#allocation147_spill] sm:$0xff] }
 0x7ca   : > { %v6783_v22 = vpop.f32.mrf.mxu3 }
 0x7cb   : > { %7121 = vst.msk [vmem:[#allocation5 + $0x18] sm:$0xff] %vm342_vm10, %v7089_v33  ;;  %v6897_v54 = vadd.f32 %v13475_v3, %v6783_v22  ;;  %v15774_v33 = vld [vmem:[#allocation144_spill] sm:$0xff]  ;;  %v15775_v22 = vld [vmem:[#allocation19_spill] sm:$0xff] }
 0x7cc   : > { %v6113_v3 = vsel %vm349_vm1, %v15774_v33, %v8629_v18  ;;  %v5901_v5 = vmul.f32 %v15775_v22, %v5810_v53  ;;  %v8630_v33 = vunpack.i.h.bf16 %v8628_v36  ;;  %v13601_v36 = vld [vmem:[%s14981_s7] ss:$0 sm:$0xff] }
 0x7cd   : > { %v6990_v45 = vmul.f32 %v15772_v46, %v6897_v54  ;;  %v7190_v10 = vmul.f32 %v13601_v36, %v7154_v12 }
 0x7ce   : > { %v6241_v27 = vpop.f32.mrf.mxu1 }
 0x7cf   : > { %v7022_v17 = vadd.f32 %v6990_v45, %v6445_v59  ;;  %v6355_v38 = vadd.f32 %v15773_v52, %v6241_v27  ;;  %6833 = vmatmul.f32.gmra.mxu3 %v6658_v58  ;;  %v8634_v59 = vunpack.i.l.bf16 %v13570_v11  ;;  %v13578_v45 = vpop.f32.mrf.mxu0  ;;  %v6659_v27 = vsel %vm349_vm1, %v13215_v9, %v8625_v34  ;;  %v13585_v52 = vpop.permute.xlu2 %8637 }
 0x7d0   : > { %v8640_v1 = vunpack.i.h.bf16 %v13585_v52 }
 0x7d1   : > { %v7058_v62 = vadd.f32 %v13543_v31, %v7022_v17  ;;  %6288 = vmatmul.f32.gmra.mxu1 %v6113_v3  ;;  %v6446_v43 = vadd.f32 %v6355_v38, %v5901_v5  ;;  %v6114_v17 = vsel %vm349_vm1, %v15776_v37, %v8634_v59  ;;  %v15777_v5 = vld [vmem:[#allocation150_spill] sm:$0xff]  ;;  %v13592_v34 = vpop.f32.mrf.mxu2 }
 0x7d2   : > { %v6786_v54 = vpop.f32.mrf.mxu3  ;;  %v7153_v37 = vld [vmem:[#allocation5 + $0x7] sm:$0xff]  ;;  %v6662_v28 = vsel %vm349_vm1, %v13247_v44, %v8640_v1 }
 0x7d3   : > { %v7090_v16 = vmax.f32 %v7058_v62, 0.0  ;;  %v6900_v55 = vadd.f32 %v13485_v57, %v6786_v54  ;;  %v15778_v62 = vld [vmem:[#allocation139_spill] sm:$0xff] }
 0x7d4   : > { %v5813_v54 = vadd.f32 %v15778_v62, %v15777_v5  ;;  %v15783_v62 = vld [vmem:[#allocation180_spill] sm:$0xff] }
 0x7d5   : > { %7122 = vst.msk [vmem:[#allocation5 + $0x20] sm:$0xff] %vm342_vm10, %v7090_v16  ;;  %v7023_v18 = vadd.f32 %v6900_v55, %v6446_v43  ;;  %v8639_v16 = vunpack.i.l.bf16 %v13585_v52  ;;  %v15779_v43 = vld [vmem:[#allocation153_spill] sm:$0xff]  ;;  %v15780_v55 = vld [vmem:[#allocation132_spill] sm:$0xff] }
 0x7d6   : > { %v6244_v53 = vpop.f32.mrf.mxu1  ;;  %v5816_v59 = vadd.f32 %v15780_v55, %v15779_v43 }
 0x7d7   : > { %v7059_v58 = vadd.f32 %v13543_v31, %v7023_v18  ;;  %6836 = vmatmul.f32.gmra.mxu3 %v6659_v27  ;;  %v6358_v38 = vadd.f32 %v13302_v32, %v6244_v53  ;;  %v15781_v27 = vld [vmem:[#allocation84_spill] sm:$0xff]  ;;  %v13606_v53 = vld [vmem:[%s14981_s7 + $0x3] ss:$0 sm:$0xff]  ;;  %v13618_v5 = vpop.f32.mrf.mxu0 }
 0x7d8   : > { %15782 = vst [vmem:[#allocation50_spill] sm:$0xff] %v13618_v5 }
 0x7d9   : > { %v7091_v57 = vmax.f32 %v7059_v58, 0.0  ;;  %6291 = vmatmul.f32.gmra.mxu1 %v6114_v17  ;;  %v6447_v18 = vadd.f32 %v6358_v38, %v5813_v54  ;;  %v6660_v58 = vsel %vm349_vm1, %v13166_v63, %v8630_v33  ;;  %v13610_v17 = vld [vmem:[#allocation5 + $0x17] sm:$0xff]  ;;  %v6115_v54 = vsel %vm349_vm1, %v15783_v62, %v8639_v16  ;;  %v13623_v63 = vpop.permute.xlu0 %8642  ;;  %v7395_v62 = vld [vmem:[#allocation5 + $0x8] sm:$0xff]  ;;  %v13663_v4 = vpop.f32.mrf.mxu2 }
 0x7da   : > { %v6789_v3 = vpop.f32.mrf.mxu3  ;;  %v7228_v55 = vmul.f32 %v13606_v53, %v13610_v17  ;;  %15787 = vst [vmem:[#allocation161_spill] sm:$0xff] %v13663_v4  ;;  %v8645_v50 = vunpack.i.h.bf16 %v13623_v63  ;;  %v13737_v4 = vpop.permute.xlu2 %8652 }
 0x7db   : > { %7123 = vst.msk [vmem:[#allocation5 + $0x28] sm:$0xff] %vm342_vm10, %v7091_v57  ;;  %v6903_v9 = vadd.f32 %v13495_v30, %v6789_v3  ;;  %v13616_v3 = vld [vmem:[%s14981_s7 + $0x6] ss:$0 sm:$0xff] }
 0x7dc   : > { %v13659_v2 = vld [vmem:[#allocation5 + $0x19] sm:$0xff] }
 0x7dd   : > { %v6992_v32 = vmul.f32 %v15781_v27, %v6903_v9  ;;  %v15784_v9 = vld [vmem:[#allocation8_spill] sm:$0xff] }
 0x7de   : > { %v6247_v30 = vpop.f32.mrf.mxu1  ;;  %v5903_v43 = vmul.f32 %v15784_v9, %v5816_v59 }
 0x7df   : > { %v7024_v57 = vadd.f32 %v6992_v32, %v6447_v18  ;;  %v6361_v38 = vadd.f32 %v13331_v21, %v6247_v30  ;;  %6839 = vmatmul.f32.gmra.mxu3 %v6660_v58  ;;  %v7189_v21 = vmul.f32 %v13601_v36, %v7153_v37  ;;  %v8635_v18 = vunpack.i.h.bf16 %v13570_v11  ;;  %v13643_v37 = vld [vmem:[%s14981_s7 + $0x4] ss:$0 sm:$0xff] }
 0x7e0   : > { %v8644_v11 = vunpack.i.l.bf16 %v13623_v63 }
 0x7e1   : > { %v7060_v33 = vadd.f32 %v13543_v31, %v7024_v57  ;;  %6294 = vmatmul.f32.gmra.mxu1 %v6115_v54  ;;  %v6448_v35 = vadd.f32 %v6361_v38, %v5903_v43  ;;  %v13638_v57 = vld [vmem:[%s14981_s7 + $0x1] ss:$0 sm:$0xff]  ;;  %v13646_v54 = vld [vmem:[#allocation5 + $0x18] sm:$0xff]  ;;  %v7260_v43 = vadd.f32 %v7228_v55, %v7189_v21  ;;  %v13673_v55 = vld [vmem:[%s14981_s7 + $0x2] ss:$0 sm:$0xff] }
 0x7e2   : > { %v6792_v32 = vpop.f32.mrf.mxu3  ;;  %v13630_v30 = vld [vmem:[#allocation5 + $0x27] sm:$0xff]  ;;  %v7432_v49 = vmul.f32 %v13638_v57, %v7395_v62  ;;  %v7471_v52 = vmul.f32 %v13643_v37, %v13646_v54  ;;  %v13691_v62 = vld [vmem:[%s14981_s7 + $0x8] ss:$0 sm:$0xff]  ;;  %v7433_v1 = vmul.f32 %v13638_v57, %v7396_v39 }
 0x7e3   : > { %v7092_v58 = vmax.f32 %v7060_v33, 0.0  ;;  %v6906_v16 = vadd.f32 %v13507_v47, %v6792_v32  ;;  %v7299_v59 = vmul.f32 %v13616_v3, %v13630_v30  ;;  %v13651_v47 = vld [vmem:[%s14981_s7 + $0x5] ss:$0 sm:$0xff]  ;;  %v13657_v33 = vld [vmem:[%s14981_s7 + $0x7] ss:$0 sm:$0xff]  ;;  %v7638_v32 = vld [vmem:[#allocation5 + $0x9] sm:$0xff] }
 0x7e4   : > { %v13668_v21 = vld [vmem:[#allocation5 + $0x28] sm:$0xff]  ;;  %v7714_v0 = vmul.f32 %v13651_v47, %v13659_v2  ;;  %v7503_v41 = vadd.f32 %v7471_v52, %v7432_v49 }
 0x7e5   : > { %7124 = vst.msk [vmem:[#allocation5 + $0x30] sm:$0xff] %vm342_vm10, %v7092_v58  ;;  %v7025_v38 = vadd.f32 %v6906_v16, %v6448_v35  ;;  %v6661_v35 = vsel %vm349_vm1, %v13199_v7, %v8635_v18  ;;  %v13675_v58 = vpop.permute.xlu1 %8647  ;;  %v7331_v42 = vadd.f32 %v7299_v59, %v7260_v43  ;;  %v6116_v7 = vsel %vm349_vm1, %v8743_v24, %v8644_v11  ;;  %v13693_v24 = vld [vmem:[#allocation5 + $0x1f] sm:$0xff] }
 0x7e6   : > { %v6250_v56 = vpop.f32.mrf.mxu1  ;;  %v7675_v18 = vmul.f32 %v13673_v55, %v7638_v32  ;;  %v7542_v59 = vmul.f32 %v13657_v33, %v13668_v21  ;;  %v13695_v11 = vld [vmem:[#allocation5 + $0x20] sm:$0xff]  ;;  %v15789_v32 = vld [vmem:[#allocation135_spill] sm:$0xff]  ;;  %v7229_v15 = vmul.f32 %v13606_v53, %v13693_v24 }
 0x7e7   : > { %v7061_v16 = vadd.f32 %v13543_v31, %v7025_v38  ;;  %6842 = vmatmul.f32.gmra.mxu3 %v6661_v35  ;;  %v6364_v38 = vadd.f32 %v13352_v6, %v6250_v56  ;;  %v15788_v43 = vld [vmem:[#allocation156_spill] sm:$0xff]  ;;  %v8649_v6 = vunpack.i.l.bf16 %v13675_v58  ;;  %v13701_v56 = vpop.f32.mrf.mxu0  ;;  %v7363_v61 = vmul.f32 %v15765_v48, %v7331_v42  ;;  %v15792_v48 = vld [vmem:[#allocation85_spill] sm:$0xff] }
 0x7e8   : > { %v5819_v35 = vadd.f32 %v15789_v32, %v15788_v43  ;;  %15791 = vst [vmem:[#allocation51_spill] sm:$0xff] %v13701_v56  ;;  %v13709_v43 = vld [vmem:[#allocation5 + $0x21] sm:$0xff]  ;;  %v7746_v32 = vadd.f32 %v7714_v0, %v7675_v18  ;;  %v7574_v42 = vadd.f32 %v7542_v59, %v7503_v41  ;;  %v7639_v0 = vld [vmem:[#allocation5 + $0x11] sm:$0xff] }
 0x7e9   : > { %v7093_v51 = vmax.f32 %v7061_v16, 0.0  ;;  %6297 = vmatmul.f32.gmra.mxu1 %v6116_v7  ;;  %v5905_v16 = vmul.f32 %v15790_v23, %v5822_v26  ;;  %v8744_v18 = vld [vmem:[#allocation4 + $0xb8] sm:$0xff]  ;;  %v7676_v56 = vmul.f32 %v13673_v55, %v7639_v0  ;;  %v15794_v0 = vld [vmem:[#allocation152_spill] sm:$0xff] }
 0x7ea   : > { %v6795_v7 = vpop.f32.mrf.mxu3 }
 0x7eb   : > { %7125 = vst.msk [vmem:[#allocation5 + $0x38] sm:$0xff] %vm342_vm10, %v7093_v51  ;;  %v6909_v20 = vadd.f32 %v13519_v60, %v6795_v7  ;;  %v7472_v51 = vmul.f32 %v13643_v37, %v13695_v11  ;;  %v6449_v60 = vadd.f32 %v6364_v38, %v5819_v35  ;;  %v6117_v7 = vsel %vm349_vm1, %v8744_v18, %v8649_v6 }
 0x7ec   : > { %v13711_v26 = vld [vmem:[#allocation5 + $0x29] sm:$0xff]  ;;  %v7715_v38 = vmul.f32 %v13651_v47, %v13709_v43  ;;  %v7261_v6 = vadd.f32 %v7229_v15, %v7190_v10 }
 0x7ed   : > { %v13713_v13 = vld [vmem:[#allocation5 + $0x2f] sm:$0xff]  ;;  %v6994_v12 = vmul.f32 %v15792_v48, %v6909_v20  ;;  %v7785_v49 = vmul.f32 %v13691_v62, %v13711_v26  ;;  %v7606_v20 = vadd.f32 %v7574_v42, %v7363_v61  ;;  %v13733_v48 = vpop.f32.mrf.mxu2  ;;  %v7504_v18 = vadd.f32 %v7472_v51, %v7433_v1 }
 0x7ee   : > { %v13717_v44 = vld [vmem:[#allocation5 + $0x30] sm:$0xff]  ;;  %v6253_v52 = vpop.f32.mrf.mxu1  ;;  %v7300_v23 = vmul.f32 %v13616_v3, %v13713_v13  ;;  %v7230_v61 = vmul.f32 %v13606_v53, %v13630_v30  ;;  %v7747_v10 = vadd.f32 %v7715_v38, %v7676_v56 }
 0x7ef   : > { %v7543_v39 = vmul.f32 %v13657_v33, %v13717_v44  ;;  %v7026_v35 = vadd.f32 %v6994_v12, %v6449_v60  ;;  %v6367_v41 = vadd.f32 %v13529_v25, %v6253_v52  ;;  %6845 = vmatmul.f32.gmra.mxu3 %v6662_v28  ;;  %v7817_v59 = vadd.f32 %v7785_v49, %v7746_v32  ;;  %v15793_v49 = vld [vmem:[#allocation46_spill] sm:$0xff] }
 0x7f0   : > { %v7191_v25 = vmul.f32 %v13601_v36, %v13610_v17  ;;  %v7332_v60 = vadd.f32 %v7300_v23, %v7261_v6  ;;  %v5828_v52 = vadd.f32 %v15794_v0, %v15793_v49  ;;  %v13755_v23 = vpop.f32.mrf.mxu0 }
 0x7f1   : > { %v7062_v9 = vadd.f32 %v13543_v31, %v7026_v35  ;;  %6300 = vmatmul.f32.gmra.mxu1 %v6117_v7  ;;  %v7881_v5 = vadd.f32 %v7817_v59, %v7606_v20  ;;  %v6450_v28 = vadd.f32 %v6367_v41, %v5905_v16  ;;  %v7575_v63 = vadd.f32 %v7543_v39, %v7504_v18  ;;  %v15796_v39 = vld [vmem:[#allocation149_spill] sm:$0xff]  ;;  %v8745_v20 = vld [vmem:[#allocation4 + $0xc1] sm:$0xff] }
 0x7f2   : > { %v6798_v32 = vpop.f32.mrf.mxu3  ;;  %v13744_v15 = vld [vmem:[#allocation5 + $0x31] sm:$0xff]  ;;  %v8654_v16 = vunpack.i.l.bf16 %v13737_v4  ;;  %v7262_v7 = vadd.f32 %v7230_v61, %v7191_v25  ;;  %v8650_v35 = vunpack.i.h.bf16 %v13675_v58  ;;  %v6663_v59 = vsel %vm349_vm1, %v8745_v20, %v8645_v50 }
 0x7f3   : > { %v13746_v1 = vld [vmem:[#allocation5 + $0x37] sm:$0xff]  ;;  %v7094_v51 = vmax.f32 %v7062_v9, 0.0  ;;  %v6912_v12 = vadd.f32 %v13537_v19, %v6798_v32  ;;  %v7913_v42 = vsel %vm342_vm10, %v7881_v5, 0.0  ;;  %v7786_v17 = vmul.f32 %v13691_v62, %v13744_v15  ;;  %v15795_v5 = vld [vmem:[#allocation157_spill] sm:$0xff]  ;;  %v13768_v32 = vpop.permute.xlu0 %8657 }
 0x7f4   : > { %7914 = vadd.xlane.f32.xlu2 %v7913_v42  ;;  %v7301_v56 = vmul.f32 %v13616_v3, %v13746_v1  ;;  %v5825_v38 = vadd.f32 %v15796_v39, %v15795_v5  ;;  %v13764_v6 = vld [vmem:[#allocation5 + $0x38] sm:$0xff]  ;;  %v7473_v18 = vmul.f32 %v13643_v37, %v13668_v21  ;;  %v7607_v25 = vadd.f32 %v7575_v63, %v7332_v60 }
 0x7f5   : > { %7126 = vst.msk [vmem:[#allocation5 + $0x40] sm:$0xff] %vm342_vm10, %v7094_v51  ;;  %v7027_v9 = vadd.f32 %v6912_v12, %v6450_v28  ;;  %v7818_v19 = vadd.f32 %v7786_v17, %v7747_v10  ;;  %v15797_v51 = vld [vmem:[#allocation26_spill] sm:$0xff]  ;;  %v7434_v50 = vmul.f32 %v13638_v57, %v13646_v54  ;;  %v7716_v17 = vmul.f32 %v13651_v47, %v13711_v26  ;;  %v13781_v60 = vpop.f32.mrf.mxu2 }
 0x7f6   : > { %v6256_v41 = vpop.f32.mrf.mxu1  ;;  %v7333_v10 = vadd.f32 %v7301_v56, %v7262_v7  ;;  %v5907_v58 = vmul.f32 %v15797_v51, %v5828_v52  ;;  %v8746_v12 = vld [vmem:[#allocation4 + $0xc0] sm:$0xff]  ;;  %v8655_v63 = vunpack.i.h.bf16 %v13737_v4  ;;  %v8659_v52 = vunpack.i.l.bf16 %v13768_v32  ;;  %v8749_v4 = vld [vmem:[#allocation4 + $0xd0] sm:$0xff] }
 0x7f7   : > { %v7063_v28 = vadd.f32 %v13543_v31, %v7027_v9  ;;  %6848 = vmatmul.f32.gmra.mxu3 %v6663_v59  ;;  %v7850_v61 = vmul.f32 %v15772_v46, %v7818_v19  ;;  %v6118_v42 = vsel %vm349_vm1, %v8746_v12, %v8654_v16  ;;  %v6370_v0 = vadd.f32 %v13550_v29, %v6256_v41 }
 0x7f8   : > { %v7544_v46 = vmul.f32 %v13657_v33, %v13764_v6  ;;  %v6664_v54 = vsel %vm349_vm1, %v13229_v8, %v8650_v35  ;;  %v7677_v56 = vmul.f32 %v13673_v55, %v13659_v2  ;;  %v7365_v7 = vmul.f32 %v15775_v22, %v7333_v10  ;;  %v15798_v22 = vld [vmem:[#allocation82_spill] sm:$0xff] }
 0x7f9   : > { %v7095_v49 = vmax.f32 %v7063_v28, 0.0  ;;  %6303 = vmatmul.f32.gmra.mxu1 %v6118_v42  ;;  %v7882_v9 = vadd.f32 %v7850_v61, %v7607_v25  ;;  %v7505_v5 = vadd.f32 %v7473_v18, %v7434_v50  ;;  %v7192_v8 = vmul.f32 %v13601_v36, %v13693_v24  ;;  %v13808_v61 = vpop.f32.mrf.mxu0 }
 0x7fa   : > { %v6801_v16 = vpop.f32.mrf.mxu3  ;;  %v7748_v41 = vadd.f32 %v7716_v17, %v7677_v56  ;;  %v7231_v2 = vmul.f32 %v13606_v53, %v13713_v13  ;;  %v6451_v59 = vadd.f32 %v6370_v0, %v5825_v38  ;;  %v7435_v12 = vmul.f32 %v13638_v57, %v13695_v11 }
 0x7fb   : > { %7127 = vst.msk [vmem:[#allocation5 + $0x48] sm:$0xff] %vm342_vm10, %v7095_v49  ;;  %v6915_v29 = vadd.f32 %v13559_v14, %v6801_v16  ;;  %v7916_v19 = vsel %vm342_vm10, %v7882_v9, 0.0  ;;  %v7474_v14 = vmul.f32 %v13643_v37, %v13717_v44  ;;  %v7576_v28 = vadd.f32 %v7544_v46, %v7505_v5  ;;  %v8747_v9 = vld [vmem:[#allocation4 + $0xc8] sm:$0xff] }
 0x7fc   : > { %7917 = vadd.xlane.f32.xlu0 %v7916_v19  ;;  %v13793_v39 = vld [vmem:[#allocation5 + $0x39] sm:$0xff]  ;;  %v7717_v38 = vmul.f32 %v13651_v47, %v13744_v15  ;;  %v6119_v46 = vsel %vm349_vm1, %v8747_v9, %v8659_v52  ;;  %v7263_v16 = vadd.f32 %v7231_v2, %v7192_v8  ;;  %v7678_v11 = vmul.f32 %v13673_v55, %v13709_v43 }
 0x7fd   : > { %v13795_v20 = vld [vmem:[#allocation5 + $0x3f] sm:$0xff]  ;;  %v6996_v18 = vmul.f32 %v15798_v22, %v6915_v29  ;;  %v7787_v25 = vmul.f32 %v13691_v62, %v13793_v39  ;;  %v7608_v49 = vadd.f32 %v7576_v28, %v7365_v7  ;;  %v7506_v56 = vadd.f32 %v7474_v14, %v7435_v12  ;;  %v13822_v29 = vpop.permute.xlu1 %8662  ;;  %v15799_v12 = vld [vmem:[#allocation71_spill] sm:$0xff] }
 0x7fe   : > { %v13801_v35 = vld [vmem:[#allocation5 + $0x40] sm:$0xff]  ;;  %v6259_v10 = vpop.f32.mrf.mxu1  ;;  %v7302_v24 = vmul.f32 %v13616_v3, %v13795_v20  ;;  %v7749_v14 = vadd.f32 %v7717_v38, %v7678_v11  ;;  %v7475_v11 = vmul.f32 %v13643_v37, %v13764_v6 }
 0x7ff   : > { %v7545_v42 = vmul.f32 %v13657_v33, %v13801_v35  ;;  %v7028_v50 = vadd.f32 %v6996_v18, %v6451_v59  ;;  %v6373_v17 = vadd.f32 %v13573_v40, %v6259_v10  ;;  %6851 = vmatmul.f32.gmra.mxu3 %v6664_v54  ;;  %v7819_v0 = vadd.f32 %v7787_v25, %v7748_v41  ;;  %v13833_v59 = vpop.permute.xlu2 %8667  ;;  %v13839_v10 = vpop.f32.mrf.mxu2 }
 0x800   : > { %v7193_v40 = vmul.f32 %v13601_v36, %v13630_v30  ;;  %v7232_v54 = vmul.f32 %v13606_v53, %v13746_v1  ;;  %v7334_v52 = vadd.f32 %v7302_v24, %v7263_v16 }
 0x801   : > { %v7064_v19 = vadd.f32 %v13543_v31, %v7028_v50  ;;  %6306 = vmatmul.f32.gmra.mxu1 %v6119_v46  ;;  %v7883_v5 = vadd.f32 %v7819_v0, %v7608_v49  ;;  %v6452_v7 = vadd.f32 %v6373_v17, %v5907_v58  ;;  %v7577_v8 = vadd.f32 %v7545_v42, %v7506_v56  ;;  %v15800_v42 = vld [vmem:[#allocation159_spill] sm:$0xff]  ;;  %v8748_v46 = vld [vmem:[#allocation4 + $0xd1] sm:$0xff] }
 0x802   : > { %v6804_v41 = vpop.f32.mrf.mxu3  ;;  %v13829_v2 = vld [vmem:[#allocation5 + $0x41] sm:$0xff]  ;;  %v8664_v58 = vunpack.i.l.bf16 %v13822_v29  ;;  %v5834_v38 = vadd.f32 %v15800_v42, %v15799_v12  ;;  %v7264_v17 = vadd.f32 %v7232_v54, %v7193_v40  ;;  %v8669_v49 = vunpack.i.l.bf16 %v13833_v59  ;;  %v8750_v42 = vld [vmem:[#allocation4 + $0xd9] sm:$0xff] }
 0x803   : > { %v13831_v43 = vld [vmem:[#allocation5 + $0x47] sm:$0xff]  ;;  %v7096_v18 = vmax.f32 %v7064_v19, 0.0  ;;  %v6918_v28 = vadd.f32 %v13578_v45, %v6804_v41  ;;  %v7919_v25 = vsel %vm342_vm10, %v7883_v5, 0.0  ;;  %v7788_v30 = vmul.f32 %v13691_v62, %v13829_v2 }
 0x804   : > { %7920 = vadd.xlane.f32.xlu1 %v7919_v25  ;;  %v7303_v24 = vmul.f32 %v13616_v3, %v13831_v43  ;;  %v8660_v0 = vunpack.i.h.bf16 %v13768_v32  ;;  %v6665_v16 = vsel %vm349_vm1, %v8748_v46, %v8655_v63  ;;  %v13852_v56 = vld [vmem:[#allocation5 + $0x48] sm:$0xff]  ;;  %v7609_v5 = vadd.f32 %v7577_v8, %v7334_v52  ;;  %v15802_v32 = vld [vmem:[#allocation155_spill] sm:$0xff]  ;;  %v15805_v46 = vld [vmem:[#allocation8_spill] sm:$0xff] }
 0x805   : > { %7128 = vst.msk [vmem:[#allocation5 + $0x50] sm:$0xff] %vm342_vm10, %v7096_v18  ;;  %v7029_v50 = vadd.f32 %v6918_v28, %v6452_v7  ;;  %v7820_v45 = vadd.f32 %v7788_v30, %v7749_v14  ;;  %v15801_v7 = vld [vmem:[#allocation53_spill] sm:$0xff]  ;;  %v13860_v14 = vpop.f32.mrf.mxu0  ;;  %v6120_v63 = vsel %vm349_vm1, %v8749_v4, %v8664_v58  ;;  %v7436_v18 = vmul.f32 %v13638_v57, %v13668_v21 }
 0x806   : > { %v6262_v9 = vpop.f32.mrf.mxu1  ;;  %v7335_v54 = vadd.f32 %v7303_v24, %v7264_v17  ;;  %v5831_v41 = vadd.f32 %v15802_v32, %v15801_v7  ;;  %v7718_v28 = vmul.f32 %v13651_v47, %v13793_v39  ;;  %v7546_v8 = vmul.f32 %v13657_v33, %v13852_v56  ;;  %v15803_v30 = vld [vmem:[#allocation17_spill] sm:$0xff] }
 0x807   : > { %v7065_v19 = vadd.f32 %v13543_v31, %v7029_v50  ;;  %6854 = vmatmul.f32.gmra.mxu3 %v6665_v16  ;;  %v7852_v40 = vmul.f32 %v15781_v27, %v7820_v45  ;;  %v6376_v52 = vadd.f32 %v13592_v34, %v6262_v9  ;;  %v5909_v24 = vmul.f32 %v15803_v30, %v5834_v38  ;;  %v8751_v50 = vld [vmem:[#allocation4 + $0xd8] sm:$0xff] }
 0x808   : > { %v6666_v58 = vsel %vm349_vm1, %v8750_v42, %v8660_v0  ;;  %v6121_v21 = vsel %vm349_vm1, %v8751_v50, %v8669_v49  ;;  %v7679_v45 = vmul.f32 %v13673_v55, %v13711_v26  ;;  %v15804_v34 = vld [vmem:[#allocation50_spill] sm:$0xff]  ;;  %v7367_v16 = vmul.f32 %v15805_v46, %v7335_v54  ;;  %v13909_v46 = vpop.permute.xlu0 %8672 }
 0x809   : > { %v7097_v25 = vmax.f32 %v7065_v19, 0.0  ;;  %6309 = vmatmul.f32.gmra.mxu1 %v6120_v63  ;;  %v7884_v27 = vadd.f32 %v7852_v40, %v7609_v5  ;;  %v7507_v19 = vadd.f32 %v7475_v11, %v7436_v18  ;;  %v7194_v49 = vmul.f32 %v13601_v36, %v13713_v13  ;;  %v15806_v54 = vld [vmem:[#allocation86_spill] sm:$0xff]  ;;  %v13894_v18 = vpop.f32.mrf.mxu2 }
 0x80a   : > { %v6807_v12 = vpop.f32.mrf.mxu3  ;;  %v7750_v5 = vadd.f32 %v7718_v28, %v7679_v45  ;;  %v7233_v26 = vmul.f32 %v13606_v53, %v13795_v20  ;;  %v7476_v7 = vmul.f32 %v13643_v37, %v13801_v35  ;;  %v6453_v32 = vadd.f32 %v6376_v52, %v5831_v41  ;;  %v5965_v45 = vld [vmem:[#allocation4 + $0x118] sm:$0xff] }
 0x80b   : > { %7129 = vst.msk [vmem:[#allocation5 + $0x58] sm:$0xff] %vm342_vm10, %v7097_v25  ;;  %v6921_v17 = vadd.f32 %v15804_v34, %v6807_v12  ;;  %v7922_v9 = vsel %vm342_vm10, %v7884_v27, 0.0  ;;  %v7578_v4 = vadd.f32 %v7546_v8, %v7507_v19  ;;  %v7437_v25 = vmul.f32 %v13638_v57, %v13717_v44  ;;  %v15807_v8 = vld [vmem:[#allocation161_spill] sm:$0xff]  ;;  %8387 = vmatmul.msk.f32.gmra.mxu2 %vm349_vm1, %v5965_v45 }
 0x80c   : > { %7923 = vadd.xlane.f32.xlu2 %v7922_v9  ;;  %v13879_v38 = vld [vmem:[#allocation5 + $0x49] sm:$0xff]  ;;  %v7719_v41 = vmul.f32 %v13651_v47, %v13829_v2  ;;  %v8665_v34 = vunpack.i.h.bf16 %v13822_v29  ;;  %v7680_v44 = vmul.f32 %v13673_v55, %v13744_v15  ;;  %v8670_v45 = vunpack.i.h.bf16 %v13833_v59  ;;  %v15812_v59 = vld [vmem:[#allocation59_spill] sm:$0xff] }
 0x80d   : > { %v13881_v0 = vld [vmem:[#allocation5 + $0x4f] sm:$0xff]  ;;  %v6998_v11 = vmul.f32 %v15806_v54, %v6921_v17  ;;  %v7789_v63 = vmul.f32 %v13691_v62, %v13879_v38  ;;  %v7610_v42 = vadd.f32 %v7578_v4, %v7367_v16  ;;  %v7265_v17 = vadd.f32 %v7233_v26, %v7194_v49  ;;  %v13916_v29 = vpop.f32.mrf.mxu0 }
 0x80e   : > { %v13887_v40 = vld [vmem:[#allocation5 + $0x50] sm:$0xff]  ;;  %v6265_v28 = vpop.f32.mrf.mxu1  ;;  %v7304_v13 = vmul.f32 %v13616_v3, %v13881_v0  ;;  %v7508_v9 = vadd.f32 %v7476_v7, %v7437_v25  ;;  %v7234_v16 = vmul.f32 %v13606_v53, %v13831_v43 }
 0x80f   : > { %v7547_v27 = vmul.f32 %v13657_v33, %v13887_v40  ;;  %v7030_v52 = vadd.f32 %v6998_v11, %v6453_v32  ;;  %v6379_v12 = vadd.f32 %v15807_v8, %v6265_v28  ;;  %6857 = vmatmul.f32.gmra.mxu3 %v6666_v58  ;;  %v7821_v50 = vadd.f32 %v7789_v63, %v7750_v5  ;;  %v13922_v63 = vpop.permute.xlu1 %8677  ;;  %v15808_v28 = vld [vmem:[#allocation51_spill] sm:$0xff] }
 0x810   : > { %v7195_v58 = vmul.f32 %v13601_v36, %v13746_v1  ;;  %v7336_v26 = vadd.f32 %v7304_v13, %v7265_v17  ;;  %v7751_v11 = vadd.f32 %v7719_v41, %v7680_v44  ;;  %v15810_v41 = vld [vmem:[#allocation183_spill] sm:$0xff]  ;;  %v8679_v17 = vunpack.i.l.bf16 %v13922_v63 }
 0x811   : > { %v7066_v19 = vadd.f32 %v13543_v31, %v7030_v52  ;;  %6312 = vmatmul.f32.gmra.mxu1 %v6121_v21  ;;  %v7885_v32 = vadd.f32 %v7821_v50, %v7610_v42  ;;  %v6454_v5 = vadd.f32 %v6379_v12, %v5909_v24  ;;  %v7579_v15 = vadd.f32 %v7547_v27, %v7508_v9  ;;  %v15809_v27 = vld [vmem:[#allocation15_spill] sm:$0xff] }
 0x812   : > { %v6810_v49 = vpop.f32.mrf.mxu3  ;;  %v13918_v7 = vld [vmem:[#allocation5 + $0x51] sm:$0xff]  ;;  %v8674_v24 = vunpack.i.l.bf16 %v13909_v46  ;;  %v5840_v8 = vadd.f32 %v15810_v41, %v15809_v27  ;;  %v7266_v50 = vadd.f32 %v7234_v16, %v7195_v58  ;;  %v7438_v41 = vmul.f32 %v13638_v57, %v13764_v6 }
 0x813   : > { %v13920_v4 = vld [vmem:[#allocation5 + $0x57] sm:$0xff]  ;;  %v7098_v21 = vmax.f32 %v7066_v19, 0.0  ;;  %v6924_v25 = vadd.f32 %v15808_v28, %v6810_v49  ;;  %v7925_v1 = vsel %vm342_vm10, %v7885_v32, 0.0  ;;  %v7790_v52 = vmul.f32 %v13691_v62, %v13918_v7 }
 0x814   : > { %7926 = vadd.xlane.f32.xlu2 %v7925_v1  ;;  %v7305_v13 = vmul.f32 %v13616_v3, %v13920_v4  ;;  %v8752_v44 = vld [vmem:[#allocation4 + $0xe1] sm:$0xff]  ;;  %v7477_v49 = vmul.f32 %v13643_v37, %v13852_v56 }
 0x815   : > { %7130 = vst.msk [vmem:[#allocation5 + $0x60] sm:$0xff] %vm342_vm10, %v7098_v21  ;;  %v7031_v12 = vadd.f32 %v6924_v25, %v6454_v5  ;;  %v7822_v42 = vadd.f32 %v7790_v52, %v7751_v11  ;;  %v6667_v19 = vsel %vm349_vm1, %v8752_v44, %v8665_v34  ;;  %v13937_v32 = vld [vmem:[#allocation5 + $0x58] sm:$0xff]  ;;  %v7611_v21 = vadd.f32 %v7579_v15, %v7336_v26  ;;  %v15811_v5 = vld [vmem:[#allocation85_spill] sm:$0xff]  ;;  %v5966_v16 = vld [vmem:[#allocation4 + $0x120] sm:$0xff]  ;;  %v13945_v52 = vpop.f32.mrf.mxu2 }
 0x816   : > { %v6268_v9 = vpop.f32.mrf.mxu1  ;;  %v7337_v58 = vadd.f32 %v7305_v13, %v7266_v50  ;;  %v15813_v25 = vld [vmem:[#allocation162_spill] sm:$0xff]  ;;  %8388 = vmatmul.msk.f32.gmra.mxu2 %vm349_vm1, %v5966_v16  ;;  %v15814_v44 = vld [vmem:[#allocation28_spill] sm:$0xff]  ;;  %v13966_v16 = vpop.f32.mrf.mxu0 }
 0x817   : > { %v7067_v28 = vadd.f32 %v13543_v31, %v7031_v12  ;;  %6860 = vmatmul.f32.gmra.mxu3 %v6667_v19  ;;  %v7854_v11 = vmul.f32 %v15811_v5, %v7822_v42  ;;  %v5837_v1 = vadd.f32 %v15813_v25, %v15812_v59  ;;  %v8753_v27 = vld [vmem:[#allocation4 + $0xe0] sm:$0xff]  ;;  %v7720_v12 = vmul.f32 %v13651_v47, %v13879_v38  ;;  %v8754_v5 = vld [vmem:[#allocation4 + $0xe9] sm:$0xff] }
 0x818   : > { %v6122_v34 = vsel %vm349_vm1, %v8753_v27, %v8674_v24  ;;  %v6382_v15 = vadd.f32 %v13733_v48, %v6268_v9  ;;  %v7548_v42 = vmul.f32 %v13657_v33, %v13937_v32  ;;  %v6510_v50 = vld [vmem:[#allocation4 + $0x119] sm:$0xff]  ;;  %v5911_v19 = vmul.f32 %v15814_v44, %v5840_v8  ;;  %v8755_v59 = vld [vmem:[#allocation4 + $0xe8] sm:$0xff] }
 0x819   : > { %v7099_v26 = vmax.f32 %v7067_v28, 0.0  ;;  %6315 = vmatmul.f32.gmra.mxu1 %v6122_v34  ;;  %v7886_v13 = vadd.f32 %v7854_v11, %v7611_v21  ;;  %v6668_v6 = vsel %vm349_vm1, %v8754_v5, %v8670_v45  ;;  %v6123_v25 = vsel %vm349_vm1, %v8755_v59, %v8679_v17  ;;  %8443 = vmatmul.msk.f32.gmra.mxu0 %vm349_vm1, %v6510_v50  ;;  %v15815_v21 = vld [vmem:[#allocation24_spill] sm:$0xff] }
 0x81a   : > { %v6813_v24 = vpop.f32.mrf.mxu3  ;;  %v7681_v28 = vmul.f32 %v13673_v55, %v13793_v39  ;;  %v7369_v8 = vmul.f32 %v15815_v21, %v7337_v58  ;;  %v7509_v11 = vadd.f32 %v7477_v49, %v7438_v41  ;;  %v7196_v39 = vmul.f32 %v13601_v36, %v13795_v20  ;;  %v15816_v41 = vld [vmem:[#allocation87_spill] sm:$0xff] }
 0x81b   : > { %7131 = vst.msk [vmem:[#allocation5 + $0x68] sm:$0xff] %vm342_vm10, %v7099_v26  ;;  %v6927_v48 = vadd.f32 %v13755_v23, %v6813_v24  ;;  %v7928_v9 = vsel %vm342_vm10, %v7886_v13, 0.0  ;;  %v7235_v34 = vmul.f32 %v13606_v53, %v13881_v0  ;;  %v7478_v58 = vmul.f32 %v13643_v37, %v13887_v40 }
 0x81c   : > { %7929 = vadd.xlane.f32.xlu0 %v7928_v9  ;;  %v13968_v45 = vld [vmem:[#allocation5 + $0x59] sm:$0xff]  ;;  %v7752_v17 = vadd.f32 %v7720_v12, %v7681_v28  ;;  %v6455_v49 = vadd.f32 %v6382_v15, %v5837_v1  ;;  %v7580_v13 = vadd.f32 %v7548_v42, %v7509_v11  ;;  %v7439_v20 = vmul.f32 %v13638_v57, %v13801_v35  ;;  %v13995_v35 = vpop.permute.xlu2 %8682 }
 0x81d   : > { %v13970_v27 = vld [vmem:[#allocation5 + $0x5f] sm:$0xff]  ;;  %v7000_v26 = vmul.f32 %v15816_v41, %v6927_v48  ;;  %v7791_v12 = vmul.f32 %v13691_v62, %v13968_v45  ;;  %v7721_v59 = vmul.f32 %v13651_v47, %v13918_v7  ;;  %v8675_v48 = vunpack.i.h.bf16 %v13909_v46 }
 0x81e   : > { %v13976_v23 = vld [vmem:[#allocation5 + $0x60] sm:$0xff]  ;;  %v6271_v50 = vpop.f32.mrf.mxu1  ;;  %v7306_v24 = vmul.f32 %v13616_v3, %v13970_v27  ;;  %v7612_v42 = vadd.f32 %v7580_v13, %v7369_v8  ;;  %v7267_v9 = vadd.f32 %v7235_v34, %v7196_v39  ;;  %v7510_v21 = vadd.f32 %v7478_v58, %v7439_v20 }
 0x81f   : > { %v7549_v5 = vmul.f32 %v13657_v33, %v13976_v23  ;;  %v7032_v1 = vadd.f32 %v7000_v26, %v6455_v49  ;;  %v6385_v15 = vadd.f32 %v13781_v60, %v6271_v50  ;;  %6863 = vmatmul.f32.gmra.mxu3 %v6668_v6  ;;  %v7823_v28 = vadd.f32 %v7791_v12, %v7752_v17  ;;  %v14002_v6 = vpop.f32.mrf.mxu2 }
 0x820   : > { %v7682_v11 = vmul.f32 %v13673_v55, %v13829_v2  ;;  %v7197_v49 = vmul.f32 %v13601_v36, %v13831_v43  ;;  %v7236_v60 = vmul.f32 %v13606_v53, %v13920_v4  ;;  %v7338_v17 = vadd.f32 %v7306_v24, %v7267_v9 }
 0x821   : > { %v7068_v44 = vadd.f32 %v13543_v31, %v7032_v1  ;;  %6318 = vmatmul.f32.gmra.mxu1 %v6123_v25  ;;  %v7887_v41 = vadd.f32 %v7823_v28, %v7612_v42  ;;  %v6456_v46 = vadd.f32 %v6385_v15, %v5911_v19  ;;  %v7581_v39 = vadd.f32 %v7549_v5, %v7510_v21  ;;  %v15817_v5 = vld [vmem:[#allocation200_spill] sm:$0xff]  ;;  %v8756_v15 = vld [vmem:[#allocation4 + $0xf1] sm:$0xff] }
 0x822   : > { %v6816_v8 = vpop.f32.mrf.mxu3  ;;  %v14004_v34 = vld [vmem:[#allocation5 + $0x61] sm:$0xff]  ;;  %v7753_v2 = vadd.f32 %v7721_v59, %v7682_v11  ;;  %v8684_v12 = vunpack.i.l.bf16 %v13995_v35  ;;  %v7268_v20 = vadd.f32 %v7236_v60, %v7197_v49  ;;  %v6669_v42 = vsel %vm349_vm1, %v8756_v15, %v8675_v48 }
 0x823   : > { %v14006_v58 = vld [vmem:[#allocation5 + $0x67] sm:$0xff]  ;;  %v7100_v26 = vmax.f32 %v7068_v44, 0.0  ;;  %v6930_v25 = vadd.f32 %v13808_v61, %v6816_v8  ;;  %v7931_v13 = vsel %vm342_vm10, %v7887_v41, 0.0  ;;  %v7792_v43 = vmul.f32 %v13691_v62, %v14004_v34  ;;  %v14019_v41 = vpop.f32.mrf.mxu0 }
 0x824   : > { %7932 = vadd.xlane.f32.xlu1 %v7931_v13  ;;  %v7307_v19 = vmul.f32 %v13616_v3, %v14006_v58  ;;  %v15818_v44 = vld [vmem:[#allocation166_spill] sm:$0xff]  ;;  %v8680_v61 = vunpack.i.h.bf16 %v13922_v63  ;;  %v7479_v9 = vmul.f32 %v13643_v37, %v13937_v32  ;;  %v7613_v11 = vadd.f32 %v7581_v39, %v7338_v17 }
 0x825   : > { %7132 = vst.msk [vmem:[#allocation5 + $0x70] sm:$0xff] %vm342_vm10, %v7100_v26  ;;  %v7033_v50 = vadd.f32 %v6930_v25, %v6456_v46  ;;  %v7824_v24 = vadd.f32 %v7792_v43, %v7753_v2  ;;  %v5846_v59 = vadd.f32 %v15818_v44, %v15817_v5  ;;  %v14022_v28 = vld [vmem:[#allocation5 + $0x68] sm:$0xff]  ;;  %v8757_v2 = vld [vmem:[#allocation4 + $0xf0] sm:$0xff]  ;;  %v7440_v48 = vmul.f32 %v13638_v57, %v13852_v56 }
 0x826   : > { %v6274_v1 = vpop.f32.mrf.mxu1  ;;  %v7339_v60 = vadd.f32 %v7307_v19, %v7268_v20  ;;  %v15819_v46 = vld [vmem:[#allocation170_spill] sm:$0xff]  ;;  %v6124_v26 = vsel %vm349_vm1, %v8757_v2, %v8684_v12  ;;  %v7722_v25 = vmul.f32 %v13651_v47, %v13968_v45  ;;  %v7683_v56 = vmul.f32 %v13673_v55, %v13879_v38 }
 0x827   : > { %v7069_v21 = vadd.f32 %v13543_v31, %v7033_v50  ;;  %6866 = vmatmul.f32.gmra.mxu3 %v6669_v42  ;;  %v7856_v49 = vmul.f32 %v15798_v22, %v7824_v24  ;;  %v15820_v63 = vld [vmem:[#allocation158_spill] sm:$0xff]  ;;  %v6388_v43 = vadd.f32 %v13839_v10, %v6274_v1  ;;  %v7550_v22 = vmul.f32 %v13657_v33, %v14022_v28  ;;  %v14047_v15 = vpop.f32.mrf.mxu2 }
 0x828   : > { %v5843_v8 = vadd.f32 %v15820_v63, %v15819_v46  ;;  %v15821_v39 = vld [vmem:[#allocation30_spill] sm:$0xff]  ;;  %v8685_v50 = vunpack.i.h.bf16 %v13995_v35  ;;  %v7371_v44 = vmul.f32 %v15797_v51, %v7339_v60  ;;  %v7511_v1 = vadd.f32 %v7479_v9, %v7440_v48  ;;  %v6060_v9 = vpop.permute.xlu0 %6059 }
 0x829   : > { %v7101_v13 = vmax.f32 %v7069_v21, 0.0  ;;  %6321 = vmatmul.f32.gmra.mxu1 %v6124_v26  ;;  %v7888_v17 = vadd.f32 %v7856_v49, %v7613_v11  ;;  %v5913_v19 = vmul.f32 %v15821_v39, %v5846_v59  ;;  %v8758_v12 = vld [vmem:[#allocation4 + $0xf9] sm:$0xff]  ;;  %v7754_v42 = vadd.f32 %v7722_v25, %v7683_v56  ;;  %v15822_v49 = vld [vmem:[#allocation83_spill] sm:$0xff] }
 0x82a   : > { %v6819_v24 = vpop.f32.mrf.mxu3  ;;  %v6670_v20 = vsel %vm349_vm1, %v8758_v12, %v8680_v61  ;;  %v7198_v38 = vmul.f32 %v13601_v36, %v13881_v0  ;;  %v7237_v61 = vmul.f32 %v13606_v53, %v13970_v27  ;;  %v7480_v51 = vmul.f32 %v13643_v37, %v13976_v23  ;;  %v8762_v35 = vld [vmem:[#allocation4 + $0x100] sm:$0xff] }
 0x82b   : > { %7133 = vst.msk [vmem:[#allocation5 + $0x78] sm:$0xff] %vm342_vm10, %v7101_v13  ;;  %v6933_v10 = vadd.f32 %v13860_v14, %v6819_v24  ;;  %v7934_v5 = vsel %vm342_vm10, %v7888_v17, 0.0  ;;  %v6457_v11 = vadd.f32 %v6388_v43, %v5843_v8  ;;  %v7582_v46 = vadd.f32 %v7550_v22, %v7511_v1  ;;  %v14073_v22 = vpop.f32.mrf.mxu0  ;;  %v8759_v24 = vld [vmem:[#allocation4 + $0xf8] sm:$0xff] }
 0x82c   : > { %7935 = vadd.xlane.f32.xlu2 %v7934_v5  ;;  %v14049_v59 = vld [vmem:[#allocation5 + $0x69] sm:$0xff]  ;;  %v7441_v26 = vmul.f32 %v13638_v57, %v13887_v40  ;;  %v7723_v25 = vmul.f32 %v13651_v47, %v14004_v34  ;;  %v6125_v12 = vsel %vm349_vm1, %v8759_v24, %v6060_v9  ;;  %v7269_v56 = vadd.f32 %v7237_v61, %v7198_v38 }
 0x82d   : > { %v14051_v21 = vld [vmem:[#allocation5 + $0x6f] sm:$0xff]  ;;  %v7002_v60 = vmul.f32 %v15822_v49, %v6933_v10  ;;  %v7793_v63 = vmul.f32 %v13691_v62, %v14049_v59  ;;  %v7614_v43 = vadd.f32 %v7582_v46, %v7371_v44  ;;  %v7684_v40 = vmul.f32 %v13673_v55, %v13918_v7  ;;  %v6062_v46 = vpop.permute.xlu1 %6061 }
 0x82e   : > { %v14057_v14 = vld [vmem:[#allocation5 + $0x70] sm:$0xff]  ;;  %v6277_v2 = vpop.f32.mrf.mxu1  ;;  %v7308_v0 = vmul.f32 %v13616_v3, %v14051_v21  ;;  %v7512_v10 = vadd.f32 %v7480_v51, %v7441_v26 }
 0x82f   : > { %v7551_v48 = vmul.f32 %v13657_v33, %v14057_v14  ;;  %v7034_v8 = vadd.f32 %v7002_v60, %v6457_v11  ;;  %v6391_v13 = vadd.f32 %v13894_v18, %v6277_v2  ;;  %6869 = vmatmul.f32.gmra.mxu3 %v6670_v20  ;;  %v7825_v17 = vadd.f32 %v7793_v63, %v7754_v42  ;;  %v14094_v26 = vpop.f32.mrf.mxu2 }
 0x830   : > { %v7199_v18 = vmul.f32 %v13601_v36, %v13920_v4  ;;  %v7238_v20 = vmul.f32 %v13606_v53, %v14006_v58  ;;  %v7340_v11 = vadd.f32 %v7308_v0, %v7269_v56  ;;  %v7755_v38 = vadd.f32 %v7723_v25, %v7684_v40  ;;  %v8760_v25 = vld [vmem:[#allocation4 + $0x101] sm:$0xff] }
 0x831   : > { %v7070_v5 = vadd.f32 %v13543_v31, %v7034_v8  ;;  %6324 = vmatmul.f32.gmra.mxu1 %v6125_v12  ;;  %v7889_v1 = vadd.f32 %v7825_v17, %v7614_v43  ;;  %v6458_v44 = vadd.f32 %v6391_v13, %v5913_v19  ;;  %v7583_v60 = vadd.f32 %v7551_v48, %v7512_v10  ;;  %v14106_v43 = vld [vmem:[%s14980_s6] ss:$0 sm:$0xff] }
 0x832   : > { %v6822_v42 = vpop.f32.mrf.mxu3  ;;  %v14083_v9 = vld [vmem:[#allocation5 + $0x71] sm:$0xff]  ;;  %v7270_v0 = vadd.f32 %v7238_v20, %v7199_v18  ;;  %v7481_v13 = vmul.f32 %v13643_v37, %v14022_v28  ;;  %v7442_v10 = vmul.f32 %v13638_v57, %v13937_v32  ;;  %v7724_v40 = vmul.f32 %v13651_v47, %v14049_v59 }
 0x833   : > { %v14085_v61 = vld [vmem:[#allocation5 + $0x77] sm:$0xff]  ;;  %v7102_v7 = vmax.f32 %v7070_v5, 0.0  ;;  %v6936_v31 = vadd.f32 %v13916_v29, %v6822_v42  ;;  %v7937_v51 = vsel %vm342_vm10, %v7889_v1, 0.0  ;;  %v7794_v4 = vmul.f32 %v13691_v62, %v14083_v9 }
 0x834   : > { %7938 = vadd.xlane.f32.xlu0 %v7937_v51  ;;  %v7309_v19 = vmul.f32 %v13616_v3, %v14085_v61  ;;  %v6671_v29 = vsel %vm349_vm1, %v8760_v25, %v8685_v50  ;;  %v14099_v8 = vld [vmem:[#allocation5 + $0x78] sm:$0xff]  ;;  %v7615_v24 = vadd.f32 %v7583_v60, %v7340_v11  ;;  %v6126_v50 = vsel %vm349_vm1, %v8762_v35, %v6062_v46  ;;  %v15826_v60 = vld [vmem:[#allocation25_spill] sm:$0xff] }
 0x835   : > { %7134 = vst.msk [vmem:[#allocation5 + $0x80] sm:$0xff] %vm342_vm10, %v7102_v7  ;;  %v7035_v63 = vadd.f32 %v6936_v31, %v6458_v44  ;;  %v7826_v2 = vadd.f32 %v7794_v4, %v7755_v38  ;;  %v7552_v20 = vmul.f32 %v13657_v33, %v14099_v8  ;;  %v15823_v44 = vld [vmem:[#allocation16_spill] sm:$0xff]  ;;  %v14122_v7 = vpop.f32.mrf.mxu0  ;;  %v7685_v31 = vmul.f32 %v13673_v55, %v13968_v45  ;;  %v6511_v4 = vld [vmem:[#allocation4 + $0x121] sm:$0xff] }
 0x836   : > { %v6280_v48 = vpop.f32.mrf.mxu1  ;;  %v7341_v56 = vadd.f32 %v7309_v19, %v7270_v0  ;;  %v15825_v11 = vld [vmem:[#allocation176_spill] sm:$0xff]  ;;  %v7513_v46 = vadd.f32 %v7481_v13, %v7442_v10  ;;  %v7239_v45 = vmul.f32 %v13606_v53, %v14051_v21 }
 0x837   : > { %v7071_v17 = vadd.f32 %v14106_v43, %v7035_v63  ;;  %6872 = vmatmul.f32.gmra.mxu3 %v6671_v29  ;;  %v7858_v12 = vmul.f32 %v15806_v54, %v7826_v2  ;;  %v6394_v1 = vadd.f32 %v13945_v52, %v6280_v48  ;;  %v15824_v54 = vld [vmem:[#allocation197_spill] sm:$0xff]  ;;  %v5852_v38 = vadd.f32 %v15826_v60, %v15825_v11 }
 0x838   : > { %v5849_v42 = vadd.f32 %v15824_v54, %v15823_v44  ;;  %v7373_v19 = vmul.f32 %v15803_v30, %v7341_v56  ;;  %v7756_v2 = vadd.f32 %v7724_v40, %v7685_v31  ;;  %v7200_v48 = vmul.f32 %v13601_v36, %v13970_v27  ;;  %v15827_v30 = vld [vmem:[#allocation89_spill] sm:$0xff]  ;;  %v15828_v40 = vld [vmem:[#allocation23_spill] sm:$0xff] }
 0x839   : > { %v7103_v5 = vmax.f32 %v7071_v17, 0.0  ;;  %6327 = vmatmul.f32.gmra.mxu1 %v6126_v50  ;;  %v7890_v18 = vadd.f32 %v7858_v12, %v7615_v24  ;;  %v7584_v17 = vadd.f32 %v7552_v20, %v7513_v46  ;;  %v7443_v36 = vmul.f32 %v13638_v57, %v13976_v23  ;;  %v14171_v20 = vld [vmem:[%s14981_s7 + $0x3] ss:$0 sm:$0xff] }
 0x83a   : > { %v6825_v32 = vpop.f32.mrf.mxu3  ;;  %v6459_v29 = vadd.f32 %v6394_v1, %v5849_v42  ;;  %v14156_v1 = vpop.f32.mrf.mxu2  ;;  %v7686_v57 = vmul.f32 %v13673_v55, %v14004_v34  ;;  %v7240_v44 = vmul.f32 %v14171_v20, %v14085_v61 }
 0x83b   : > { %7135 = vst.msk [vmem:[#allocation5 + $0x88] sm:$0xff] %vm342_vm10, %v7103_v5  ;;  %v6939_v52 = vadd.f32 %v13966_v16, %v6825_v32  ;;  %v7940_v51 = vsel %vm342_vm10, %v7890_v18, 0.0  ;;  %v7482_v16 = vmul.f32 %v13643_v37, %v14057_v14  ;;  %v7725_v37 = vmul.f32 %v13651_v47, %v14083_v9  ;;  %v14164_v47 = vld [vmem:[%s14981_s7] ss:$0 sm:$0xff] }
 0x83c   : > { %7941 = vadd.xlane.f32.xlu1 %v7940_v51  ;;  %v14130_v63 = vld [vmem:[#allocation5 + $0x79] sm:$0xff]  ;;  %v7616_v50 = vadd.f32 %v7584_v17, %v7373_v19  ;;  %v5915_v5 = vmul.f32 %v15828_v40, %v5852_v38  ;;  %v15829_v17 = vld [vmem:[#allocation87_spill] sm:$0xff] }
 0x83d   : > { %v14132_v0 = vld [vmem:[#allocation5 + $0x7f] sm:$0xff]  ;;  %v7004_v13 = vmul.f32 %v15827_v30, %v6939_v52  ;;  %v7795_v24 = vmul.f32 %v13691_v62, %v14130_v63  ;;  %v7514_v18 = vadd.f32 %v7482_v16, %v7443_v36  ;;  %v7757_v60 = vadd.f32 %v7725_v37, %v7686_v57  ;;  %v14183_v51 = vpop.f32.mrf.mxu0  ;;  %v15832_v57 = vld [vmem:[#allocation179_spill] sm:$0xff] }
 0x83e   : > { %v14138_v25 = vld [vmem:[#allocation5 + $0x80] sm:$0xff]  ;;  %v6283_v12 = vpop.f32.mrf.mxu1  ;;  %v7310_v56 = vmul.f32 %v13616_v3, %v14132_v0  ;;  %v7271_v3 = vadd.f32 %v7239_v45, %v7200_v48 }
 0x83f   : > { %v7553_v53 = vmul.f32 %v13657_v33, %v14138_v25  ;;  %v7036_v27 = vadd.f32 %v7004_v13, %v6459_v29  ;;  %v6397_v35 = vadd.f32 %v14002_v6, %v6283_v12  ;;  %8444 = vmatmul.msk.f32.vlgmr.msrb.gmra.mxu3 %vm349_vm1, %v6511_v4  ;;  %v7827_v10 = vadd.f32 %v7795_v24, %v7756_v2  ;;  %v14188_v4 = vld [vmem:[%s14981_s7 + $0x6] ss:$0 sm:$0xff] }
 0x840   : > { %v7201_v6 = vmul.f32 %v14164_v47, %v14006_v58  ;;  %v7342_v54 = vadd.f32 %v7310_v56, %v7271_v3  ;;  %v14207_v56 = vld [vmem:[%s14981_s7 + $0x1] ss:$0 sm:$0xff] }
 0x841   : > { %v7072_v33 = vadd.f32 %v14106_v43, %v7036_v27  ;;  %v7891_v23 = vadd.f32 %v7827_v10, %v7616_v50  ;;  %v6460_v55 = vadd.f32 %v6397_v35, %v5915_v5  ;;  %v7585_v42 = vadd.f32 %v7553_v53, %v7514_v18  ;;  %v14214_v53 = vld [vmem:[%s14981_s7 + $0x5] ss:$0 sm:$0xff]  ;;  %v14222_v10 = vld [vmem:[%s14981_s7 + $0x7] ss:$0 sm:$0xff] }
 0x842   : > { %v6828_v34 = vpop.f32.mrf.mxu3  ;;  %v14175_v11 = vld [vmem:[#allocation5 + $0x81] sm:$0xff]  ;;  %v7272_v2 = vadd.f32 %v7240_v44, %v7201_v6  ;;  %v7444_v36 = vmul.f32 %v14207_v56, %v14022_v28  ;;  %v7726_v37 = vmul.f32 %v14214_v53, %v14130_v63  ;;  %v15830_v5 = vld [vmem:[#allocation203_spill] sm:$0xff]  ;;  %v14230_v6 = vpop.f32.mrf.mxu2 }
 0x843   : > { %v14177_v38 = vld [vmem:[#allocation5 + $0x87] sm:$0xff]  ;;  %v7104_v32 = vmax.f32 %v7072_v33, 0.0  ;;  %v6942_v58 = vadd.f32 %v14019_v41, %v6828_v34  ;;  %v7943_v31 = vsel %vm342_vm10, %v7891_v23, 0.0  ;;  %v7796_v52 = vmul.f32 %v13691_v62, %v14175_v11  ;;  %v14198_v62 = vld [vmem:[%s14981_s7 + $0x4] ss:$0 sm:$0xff] }
 0x844   : > { %7944 = vadd.xlane.f32.xlu2 %v7943_v31  ;;  %v7311_v19 = vmul.f32 %v14188_v4, %v14177_v38  ;;  %v14193_v45 = vld [vmem:[#allocation5 + $0x88] sm:$0xff]  ;;  %v7483_v16 = vmul.f32 %v14198_v62, %v14099_v8  ;;  %v7617_v13 = vadd.f32 %v7585_v42, %v7342_v54  ;;  %v15831_v3 = vld [vmem:[#allocation175_spill] sm:$0xff]  ;;  %v15834_v42 = vld [vmem:[#allocation28_spill] sm:$0xff] }
 0x845   : > { %7136 = vst.msk [vmem:[#allocation5 + $0x90] sm:$0xff] %vm342_vm10, %v7104_v32  ;;  %v7037_v46 = vadd.f32 %v6942_v58, %v6460_v55  ;;  %v7828_v41 = vadd.f32 %v7796_v52, %v7757_v60  ;;  %v7554_v28 = vmul.f32 %v14222_v10, %v14193_v45  ;;  %v5855_v18 = vadd.f32 %v15831_v3, %v15830_v5  ;;  %v15833_v33 = vld [vmem:[#allocation186_spill] sm:$0xff]  ;;  %v15836_v5 = vld [vmem:[#allocation37_spill] sm:$0xff] }
 0x846   : > { %v6286_v48 = vpop.f32.mrf.mxu1  ;;  %v7343_v12 = vadd.f32 %v7311_v19, %v7272_v2  ;;  %v5858_v23 = vadd.f32 %v15833_v33, %v15832_v57  ;;  %v7515_v32 = vadd.f32 %v7483_v16, %v7444_v36  ;;  %v7202_v19 = vmul.f32 %v14164_v47, %v14051_v21  ;;  %v15835_v2 = vld [vmem:[#allocation163_spill] sm:$0xff] }
 0x847   : > { %v7073_v29 = vadd.f32 %v14106_v43, %v7037_v46  ;;  %v7860_v24 = vmul.f32 %v15829_v17, %v7828_v41  ;;  %v6400_v35 = vadd.f32 %v14047_v15, %v6286_v48  ;;  %v14235_v15 = vld [vmem:[%s14981_s7 + $0x2] ss:$0 sm:$0xff] }
 0x848   : > { %v7687_v55 = vmul.f32 %v14235_v15, %v14049_v59  ;;  %v7375_v60 = vmul.f32 %v15834_v42, %v7343_v12  ;;  %v7241_v59 = vmul.f32 %v14171_v20, %v14132_v0  ;;  %v7586_v16 = vadd.f32 %v7554_v28, %v7515_v32 }
 0x849   : > { %v7105_v27 = vmax.f32 %v7073_v29, 0.0  ;;  %v7892_v50 = vadd.f32 %v7860_v24, %v7617_v13  ;;  %v6461_v41 = vadd.f32 %v6400_v35, %v5855_v18  ;;  %v14259_v29 = vld [vmem:[%s14981_s7 + $0x8] ss:$0 sm:$0xff]  ;;  %v14263_v13 = vpop.f32.mrf.mxu0  ;;  %v7445_v12 = vmul.f32 %v14207_v56, %v14057_v14 }
 0x84a   : > { %v6831_v44 = vpop.f32.mrf.mxu3  ;;  %v7758_v31 = vadd.f32 %v7726_v37, %v7687_v55  ;;  %v7727_v37 = vmul.f32 %v14214_v53, %v14175_v11  ;;  %v5917_v3 = vmul.f32 %v15836_v5, %v5858_v23  ;;  %v7273_v18 = vadd.f32 %v7241_v59, %v7202_v19 }
 0x84b   : > { %7137 = vst.msk [vmem:[#allocation5 + $0x98] sm:$0xff] %vm342_vm10, %v7105_v27  ;;  %v6945_v34 = vadd.f32 %v14073_v22, %v6831_v44  ;;  %v7946_v54 = vsel %vm342_vm10, %v7892_v50, 0.0  ;;  %v7484_v22 = vmul.f32 %v14198_v62, %v14138_v25  ;;  %v7618_v50 = vadd.f32 %v7586_v16, %v7375_v60 }
 0x84c   : > { %7947 = vadd.xlane.f32.xlu0 %v7946_v54  ;;  %v14243_v58 = vld [vmem:[#allocation5 + $0x89] sm:$0xff]  ;;  %v7688_v33 = vmul.f32 %v14235_v15, %v14083_v9  ;;  %v7203_v55 = vmul.f32 %v14164_v47, %v14085_v61 }
 0x84d   : > { %v14245_v52 = vld [vmem:[#allocation5 + $0x8f] sm:$0xff]  ;;  %v7006_v48 = vmul.f32 %v15835_v2, %v6945_v34  ;;  %v7797_v21 = vmul.f32 %v14259_v29, %v14243_v58  ;;  %v7516_v57 = vadd.f32 %v7484_v22, %v7445_v12  ;;  %v7242_v34 = vmul.f32 %v14171_v20, %v14177_v38  ;;  %v14290_v22 = vpop.f32.mrf.mxu2 }
 0x84e   : > { %v14251_v46 = vld [vmem:[#allocation5 + $0x90] sm:$0xff]  ;;  %v6289_v17 = vpop.f32.mrf.mxu1  ;;  %v7312_v24 = vmul.f32 %v14188_v4, %v14245_v52  ;;  %v7759_v23 = vadd.f32 %v7727_v37, %v7688_v33 }
 0x84f   : > { %v7555_v36 = vmul.f32 %v14222_v10, %v14251_v46  ;;  %v7038_v27 = vadd.f32 %v7006_v48, %v6461_v41  ;;  %v6403_v35 = vadd.f32 %v14094_v26, %v6289_v17  ;;  %v7829_v28 = vadd.f32 %v7797_v21, %v7758_v31 }
 0x850   : > { %v7344_v42 = vadd.f32 %v7312_v24, %v7273_v18  ;;  %v7274_v21 = vadd.f32 %v7242_v34, %v7203_v55  ;;  %v15840_v34 = vld [vmem:[#allocation173_spill] sm:$0xff] }
 0x851   : > { %v7074_v14 = vadd.f32 %v14106_v43, %v7038_v27  ;;  %v7893_v44 = vadd.f32 %v7829_v28, %v7618_v50  ;;  %v6462_v54 = vadd.f32 %v6403_v35, %v5917_v3  ;;  %v7587_v60 = vadd.f32 %v7555_v36, %v7516_v57  ;;  %v14301_v35 = vpop.f32.mrf.mxu0 }
 0x852   : > { %v6834_v26 = vpop.f32.mrf.mxu3  ;;  %v14282_v32 = vld [vmem:[#allocation5 + $0x91] sm:$0xff]  ;;  %v7446_v50 = vmul.f32 %v14207_v56, %v14099_v8  ;;  %v7728_v28 = vmul.f32 %v14214_v53, %v14243_v58  ;;  %v7689_v8 = vmul.f32 %v14235_v15, %v14130_v63  ;;  %v7243_v63 = vmul.f32 %v14171_v20, %v14245_v52 }
 0x853   : > { %v14284_v31 = vld [vmem:[#allocation5 + $0x97] sm:$0xff]  ;;  %v7106_v19 = vmax.f32 %v7074_v14, 0.0  ;;  %v6948_v9 = vadd.f32 %v14122_v7, %v6834_v26  ;;  %v7949_v59 = vsel %vm342_vm10, %v7893_v44, 0.0  ;;  %v7798_v61 = vmul.f32 %v14259_v29, %v14282_v32  ;;  %v15837_v14 = vld [vmem:[#allocation182_spill] sm:$0xff] }
 0x854   : > { %7950 = vadd.xlane.f32.xlu1 %v7949_v59  ;;  %v7313_v41 = vmul.f32 %v14188_v4, %v14284_v31  ;;  %v14295_v24 = vld [vmem:[#allocation5 + $0x98] sm:$0xff]  ;;  %v7485_v7 = vmul.f32 %v14198_v62, %v14193_v45  ;;  %v7619_v36 = vadd.f32 %v7587_v60, %v7344_v42 }
 0x855   : > { %7138 = vst.msk [vmem:[#allocation5 + $0xa0] sm:$0xff] %vm342_vm10, %v7106_v19  ;;  %v7039_v48 = vadd.f32 %v6948_v9, %v6462_v54  ;;  %v7830_v16 = vadd.f32 %v7798_v61, %v7759_v23  ;;  %v7556_v33 = vmul.f32 %v14222_v10, %v14295_v24  ;;  %v15838_v44 = vld [vmem:[#allocation167_spill] sm:$0xff]  ;;  %v7760_v9 = vadd.f32 %v7728_v28, %v7689_v8 }
 0x856   : > { %v6292_v17 = vpop.f32.mrf.mxu1  ;;  %v7345_v27 = vadd.f32 %v7313_v41, %v7274_v21  ;;  %v5861_v55 = vadd.f32 %v15838_v44, %v15837_v14  ;;  %v7517_v23 = vadd.f32 %v7485_v7, %v7446_v50  ;;  %v7204_v61 = vmul.f32 %v14164_v47, %v14132_v0  ;;  %v14335_v7 = vpop.f32.mrf.mxu2 }
 0x857   : > { %v7075_v12 = vadd.f32 %v14106_v43, %v7039_v48  ;;  %v7862_v37 = vmul.f32 %v15822_v49, %v7830_v16  ;;  %v6406_v18 = vadd.f32 %v14156_v1, %v6292_v17  ;;  %v15839_v49 = vld [vmem:[#allocation206_spill] sm:$0xff] }
 0x858   : > { %v5864_v54 = vadd.f32 %v15840_v34, %v15839_v49  ;;  %v7377_v60 = vmul.f32 %v15821_v39, %v7345_v27  ;;  %v15841_v39 = vld [vmem:[#allocation90_spill] sm:$0xff]  ;;  %v7588_v21 = vadd.f32 %v7556_v33, %v7517_v23  ;;  %v7729_v27 = vmul.f32 %v14214_v53, %v14282_v32 }
 0x859   : > { %v7107_v3 = vmax.f32 %v7075_v12, 0.0  ;;  %v7894_v57 = vadd.f32 %v7862_v37, %v7619_v36  ;;  %v6463_v48 = vadd.f32 %v6406_v18, %v5861_v55  ;;  %v7447_v36 = vmul.f32 %v14207_v56, %v14138_v25  ;;  %v14354_v8 = vpop.f32.mrf.mxu0 }
 0x85a   : > { %v6837_v26 = vpop.f32.mrf.mxu3  ;;  %v7275_v14 = vadd.f32 %v7243_v63, %v7204_v61  ;;  %v7690_v55 = vmul.f32 %v14235_v15, %v14175_v11  ;;  %v7205_v34 = vmul.f32 %v14164_v47, %v14177_v38 }
 0x85b   : > { %7139 = vst.msk [vmem:[#allocation5 + $0xa8] sm:$0xff] %vm342_vm10, %v7107_v3  ;;  %v6951_v42 = vadd.f32 %v14183_v51, %v6837_v26  ;;  %v7952_v1 = vsel %vm342_vm10, %v7894_v57, 0.0  ;;  %v7486_v51 = vmul.f32 %v14198_v62, %v14251_v46  ;;  %v7620_v3 = vadd.f32 %v7588_v21, %v7377_v60  ;;  %v15842_v57 = vld [vmem:[#allocation38_spill] sm:$0xff] }
 0x85c   : > { %7953 = vadd.xlane.f32.xlu2 %v7952_v1  ;;  %v14320_v19 = vld [vmem:[#allocation5 + $0x99] sm:$0xff]  ;;  %v5919_v33 = vmul.f32 %v15842_v57, %v5864_v54  ;;  %v7244_v26 = vmul.f32 %v14171_v20, %v14284_v31  ;;  %v7761_v23 = vadd.f32 %v7729_v27, %v7690_v55  ;;  %v7487_v27 = vmul.f32 %v14198_v62, %v14295_v24 }
 0x85d   : > { %v14322_v59 = vld [vmem:[#allocation5 + $0x9f] sm:$0xff]  ;;  %v7008_v16 = vmul.f32 %v15841_v39, %v6951_v42  ;;  %v7799_v17 = vmul.f32 %v14259_v29, %v14320_v19  ;;  %v7518_v44 = vadd.f32 %v7486_v51, %v7447_v36  ;;  %v14364_v51 = vld [vmem:[#allocation6] ss:$0 sm:$0xff]  ;;  %v7448_v55 = vmul.f32 %v14207_v56, %v14193_v45 }
 0x85e   : > { %v14328_v41 = vld [vmem:[#allocation5 + $0xa0] sm:$0xff]  ;;  %v6295_v12 = vpop.f32.mrf.mxu1  ;;  %v7314_v0 = vmul.f32 %v14188_v4, %v14322_v59  ;;  %v7691_v45 = vmul.f32 %v14235_v15, %v14243_v58  ;;  %v7206_v58 = vmul.f32 %v14164_v47, %v14245_v52  ;;  %v7449_v52 = vmul.f32 %v14207_v56, %v14251_v46 }
 0x85f   : > { %v7557_v37 = vmul.f32 %v14222_v10, %v14328_v41  ;;  %v7040_v50 = vadd.f32 %v7008_v16, %v6463_v48  ;;  %v6409_v28 = vadd.f32 %v14230_v6, %v6295_v12  ;;  %v7831_v18 = vadd.f32 %v7799_v17, %v7760_v9  ;;  %v15843_v12 = vld [vmem:[#allocation187_spill] sm:$0xff] }
 0x860   : > { %v7346_v1 = vadd.f32 %v7314_v0, %v7275_v14  ;;  %v7276_v17 = vadd.f32 %v7244_v26, %v7205_v34  ;;  %v15844_v0 = vld [vmem:[#allocation33_spill] sm:$0xff]  ;;  %v14384_v14 = vpop.f32.mrf.mxu2  ;;  %v7692_v46 = vmul.f32 %v14235_v15, %v14282_v32 }
 0x861   : > { %v7076_v25 = vadd.f32 %v14106_v43, %v7040_v50  ;;  %v7895_v49 = vadd.f32 %v7831_v18, %v7620_v3  ;;  %v6464_v6 = vadd.f32 %v6409_v28, %v5919_v33  ;;  %v7589_v54 = vadd.f32 %v7557_v37, %v7518_v44 }
 0x862   : > { %v6840_v42 = vpop.f32.mrf.mxu3  ;;  %v14356_v60 = vld [vmem:[#allocation5 + $0xa1] sm:$0xff]  ;;  %v5870_v36 = vadd.f32 %v15844_v0, %v15843_v12  ;;  %v7245_v12 = vmul.f32 %v14171_v20, %v14322_v59 }
 0x863   : > { %v14358_v9 = vld [vmem:[#allocation5 + $0xa7] sm:$0xff]  ;;  %v7108_v11 = vmax.f32 %v7076_v25, 0.0  ;;  %v6954_v61 = vadd.f32 %v14263_v13, %v6840_v42  ;;  %v7955_v38 = vsel %vm342_vm10, %v7895_v49, 0.0  ;;  %v7800_v63 = vmul.f32 %v14259_v29, %v14356_v60 }
 0x864   : > { %7956 = vadd.xlane.f32.xlu0 %v7955_v38  ;;  %v7315_v48 = vmul.f32 %v14188_v4, %v14358_v9  ;;  %v14371_v37 = vld [vmem:[#allocation5 + $0xa8] sm:$0xff]  ;;  %v7621_v3 = vadd.f32 %v7589_v54, %v7346_v1  ;;  %v7730_v25 = vmul.f32 %v14214_v53, %v14320_v19  ;;  %v15847_v54 = vld [vmem:[#allocation27_spill] sm:$0xff] }
 0x865   : > { %7140 = vst.msk [vmem:[#allocation5 + $0xb0] sm:$0xff] %vm342_vm10, %v7108_v11  ;;  %v7041_v16 = vadd.f32 %v6954_v61, %v6464_v6  ;;  %v7832_v21 = vadd.f32 %v7800_v63, %v7761_v23  ;;  %v7558_v6 = vmul.f32 %v14222_v10, %v14371_v37  ;;  %v15845_v42 = vld [vmem:[#allocation69_spill] sm:$0xff]  ;;  %v5921_v23 = vmul.f32 %v15847_v54, %v5870_v36  ;;  %v15848_v36 = vld [vmem:[#allocation103_spill] sm:$0xff] }
 0x866   : > { %v6298_v13 = vpop.f32.mrf.mxu1  ;;  %v7347_v33 = vadd.f32 %v7315_v48, %v7276_v17  ;;  %v7519_v63 = vadd.f32 %v7487_v27, %v7448_v55  ;;  %v14405_v48 = vpop.f32.mrf.mxu0 }
 0x867   : > { %v7077_v50 = vadd.f32 %v14106_v43, %v7041_v16  ;;  %v7915_v28 = vpop.xlane.xlu2 %7914  ;;  %v7864_v18 = vmul.f32 %v15827_v30, %v7832_v21  ;;  %v6412_v34 = vadd.f32 %v14290_v22, %v6298_v13  ;;  %v15846_v30 = vld [vmem:[#allocation178_spill] sm:$0xff]  ;;  %v7762_v21 = vadd.f32 %v7730_v25, %v7691_v45 }
 0x868   : > { %v8013_v44 = vadd.f32 %v14364_v51, %v7915_v28  ;;  %v5867_v1 = vadd.f32 %v15846_v30, %v15845_v42  ;;  %v7379_v38 = vmul.f32 %v15828_v40, %v7347_v33  ;;  %v7488_v40 = vmul.f32 %v14198_v62, %v14328_v41 }
 0x869   : > { %v7109_v49 = vmax.f32 %v7077_v50, 0.0  ;;  %v7896_v26 = vadd.f32 %v7864_v18, %v7621_v3  ;;  %v7590_v27 = vadd.f32 %v7558_v6, %v7519_v63  ;;  %v7731_v33 = vmul.f32 %v14214_v53, %v14356_v60 }
 0x86a   : > { %8045 = vst.msk [vmem:[%s14381_s30] sm:$0xff] %vm335_vm0, %v8013_v44  ;;  %v6843_v11 = vpop.f32.mrf.mxu3  ;;  %v6465_v0 = vadd.f32 %v6412_v34, %v5867_v1  ;;  %v7277_v6 = vadd.f32 %v7245_v12, %v7206_v58  ;;  %v7520_v42 = vadd.f32 %v7488_v40, %v7449_v52  ;;  %v7246_v45 = vmul.f32 %v14171_v20, %v14358_v9 }
 0x86b   : > { %7141 = vst.msk [vmem:[#allocation5 + $0xb8] sm:$0xff] %vm342_vm10, %v7109_v49  ;;  %v6957_v61 = vadd.f32 %v14301_v35, %v6843_v11  ;;  %v7958_v22 = vsel %vm342_vm10, %v7896_v26, 0.0  ;;  %v7622_v49 = vadd.f32 %v7590_v27, %v7379_v38  ;;  %v7207_v11 = vmul.f32 %v14164_v47, %v14284_v31 }
 0x86c   : > { %7959 = vadd.xlane.f32.xlu1 %v7958_v22  ;;  %v14407_v16 = vld [vmem:[#allocation5 + $0xa9] sm:$0xff]  ;;  %v7763_v32 = vadd.f32 %v7731_v33, %v7692_v46 }
 0x86d   : > { %v14409_v17 = vld [vmem:[#allocation5 + $0xaf] sm:$0xff]  ;;  %v7010_v13 = vmul.f32 %v15848_v36, %v6957_v61  ;;  %v7801_v50 = vmul.f32 %v14259_v29, %v14407_v16  ;;  %v7732_v46 = vmul.f32 %v14214_v53, %v14407_v16 }
 0x86e   : > { %v14415_v35 = vld [vmem:[#allocation5 + $0xb0] sm:$0xff]  ;;  %v6301_v28 = vpop.f32.mrf.mxu1  ;;  %v7316_v3 = vmul.f32 %v14188_v4, %v14409_v17 }
 0x86f   : > { %v7559_v18 = vmul.f32 %v14222_v10, %v14415_v35  ;;  %v7042_v44 = vadd.f32 %v7010_v13, %v6465_v0  ;;  %v6415_v55 = vadd.f32 %v14335_v7, %v6301_v28  ;;  %v7918_v25 = vpop.xlane.xlu0 %7917  ;;  %v7833_v34 = vadd.f32 %v7801_v50, %v7762_v21  ;;  %v14439_v7 = vpop.f32.mrf.mxu2  ;;  %v15849_v28 = vld [vmem:[#allocation190_spill] sm:$0xff] }
 0x870   : > { %v8014_v26 = vadd.f32 %v14364_v51, %v7918_v25  ;;  %v7348_v38 = vadd.f32 %v7316_v3, %v7277_v6  ;;  %v7278_v50 = vadd.f32 %v7246_v45, %v7207_v11  ;;  %v15850_v3 = vld [vmem:[#allocation22_spill] sm:$0xff] }
 0x871   : > { %v7078_v30 = vadd.f32 %v14106_v43, %v7042_v44  ;;  %v7897_v1 = vadd.f32 %v7833_v34, %v7622_v49  ;;  %v6466_v61 = vadd.f32 %v6415_v55, %v5921_v23  ;;  %v7591_v63 = vadd.f32 %v7559_v18, %v7520_v42  ;;  %v14456_v18 = vpop.f32.mrf.mxu0 }
 0x872   : > { %8046 = vst.msk [vmem:[%s14381_s30 + $0x8] sm:$0xff] %vm335_vm0, %v8014_v26  ;;  %v6846_v22 = vpop.f32.mrf.mxu3  ;;  %v14443_v21 = vld [vmem:[#allocation5 + $0xb1] sm:$0xff]  ;;  %v5876_v52 = vadd.f32 %v15850_v3, %v15849_v28  ;;  %v7489_v44 = vmul.f32 %v14198_v62, %v14371_v37  ;;  %v7450_v42 = vmul.f32 %v14207_v56, %v14295_v24  ;;  %v7693_v24 = vmul.f32 %v14235_v15, %v14320_v19  ;;  %v15854_v3 = vld [vmem:[#allocation88_spill] sm:$0xff] }
 0x873   : > { %v14445_v58 = vld [vmem:[#allocation5 + $0xb7] sm:$0xff]  ;;  %v7110_v12 = vmax.f32 %v7078_v30, 0.0  ;;  %v6960_v40 = vadd.f32 %v14354_v8, %v6846_v22  ;;  %v7961_v31 = vsel %vm342_vm10, %v7897_v1, 0.0  ;;  %v7802_v0 = vmul.f32 %v14259_v29, %v14443_v21  ;;  %v15852_v22 = vld [vmem:[#allocation189_spill] sm:$0xff] }
 0x874   : > { %7962 = vadd.xlane.f32.xlu2 %v7961_v31  ;;  %v7317_v23 = vmul.f32 %v14188_v4, %v14445_v58  ;;  %v14458_v33 = vld [vmem:[#allocation5 + $0xb8] sm:$0xff]  ;;  %v7623_v49 = vadd.f32 %v7591_v63, %v7348_v38  ;;  %v7521_v31 = vadd.f32 %v7489_v44, %v7450_v42  ;;  %v7208_v19 = vmul.f32 %v14164_v47, %v14322_v59 }
 0x875   : > { %7142 = vst.msk [vmem:[#allocation5 + $0xc0] sm:$0xff] %vm342_vm10, %v7110_v12  ;;  %v7043_v13 = vadd.f32 %v6960_v40, %v6466_v61  ;;  %v7834_v27 = vadd.f32 %v7802_v0, %v7763_v32  ;;  %v7560_v45 = vmul.f32 %v14222_v10, %v14458_v33  ;;  %v15851_v61 = vld [vmem:[#allocation188_spill] sm:$0xff]  ;;  %v7451_v59 = vmul.f32 %v14207_v56, %v14328_v41 }
 0x876   : > { %v6304_v8 = vpop.f32.mrf.mxu1  ;;  %v7349_v26 = vadd.f32 %v7317_v23, %v7278_v50  ;;  %v5873_v38 = vadd.f32 %v15852_v22, %v15851_v61  ;;  %v7247_v50 = vmul.f32 %v14171_v20, %v14409_v17  ;;  %v7694_v41 = vmul.f32 %v14235_v15, %v14356_v60 }
 0x877   : > { %v7079_v55 = vadd.f32 %v14106_v43, %v7043_v13  ;;  %v7921_v25 = vpop.xlane.xlu1 %7920  ;;  %v7866_v34 = vmul.f32 %v15835_v2, %v7834_v27  ;;  %v6418_v1 = vadd.f32 %v14384_v14, %v6304_v8  ;;  %v15853_v2 = vld [vmem:[#allocation91_spill] sm:$0xff]  ;;  %v14483_v0 = vpop.f32.mrf.mxu2  ;;  %v7764_v13 = vadd.f32 %v7732_v46, %v7693_v24 }
 0x878   : > { %v8015_v6 = vadd.f32 %v14364_v51, %v7921_v25  ;;  %v5923_v63 = vmul.f32 %v15853_v2, %v5876_v52  ;;  %v7381_v40 = vmul.f32 %v15836_v5, %v7349_v26  ;;  %v7490_v5 = vmul.f32 %v14198_v62, %v14415_v35 }
 0x879   : > { %v7111_v30 = vmax.f32 %v7079_v55, 0.0  ;;  %v7898_v11 = vadd.f32 %v7866_v34, %v7623_v49  ;;  %v6467_v28 = vadd.f32 %v6418_v1, %v5873_v38  ;;  %v7592_v8 = vadd.f32 %v7560_v45, %v7521_v31  ;;  %v6968_v1 = vpop.f32.mrf.mxu0 }
 0x87a   : > { %8047 = vst.msk [vmem:[%s14381_s30 + $0x10] sm:$0xff] %vm335_vm0, %v8015_v6  ;;  %v6849_v32 = vpop.f32.mrf.mxu3  ;;  %v7733_v34 = vmul.f32 %v14214_v53, %v14443_v21  ;;  %v7279_v45 = vadd.f32 %v7247_v50, %v7208_v19  ;;  %v7522_v61 = vadd.f32 %v7490_v5, %v7451_v59 }
 0x87b   : > { %7143 = vst.msk [vmem:[#allocation5 + $0xc8] sm:$0xff] %vm342_vm10, %v7111_v30  ;;  %v6963_v12 = vadd.f32 %v14405_v48, %v6849_v32  ;;  %v7964_v14 = vsel %vm342_vm10, %v7898_v11, 0.0  ;;  %v7624_v46 = vadd.f32 %v7592_v8, %v7381_v40  ;;  %v7209_v32 = vmul.f32 %v14164_v47, %v14358_v9 }
 0x87c   : > { %7965 = vadd.xlane.f32.xlu0 %v7964_v14  ;;  %v14485_v23 = vld [vmem:[#allocation5 + $0xb9] sm:$0xff] }
 0x87d   : > { %v14487_v27 = vld [vmem:[#allocation5 + $0xbf] sm:$0xff]  ;;  %v7012_v52 = vmul.f32 %v15854_v3, %v6963_v12  ;;  %v7803_v44 = vmul.f32 %v14259_v29, %v14485_v23 }
 0x87e   : > { %v14493_v48 = vld [vmem:[#allocation5 + $0xc0] sm:$0xff]  ;;  %v6307_v55 = vpop.f32.mrf.mxu1  ;;  %v7318_v25 = vmul.f32 %v14188_v4, %v14487_v27 }
 0x87f   : > { %v7561_v49 = vmul.f32 %v14222_v10, %v14493_v48  ;;  %v7044_v26 = vadd.f32 %v7012_v52, %v6467_v28  ;;  %v6421_v6 = vadd.f32 %v14439_v7, %v6307_v55  ;;  %v7924_v42 = vpop.xlane.xlu2 %7923  ;;  %v7835_v30 = vadd.f32 %v7803_v44, %v7764_v13  ;;  %v15855_v44 = vld [vmem:[#allocation61_spill] sm:$0xff]  ;;  %v6426_v59 = vpop.f32.mrf.mxu2 }
 0x880   : > { %v8016_v11 = vadd.f32 %v14364_v51, %v7924_v42  ;;  %v7248_v7 = vmul.f32 %v14171_v20, %v14445_v58  ;;  %v7350_v14 = vadd.f32 %v7318_v25, %v7279_v45  ;;  %v7765_v13 = vadd.f32 %v7733_v34, %v7694_v41  ;;  %v15856_v55 = vld [vmem:[#allocation181_spill] sm:$0xff] }
 0x881   : > { %v7080_v22 = vadd.f32 %v14106_v43, %v7044_v26  ;;  %v7899_v38 = vadd.f32 %v7835_v30, %v7624_v46  ;;  %v6468_v24 = vadd.f32 %v6421_v6, %v5923_v63  ;;  %v7593_v40 = vadd.f32 %v7561_v49, %v7522_v61 }
 0x882   : > { %8048 = vst.msk [vmem:[%s14381_s30 + $0x18] sm:$0xff] %vm335_vm0, %v8016_v11  ;;  %v6852_v12 = vpop.f32.mrf.mxu3  ;;  %v14519_v31 = vld [vmem:[#allocation5 + $0xc1] sm:$0xff]  ;;  %v7280_v8 = vadd.f32 %v7248_v7, %v7209_v32  ;;  %v5882_v25 = vadd.f32 %v15856_v55, %v15855_v44  ;;  %v7491_v34 = vmul.f32 %v14198_v62, %v14458_v33  ;;  %v7452_v45 = vmul.f32 %v14207_v56, %v14371_v37 }
 0x883   : > { %v14521_v19 = vld [vmem:[#allocation5 + $0xc7] sm:$0xff]  ;;  %v7112_v60 = vmax.f32 %v7080_v22, 0.0  ;;  %v6966_v50 = vadd.f32 %v14456_v18, %v6852_v12  ;;  %v7967_v5 = vsel %vm342_vm10, %v7899_v38, 0.0  ;;  %v7804_v9 = vmul.f32 %v14259_v29, %v14519_v31 }
 0x884   : > { %7968 = vadd.xlane.f32.xlu1 %v7967_v5  ;;  %v7319_v63 = vmul.f32 %v14188_v4, %v14521_v19  ;;  %v14532_v18 = vld [vmem:[#allocation5 + $0xc8] sm:$0xff]  ;;  %v7625_v42 = vadd.f32 %v7593_v40, %v7350_v14  ;;  %v7734_v61 = vmul.f32 %v14214_v53, %v14485_v23  ;;  %v6971_v40 = vpop.f32.mrf.mxu0  ;;  %v7695_v37 = vmul.f32 %v14235_v15, %v14407_v16 }
 0x885   : > { %7144 = vst.msk [vmem:[#allocation5 + $0xd0] sm:$0xff] %vm342_vm10, %v7112_v60  ;;  %v7045_v28 = vadd.f32 %v6966_v50, %v6468_v24  ;;  %v7836_v52 = vadd.f32 %v7804_v9, %v7765_v13  ;;  %v7562_v32 = vmul.f32 %v14222_v10, %v14532_v18  ;;  %v15857_v7 = vld [vmem:[#allocation9_spill] sm:$0xff]  ;;  %v7523_v5 = vadd.f32 %v7491_v34, %v7452_v45 }
 0x886   : > { %v6310_v49 = vpop.f32.mrf.mxu1  ;;  %v7351_v30 = vadd.f32 %v7319_v63, %v7280_v8  ;;  %v15858_v24 = vld [vmem:[#allocation57_spill] sm:$0xff]  ;;  %v7766_v63 = vadd.f32 %v7734_v61, %v7695_v37  ;;  %v7249_v16 = vmul.f32 %v14171_v20, %v14487_v27 }
 0x887   : > { %v7081_v26 = vadd.f32 %v14106_v43, %v7045_v28  ;;  %v7927_v6 = vpop.xlane.xlu2 %7926  ;;  %v7868_v46 = vmul.f32 %v15841_v39, %v7836_v52  ;;  %v6424_v22 = vadd.f32 %v14483_v0, %v6310_v49  ;;  %v5879_v12 = vadd.f32 %v15858_v24, %v15857_v7  ;;  %v15859_v39 = vld [vmem:[#allocation92_spill] sm:$0xff] }
 0x888   : > { %v8017_v11 = vadd.f32 %v14364_v51, %v7927_v6  ;;  %v5925_v14 = vmul.f32 %v15859_v39, %v5882_v25  ;;  %v7383_v50 = vmul.f32 %v15842_v57, %v7351_v30  ;;  %v7210_v52 = vmul.f32 %v14164_v47, %v14409_v17  ;;  %v15860_v57 = vld [vmem:[#allocation100_spill] sm:$0xff] }
 0x889   : > { %v7113_v41 = vmax.f32 %v7081_v26, 0.0  ;;  %v7900_v38 = vadd.f32 %v7868_v46, %v7625_v42  ;;  %v6469_v44 = vadd.f32 %v6424_v22, %v5879_v12  ;;  %v7594_v25 = vadd.f32 %v7562_v32, %v7523_v5 }
 0x88a   : > { %8049 = vst.msk [vmem:[%s14381_s30 + $0x20] sm:$0xff] %vm335_vm0, %v8017_v11  ;;  %v6855_v13 = vpop.f32.mrf.mxu3  ;;  %v7453_v17 = vmul.f32 %v14207_v56, %v14415_v35  ;;  %v7735_v42 = vmul.f32 %v14214_v53, %v14519_v31  ;;  %v7696_v35 = vmul.f32 %v14235_v15, %v14443_v21  ;;  %v7211_v12 = vmul.f32 %v14164_v47, %v14445_v58 }
 0x88b   : > { %7145 = vst.msk [vmem:[#allocation5 + $0xd8] sm:$0xff] %vm342_vm10, %v7113_v41  ;;  %v6969_v60 = vadd.f32 %v6968_v1, %v6855_v13  ;;  %v7970_v0 = vsel %vm342_vm10, %v7900_v38, 0.0  ;;  %v7492_v1 = vmul.f32 %v14198_v62, %v14493_v48  ;;  %v7626_v45 = vadd.f32 %v7594_v25, %v7383_v50  ;;  %v6429_v41 = vpop.f32.mrf.mxu2 }
 0x88c   : > { %7971 = vadd.xlane.f32.xlu2 %v7970_v0  ;;  %v14556_v9 = vld [vmem:[#allocation5 + $0xc9] sm:$0xff]  ;;  %v7281_v38 = vadd.f32 %v7249_v16, %v7210_v52  ;;  %v7767_v5 = vadd.f32 %v7735_v42, %v7696_v35 }
 0x88d   : > { %v14558_v28 = vld [vmem:[#allocation5 + $0xcf] sm:$0xff]  ;;  %v7014_v55 = vmul.f32 %v15860_v57, %v6969_v60  ;;  %v7805_v49 = vmul.f32 %v14259_v29, %v14556_v9  ;;  %v7524_v32 = vadd.f32 %v7492_v1, %v7453_v17  ;;  %v6974_v1 = vpop.f32.mrf.mxu0 }
 0x88e   : > { %v14564_v8 = vld [vmem:[#allocation5 + $0xd0] sm:$0xff]  ;;  %v6313_v34 = vpop.f32.mrf.mxu1  ;;  %v7320_v26 = vmul.f32 %v14188_v4, %v14558_v28 }
 0x88f   : > { %v7563_v6 = vmul.f32 %v14222_v10, %v14564_v8  ;;  %v7046_v46 = vadd.f32 %v7014_v55, %v6469_v44  ;;  %v6427_v30 = vadd.f32 %v6426_v59, %v6313_v34  ;;  %v7930_v11 = vpop.xlane.xlu0 %7929  ;;  %v7837_v61 = vadd.f32 %v7805_v49, %v7766_v63  ;;  %v15861_v49 = vld [vmem:[#allocation81_spill] sm:$0xff]  ;;  %v15862_v34 = vld [vmem:[#allocation32_spill] sm:$0xff] }
 0x890   : > { %v8018_v22 = vadd.f32 %v14364_v51, %v7930_v11  ;;  %v7250_v59 = vmul.f32 %v14171_v20, %v14521_v19  ;;  %v7352_v60 = vadd.f32 %v7320_v26, %v7281_v38  ;;  %v5888_v26 = vadd.f32 %v15862_v34, %v15861_v49 }
 0x891   : > { %v7082_v7 = vadd.f32 %v14106_v43, %v7046_v46  ;;  %v7901_v24 = vadd.f32 %v7837_v61, %v7626_v45  ;;  %v6470_v13 = vadd.f32 %v6427_v30, %v5925_v14  ;;  %v7595_v0 = vadd.f32 %v7563_v6, %v7524_v32 }
 0x892   : > { %8050 = vst.msk [vmem:[%s14381_s30 + $0x28] sm:$0xff] %vm335_vm0, %v8018_v22  ;;  %v6858_v37 = vpop.f32.mrf.mxu3  ;;  %v14589_v50 = vld [vmem:[#allocation5 + $0xd1] sm:$0xff]  ;;  %v7282_v25 = vadd.f32 %v7250_v59, %v7211_v12  ;;  %v7493_v6 = vmul.f32 %v14198_v62, %v14532_v18  ;;  %v7454_v22 = vmul.f32 %v14207_v56, %v14458_v33  ;;  %v7736_v38 = vmul.f32 %v14214_v53, %v14556_v9  ;;  %v15863_v12 = vld [vmem:[#allocation36_spill] sm:$0xff] }
 0x893   : > { %v14591_v63 = vld [vmem:[#allocation5 + $0xd7] sm:$0xff]  ;;  %v7114_v21 = vmax.f32 %v7082_v7, 0.0  ;;  %v6972_v52 = vadd.f32 %v6971_v40, %v6858_v37  ;;  %v7973_v16 = vsel %vm342_vm10, %v7901_v24, 0.0  ;;  %v7806_v58 = vmul.f32 %v14259_v29, %v14589_v50  ;;  %v15865_v37 = vld [vmem:[#allocation133_spill] sm:$0xff] }
 0x894   : > { %7974 = vadd.xlane.f32.xlu0 %v7973_v16  ;;  %v7321_v14 = vmul.f32 %v14188_v4, %v14591_v63  ;;  %v14601_v40 = vld [vmem:[#allocation5 + $0xd8] sm:$0xff]  ;;  %v7627_v30 = vadd.f32 %v7595_v0, %v7352_v60  ;;  %v6432_v60 = vpop.f32.mrf.mxu2  ;;  %v7697_v33 = vmul.f32 %v14235_v15, %v14485_v23  ;;  %v7251_v23 = vmul.f32 %v14171_v20, %v14558_v28 }
 0x895   : > { %7146 = vst.msk [vmem:[#allocation5 + $0xe0] sm:$0xff] %vm342_vm10, %v7114_v21  ;;  %v7047_v44 = vadd.f32 %v6972_v52, %v6470_v13  ;;  %v7838_v55 = vadd.f32 %v7806_v58, %v7767_v5  ;;  %v7564_v24 = vmul.f32 %v14222_v10, %v14601_v40  ;;  %v15864_v59 = vld [vmem:[#allocation184_spill] sm:$0xff]  ;;  %v7525_v52 = vadd.f32 %v7493_v6, %v7454_v22 }
 0x896   : > { %v6316_v17 = vpop.f32.mrf.mxu1  ;;  %v7353_v45 = vadd.f32 %v7321_v14, %v7282_v25  ;;  %v5885_v13 = vadd.f32 %v15864_v59, %v15863_v12  ;;  %v7768_v58 = vadd.f32 %v7736_v38, %v7697_v33  ;;  %v7213_v59 = vmul.f32 %v14164_v47, %v14521_v19 }
 0x897   : > { %v7083_v42 = vadd.f32 %v14106_v43, %v7047_v44  ;;  %v7933_v46 = vpop.xlane.xlu1 %7932  ;;  %v7870_v11 = vmul.f32 %v15848_v36, %v7838_v55  ;;  %v6430_v35 = vadd.f32 %v6429_v41, %v6316_v17  ;;  %v5927_v36 = vmul.f32 %v15865_v37, %v5888_v26  ;;  %v6977_v17 = vpop.f32.mrf.mxu0 }
 0x898   : > { %v8019_v61 = vadd.f32 %v14364_v51, %v7933_v46  ;;  %v7385_v21 = vmul.f32 %v15847_v54, %v7353_v45  ;;  %v7212_v44 = vmul.f32 %v14164_v47, %v14487_v27  ;;  %v15866_v54 = vld [vmem:[#allocation93_spill] sm:$0xff]  ;;  %v7596_v34 = vadd.f32 %v7564_v24, %v7525_v52 }
 0x899   : > { %v7115_v32 = vmax.f32 %v7083_v42, 0.0  ;;  %v7902_v7 = vadd.f32 %v7870_v11, %v7627_v30  ;;  %v6471_v25 = vadd.f32 %v6430_v35, %v5885_v13  ;;  %v7455_v42 = vmul.f32 %v14207_v56, %v14493_v48 }
 0x89a   : > { %8051 = vst.msk [vmem:[%s14381_s30 + $0x30] sm:$0xff] %vm335_vm0, %v8019_v61  ;;  %v6861_v0 = vpop.f32.mrf.mxu3  ;;  %v7737_v30 = vmul.f32 %v14214_v53, %v14589_v50  ;;  %v7628_v22 = vadd.f32 %v7596_v34, %v7385_v21  ;;  %v7283_v35 = vadd.f32 %v7251_v23, %v7212_v44  ;;  %v7698_v24 = vmul.f32 %v14235_v15, %v14519_v31  ;;  %v15868_v34 = vld [vmem:[#allocation13_spill] sm:$0xff] }
 0x89b   : > { %7147 = vst.msk [vmem:[#allocation5 + $0xe8] sm:$0xff] %vm342_vm10, %v7115_v32  ;;  %v6975_v5 = vadd.f32 %v6974_v1, %v6861_v0  ;;  %v7976_v41 = vsel %vm342_vm10, %v7902_v7, 0.0  ;;  %v7494_v1 = vmul.f32 %v14198_v62, %v14564_v8  ;;  %v7252_v13 = vmul.f32 %v14171_v20, %v14591_v63 }
 0x89c   : > { %7977 = vadd.xlane.f32.xlu1 %v7976_v41  ;;  %v14624_v16 = vld [vmem:[#allocation5 + $0xd9] sm:$0xff]  ;;  %v7769_v21 = vadd.f32 %v7737_v30, %v7698_v24  ;;  %v6435_v44 = vpop.f32.mrf.mxu2 }
 0x89d   : > { %v14626_v14 = vld [vmem:[#allocation5 + $0xdf] sm:$0xff]  ;;  %v7016_v49 = vmul.f32 %v15866_v54, %v6975_v5  ;;  %v7807_v26 = vmul.f32 %v14259_v29, %v14624_v16  ;;  %v7526_v7 = vadd.f32 %v7494_v1, %v7455_v42  ;;  %v14676_v42 = vld [vmem:[%s14980_s6] ss:$0 sm:$0xff] }
 0x89e   : > { %v14632_v55 = vld [vmem:[#allocation5 + $0xe0] sm:$0xff]  ;;  %v6319_v6 = vpop.f32.mrf.mxu1  ;;  %v7322_v27 = vmul.f32 %v14188_v4, %v14626_v14 }
 0x89f   : > { %v7565_v46 = vmul.f32 %v14222_v10, %v14632_v55  ;;  %v7048_v11 = vadd.f32 %v7016_v49, %v6471_v25  ;;  %v6433_v45 = vadd.f32 %v6432_v60, %v6319_v6  ;;  %v7936_v61 = vpop.xlane.xlu2 %7935  ;;  %v7839_v38 = vadd.f32 %v7807_v26, %v7768_v58  ;;  %v15867_v49 = vld [vmem:[#allocation195_spill] sm:$0xff] }
 0x8a0   : > { %v8020_v32 = vadd.f32 %v14364_v51, %v7936_v61  ;;  %v7354_v33 = vadd.f32 %v7322_v27, %v7283_v35  ;;  %v7284_v25 = vadd.f32 %v7252_v13, %v7213_v59  ;;  %v5894_v26 = vadd.f32 %v15868_v34, %v15867_v49  ;;  %v15869_v59 = vld [vmem:[#allocation65_spill] sm:$0xff]  ;;  %v15872_v49 = vld [vmem:[#allocation124_spill] sm:$0xff] }
 0x8a1   : > { %v7084_v48 = vadd.f32 %v14106_v43, %v7048_v11  ;;  %v7903_v12 = vadd.f32 %v7839_v38, %v7628_v22  ;;  %v6472_v60 = vadd.f32 %v6433_v45, %v5927_v36  ;;  %v7597_v5 = vadd.f32 %v7565_v46, %v7526_v7  ;;  %v6980_v22 = vpop.f32.mrf.mxu0  ;;  %v15870_v13 = vld [vmem:[#allocation185_spill] sm:$0xff] }
 0x8a2   : > { %8052 = vst.msk [vmem:[%s14381_s30 + $0x38] sm:$0xff] %vm335_vm0, %v8020_v32  ;;  %v6864_v0 = vpop.f32.mrf.mxu3  ;;  %v14657_v41 = vld [vmem:[#allocation5 + $0xe1] sm:$0xff]  ;;  %v7495_v27 = vmul.f32 %v14198_v62, %v14601_v40  ;;  %v7456_v32 = vmul.f32 %v14207_v56, %v14532_v18  ;;  %v7738_v35 = vmul.f32 %v14214_v53, %v14624_v16  ;;  %v7699_v18 = vmul.f32 %v14235_v15, %v14556_v9 }
 0x8a3   : > { %v14659_v52 = vld [vmem:[#allocation5 + $0xe7] sm:$0xff]  ;;  %v7116_v31 = vmax.f32 %v7084_v48, 0.0  ;;  %v6978_v43 = vadd.f32 %v6977_v17, %v6864_v0  ;;  %v7979_v58 = vsel %vm342_vm10, %v7903_v12, 0.0  ;;  %v7808_v19 = vmul.f32 %v14259_v29, %v14657_v41 }
 0x8a4   : > { %7980 = vadd.xlane.f32.xlu2 %v7979_v58  ;;  %v7323_v36 = vmul.f32 %v14188_v4, %v14659_v52  ;;  %v14669_v17 = vld [vmem:[#allocation5 + $0xe8] sm:$0xff]  ;;  %v7629_v11 = vadd.f32 %v7597_v5, %v7354_v33  ;;  %v6438_v58 = vpop.f32.mrf.mxu2  ;;  %v7253_v9 = vmul.f32 %v14171_v20, %v14626_v14 }
 0x8a5   : > { %7148 = vst.msk [vmem:[#allocation5 + $0xf0] sm:$0xff] %vm342_vm10, %v7116_v31  ;;  %v7049_v23 = vadd.f32 %v6978_v43, %v6472_v60  ;;  %v7840_v1 = vadd.f32 %v7808_v19, %v7769_v21  ;;  %v7566_v12 = vmul.f32 %v14222_v10, %v14669_v17  ;;  %v5891_v60 = vadd.f32 %v15870_v13, %v15869_v59 }
 0x8a6   : > { %v6322_v6 = vpop.f32.mrf.mxu1  ;;  %v7355_v61 = vadd.f32 %v7323_v36, %v7284_v25  ;;  %v7527_v43 = vadd.f32 %v7495_v27, %v7456_v32  ;;  %v7496_v25 = vmul.f32 %v14198_v62, %v14632_v55  ;;  %v7739_v62 = vmul.f32 %v14214_v53, %v14657_v41  ;;  %v14727_v53 = vld [vmem:[%s14981_s7] ss:$0 sm:$0xff] }
 0x8a7   : > { %v7085_v46 = vadd.f32 %v14676_v42, %v7049_v23  ;;  %v7939_v30 = vpop.xlane.xlu0 %7938  ;;  %v7872_v45 = vmul.f32 %v15854_v3, %v7840_v1  ;;  %v6436_v24 = vadd.f32 %v6435_v44, %v6322_v6  ;;  %v15871_v3 = vld [vmem:[#allocation208_spill] sm:$0xff]  ;;  %v7770_v44 = vadd.f32 %v7738_v35, %v7699_v18 }
 0x8a8   : > { %v8021_v38 = vadd.f32 %v14364_v51, %v7939_v30  ;;  %v5929_v0 = vmul.f32 %v15871_v3, %v5894_v26  ;;  %v7387_v31 = vmul.f32 %v15853_v2, %v7355_v61  ;;  %v7214_v23 = vmul.f32 %v14164_v47, %v14558_v28 }
 0x8a9   : > { %v7117_v7 = vmax.f32 %v7085_v46, 0.0  ;;  %v7904_v48 = vadd.f32 %v7872_v45, %v7629_v11  ;;  %v6473_v2 = vadd.f32 %v6436_v24, %v5891_v60  ;;  %v7598_v26 = vadd.f32 %v7566_v12, %v7527_v43 }
 0x8aa   : > { %8053 = vst.msk [vmem:[%s14381_s30 + $0x40] sm:$0xff] %vm335_vm0, %v8021_v38  ;;  %v6867_v33 = vpop.f32.mrf.mxu3  ;;  %v7457_v47 = vmul.f32 %v14207_v56, %v14564_v8  ;;  %v6983_v38 = vpop.f32.mrf.mxu0  ;;  %v7285_v32 = vadd.f32 %v7253_v9, %v7214_v23  ;;  %v7700_v56 = vmul.f32 %v14235_v15, %v14589_v50  ;;  %v7215_v35 = vmul.f32 %v14727_v53, %v14591_v63 }
 0x8ab   : > { %7149 = vst.msk [vmem:[#allocation5 + $0xf8] sm:$0xff] %vm342_vm10, %v7117_v7  ;;  %v6981_v5 = vadd.f32 %v6980_v22, %v6867_v33  ;;  %v7982_v21 = vsel %vm342_vm10, %v7904_v48, 0.0  ;;  %v7630_v45 = vadd.f32 %v7598_v26, %v7387_v31  ;;  %v14734_v7 = vld [vmem:[%s14981_s7 + $0x3] ss:$0 sm:$0xff] }
 0x8ac   : > { %7983 = vadd.xlane.f32.xlu0 %v7982_v21  ;;  %v14697_v19 = vld [vmem:[#allocation5 + $0xe9] sm:$0xff]  ;;  %v7254_v24 = vmul.f32 %v14734_v7, %v14659_v52  ;;  %v7771_v13 = vadd.f32 %v7739_v62, %v7700_v56  ;;  %v14777_v62 = vld [vmem:[%s14981_s7 + $0x7] ss:$0 sm:$0xff] }
 0x8ad   : > { %v14699_v36 = vld [vmem:[#allocation5 + $0xef] sm:$0xff]  ;;  %v7018_v34 = vmul.f32 %v15872_v49, %v6981_v5  ;;  %v7809_v6 = vmul.f32 %v14259_v29, %v14697_v19 }
 0x8ae   : > { %v14705_v1 = vld [vmem:[#allocation5 + $0xf0] sm:$0xff]  ;;  %v6325_v27 = vpop.f32.mrf.mxu1  ;;  %v7324_v46 = vmul.f32 %v14188_v4, %v14699_v36  ;;  %v7528_v4 = vadd.f32 %v7496_v25, %v7457_v47  ;;  %v7255_v56 = vmul.f32 %v14734_v7, %v14699_v36 }
 0x8af   : > { %v7567_v20 = vmul.f32 %v14222_v10, %v14705_v1  ;;  %v7050_v28 = vadd.f32 %v7018_v34, %v6473_v2  ;;  %v6439_v30 = vadd.f32 %v6438_v58, %v6325_v27  ;;  %v7942_v11 = vpop.xlane.xlu1 %7941  ;;  %v7841_v61 = vadd.f32 %v7809_v6, %v7770_v44  ;;  %v14770_v27 = vld [vmem:[%s14981_s7 + $0x1] ss:$0 sm:$0xff] }
 0x8b0   : > { %v8022_v22 = vadd.f32 %v14364_v51, %v7942_v11  ;;  %v7356_v48 = vadd.f32 %v7324_v46, %v7285_v32  ;;  %v7286_v58 = vadd.f32 %v7254_v24, %v7215_v35  ;;  %v7458_v46 = vmul.f32 %v14770_v27, %v14601_v40  ;;  %v14811_v35 = vld [vmem:[%s14981_s7 + $0x8] ss:$0 sm:$0xff] }
 0x8b1   : > { %v7086_v8 = vadd.f32 %v14676_v42, %v7050_v28  ;;  %v7905_v10 = vadd.f32 %v7841_v61, %v7630_v45  ;;  %v6474_v15 = vadd.f32 %v6439_v30, %v5929_v0  ;;  %v7599_v12 = vadd.f32 %v7567_v20, %v7528_v4  ;;  %v14750_v0 = vld [vmem:[%s14981_s7 + $0x6] ss:$0 sm:$0xff]  ;;  %v14784_v28 = vld [vmem:[%s14981_s7 + $0x5] ss:$0 sm:$0xff] }
 0x8b2   : > { %8054 = vst.msk [vmem:[%s14381_s30 + $0x48] sm:$0xff] %vm335_vm0, %v8022_v22  ;;  %v6870_v50 = vpop.f32.mrf.mxu3  ;;  %v14740_v59 = vld [vmem:[#allocation5 + $0xf1] sm:$0xff]  ;;  %v7740_v30 = vmul.f32 %v14784_v28, %v14697_v19 }
 0x8b3   : > { %v14742_v60 = vld [vmem:[#allocation5 + $0xf7] sm:$0xff]  ;;  %v7118_v63 = vmax.f32 %v7086_v8, 0.0  ;;  %v6984_v33 = vadd.f32 %v6983_v38, %v6870_v50  ;;  %v7985_v18 = vsel %vm342_vm10, %v7905_v10, 0.0  ;;  %v7810_v5 = vmul.f32 %v14259_v29, %v14740_v59  ;;  %v14760_v29 = vld [vmem:[%s14981_s7 + $0x4] ss:$0 sm:$0xff]  ;;  %v6441_v50 = vpop.f32.mrf.mxu2 }
 0x8b4   : > { %7986 = vadd.xlane.f32.xlu1 %v7985_v18  ;;  %v7325_v21 = vmul.f32 %v14750_v0, %v14742_v60  ;;  %v14755_v44 = vld [vmem:[#allocation5 + $0xf8] sm:$0xff]  ;;  %v7497_v23 = vmul.f32 %v14760_v29, %v14669_v17  ;;  %v7631_v2 = vadd.f32 %v7599_v12, %v7356_v48  ;;  %v14796_v22 = vld [vmem:[%s14981_s7 + $0x2] ss:$0 sm:$0xff]  ;;  %v7498_v24 = vmul.f32 %v14760_v29, %v14705_v1 }
 0x8b5   : > { %7150 = vst.msk [vmem:[#allocation5 + $0x100] sm:$0xff] %vm342_vm10, %v7118_v63  ;;  %v7051_v31 = vadd.f32 %v6984_v33, %v6474_v15  ;;  %v7842_v43 = vadd.f32 %v7810_v5, %v7771_v13  ;;  %v7701_v38 = vmul.f32 %v14796_v22, %v14624_v16  ;;  %v7216_v48 = vmul.f32 %v14727_v53, %v14626_v14 }
 0x8b6   : > { %v7357_v26 = vadd.f32 %v7325_v21, %v7286_v58  ;;  %v7529_v61 = vadd.f32 %v7497_v23, %v7458_v46  ;;  %v6328_v15 = vpop.f32.mrf.mxu1  ;;  %v7741_v13 = vmul.f32 %v14784_v28, %v14740_v59  ;;  %v7459_v5 = vmul.f32 %v14770_v27, %v14632_v55 }
 0x8b7   : > { %v7087_v9 = vadd.f32 %v14676_v42, %v7051_v31  ;;  %v7945_v25 = vpop.xlane.xlu2 %7944  ;;  %v7874_v34 = vmul.f32 %v15860_v57, %v7842_v43  ;;  %v7568_v57 = vmul.f32 %v14777_v62, %v14755_v44  ;;  %v7772_v10 = vadd.f32 %v7740_v30, %v7701_v38 }
 0x8b8   : > { %v8023_v6 = vadd.f32 %v14364_v51, %v7945_v25  ;;  %v7389_v45 = vmul.f32 %v15859_v39, %v7357_v26  ;;  %v7287_v43 = vadd.f32 %v7255_v56, %v7216_v48  ;;  %v7702_v14 = vmul.f32 %v14796_v22, %v14657_v41  ;;  %v15873_v25 = vld [vmem:[#allocation201_spill] sm:$0xff] }
 0x8b9   : > { %v7119_v47 = vmax.f32 %v7087_v9, 0.0  ;;  %v7906_v20 = vadd.f32 %v7874_v34, %v7631_v2  ;;  %v7600_v39 = vadd.f32 %v7568_v57, %v7529_v61  ;;  %v6442_v58 = vadd.f32 %v6441_v50, %v6328_v15  ;;  %v15874_v2 = vld [vmem:[#allocation47_spill] sm:$0xff] }
 0x8ba   : > { %8055 = vst.msk [vmem:[%s14381_s30 + $0x50] sm:$0xff] %vm335_vm0, %v8023_v6  ;;  %v6873_v40 = vpop.f32.mrf.mxu3  ;;  %v7530_v9 = vadd.f32 %v7498_v24, %v7459_v5  ;;  %v5897_v34 = vadd.f32 %v15874_v2, %v15873_v25  ;;  %v7773_v46 = vadd.f32 %v7741_v13, %v7702_v14  ;;  %v7256_v56 = vmul.f32 %v14734_v7, %v14742_v60  ;;  %v7535_v13 = vld [vmem:[#allocation5 + $0x118] sm:$0xff] }
 0x8bb   : > { %7151 = vst.msk [vmem:[#allocation5 + $0x108] sm:$0xff] %vm342_vm10, %v7119_v47  ;;  %v7988_v11 = vsel %vm342_vm10, %v7906_v20, 0.0  ;;  %v7632_v33 = vadd.f32 %v7600_v39, %v7389_v45  ;;  %v7217_v15 = vmul.f32 %v14727_v53, %v14659_v52  ;;  %v7460_v52 = vmul.f32 %v14770_v27, %v14669_v17  ;;  %v7778_v2 = vld [vmem:[#allocation5 + $0x119] sm:$0xff] }
 0x8bc   : > { %7989 = vadd.xlane.f32.xlu2 %v7988_v11  ;;  %v14800_v32 = vld [vmem:[#allocation5 + $0xf9] sm:$0xff]  ;;  %v6475_v30 = vadd.f32 %v6442_v58, %v5897_v34  ;;  %v15875_v11 = vld [vmem:[#allocation131_spill] sm:$0xff]  ;;  %v7461_v14 = vmul.f32 %v14770_v27, %v14705_v1  ;;  %v7704_v58 = vmul.f32 %v14796_v22, %v14740_v59 }
 0x8bd   : > { %v14802_v4 = vld [vmem:[#allocation5 + $0xff] sm:$0xff]  ;;  %v7811_v16 = vmul.f32 %v14811_v35, %v14800_v32 }
 0x8be   : > { %v14806_v8 = vld [vmem:[#allocation5 + $0x100] sm:$0xff]  ;;  %v7326_v12 = vmul.f32 %v14750_v0, %v14802_v4  ;;  %v7257_v25 = vmul.f32 %v14734_v7, %v14802_v4 }
 0x8bf   : > { %v7948_v63 = vpop.xlane.xlu0 %7947  ;;  %v7843_v18 = vadd.f32 %v7811_v16, %v7772_v10  ;;  %v7569_v21 = vmul.f32 %v14777_v62, %v14806_v8  ;;  %v7536_v34 = vld [vmem:[#allocation5 + $0x120] sm:$0xff]  ;;  %v7500_v1 = vmul.f32 %v14760_v29, %v14806_v8 }
 0x8c0   : > { %v8024_v31 = vadd.f32 %v14364_v51, %v7948_v63  ;;  %v7358_v6 = vadd.f32 %v7326_v12, %v7287_v43  ;;  %v7288_v63 = vadd.f32 %v7256_v56, %v7217_v15  ;;  %v7218_v43 = vmul.f32 %v14727_v53, %v14699_v36 }
 0x8c1   : > { %v7907_v23 = vadd.f32 %v7843_v18, %v7632_v33  ;;  %v7601_v57 = vadd.f32 %v7569_v21, %v7530_v9  ;;  %v7499_v33 = vmul.f32 %v14760_v29, %v14755_v44  ;;  %v7742_v9 = vmul.f32 %v14784_v28, %v14800_v32 }
 0x8c2   : > { %8056 = vst.msk [vmem:[%s14381_s30 + $0x58] sm:$0xff] %vm335_vm0, %v8024_v31  ;;  %v6986_v26 = vpop.f32.mrf.mxu3  ;;  %v14834_v55 = vld [vmem:[#allocation5 + $0x101] sm:$0xff]  ;;  %v14856_v31 = vmul.f32 %v14777_v62, %v7535_v13  ;;  %v7289_v56 = vadd.f32 %v7257_v25, %v7218_v43  ;;  %v14906_v43 = vld [vmem:[#allocation6] ss:$0 sm:$0xff] }
 0x8c3   : > { %v6987_v47 = vadd.f32 %v6986_v26, %v6873_v40  ;;  %v7991_v20 = vsel %vm342_vm10, %v7907_v23, 0.0  ;;  %v7812_v41 = vmul.f32 %v14811_v35, %v14834_v55  ;;  %v7221_v38 = vld [vmem:[#allocation5 + $0x107] sm:$0xff]  ;;  %v7633_v16 = vadd.f32 %v7601_v57, %v7358_v6 }
 0x8c4   : > { %7992 = vadd.xlane.f32.xlu0 %v7991_v20  ;;  %v7327_v50 = vmul.f32 %v14750_v0, %v7221_v38  ;;  %v7464_v5 = vld [vmem:[#allocation5 + $0x108] sm:$0xff]  ;;  %v7531_v23 = vadd.f32 %v7499_v33, %v7460_v52  ;;  %v7743_v59 = vmul.f32 %v14784_v28, %v14834_v55  ;;  %v7219_v26 = vmul.f32 %v14727_v53, %v14742_v60 }
 0x8c5   : > { %v7020_v45 = vmul.f32 %v15875_v11, %v6987_v47  ;;  %v7844_v61 = vadd.f32 %v7812_v41, %v7773_v46  ;;  %v7570_v17 = vmul.f32 %v14777_v62, %v7464_v5  ;;  %v7462_v6 = vmul.f32 %v14770_v27, %v14755_v44  ;;  %v7779_v41 = vld [vmem:[#allocation5 + $0x121] sm:$0xff] }
 0x8c6   : > { %v7359_v21 = vadd.f32 %v7327_v50, %v7288_v63  ;;  %v7258_v20 = vmul.f32 %v14734_v7, %v7221_v38  ;;  %v7501_v57 = vmul.f32 %v14760_v29, %v7464_v5  ;;  %v7573_v60 = vmul.f32 %v14777_v62, %v7536_v34 }
 0x8c7   : > { %v7052_v39 = vadd.f32 %v7020_v45, %v6475_v30  ;;  %v7951_v10 = vpop.xlane.xlu1 %7950  ;;  %v7876_v40 = vmul.f32 %v15866_v54, %v7844_v61  ;;  %v7705_v30 = vmul.f32 %v14796_v22, %v14800_v32  ;;  %v7815_v45 = vmul.f32 %v14811_v35, %v7778_v2 }
 0x8c8   : > { %v8025_v24 = vadd.f32 %v14364_v51, %v7951_v10  ;;  %v7391_v47 = vmul.f32 %v15865_v37, %v7359_v21  ;;  %v7602_v44 = vadd.f32 %v7570_v17, %v7531_v23  ;;  %v7220_v37 = vmul.f32 %v14727_v53, %v14802_v4 }
 0x8c9   : > { %v7088_v48 = vadd.f32 %v14676_v42, %v7052_v39  ;;  %v7908_v12 = vadd.f32 %v7876_v40, %v7633_v16  ;;  %v7703_v42 = vmul.f32 %v14796_v22, %v14697_v19  ;;  %v7293_v19 = vld [vmem:[#allocation5 + $0x11f] sm:$0xff]  ;;  %v7532_v38 = vadd.f32 %v7500_v1, %v7461_v14 }
 0x8ca   : > { %8057 = vst.msk [vmem:[%s14381_s30 + $0x60] sm:$0xff] %vm335_vm0, %v8025_v24  ;;  %v7330_v61 = vmul.f32 %v14750_v0, %v7293_v19  ;;  %v7463_v39 = vmul.f32 %v14770_v27, %v14806_v8  ;;  %v7706_v32 = vmul.f32 %v14796_v22, %v14834_v55  ;;  %v7816_v10 = vmul.f32 %v14811_v35, %v7779_v41 }
 0x8cb   : > { %v7120_v18 = vmax.f32 %v7088_v48, 0.0  ;;  %v7994_v54 = vsel %vm342_vm10, %v7908_v12, 0.0  ;;  %v7634_v16 = vadd.f32 %v7602_v44, %v7391_v47  ;;  %v7775_v50 = vadd.f32 %v7743_v59, %v7704_v58 }
 0x8cc   : > { %7995 = vadd.xlane.f32.xlu1 %v7994_v54  ;;  %v7290_v48 = vadd.f32 %v7258_v20, %v7219_v26  ;;  %v7533_v12 = vadd.f32 %v7501_v57, %v7462_v6 }
 0x8cd   : > { %7152 = vst.msk [vmem:[#allocation5 + $0x110] sm:$0xff] %vm342_vm10, %v7120_v18 }
 0x8cf   : > { %v7954_v36 = vpop.xlane.xlu2 %7953 }
 0x8d0   : > { %v8026_v46 = vadd.f32 %v14364_v51, %v7954_v36  ;;  %v7774_v51 = vadd.f32 %v7742_v9, %v7703_v42 }
 0x8d2   : > { %8058 = vst.msk [vmem:[%s14381_s30 + $0x68] sm:$0xff] %vm335_vm0, %v8026_v46 }
 0x8d4   : > { %v7707_v40 = vld [vmem:[#allocation5 + $0x109] sm:$0xff]  ;;  %v7708_v63 = vld [vmem:[#allocation5 + $0x111] sm:$0xff] }
 0x8d5   : > { %v7222_v24 = vld [vmem:[#allocation5 + $0x10f] sm:$0xff]  ;;  %v7813_v13 = vmul.f32 %v14811_v35, %v7707_v40  ;;  %v7292_v27 = vld [vmem:[#allocation5 + $0x117] sm:$0xff]  ;;  %v7744_v8 = vmul.f32 %v14784_v28, %v7707_v40  ;;  %v7814_v22 = vmul.f32 %v14811_v35, %v7708_v63  ;;  %v7745_v2 = vmul.f32 %v14784_v28, %v7708_v63 }
 0x8d6   : > { %v7465_v15 = vld [vmem:[#allocation5 + $0x110] sm:$0xff]  ;;  %v7328_v53 = vmul.f32 %v14750_v0, %v7222_v24  ;;  %v7329_v55 = vmul.f32 %v14750_v0, %v7292_v27  ;;  %v7259_v33 = vmul.f32 %v14734_v7, %v7222_v24  ;;  %v7604_v0 = vadd.f32 %v14856_v31, %v7533_v12 }
 0x8d7   : > { %v7571_v4 = vmul.f32 %v14777_v62, %v7465_v15  ;;  %v7502_v18 = vmul.f32 %v14760_v29, %v7465_v15  ;;  %v7957_v54 = vpop.xlane.xlu0 %7956  ;;  %v7845_v5 = vadd.f32 %v7813_v13, %v7774_v51  ;;  %v7776_v42 = vadd.f32 %v7744_v8, %v7705_v30 }
 0x8d8   : > { %v7360_v21 = vadd.f32 %v7328_v53, %v7289_v56  ;;  %v8027_v62 = vadd.f32 %v14906_v43, %v7957_v54  ;;  %v7846_v14 = vadd.f32 %v7814_v22, %v7775_v50  ;;  %v7361_v58 = vadd.f32 %v7329_v55, %v7290_v48 }
 0x8d9   : > { %v7603_v52 = vadd.f32 %v7571_v4, %v7532_v38  ;;  %v7291_v23 = vadd.f32 %v7259_v33, %v7220_v37  ;;  %v7909_v35 = vadd.f32 %v7845_v5, %v7634_v16  ;;  %v7534_v7 = vadd.f32 %v7502_v18, %v7463_v39 }
 0x8da   : > { %8059 = vst.msk [vmem:[%s14381_s30 + $0x70] sm:$0xff] %vm335_vm0, %v8027_v62  ;;  %v7878_v29 = vmul.f32 %v15872_v49, %v7846_v14  ;;  %v7393_v9 = vmul.f32 %v15871_v3, %v7361_v58  ;;  %v7847_v59 = vadd.f32 %v7815_v45, %v7776_v42  ;;  %v7777_v26 = vadd.f32 %v7745_v2, %v7706_v32 }
 0x8db   : > { %v7635_v17 = vadd.f32 %v7603_v52, %v7360_v21  ;;  %v7362_v25 = vadd.f32 %v7330_v61, %v7291_v23  ;;  %v7997_v19 = vsel %vm342_vm10, %v7909_v35, 0.0  ;;  %v7605_v34 = vadd.f32 %v7573_v60, %v7534_v7 }
 0x8dc   : > { %7998 = vadd.xlane.f32.xlu2 %v7997_v19  ;;  %v7636_v1 = vadd.f32 %v7604_v0, %v7393_v9  ;;  %v7848_v49 = vadd.f32 %v7816_v10, %v7777_v26 }
 0x8dd   : > { %v7910_v36 = vadd.f32 %v7878_v29, %v7635_v17  ;;  %v7637_v46 = vadd.f32 %v7605_v34, %v7362_v25 }
 0x8de   : > { %v7911_v6 = vadd.f32 %v7847_v59, %v7636_v1  ;;  %v7880_v20 = vmul.f32 %v15875_v11, %v7848_v49 }
 0x8df   : > { %v8000_v31 = vsel %vm342_vm10, %v7910_v36, 0.0  ;;  %v7960_v3 = vpop.xlane.xlu1 %7959 }
 0x8e0   : > { %8001 = vadd.xlane.f32.xlu0 %v8000_v31  ;;  %v8028_v28 = vadd.f32 %v14906_v43, %v7960_v3  ;;  %v8003_v47 = vsel %vm342_vm10, %v7911_v6, 0.0  ;;  %v7912_v57 = vadd.f32 %v7880_v20, %v7637_v46 }
 0x8e1   : > { %8004 = vadd.xlane.f32.xlu1 %v8003_v47 }
 0x8e2   : > { %8060 = vst.msk [vmem:[%s14381_s30 + $0x78] sm:$0xff] %vm335_vm0, %v8028_v28  ;;  %v8006_v41 = vsel %vm342_vm10, %v7912_v57, 0.0 }
 0x8e4   : > { %8007 = vadd.xlane.f32.xlu2 %v8006_v41 }
 0x8e7   : > { %v7963_v30 = vpop.xlane.xlu2 %7962 }
 0x8e8   : > { %v8029_v45 = vadd.f32 %v14906_v43, %v7963_v30 }
 0x8ea   : > { %8061 = vst.msk [vmem:[%s14381_s30 + $0x80] sm:$0xff] %vm335_vm0, %v8029_v45 }
 0x8ef   : > { %v7966_v61 = vpop.xlane.xlu0 %7965 }
 0x8f0   : > { %v8030_v60 = vadd.f32 %v14906_v43, %v7966_v61 }
 0x8f2   : > { %8062 = vst.msk [vmem:[%s14381_s30 + $0x88] sm:$0xff] %vm335_vm0, %v8030_v60 }
 0x8f7   : > { %v7969_v11 = vpop.xlane.xlu1 %7968 }
 0x8f8   : > { %v8031_v44 = vadd.f32 %v14906_v43, %v7969_v11 }
 0x8fa   : > { %8063 = vst.msk [vmem:[%s14381_s30 + $0x90] sm:$0xff] %vm335_vm0, %v8031_v44 }
 0x8ff   : > { %v7972_v51 = vpop.xlane.xlu2 %7971 }
 0x900   : > { %v8032_v56 = vadd.f32 %v14906_v43, %v7972_v51 }
 0x902   : > { %8064 = vst.msk [vmem:[%s14381_s30 + $0x98] sm:$0xff] %vm335_vm0, %v8032_v56 }
 0x907   : > { %v7975_v37 = vpop.xlane.xlu0 %7974 }
 0x908   : > { %v8033_v38 = vadd.f32 %v14906_v43, %v7975_v37 }
 0x90a   : > { %8065 = vst.msk [vmem:[%s14381_s30 + $0xa0] sm:$0xff] %vm335_vm0, %v8033_v38 }
 0x90f   : > { %v7978_v39 = vpop.xlane.xlu1 %7977 }
 0x910   : > { %v8034_v32 = vadd.f32 %v14906_v43, %v7978_v39 }
 0x912   : > { %8066 = vst.msk [vmem:[%s14381_s30 + $0xa8] sm:$0xff] %vm335_vm0, %v8034_v32 }
 0x917   : > { %v7981_v10 = vpop.xlane.xlu2 %7980 }
 0x918   : > { %v8035_v16 = vadd.f32 %v14906_v43, %v7981_v10 }
 0x91a   : > { %8067 = vst.msk [vmem:[%s14381_s30 + $0xb0] sm:$0xff] %vm335_vm0, %v8035_v16 }
 0x91f   : > { %v7984_v40 = vpop.xlane.xlu0 %7983 }
 0x920   : > { %v8036_v24 = vadd.f32 %v14906_v43, %v7984_v40 }
 0x922   : > { %8068 = vst.msk [vmem:[%s14381_s30 + $0xb8] sm:$0xff] %vm335_vm0, %v8036_v24 }
 0x927   : > { %v7987_v15 = vpop.xlane.xlu1 %7986 }
 0x928   : > { %v8037_v50 = vadd.f32 %v14906_v43, %v7987_v15 }
 0x92a   : > { %8069 = vst.msk [vmem:[%s14381_s30 + $0xc0] sm:$0xff] %vm335_vm0, %v8037_v50 }
 0x92f   : > { %v7990_v48 = vpop.xlane.xlu2 %7989 }
 0x930   : > { %v8038_v12 = vadd.f32 %v14906_v43, %v7990_v48 }
 0x932   : > { %8070 = vst.msk [vmem:[%s14381_s30 + $0xc8] sm:$0xff] %vm335_vm0, %v8038_v12 }
 0x937   : > { %v7993_v13 = vpop.xlane.xlu0 %7992 }
 0x938   : > { %v8039_v53 = vadd.f32 %v14906_v43, %v7993_v13 }
 0x93a   : > { %8071 = vst.msk [vmem:[%s14381_s30 + $0xd0] sm:$0xff] %vm335_vm0, %v8039_v53 }
 0x93f   : > { %v7996_v4 = vpop.xlane.xlu1 %7995 }
 0x940   : > { %v8040_v63 = vadd.f32 %v14906_v43, %v7996_v4 }
 0x942   : > { %8072 = vst.msk [vmem:[%s14381_s30 + $0xd8] sm:$0xff] %vm335_vm0, %v8040_v63 }
 0x94f   : > { %v7999_v27 = vpop.xlane.xlu2 %7998 }
 0x950   : > { %v8041_v8 = vadd.f32 %v14906_v43, %v7999_v27 }
 0x952   : > { %8073 = vst.msk [vmem:[%s14381_s30 + $0xe0] sm:$0xff] %vm335_vm0, %v8041_v8 }
 0x953   : > { %v8002_v22 = vpop.xlane.xlu0 %8001 }
 0x954   : > { %v8042_v55 = vadd.f32 %v14906_v43, %v8002_v22  ;;  %v8005_v33 = vpop.xlane.xlu1 %8004 }
 0x955   : > { %v8043_v18 = vadd.f32 %v14906_v43, %v8005_v33 }
 0x956   : > { %8074 = vst.msk [vmem:[%s14381_s30 + $0xe8] sm:$0xff] %vm335_vm0, %v8042_v55 }
 0x957   : > { %8075 = vst.msk [vmem:[%s14381_s30 + $0xf0] sm:$0xff] %vm335_vm0, %v8043_v18  ;;  %v8008_v54 = vpop.xlane.xlu2 %8007 }
 0x958   : > { %v8044_v5 = vadd.f32 %v14906_v43, %v8008_v54 }
 0x95a   : > { %8076 = vst.msk [vmem:[%s14381_s30 + $0xf8] sm:$0xff] %vm335_vm0, %v8044_v5 }
 0x95b PF: > { %s21_s11 = sadd.s32 1, %s8789_s11  }
 0x95c   : > { %p18_p4 = scmp.ge.s32.totalorder %s21_s11, 4  }
 0x95e   :  { %20 = sbr.rel (!%p18_p4) target bundleno = 3 (0x3), region = 106 }

</bundles_post_ra>
